<compile_context>
chip_gen: v7x
topology: tpu7x:2x2x1
jax: 0.10.0
libtpu: 0.0.40
codegen_flags: <defaults>
</compile_context>

<pallas_src>
import functools

import jax
import jax.numpy as jnp
import numpy as np
from jax.experimental import pallas as pl
from jax.experimental.pallas import tpu as pltpu


def _round_up(x, m):
    return (x + m - 1) // m * m


# ----------------------------------------------------------------------------
# Fused kernel: conv1+pool -> conv2+pool -> conv3+pool  (all T frames batched)
# ----------------------------------------------------------------------------
def _fused_cnn_kernel(x_ref, w1_ref, b1_ref, w2_ref, b2_ref, w3_ref, b3_ref,
                      o_ref,
                      act1_ref, act2_ref, act3_ref, pad2_ref, pad3_ref,
                      *, T, H, W):
    C3 = 128
    H1, W1 = H, W
    H2, W2 = H1 // 2, W1 // 2
    H3, W3 = H2 // 2, W2 // 2
    H4, W4 = H3 // 2, W3 // 2
    hp2, wp2 = H2 + 2, W2 + 2          # padded extents of layer-2 input
    hp3, wp3 = H3 + 2, W3 + 2          # padded extents of layer-3 input

    # Zero the flat padded scratches (borders + spare tail).  Interiors are fully rewritten
    # below, so this makes "padding == 0" always hold.  Zeroed every grid step (not under
    # pl.when(pid==0)): with "parallel" megacore sharding a core may never see pid==0.
    pad2_ref[...] = jnp.zeros_like(pad2_ref)
    pad3_ref[...] = jnp.zeros_like(pad3_ref)

    def pool_bias_relu(act_ref, t, h, wp_a, hp_a, b_ref):
        """2x2 max-pool of frame t from a raw conv slab stored row-major with hp_a*wp_a rows
        per frame (only the first h rows are valid conv outputs).  Bias + ReLU are applied
        AFTER pooling (both commute with max).  Returns (h//2, wp_a//2, c) f32; any columns
        >= valid_w//2 are junk (dropped/zeroed by the caller)."""
        base = t * hp_a * wp_a                       # even, since wp_a is even
        n = h * wp_a // 2
        m = jnp.maximum(act_ref[pl.ds(base, n, stride=2), :],       # columns with even j
                        act_ref[pl.ds(base + 1, n, stride=2), :])   # columns with odd  j
        c = m.shape[-1]
        m = m.reshape(h // 2, 2, wp_a // 2, c).max(axis=1)          # vertical row pairs
        return jnp.maximum(m + b_ref[...], 0.0)

    def store_padded_interior(pooled, t, wo, dst_ref, hpn, wpn):
        """Write the valid columns [0, wo) of pooled (ho, wc, c) as the interior of frame t
        in the flat zero-padded scratch dst_ref (hpn*wpn rows per frame) using ONE contiguous
        store: columns beyond wo are zeroed/appended so the spill-over rows of the store land
        exactly on border positions (which must be zero anyway)."""
        ho, wc, c = pooled.shape
        col = jax.lax.broadcasted_iota(jnp.int32, pooled.shape, 1)
        val = jnp.where(col < wo, pooled, 0.0)
        if wpn > wc:
            val = jnp.concatenate(
                [val, jnp.zeros((ho, wpn - wc, c), val.dtype)], axis=1)
        start = t * hpn * wpn + wpn + 1              # first interior position of frame t
        dst_ref[pl.ds(start, ho * wpn), :] = val.reshape(ho * wpn, c)

    def conv3x3_raw(pad_ref, w_ref, rows, wp):
        """Raw 3x3 'same' conv of ALL T frames from the flat zero-padded scratch: nine MXU
        matmuls on contiguous sublane windows (no VMEM tap copies), bf16 operands, f32
        accumulation.  Output rows follow the padded-slab layout; rows/cols that fall on
        padding positions are junk and are dropped by the pooling step."""
        acc = None
        for dy in range(3):
            for dx in range(3):
                tap = pad_ref[pl.ds(dy * wp + dx, rows), :].astype(jnp.bfloat16)
                part = jnp.dot(tap, w_ref[dy * 3 + dx],
                               preferred_element_type=jnp.float32)
                acc = part if acc is None else acc + part
        return acc

    # ---- layer 1: ONE (T*H*W, 9*Cin) x (9*Cin, 32) im2col matmul over all frames ----
    act1_ref[...] = jnp.dot(x_ref[0], w1_ref[...], preferred_element_type=jnp.float32)
    for t in range(T):
        p1 = pool_bias_relu(act1_ref, t, H1, W1, H1, b1_ref)         # (H2, W2, 32)
        store_padded_interior(p1, t, W2, pad2_ref, hp2, wp2)

    # ---- layer 2: nine (T*hp2*wp2, 32) x (32, 64) tap matmuls ----
    act2_ref[...] = conv3x3_raw(pad2_ref, w2_ref, T * hp2 * wp2, wp2)
    for t in range(T):
        p2 = pool_bias_relu(act2_ref, t, H2, wp2, hp2, b2_ref)       # (H3, wp2//2, 64)
        store_padded_interior(p2, t, W3, pad3_ref, hp3, wp3)

    # ---- layer 3: nine (T*hp3*wp3, 64) x (64, 128) tap matmuls ----
    act3_ref[...] = conv3x3_raw(pad3_ref, w3_ref, T * hp3 * wp3, wp3)
    for t in range(T):
        p3 = pool_bias_relu(act3_ref, t, H3, wp3, hp3, b3_ref)       # (H4, wp3//2, 128)
        o_ref[0, t] = p3[:, :W4, :].reshape(H4 * W4, C3)             # (h, w, c) feature order


# ----------------------------------------------------------------------------
# Wrapper: bf16 im2col prep, single pallas_call, FC head + temporal mean in XLA
# ----------------------------------------------------------------------------
@jax.jit
def cnn_forward(x_btchw, kp):
    B, T, C, H, W = x_btchw.shape
    assert H % 8 == 0 and W % 8 == 0, "H, W must be divisible by 8 (three 2x2 pools)"
    H4, W4 = H // 8, W // 8

    # Layer-1 im2col fused with the NCHW handling, emitted in bf16 (halves the 9x-inflated
    # HBM intermediate).  Row order (t, h, w); K order (tap, cin) matches kp["w1"].
    xp = jnp.pad(x_btchw, ((0, 0), (0, 0), (0, 0), (1, 1), (1, 1)))
    taps = [xp[:, :, :, dy:dy + H, dx:dx + W] for dy in range(3) for dx in range(3)]
    pat = jnp.stack(taps, axis=2)                                    # (B, T, 9, C, H, W)
    pat = (pat.transpose(0, 1, 4, 5, 2, 3)
              .reshape(B, T * H * W, 9 * C)
              .astype(jnp.bfloat16))

    hp2, wp2 = H // 2 + 2, W // 2 + 2
    hp3, wp3 = H // 4 + 2, W // 4 + 2
    npad2 = _round_up(T * hp2 * wp2 + 2 * wp2 + 2, 16)   # +spare rows so the (2,2) tap window
    npad3 = _round_up(T * hp3 * wp3 + 2 * wp3 + 2, 16)   #  stays in bounds (zeros -> junk rows)

    # TODO(synk): for large H*W*T chunk the frame batch over a second grid axis so the
    # activation scratches stay within the per-core VMEM budget.
    kernel = functools.partial(_fused_cnn_kernel, T=T, H=H, W=W)
    feats = pl.pallas_call(
        kernel,
        out_shape=jax.ShapeDtypeStruct((B, T, H4 * W4, 128), jnp.float32),
        grid_spec=pltpu.PrefetchScalarGridSpec(
            num_scalar_prefetch=0,
            grid=(B,),
            in_specs=[
                pl.BlockSpec((1, T * H * W, 9 * C), lambda b: (b, 0, 0)),
                pl.BlockSpec((9 * C, 32), lambda b: (0, 0)),
                pl.BlockSpec((1, 32), lambda b: (0, 0)),
                pl.BlockSpec((9, 32, 64), lambda b: (0, 0, 0)),
                pl.BlockSpec((1, 64), lambda b: (0, 0)),
                pl.BlockSpec((9, 64, 128), lambda b: (0, 0, 0)),
                pl.BlockSpec((1, 128), lambda b: (0, 0)),
            ],
            out_specs=pl.BlockSpec((1, T, H4 * W4, 128), lambda b: (b, 0, 0, 0)),
            scratch_shapes=[
                pltpu.VMEM((T * H * W, 32), jnp.float32),             # raw conv1 output
                pltpu.VMEM((T * hp2 * wp2, 64), jnp.float32),         # raw conv2 slab
                pltpu.VMEM((T * hp3 * wp3, 128), jnp.float32),        # raw conv3 slab
                pltpu.VMEM((npad2, 32), jnp.float32),                 # flat zero-padded layer-2 input
                pltpu.VMEM((npad3, 64), jnp.float32),                 # flat zero-padded layer-3 input
            ],
        ),
        compiler_params=pltpu.CompilerParams(dimension_semantics=("parallel",)),
    )(pat, kp["w1"], kp["b1"], kp["w2"], kp["b2"], kp["w3"], kp["b3"])

    # FC head + temporal mean out of the kernel (per perf review): the fc1 matmul sees
    # M = B*T rows, fc1 weights never occupy kernel VMEM, and the kernel output is lane-dense.
    feat = feats.reshape(B * T, H4 * W4 * 128)       # (h, w, c) order == folded fw1 rows
    hdn = jnp.maximum(
        jnp.dot(feat, kp["fw1"], precision=jax.lax.Precision.HIGHEST) + kp["fb1"], 0.0)
    logits = jnp.dot(hdn, kp["fw2"], precision=jax.lax.Precision.HIGHEST) + kp["fb2"]
    return logits.reshape(B, T, -1).mean(axis=1)     # PyTorch: x.view(B, T, -1).mean(dim=1)


# ----------------------------------------------------------------------------
# Parameters: natural (PyTorch-like) shapes + one-time kernel-layout preparation
# ----------------------------------------------------------------------------
def init_params(key, input_dim, output_dim, feat_h, feat_w):
    ks = jax.random.split(key, 5)

    def conv_w(k, cin, cout):
        return jax.random.normal(k, (3, 3, cin, cout), jnp.float32) / np.sqrt(9 * cin)

    def lin_w(k, fin, fout):
        return jax.random.normal(k, (fin, fout), jnp.float32) / np.sqrt(fin)

    feature_size = 128 * feat_h * feat_w
    return {
        "w1": conv_w(ks[0], input_dim, 32), "b1": 0.01 * jnp.ones((1, 32), jnp.float32),
        "w2": conv_w(ks[1], 32, 64),        "b2": 0.01 * jnp.ones((1, 64), jnp.float32),
        "w3": conv_w(ks[2], 64, 128),       "b3": 0.01 * jnp.ones((1, 128), jnp.float32),
        "fw1": lin_w(ks[3], feature_size, 512), "fb1": 0.01 * jnp.ones((1, 512), jnp.float32),
        "fw2": lin_w(ks[4], 512, output_dim),   "fb2": jnp.zeros((1, output_dim), jnp.float32),
    }


def prepare_params(params, feat_h, feat_w):
    """One-time layout prep: conv taps flattened + cast to bf16 (MXU-native operands), and
    nn.Flatten's NCHW (C-major) row order folded into fc1 so the kernel emits features in
    their natural (h, w, c) order with no transpose."""
    C3 = 128
    cin1 = params["w1"].shape[2]
    n_hidden = params["fw1"].shape[-1]
    fw1k = (params["fw1"].reshape(C3, feat_h, feat_w, n_hidden)
            .transpose(1, 2, 0, 3).reshape(feat_h * feat_w * C3, n_hidden))
    kp = dict(params)
    kp["w1"] = params["w1"].reshape(9 * cin1, 32).astype(jnp.bfloat16)
    kp["w2"] = params["w2"].reshape(9, 32, 64).astype(jnp.bfloat16)
    kp["w3"] = params["w3"].reshape(9, 64, 128).astype(jnp.bfloat16)
    kp["fw1"] = fw1k
    return kp


# ----------------------------------------------------------------------------
# Pure-JAX reference (correctness check only)
# ----------------------------------------------------------------------------
def ref_forward(x_btchw, params):
    B, T, C, H, W = x_btchw.shape
    x = x_btchw.reshape(B * T, C, H, W).transpose(0, 2, 3, 1)
    for wname, bname in (("w1", "b1"), ("w2", "b2"), ("w3", "b3")):
        y = jax.lax.conv_general_dilated(
            x, params[wname], window_strides=(1, 1), padding="SAME",
            dimension_numbers=("NHWC", "HWIO", "NHWC"),
            precision=jax.lax.Precision.HIGHEST)
        y = jnp.maximum(y + params[bname].reshape(1, 1, 1, -1), 0.0)
        N, Hh, Ww, Cc = y.shape
        x = y.reshape(N, Hh // 2, 2, Ww // 2, 2, Cc).max(axis=(2, 4))
    N, Ho, Wo, Cc = x.shape
    feat = x.transpose(0, 3, 1, 2).reshape(N, Cc * Ho * Wo)       # nn.Flatten (NCHW order)
    h = jnp.maximum(
        jnp.dot(feat, params["fw1"], precision=jax.lax.Precision.HIGHEST) + params["fb1"], 0.0)
    logits = jnp.dot(h, params["fw2"], precision=jax.lax.Precision.HIGHEST) + params["fb2"]
    return logits.reshape(B, T, -1).mean(axis=1)


if __name__ == "__main__":
    # Small synthetic config consistent with the module:
    # cfg['cnn_model'] = {input_dim: 3, output_dim: 10, input_height: 16, input_width: 32}
    B, T, C, H, W = 2, 3, 3, 16, 32
    num_classes = 10

    key = jax.random.PRNGKey(0)
    kx, kp_key = jax.random.split(key)
    x = jax.random.normal(kx, (B, T, C, H, W), jnp.float32)
    # after 3 (conv + 2x2 pool) stages spatial is (H/8, W/8) = (2, 4); feature = 128*2*4 = 1024
    params = init_params(kp_key, C, num_classes, H // 8, W // 8)
    kparams = prepare_params(params, H // 8, W // 8)

    logits = jax.block_until_ready(cnn_forward(x, kparams))
    assert logits.shape == (B, num_classes), logits.shape

    ref = jax.block_until_ready(ref_forward(x, params))
    # bf16 MXU operands (f32 accumulation) vs. a Precision.HIGHEST f32 reference.
    np.testing.assert_allclose(np.asarray(logits), np.asarray(ref), rtol=3e-2, atol=2e-2)

    print("KERNEL_OK")
</pallas_src>

<mosaic_0001>
module attributes {stable_mosaic.version = 11 : i64} {
  func.func @_fused_cnn_kernel(%arg0: i32, %arg1: memref<1x1536x27xbf16, #tpu.memory_space<vmem>>, %arg2: memref<27x32xbf16, #tpu.memory_space<vmem>>, %arg3: memref<1x32xf32, #tpu.memory_space<vmem>>, %arg4: memref<9x32x64xbf16, #tpu.memory_space<vmem>>, %arg5: memref<1x64xf32, #tpu.memory_space<vmem>>, %arg6: memref<9x64x128xbf16, #tpu.memory_space<vmem>>, %arg7: memref<1x128xf32, #tpu.memory_space<vmem>>, %arg8: memref<1x3x8x128xf32, #tpu.memory_space<vmem>>, %arg9: memref<1536x32xf32, #tpu.memory_space<vmem>>, %arg10: memref<540x64xf32, #tpu.memory_space<vmem>>, %arg11: memref<180x128xf32, #tpu.memory_space<vmem>>, %arg12: memref<592x32xf32, #tpu.memory_space<vmem>>, %arg13: memref<208x64xf32, #tpu.memory_space<vmem>>) attributes {dimension_semantics = [#tpu.dimension_semantics<parallel>], iteration_bounds = array<i64: 2>, scalar_prefetch = 0 : i64, scratch_operands = 5 : i64, tpu.core_type = #tpu.core_type<tc>, window_params = [{transform_indices = @transform_0, window_bounds = array<i64: 1, 1536, 27>}, {pipeline_mode = #tpu.pipeline_mode<synchronous>, transform_indices = @transform_1, window_bounds = array<i64: 27, 32>}, {pipeline_mode = #tpu.pipeline_mode<synchronous>, transform_indices = @transform_2, window_bounds = array<i64: 1, 32>}, {pipeline_mode = #tpu.pipeline_mode<synchronous>, transform_indices = @transform_3, window_bounds = array<i64: 9, 32, 64>}, {pipeline_mode = #tpu.pipeline_mode<synchronous>, transform_indices = @transform_4, window_bounds = array<i64: 1, 64>}, {pipeline_mode = #tpu.pipeline_mode<synchronous>, transform_indices = @transform_5, window_bounds = array<i64: 9, 64, 128>}, {pipeline_mode = #tpu.pipeline_mode<synchronous>, transform_indices = @transform_6, window_bounds = array<i64: 1, 128>}, {transform_indices = @transform_7, window_bounds = array<i64: 1, 3, 8, 128>}]} {
    %cst = arith.constant 0.000000e+00 : f32
    %0 = vector.broadcast %cst : f32 to vector<592x32xf32>
    %c0 = arith.constant 0 : index
    %c0_0 = arith.constant 0 : index
    %1 = vector.load %arg12[%c0, %c0_0] : memref<592x32xf32, #tpu.memory_space<vmem>>, vector<592x32xf32>
    tpu.vector_store %arg12[%c0, %c0_0], %0 {strides = array<i32>} : memref<592x32xf32, #tpu.memory_space<vmem>>, vector<592x32xf32>,
    %cst_1 = arith.constant 0.000000e+00 : f32
    %2 = vector.broadcast %cst_1 : f32 to vector<208x64xf32>
    %c0_2 = arith.constant 0 : index
    %c0_3 = arith.constant 0 : index
    %3 = vector.load %arg13[%c0_2, %c0_3] : memref<208x64xf32, #tpu.memory_space<vmem>>, vector<208x64xf32>
    tpu.vector_store %arg13[%c0_2, %c0_3], %2 {strides = array<i32>} : memref<208x64xf32, #tpu.memory_space<vmem>>, vector<208x64xf32>,
    %c0_4 = arith.constant 0 : index
    %c0_5 = arith.constant 0 : index
    %c0_6 = arith.constant 0 : index
    %4 = vector.load %arg1[%c0_4, %c0_5, %c0_6] : memref<1x1536x27xbf16, #tpu.memory_space<vmem>>, vector<1x1536x27xbf16>
    %5 = vector.shape_cast %4 : vector<1x1536x27xbf16> to vector<1536x27xbf16>
    %c0_7 = arith.constant 0 : index
    %c0_8 = arith.constant 0 : index
    %6 = vector.load %arg2[%c0_7, %c0_8] : memref<27x32xbf16, #tpu.memory_space<vmem>>, vector<27x32xbf16>
    %cst_9 = arith.constant dense<0.000000e+00> : vector<1536x32xf32>
    %7 = tpu.matmul %5, %6, %cst_9 {dimension_numbers = #tpu.dot_dimension_numbers<[1], [0], [0], [1], [0, 0, 1, 1], [], []>} : vector<1536x27xbf16>, vector<27x32xbf16>, vector<1536x32xf32> -> vector<1536x32xf32>
    %c0_10 = arith.constant 0 : index
    %c0_11 = arith.constant 0 : index
    %8 = vector.load %arg9[%c0_10, %c0_11] : memref<1536x32xf32, #tpu.memory_space<vmem>>, vector<1536x32xf32>
    tpu.vector_store %arg9[%c0_10, %c0_11], %7 {strides = array<i32>} : memref<1536x32xf32, #tpu.memory_space<vmem>>, vector<1536x32xf32>,
    %c0_12 = arith.constant 0 : index
    %c0_13 = arith.constant 0 : index
    %9 = tpu.strided_load %arg9[%c0_12, %c0_13] {strides = array<i32: 2, 1>} : memref<1536x32xf32, #tpu.memory_space<vmem>>, vector<256x32xf32>
    %c1 = arith.constant 1 : index
    %c0_14 = arith.constant 0 : index
    %10 = tpu.strided_load %arg9[%c1, %c0_14] {strides = array<i32: 2, 1>} : memref<1536x32xf32, #tpu.memory_space<vmem>>, vector<256x32xf32>
    %11 = arith.maximumf %9, %10 : vector<256x32xf32>
    %12 = vector.shape_cast %11 : vector<256x32xf32> to vector<8x2x16x32xf32>
    %cst_15 = arith.constant dense<0xFF800000> : vector<8x16x32xf32>
    %13 = vector.multi_reduction <maximumf>, %12, %cst_15 [1] : vector<8x2x16x32xf32> to vector<8x16x32xf32>
    %c0_16 = arith.constant 0 : index
    %c0_17 = arith.constant 0 : index
    %14 = vector.load %arg3[%c0_16, %c0_17] : memref<1x32xf32, #tpu.memory_space<vmem>>, vector<1x32xf32>
    %15 = vector.shape_cast %14 : vector<1x32xf32> to vector<1x1x32xf32>
    %16 = vector.broadcast %15 : vector<1x1x32xf32> to vector<8x16x32xf32>
    %17 = arith.addf %13, %16 : vector<8x16x32xf32>
    %cst_18 = arith.constant 0.000000e+00 : f32
    %18 = vector.broadcast %cst_18 : f32 to vector<8x16x32xf32>
    %19 = arith.maximumf %17, %18 : vector<8x16x32xf32>
    %20 = tpu.iota {dimensions = array<i32: 1>} : vector<8x16x32xi32>
    %c16_i32 = arith.constant 16 : i32
    %21 = vector.broadcast %c16_i32 : i32 to vector<8x16x32xi32>
    %22 = arith.cmpi slt, %20, %21 : vector<8x16x32xi32>
    %cst_19 = arith.constant 0.000000e+00 : f32
    %23 = vector.broadcast %cst_19 : f32 to vector<8x16x32xf32>
    %24 = arith.select %22, %19, %23 : vector<8x16x32xi1>, vector<8x16x32xf32>
    %cst_20 = arith.constant 0.000000e+00 : f32
    %25 = vector.broadcast %cst_20 : f32 to vector<8x2x32xf32>
    %26 = tpu.concatenate %24, %25 in 1 : vector<8x16x32xf32>, vector<8x2x32xf32> -> vector<8x18x32xf32>
    %27 = vector.shape_cast %26 : vector<8x18x32xf32> to vector<144x32xf32>
    %c19 = arith.constant 19 : index
    %c0_21 = arith.constant 0 : index
    %28 = vector.load %arg12[%c19, %c0_21] : memref<592x32xf32, #tpu.memory_space<vmem>>, vector<144x32xf32>
    tpu.vector_store %arg12[%c19, %c0_21], %27 {strides = array<i32>} : memref<592x32xf32, #tpu.memory_space<vmem>>, vector<144x32xf32>,
    %c512 = arith.constant 512 : index
    %c0_22 = arith.constant 0 : index
    %29 = tpu.strided_load %arg9[%c512, %c0_22] {strides = array<i32: 2, 1>} : memref<1536x32xf32, #tpu.memory_space<vmem>>, vector<256x32xf32>
    %c513 = arith.constant 513 : index
    %c0_23 = arith.constant 0 : index
    %30 = tpu.strided_load %arg9[%c513, %c0_23] {strides = array<i32: 2, 1>} : memref<1536x32xf32, #tpu.memory_space<vmem>>, vector<256x32xf32>
    %31 = arith.maximumf %29, %30 : vector<256x32xf32>
    %32 = vector.shape_cast %31 : vector<256x32xf32> to vector<8x2x16x32xf32>
    %cst_24 = arith.constant dense<0xFF800000> : vector<8x16x32xf32>
    %33 = vector.multi_reduction <maximumf>, %32, %cst_24 [1] : vector<8x2x16x32xf32> to vector<8x16x32xf32>
    %c0_25 = arith.constant 0 : index
    %c0_26 = arith.constant 0 : index
    %34 = vector.load %arg3[%c0_25, %c0_26] : memref<1x32xf32, #tpu.memory_space<vmem>>, vector<1x32xf32>
    %35 = vector.shape_cast %34 : vector<1x32xf32> to vector<1x1x32xf32>
    %36 = vector.broadcast %35 : vector<1x1x32xf32> to vector<8x16x32xf32>
    %37 = arith.addf %33, %36 : vector<8x16x32xf32>
    %cst_27 = arith.constant 0.000000e+00 : f32
    %38 = vector.broadcast %cst_27 : f32 to vector<8x16x32xf32>
    %39 = arith.maximumf %37, %38 : vector<8x16x32xf32>
    %40 = tpu.iota {dimensions = array<i32: 1>} : vector<8x16x32xi32>
    %c16_i32_28 = arith.constant 16 : i32
    %41 = vector.broadcast %c16_i32_28 : i32 to vector<8x16x32xi32>
    %42 = arith.cmpi slt, %40, %41 : vector<8x16x32xi32>
    %cst_29 = arith.constant 0.000000e+00 : f32
    %43 = vector.broadcast %cst_29 : f32 to vector<8x16x32xf32>
    %44 = arith.select %42, %39, %43 : vector<8x16x32xi1>, vector<8x16x32xf32>
    %cst_30 = arith.constant 0.000000e+00 : f32
    %45 = vector.broadcast %cst_30 : f32 to vector<8x2x32xf32>
    %46 = tpu.concatenate %44, %45 in 1 : vector<8x16x32xf32>, vector<8x2x32xf32> -> vector<8x18x32xf32>
    %47 = vector.shape_cast %46 : vector<8x18x32xf32> to vector<144x32xf32>
    %c199 = arith.constant 199 : index
    %c0_31 = arith.constant 0 : index
    %48 = vector.load %arg12[%c199, %c0_31] : memref<592x32xf32, #tpu.memory_space<vmem>>, vector<144x32xf32>
    tpu.vector_store %arg12[%c199, %c0_31], %47 {strides = array<i32>} : memref<592x32xf32, #tpu.memory_space<vmem>>, vector<144x32xf32>,
    %c1024 = arith.constant 1024 : index
    %c0_32 = arith.constant 0 : index
    %49 = tpu.strided_load %arg9[%c1024, %c0_32] {strides = array<i32: 2, 1>} : memref<1536x32xf32, #tpu.memory_space<vmem>>, vector<256x32xf32>
    %c1025 = arith.constant 1025 : index
    %c0_33 = arith.constant 0 : index
    %50 = tpu.strided_load %arg9[%c1025, %c0_33] {strides = array<i32: 2, 1>} : memref<1536x32xf32, #tpu.memory_space<vmem>>, vector<256x32xf32>
    %51 = arith.maximumf %49, %50 : vector<256x32xf32>
    %52 = vector.shape_cast %51 : vector<256x32xf32> to vector<8x2x16x32xf32>
    %cst_34 = arith.constant dense<0xFF800000> : vector<8x16x32xf32>
    %53 = vector.multi_reduction <maximumf>, %52, %cst_34 [1] : vector<8x2x16x32xf32> to vector<8x16x32xf32>
    %c0_35 = arith.constant 0 : index
    %c0_36 = arith.constant 0 : index
    %54 = vector.load %arg3[%c0_35, %c0_36] : memref<1x32xf32, #tpu.memory_space<vmem>>, vector<1x32xf32>
    %55 = vector.shape_cast %54 : vector<1x32xf32> to vector<1x1x32xf32>
    %56 = vector.broadcast %55 : vector<1x1x32xf32> to vector<8x16x32xf32>
    %57 = arith.addf %53, %56 : vector<8x16x32xf32>
    %cst_37 = arith.constant 0.000000e+00 : f32
    %58 = vector.broadcast %cst_37 : f32 to vector<8x16x32xf32>
    %59 = arith.maximumf %57, %58 : vector<8x16x32xf32>
    %60 = tpu.iota {dimensions = array<i32: 1>} : vector<8x16x32xi32>
    %c16_i32_38 = arith.constant 16 : i32
    %61 = vector.broadcast %c16_i32_38 : i32 to vector<8x16x32xi32>
    %62 = arith.cmpi slt, %60, %61 : vector<8x16x32xi32>
    %cst_39 = arith.constant 0.000000e+00 : f32
    %63 = vector.broadcast %cst_39 : f32 to vector<8x16x32xf32>
    %64 = arith.select %62, %59, %63 : vector<8x16x32xi1>, vector<8x16x32xf32>
    %cst_40 = arith.constant 0.000000e+00 : f32
    %65 = vector.broadcast %cst_40 : f32 to vector<8x2x32xf32>
    %66 = tpu.concatenate %64, %65 in 1 : vector<8x16x32xf32>, vector<8x2x32xf32> -> vector<8x18x32xf32>
    %67 = vector.shape_cast %66 : vector<8x18x32xf32> to vector<144x32xf32>
    %c379 = arith.constant 379 : index
    %c0_41 = arith.constant 0 : index
    %68 = vector.load %arg12[%c379, %c0_41] : memref<592x32xf32, #tpu.memory_space<vmem>>, vector<144x32xf32>
    tpu.vector_store %arg12[%c379, %c0_41], %67 {strides = array<i32>} : memref<592x32xf32, #tpu.memory_space<vmem>>, vector<144x32xf32>,
    %c0_42 = arith.constant 0 : index
    %c0_43 = arith.constant 0 : index
    %69 = vector.load %arg12[%c0_42, %c0_43] : memref<592x32xf32, #tpu.memory_space<vmem>>, vector<540x32xf32>
    %70 = arith.truncf %69 : vector<540x32xf32> to vector<540x32xbf16>
    %c0_44 = arith.constant 0 : index
    %c0_45 = arith.constant 0 : index
    %c0_46 = arith.constant 0 : index
    %71 = vector.load %arg4[%c0_44, %c0_45, %c0_46] : memref<9x32x64xbf16, #tpu.memory_space<vmem>>, vector<1x32x64xbf16>
    %72 = vector.shape_cast %71 : vector<1x32x64xbf16> to vector<32x64xbf16>
    %cst_47 = arith.constant dense<0.000000e+00> : vector<540x64xf32>
    %73 = tpu.matmul %70, %72, %cst_47 {dimension_numbers = #tpu.dot_dimension_numbers<[1], [0], [0], [1], [0, 0, 1, 1], [], []>} : vector<540x32xbf16>, vector<32x64xbf16>, vector<540x64xf32> -> vector<540x64xf32>
    %c1_48 = arith.constant 1 : index
    %c0_49 = arith.constant 0 : index
    %74 = vector.load %arg12[%c1_48, %c0_49] : memref<592x32xf32, #tpu.memory_space<vmem>>, vector<540x32xf32>
    %75 = arith.truncf %74 : vector<540x32xf32> to vector<540x32xbf16>
    %c1_50 = arith.constant 1 : index
    %c0_51 = arith.constant 0 : index
    %c0_52 = arith.constant 0 : index
    %76 = vector.load %arg4[%c1_50, %c0_51, %c0_52] : memref<9x32x64xbf16, #tpu.memory_space<vmem>>, vector<1x32x64xbf16>
    %77 = vector.shape_cast %76 : vector<1x32x64xbf16> to vector<32x64xbf16>
    %cst_53 = arith.constant dense<0.000000e+00> : vector<540x64xf32>
    %78 = tpu.matmul %75, %77, %cst_53 {dimension_numbers = #tpu.dot_dimension_numbers<[1], [0], [0], [1], [0, 0, 1, 1], [], []>} : vector<540x32xbf16>, vector<32x64xbf16>, vector<540x64xf32> -> vector<540x64xf32>
    %79 = arith.addf %73, %78 : vector<540x64xf32>
    %c2 = arith.constant 2 : index
    %c0_54 = arith.constant 0 : index
    %80 = vector.load %arg12[%c2, %c0_54] : memref<592x32xf32, #tpu.memory_space<vmem>>, vector<540x32xf32>
    %81 = arith.truncf %80 : vector<540x32xf32> to vector<540x32xbf16>
    %c2_55 = arith.constant 2 : index
    %c0_56 = arith.constant 0 : index
    %c0_57 = arith.constant 0 : index
    %82 = vector.load %arg4[%c2_55, %c0_56, %c0_57] : memref<9x32x64xbf16, #tpu.memory_space<vmem>>, vector<1x32x64xbf16>
    %83 = vector.shape_cast %82 : vector<1x32x64xbf16> to vector<32x64xbf16>
    %cst_58 = arith.constant dense<0.000000e+00> : vector<540x64xf32>
    %84 = tpu.matmul %81, %83, %cst_58 {dimension_numbers = #tpu.dot_dimension_numbers<[1], [0], [0], [1], [0, 0, 1, 1], [], []>} : vector<540x32xbf16>, vector<32x64xbf16>, vector<540x64xf32> -> vector<540x64xf32>
    %85 = arith.addf %79, %84 : vector<540x64xf32>
    %c18 = arith.constant 18 : index
    %c0_59 = arith.constant 0 : index
    %86 = vector.load %arg12[%c18, %c0_59] : memref<592x32xf32, #tpu.memory_space<vmem>>, vector<540x32xf32>
    %87 = arith.truncf %86 : vector<540x32xf32> to vector<540x32xbf16>
    %c3 = arith.constant 3 : index
    %c0_60 = arith.constant 0 : index
    %c0_61 = arith.constant 0 : index
    %88 = vector.load %arg4[%c3, %c0_60, %c0_61] : memref<9x32x64xbf16, #tpu.memory_space<vmem>>, vector<1x32x64xbf16>
    %89 = vector.shape_cast %88 : vector<1x32x64xbf16> to vector<32x64xbf16>
    %cst_62 = arith.constant dense<0.000000e+00> : vector<540x64xf32>
    %90 = tpu.matmul %87, %89, %cst_62 {dimension_numbers = #tpu.dot_dimension_numbers<[1], [0], [0], [1], [0, 0, 1, 1], [], []>} : vector<540x32xbf16>, vector<32x64xbf16>, vector<540x64xf32> -> vector<540x64xf32>
    %91 = arith.addf %85, %90 : vector<540x64xf32>
    %c19_63 = arith.constant 19 : index
    %c0_64 = arith.constant 0 : index
    %92 = vector.load %arg12[%c19_63, %c0_64] : memref<592x32xf32, #tpu.memory_space<vmem>>, vector<540x32xf32>
    %93 = arith.truncf %92 : vector<540x32xf32> to vector<540x32xbf16>
    %c4 = arith.constant 4 : index
    %c0_65 = arith.constant 0 : index
    %c0_66 = arith.constant 0 : index
    %94 = vector.load %arg4[%c4, %c0_65, %c0_66] : memref<9x32x64xbf16, #tpu.memory_space<vmem>>, vector<1x32x64xbf16>
    %95 = vector.shape_cast %94 : vector<1x32x64xbf16> to vector<32x64xbf16>
    %cst_67 = arith.constant dense<0.000000e+00> : vector<540x64xf32>
    %96 = tpu.matmul %93, %95, %cst_67 {dimension_numbers = #tpu.dot_dimension_numbers<[1], [0], [0], [1], [0, 0, 1, 1], [], []>} : vector<540x32xbf16>, vector<32x64xbf16>, vector<540x64xf32> -> vector<540x64xf32>
    %97 = arith.addf %91, %96 : vector<540x64xf32>
    %c20 = arith.constant 20 : index
    %c0_68 = arith.constant 0 : index
    %98 = vector.load %arg12[%c20, %c0_68] : memref<592x32xf32, #tpu.memory_space<vmem>>, vector<540x32xf32>
    %99 = arith.truncf %98 : vector<540x32xf32> to vector<540x32xbf16>
    %c5 = arith.constant 5 : index
    %c0_69 = arith.constant 0 : index
    %c0_70 = arith.constant 0 : index
    %100 = vector.load %arg4[%c5, %c0_69, %c0_70] : memref<9x32x64xbf16, #tpu.memory_space<vmem>>, vector<1x32x64xbf16>
    %101 = vector.shape_cast %100 : vector<1x32x64xbf16> to vector<32x64xbf16>
    %cst_71 = arith.constant dense<0.000000e+00> : vector<540x64xf32>
    %102 = tpu.matmul %99, %101, %cst_71 {dimension_numbers = #tpu.dot_dimension_numbers<[1], [0], [0], [1], [0, 0, 1, 1], [], []>} : vector<540x32xbf16>, vector<32x64xbf16>, vector<540x64xf32> -> vector<540x64xf32>
    %103 = arith.addf %97, %102 : vector<540x64xf32>
    %c36 = arith.constant 36 : index
    %c0_72 = arith.constant 0 : index
    %104 = vector.load %arg12[%c36, %c0_72] : memref<592x32xf32, #tpu.memory_space<vmem>>, vector<540x32xf32>
    %105 = arith.truncf %104 : vector<540x32xf32> to vector<540x32xbf16>
    %c6 = arith.constant 6 : index
    %c0_73 = arith.constant 0 : index
    %c0_74 = arith.constant 0 : index
    %106 = vector.load %arg4[%c6, %c0_73, %c0_74] : memref<9x32x64xbf16, #tpu.memory_space<vmem>>, vector<1x32x64xbf16>
    %107 = vector.shape_cast %106 : vector<1x32x64xbf16> to vector<32x64xbf16>
    %cst_75 = arith.constant dense<0.000000e+00> : vector<540x64xf32>
    %108 = tpu.matmul %105, %107, %cst_75 {dimension_numbers = #tpu.dot_dimension_numbers<[1], [0], [0], [1], [0, 0, 1, 1], [], []>} : vector<540x32xbf16>, vector<32x64xbf16>, vector<540x64xf32> -> vector<540x64xf32>
    %109 = arith.addf %103, %108 : vector<540x64xf32>
    %c37 = arith.constant 37 : index
    %c0_76 = arith.constant 0 : index
    %110 = vector.load %arg12[%c37, %c0_76] : memref<592x32xf32, #tpu.memory_space<vmem>>, vector<540x32xf32>
    %111 = arith.truncf %110 : vector<540x32xf32> to vector<540x32xbf16>
    %c7 = arith.constant 7 : index
    %c0_77 = arith.constant 0 : index
    %c0_78 = arith.constant 0 : index
    %112 = vector.load %arg4[%c7, %c0_77, %c0_78] : memref<9x32x64xbf16, #tpu.memory_space<vmem>>, vector<1x32x64xbf16>
    %113 = vector.shape_cast %112 : vector<1x32x64xbf16> to vector<32x64xbf16>
    %cst_79 = arith.constant dense<0.000000e+00> : vector<540x64xf32>
    %114 = tpu.matmul %111, %113, %cst_79 {dimension_numbers = #tpu.dot_dimension_numbers<[1], [0], [0], [1], [0, 0, 1, 1], [], []>} : vector<540x32xbf16>, vector<32x64xbf16>, vector<540x64xf32> -> vector<540x64xf32>
    %115 = arith.addf %109, %114 : vector<540x64xf32>
    %c38 = arith.constant 38 : index
    %c0_80 = arith.constant 0 : index
    %116 = vector.load %arg12[%c38, %c0_80] : memref<592x32xf32, #tpu.memory_space<vmem>>, vector<540x32xf32>
    %117 = arith.truncf %116 : vector<540x32xf32> to vector<540x32xbf16>
    %c8 = arith.constant 8 : index
    %c0_81 = arith.constant 0 : index
    %c0_82 = arith.constant 0 : index
    %118 = vector.load %arg4[%c8, %c0_81, %c0_82] : memref<9x32x64xbf16, #tpu.memory_space<vmem>>, vector<1x32x64xbf16>
    %119 = vector.shape_cast %118 : vector<1x32x64xbf16> to vector<32x64xbf16>
    %cst_83 = arith.constant dense<0.000000e+00> : vector<540x64xf32>
    %120 = tpu.matmul %117, %119, %cst_83 {dimension_numbers = #tpu.dot_dimension_numbers<[1], [0], [0], [1], [0, 0, 1, 1], [], []>} : vector<540x32xbf16>, vector<32x64xbf16>, vector<540x64xf32> -> vector<540x64xf32>
    %121 = arith.addf %115, %120 : vector<540x64xf32>
    %c0_84 = arith.constant 0 : index
    %c0_85 = arith.constant 0 : index
    %122 = vector.load %arg10[%c0_84, %c0_85] : memref<540x64xf32, #tpu.memory_space<vmem>>, vector<540x64xf32>
    tpu.vector_store %arg10[%c0_84, %c0_85], %121 {strides = array<i32>} : memref<540x64xf32, #tpu.memory_space<vmem>>, vector<540x64xf32>,
    %c0_86 = arith.constant 0 : index
    %c0_87 = arith.constant 0 : index
    %123 = tpu.strided_load %arg10[%c0_86, %c0_87] {strides = array<i32: 2, 1>} : memref<540x64xf32, #tpu.memory_space<vmem>>, vector<72x64xf32>
    %c1_88 = arith.constant 1 : index
    %c0_89 = arith.constant 0 : index
    %124 = tpu.strided_load %arg10[%c1_88, %c0_89] {strides = array<i32: 2, 1>} : memref<540x64xf32, #tpu.memory_space<vmem>>, vector<72x64xf32>
    %125 = arith.maximumf %123, %124 : vector<72x64xf32>
    %126 = vector.shape_cast %125 : vector<72x64xf32> to vector<4x2x9x64xf32>
    %cst_90 = arith.constant dense<0xFF800000> : vector<4x9x64xf32>
    %127 = vector.multi_reduction <maximumf>, %126, %cst_90 [1] : vector<4x2x9x64xf32> to vector<4x9x64xf32>
    %c0_91 = arith.constant 0 : index
    %c0_92 = arith.constant 0 : index
    %128 = vector.load %arg5[%c0_91, %c0_92] : memref<1x64xf32, #tpu.memory_space<vmem>>, vector<1x64xf32>
    %129 = vector.shape_cast %128 : vector<1x64xf32> to vector<1x1x64xf32>
    %130 = vector.broadcast %129 : vector<1x1x64xf32> to vector<4x9x64xf32>
    %131 = arith.addf %127, %130 : vector<4x9x64xf32>
    %cst_93 = arith.constant 0.000000e+00 : f32
    %132 = vector.broadcast %cst_93 : f32 to vector<4x9x64xf32>
    %133 = arith.maximumf %131, %132 : vector<4x9x64xf32>
    %134 = tpu.iota {dimensions = array<i32: 1>} : vector<4x9x64xi32>
    %c8_i32 = arith.constant 8 : i32
    %135 = vector.broadcast %c8_i32 : i32 to vector<4x9x64xi32>
    %136 = arith.cmpi slt, %134, %135 : vector<4x9x64xi32>
    %cst_94 = arith.constant 0.000000e+00 : f32
    %137 = vector.broadcast %cst_94 : f32 to vector<4x9x64xf32>
    %138 = arith.select %136, %133, %137 : vector<4x9x64xi1>, vector<4x9x64xf32>
    %cst_95 = arith.constant 0.000000e+00 : f32
    %139 = vector.broadcast %cst_95 : f32 to vector<4x1x64xf32>
    %140 = tpu.concatenate %138, %139 in 1 : vector<4x9x64xf32>, vector<4x1x64xf32> -> vector<4x10x64xf32>
    %141 = vector.shape_cast %140 : vector<4x10x64xf32> to vector<40x64xf32>
    %c11 = arith.constant 11 : index
    %c0_96 = arith.constant 0 : index
    %142 = vector.load %arg13[%c11, %c0_96] : memref<208x64xf32, #tpu.memory_space<vmem>>, vector<40x64xf32>
    tpu.vector_store %arg13[%c11, %c0_96], %141 {strides = array<i32>} : memref<208x64xf32, #tpu.memory_space<vmem>>, vector<40x64xf32>,
    %c180 = arith.constant 180 : index
    %c0_97 = arith.constant 0 : index
    %143 = tpu.strided_load %arg10[%c180, %c0_97] {strides = array<i32: 2, 1>} : memref<540x64xf32, #tpu.memory_space<vmem>>, vector<72x64xf32>
    %c181 = arith.constant 181 : index
    %c0_98 = arith.constant 0 : index
    %144 = tpu.strided_load %arg10[%c181, %c0_98] {strides = array<i32: 2, 1>} : memref<540x64xf32, #tpu.memory_space<vmem>>, vector<72x64xf32>
    %145 = arith.maximumf %143, %144 : vector<72x64xf32>
    %146 = vector.shape_cast %145 : vector<72x64xf32> to vector<4x2x9x64xf32>
    %cst_99 = arith.constant dense<0xFF800000> : vector<4x9x64xf32>
    %147 = vector.multi_reduction <maximumf>, %146, %cst_99 [1] : vector<4x2x9x64xf32> to vector<4x9x64xf32>
    %c0_100 = arith.constant 0 : index
    %c0_101 = arith.constant 0 : index
    %148 = vector.load %arg5[%c0_100, %c0_101] : memref<1x64xf32, #tpu.memory_space<vmem>>, vector<1x64xf32>
    %149 = vector.shape_cast %148 : vector<1x64xf32> to vector<1x1x64xf32>
    %150 = vector.broadcast %149 : vector<1x1x64xf32> to vector<4x9x64xf32>
    %151 = arith.addf %147, %150 : vector<4x9x64xf32>
    %cst_102 = arith.constant 0.000000e+00 : f32
    %152 = vector.broadcast %cst_102 : f32 to vector<4x9x64xf32>
    %153 = arith.maximumf %151, %152 : vector<4x9x64xf32>
    %154 = tpu.iota {dimensions = array<i32: 1>} : vector<4x9x64xi32>
    %c8_i32_103 = arith.constant 8 : i32
    %155 = vector.broadcast %c8_i32_103 : i32 to vector<4x9x64xi32>
    %156 = arith.cmpi slt, %154, %155 : vector<4x9x64xi32>
    %cst_104 = arith.constant 0.000000e+00 : f32
    %157 = vector.broadcast %cst_104 : f32 to vector<4x9x64xf32>
    %158 = arith.select %156, %153, %157 : vector<4x9x64xi1>, vector<4x9x64xf32>
    %cst_105 = arith.constant 0.000000e+00 : f32
    %159 = vector.broadcast %cst_105 : f32 to vector<4x1x64xf32>
    %160 = tpu.concatenate %158, %159 in 1 : vector<4x9x64xf32>, vector<4x1x64xf32> -> vector<4x10x64xf32>
    %161 = vector.shape_cast %160 : vector<4x10x64xf32> to vector<40x64xf32>
    %c71 = arith.constant 71 : index
    %c0_106 = arith.constant 0 : index
    %162 = vector.load %arg13[%c71, %c0_106] : memref<208x64xf32, #tpu.memory_space<vmem>>, vector<40x64xf32>
    tpu.vector_store %arg13[%c71, %c0_106], %161 {strides = array<i32>} : memref<208x64xf32, #tpu.memory_space<vmem>>, vector<40x64xf32>,
    %c360 = arith.constant 360 : index
    %c0_107 = arith.constant 0 : index
    %163 = tpu.strided_load %arg10[%c360, %c0_107] {strides = array<i32: 2, 1>} : memref<540x64xf32, #tpu.memory_space<vmem>>, vector<72x64xf32>
    %c361 = arith.constant 361 : index
    %c0_108 = arith.constant 0 : index
    %164 = tpu.strided_load %arg10[%c361, %c0_108] {strides = array<i32: 2, 1>} : memref<540x64xf32, #tpu.memory_space<vmem>>, vector<72x64xf32>
    %165 = arith.maximumf %163, %164 : vector<72x64xf32>
    %166 = vector.shape_cast %165 : vector<72x64xf32> to vector<4x2x9x64xf32>
    %cst_109 = arith.constant dense<0xFF800000> : vector<4x9x64xf32>
    %167 = vector.multi_reduction <maximumf>, %166, %cst_109 [1] : vector<4x2x9x64xf32> to vector<4x9x64xf32>
    %c0_110 = arith.constant 0 : index
    %c0_111 = arith.constant 0 : index
    %168 = vector.load %arg5[%c0_110, %c0_111] : memref<1x64xf32, #tpu.memory_space<vmem>>, vector<1x64xf32>
    %169 = vector.shape_cast %168 : vector<1x64xf32> to vector<1x1x64xf32>
    %170 = vector.broadcast %169 : vector<1x1x64xf32> to vector<4x9x64xf32>
    %171 = arith.addf %167, %170 : vector<4x9x64xf32>
    %cst_112 = arith.constant 0.000000e+00 : f32
    %172 = vector.broadcast %cst_112 : f32 to vector<4x9x64xf32>
    %173 = arith.maximumf %171, %172 : vector<4x9x64xf32>
    %174 = tpu.iota {dimensions = array<i32: 1>} : vector<4x9x64xi32>
    %c8_i32_113 = arith.constant 8 : i32
    %175 = vector.broadcast %c8_i32_113 : i32 to vector<4x9x64xi32>
    %176 = arith.cmpi slt, %174, %175 : vector<4x9x64xi32>
    %cst_114 = arith.constant 0.000000e+00 : f32
    %177 = vector.broadcast %cst_114 : f32 to vector<4x9x64xf32>
    %178 = arith.select %176, %173, %177 : vector<4x9x64xi1>, vector<4x9x64xf32>
    %cst_115 = arith.constant 0.000000e+00 : f32
    %179 = vector.broadcast %cst_115 : f32 to vector<4x1x64xf32>
    %180 = tpu.concatenate %178, %179 in 1 : vector<4x9x64xf32>, vector<4x1x64xf32> -> vector<4x10x64xf32>
    %181 = vector.shape_cast %180 : vector<4x10x64xf32> to vector<40x64xf32>
    %c131 = arith.constant 131 : index
    %c0_116 = arith.constant 0 : index
    %182 = vector.load %arg13[%c131, %c0_116] : memref<208x64xf32, #tpu.memory_space<vmem>>, vector<40x64xf32>
    tpu.vector_store %arg13[%c131, %c0_116], %181 {strides = array<i32>} : memref<208x64xf32, #tpu.memory_space<vmem>>, vector<40x64xf32>,
    %c0_117 = arith.constant 0 : index
    %c0_118 = arith.constant 0 : index
    %183 = vector.load %arg13[%c0_117, %c0_118] : memref<208x64xf32, #tpu.memory_space<vmem>>, vector<180x64xf32>
    %184 = arith.truncf %183 : vector<180x64xf32> to vector<180x64xbf16>
    %c0_119 = arith.constant 0 : index
    %c0_120 = arith.constant 0 : index
    %c0_121 = arith.constant 0 : index
    %185 = vector.load %arg6[%c0_119, %c0_120, %c0_121] : memref<9x64x128xbf16, #tpu.memory_space<vmem>>, vector<1x64x128xbf16>
    %186 = vector.shape_cast %185 : vector<1x64x128xbf16> to vector<64x128xbf16>
    %cst_122 = arith.constant dense<0.000000e+00> : vector<180x128xf32>
    %187 = tpu.matmul %184, %186, %cst_122 {dimension_numbers = #tpu.dot_dimension_numbers<[1], [0], [0], [1], [0, 0, 1, 1], [], []>} : vector<180x64xbf16>, vector<64x128xbf16>, vector<180x128xf32> -> vector<180x128xf32>
    %c1_123 = arith.constant 1 : index
    %c0_124 = arith.constant 0 : index
    %188 = vector.load %arg13[%c1_123, %c0_124] : memref<208x64xf32, #tpu.memory_space<vmem>>, vector<180x64xf32>
    %189 = arith.truncf %188 : vector<180x64xf32> to vector<180x64xbf16>
    %c1_125 = arith.constant 1 : index
    %c0_126 = arith.constant 0 : index
    %c0_127 = arith.constant 0 : index
    %190 = vector.load %arg6[%c1_125, %c0_126, %c0_127] : memref<9x64x128xbf16, #tpu.memory_space<vmem>>, vector<1x64x128xbf16>
    %191 = vector.shape_cast %190 : vector<1x64x128xbf16> to vector<64x128xbf16>
    %cst_128 = arith.constant dense<0.000000e+00> : vector<180x128xf32>
    %192 = tpu.matmul %189, %191, %cst_128 {dimension_numbers = #tpu.dot_dimension_numbers<[1], [0], [0], [1], [0, 0, 1, 1], [], []>} : vector<180x64xbf16>, vector<64x128xbf16>, vector<180x128xf32> -> vector<180x128xf32>
    %193 = arith.addf %187, %192 : vector<180x128xf32>
    %c2_129 = arith.constant 2 : index
    %c0_130 = arith.constant 0 : index
    %194 = vector.load %arg13[%c2_129, %c0_130] : memref<208x64xf32, #tpu.memory_space<vmem>>, vector<180x64xf32>
    %195 = arith.truncf %194 : vector<180x64xf32> to vector<180x64xbf16>
    %c2_131 = arith.constant 2 : index
    %c0_132 = arith.constant 0 : index
    %c0_133 = arith.constant 0 : index
    %196 = vector.load %arg6[%c2_131, %c0_132, %c0_133] : memref<9x64x128xbf16, #tpu.memory_space<vmem>>, vector<1x64x128xbf16>
    %197 = vector.shape_cast %196 : vector<1x64x128xbf16> to vector<64x128xbf16>
    %cst_134 = arith.constant dense<0.000000e+00> : vector<180x128xf32>
    %198 = tpu.matmul %195, %197, %cst_134 {dimension_numbers = #tpu.dot_dimension_numbers<[1], [0], [0], [1], [0, 0, 1, 1], [], []>} : vector<180x64xbf16>, vector<64x128xbf16>, vector<180x128xf32> -> vector<180x128xf32>
    %199 = arith.addf %193, %198 : vector<180x128xf32>
    %c10 = arith.constant 10 : index
    %c0_135 = arith.constant 0 : index
    %200 = vector.load %arg13[%c10, %c0_135] : memref<208x64xf32, #tpu.memory_space<vmem>>, vector<180x64xf32>
    %201 = arith.truncf %200 : vector<180x64xf32> to vector<180x64xbf16>
    %c3_136 = arith.constant 3 : index
    %c0_137 = arith.constant 0 : index
    %c0_138 = arith.constant 0 : index
    %202 = vector.load %arg6[%c3_136, %c0_137, %c0_138] : memref<9x64x128xbf16, #tpu.memory_space<vmem>>, vector<1x64x128xbf16>
    %203 = vector.shape_cast %202 : vector<1x64x128xbf16> to vector<64x128xbf16>
    %cst_139 = arith.constant dense<0.000000e+00> : vector<180x128xf32>
    %204 = tpu.matmul %201, %203, %cst_139 {dimension_numbers = #tpu.dot_dimension_numbers<[1], [0], [0], [1], [0, 0, 1, 1], [], []>} : vector<180x64xbf16>, vector<64x128xbf16>, vector<180x128xf32> -> vector<180x128xf32>
    %205 = arith.addf %199, %204 : vector<180x128xf32>
    %c11_140 = arith.constant 11 : index
    %c0_141 = arith.constant 0 : index
    %206 = vector.load %arg13[%c11_140, %c0_141] : memref<208x64xf32, #tpu.memory_space<vmem>>, vector<180x64xf32>
    %207 = arith.truncf %206 : vector<180x64xf32> to vector<180x64xbf16>
    %c4_142 = arith.constant 4 : index
    %c0_143 = arith.constant 0 : index
    %c0_144 = arith.constant 0 : index
    %208 = vector.load %arg6[%c4_142, %c0_143, %c0_144] : memref<9x64x128xbf16, #tpu.memory_space<vmem>>, vector<1x64x128xbf16>
    %209 = vector.shape_cast %208 : vector<1x64x128xbf16> to vector<64x128xbf16>
    %cst_145 = arith.constant dense<0.000000e+00> : vector<180x128xf32>
    %210 = tpu.matmul %207, %209, %cst_145 {dimension_numbers = #tpu.dot_dimension_numbers<[1], [0], [0], [1], [0, 0, 1, 1], [], []>} : vector<180x64xbf16>, vector<64x128xbf16>, vector<180x128xf32> -> vector<180x128xf32>
    %211 = arith.addf %205, %210 : vector<180x128xf32>
    %c12 = arith.constant 12 : index
    %c0_146 = arith.constant 0 : index
    %212 = vector.load %arg13[%c12, %c0_146] : memref<208x64xf32, #tpu.memory_space<vmem>>, vector<180x64xf32>
    %213 = arith.truncf %212 : vector<180x64xf32> to vector<180x64xbf16>
    %c5_147 = arith.constant 5 : index
    %c0_148 = arith.constant 0 : index
    %c0_149 = arith.constant 0 : index
    %214 = vector.load %arg6[%c5_147, %c0_148, %c0_149] : memref<9x64x128xbf16, #tpu.memory_space<vmem>>, vector<1x64x128xbf16>
    %215 = vector.shape_cast %214 : vector<1x64x128xbf16> to vector<64x128xbf16>
    %cst_150 = arith.constant dense<0.000000e+00> : vector<180x128xf32>
    %216 = tpu.matmul %213, %215, %cst_150 {dimension_numbers = #tpu.dot_dimension_numbers<[1], [0], [0], [1], [0, 0, 1, 1], [], []>} : vector<180x64xbf16>, vector<64x128xbf16>, vector<180x128xf32> -> vector<180x128xf32>
    %217 = arith.addf %211, %216 : vector<180x128xf32>
    %c20_151 = arith.constant 20 : index
    %c0_152 = arith.constant 0 : index
    %218 = vector.load %arg13[%c20_151, %c0_152] : memref<208x64xf32, #tpu.memory_space<vmem>>, vector<180x64xf32>
    %219 = arith.truncf %218 : vector<180x64xf32> to vector<180x64xbf16>
    %c6_153 = arith.constant 6 : index
    %c0_154 = arith.constant 0 : index
    %c0_155 = arith.constant 0 : index
    %220 = vector.load %arg6[%c6_153, %c0_154, %c0_155] : memref<9x64x128xbf16, #tpu.memory_space<vmem>>, vector<1x64x128xbf16>
    %221 = vector.shape_cast %220 : vector<1x64x128xbf16> to vector<64x128xbf16>
    %cst_156 = arith.constant dense<0.000000e+00> : vector<180x128xf32>
    %222 = tpu.matmul %219, %221, %cst_156 {dimension_numbers = #tpu.dot_dimension_numbers<[1], [0], [0], [1], [0, 0, 1, 1], [], []>} : vector<180x64xbf16>, vector<64x128xbf16>, vector<180x128xf32> -> vector<180x128xf32>
    %223 = arith.addf %217, %222 : vector<180x128xf32>
    %c21 = arith.constant 21 : index
    %c0_157 = arith.constant 0 : index
    %224 = vector.load %arg13[%c21, %c0_157] : memref<208x64xf32, #tpu.memory_space<vmem>>, vector<180x64xf32>
    %225 = arith.truncf %224 : vector<180x64xf32> to vector<180x64xbf16>
    %c7_158 = arith.constant 7 : index
    %c0_159 = arith.constant 0 : index
    %c0_160 = arith.constant 0 : index
    %226 = vector.load %arg6[%c7_158, %c0_159, %c0_160] : memref<9x64x128xbf16, #tpu.memory_space<vmem>>, vector<1x64x128xbf16>
    %227 = vector.shape_cast %226 : vector<1x64x128xbf16> to vector<64x128xbf16>
    %cst_161 = arith.constant dense<0.000000e+00> : vector<180x128xf32>
    %228 = tpu.matmul %225, %227, %cst_161 {dimension_numbers = #tpu.dot_dimension_numbers<[1], [0], [0], [1], [0, 0, 1, 1], [], []>} : vector<180x64xbf16>, vector<64x128xbf16>, vector<180x128xf32> -> vector<180x128xf32>
    %229 = arith.addf %223, %228 : vector<180x128xf32>
    %c22 = arith.constant 22 : index
    %c0_162 = arith.constant 0 : index
    %230 = vector.load %arg13[%c22, %c0_162] : memref<208x64xf32, #tpu.memory_space<vmem>>, vector<180x64xf32>
    %231 = arith.truncf %230 : vector<180x64xf32> to vector<180x64xbf16>
    %c8_163 = arith.constant 8 : index
    %c0_164 = arith.constant 0 : index
    %c0_165 = arith.constant 0 : index
    %232 = vector.load %arg6[%c8_163, %c0_164, %c0_165] : memref<9x64x128xbf16, #tpu.memory_space<vmem>>, vector<1x64x128xbf16>
    %233 = vector.shape_cast %232 : vector<1x64x128xbf16> to vector<64x128xbf16>
    %cst_166 = arith.constant dense<0.000000e+00> : vector<180x128xf32>
    %234 = tpu.matmul %231, %233, %cst_166 {dimension_numbers = #tpu.dot_dimension_numbers<[1], [0], [0], [1], [0, 0, 1, 1], [], []>} : vector<180x64xbf16>, vector<64x128xbf16>, vector<180x128xf32> -> vector<180x128xf32>
    %235 = arith.addf %229, %234 : vector<180x128xf32>
    %c0_167 = arith.constant 0 : index
    %c0_168 = arith.constant 0 : index
    %236 = vector.load %arg11[%c0_167, %c0_168] : memref<180x128xf32, #tpu.memory_space<vmem>>, vector<180x128xf32>
    tpu.vector_store %arg11[%c0_167, %c0_168], %235 {strides = array<i32>} : memref<180x128xf32, #tpu.memory_space<vmem>>, vector<180x128xf32>,
    %c0_169 = arith.constant 0 : index
    %c0_170 = arith.constant 0 : index
    %237 = tpu.strided_load %arg11[%c0_169, %c0_170] {strides = array<i32: 2, 1>} : memref<180x128xf32, #tpu.memory_space<vmem>>, vector<20x128xf32>
    %c1_171 = arith.constant 1 : index
    %c0_172 = arith.constant 0 : index
    %238 = tpu.strided_load %arg11[%c1_171, %c0_172] {strides = array<i32: 2, 1>} : memref<180x128xf32, #tpu.memory_space<vmem>>, vector<20x128xf32>
    %239 = arith.maximumf %237, %238 : vector<20x128xf32>
    %240 = vector.shape_cast %239 : vector<20x128xf32> to vector<2x2x5x128xf32>
    %cst_173 = arith.constant dense<0xFF800000> : vector<2x5x128xf32>
    %241 = vector.multi_reduction <maximumf>, %240, %cst_173 [1] : vector<2x2x5x128xf32> to vector<2x5x128xf32>
    %c0_174 = arith.constant 0 : index
    %c0_175 = arith.constant 0 : index
    %242 = vector.load %arg7[%c0_174, %c0_175] : memref<1x128xf32, #tpu.memory_space<vmem>>, vector<1x128xf32>
    %243 = vector.shape_cast %242 : vector<1x128xf32> to vector<1x1x128xf32>
    %244 = vector.broadcast %243 : vector<1x1x128xf32> to vector<2x5x128xf32>
    %245 = arith.addf %241, %244 : vector<2x5x128xf32>
    %cst_176 = arith.constant 0.000000e+00 : f32
    %246 = vector.broadcast %cst_176 : f32 to vector<2x5x128xf32>
    %247 = arith.maximumf %245, %246 : vector<2x5x128xf32>
    %248 = vector.extract_strided_slice %247 {offsets = [0, 0, 0], sizes = [2, 4, 128], strides = [1, 1, 1]} : vector<2x5x128xf32> to vector<2x4x128xf32>
    %249 = vector.shape_cast %248 : vector<2x4x128xf32> to vector<8x128xf32>
    %c0_177 = arith.constant 0 : index
    %c0_178 = arith.constant 0 : index
    %c0_179 = arith.constant 0 : index
    %c0_180 = arith.constant 0 : index
    %250 = vector.load %arg8[%c0_177, %c0_178, %c0_179, %c0_180] : memref<1x3x8x128xf32, #tpu.memory_space<vmem>>, vector<1x1x8x128xf32>
    %251 = vector.shape_cast %250 : vector<1x1x8x128xf32> to vector<8x128xf32>
    %252 = vector.shape_cast %249 : vector<8x128xf32> to vector<1x1x8x128xf32>
    tpu.vector_store %arg8[%c0_177, %c0_178, %c0_179, %c0_180], %252 {strides = array<i32>} : memref<1x3x8x128xf32, #tpu.memory_space<vmem>>, vector<1x1x8x128xf32>,
    %c60 = arith.constant 60 : index
    %c0_181 = arith.constant 0 : index
    %253 = tpu.strided_load %arg11[%c60, %c0_181] {strides = array<i32: 2, 1>} : memref<180x128xf32, #tpu.memory_space<vmem>>, vector<20x128xf32>
    %c61 = arith.constant 61 : index
    %c0_182 = arith.constant 0 : index
    %254 = tpu.strided_load %arg11[%c61, %c0_182] {strides = array<i32: 2, 1>} : memref<180x128xf32, #tpu.memory_space<vmem>>, vector<20x128xf32>
    %255 = arith.maximumf %253, %254 : vector<20x128xf32>
    %256 = vector.shape_cast %255 : vector<20x128xf32> to vector<2x2x5x128xf32>
    %cst_183 = arith.constant dense<0xFF800000> : vector<2x5x128xf32>
    %257 = vector.multi_reduction <maximumf>, %256, %cst_183 [1] : vector<2x2x5x128xf32> to vector<2x5x128xf32>
    %c0_184 = arith.constant 0 : index
    %c0_185 = arith.constant 0 : index
    %258 = vector.load %arg7[%c0_184, %c0_185] : memref<1x128xf32, #tpu.memory_space<vmem>>, vector<1x128xf32>
    %259 = vector.shape_cast %258 : vector<1x128xf32> to vector<1x1x128xf32>
    %260 = vector.broadcast %259 : vector<1x1x128xf32> to vector<2x5x128xf32>
    %261 = arith.addf %257, %260 : vector<2x5x128xf32>
    %cst_186 = arith.constant 0.000000e+00 : f32
    %262 = vector.broadcast %cst_186 : f32 to vector<2x5x128xf32>
    %263 = arith.maximumf %261, %262 : vector<2x5x128xf32>
    %264 = vector.extract_strided_slice %263 {offsets = [0, 0, 0], sizes = [2, 4, 128], strides = [1, 1, 1]} : vector<2x5x128xf32> to vector<2x4x128xf32>
    %265 = vector.shape_cast %264 : vector<2x4x128xf32> to vector<8x128xf32>
    %c0_187 = arith.constant 0 : index
    %c1_188 = arith.constant 1 : index
    %c0_189 = arith.constant 0 : index
    %c0_190 = arith.constant 0 : index
    %266 = vector.load %arg8[%c0_187, %c1_188, %c0_189, %c0_190] : memref<1x3x8x128xf32, #tpu.memory_space<vmem>>, vector<1x1x8x128xf32>
    %267 = vector.shape_cast %266 : vector<1x1x8x128xf32> to vector<8x128xf32>
    %268 = vector.shape_cast %265 : vector<8x128xf32> to vector<1x1x8x128xf32>
    tpu.vector_store %arg8[%c0_187, %c1_188, %c0_189, %c0_190], %268 {strides = array<i32>} : memref<1x3x8x128xf32, #tpu.memory_space<vmem>>, vector<1x1x8x128xf32>,
    %c120 = arith.constant 120 : index
    %c0_191 = arith.constant 0 : index
    %269 = tpu.strided_load %arg11[%c120, %c0_191] {strides = array<i32: 2, 1>} : memref<180x128xf32, #tpu.memory_space<vmem>>, vector<20x128xf32>
    %c121 = arith.constant 121 : index
    %c0_192 = arith.constant 0 : index
    %270 = tpu.strided_load %arg11[%c121, %c0_192] {strides = array<i32: 2, 1>} : memref<180x128xf32, #tpu.memory_space<vmem>>, vector<20x128xf32>
    %271 = arith.maximumf %269, %270 : vector<20x128xf32>
    %272 = vector.shape_cast %271 : vector<20x128xf32> to vector<2x2x5x128xf32>
    %cst_193 = arith.constant dense<0xFF800000> : vector<2x5x128xf32>
    %273 = vector.multi_reduction <maximumf>, %272, %cst_193 [1] : vector<2x2x5x128xf32> to vector<2x5x128xf32>
    %c0_194 = arith.constant 0 : index
    %c0_195 = arith.constant 0 : index
    %274 = vector.load %arg7[%c0_194, %c0_195] : memref<1x128xf32, #tpu.memory_space<vmem>>, vector<1x128xf32>
    %275 = vector.shape_cast %274 : vector<1x128xf32> to vector<1x1x128xf32>
    %276 = vector.broadcast %275 : vector<1x1x128xf32> to vector<2x5x128xf32>
    %277 = arith.addf %273, %276 : vector<2x5x128xf32>
    %cst_196 = arith.constant 0.000000e+00 : f32
    %278 = vector.broadcast %cst_196 : f32 to vector<2x5x128xf32>
    %279 = arith.maximumf %277, %278 : vector<2x5x128xf32>
    %280 = vector.extract_strided_slice %279 {offsets = [0, 0, 0], sizes = [2, 4, 128], strides = [1, 1, 1]} : vector<2x5x128xf32> to vector<2x4x128xf32>
    %281 = vector.shape_cast %280 : vector<2x4x128xf32> to vector<8x128xf32>
    %c0_197 = arith.constant 0 : index
    %c2_198 = arith.constant 2 : index
    %c0_199 = arith.constant 0 : index
    %c0_200 = arith.constant 0 : index
    %282 = vector.load %arg8[%c0_197, %c2_198, %c0_199, %c0_200] : memref<1x3x8x128xf32, #tpu.memory_space<vmem>>, vector<1x1x8x128xf32>
    %283 = vector.shape_cast %282 : vector<1x1x8x128xf32> to vector<8x128xf32>
    %284 = vector.shape_cast %281 : vector<8x128xf32> to vector<1x1x8x128xf32>
    tpu.vector_store %arg8[%c0_197, %c2_198, %c0_199, %c0_200], %284 {strides = array<i32>} : memref<1x3x8x128xf32, #tpu.memory_space<vmem>>, vector<1x1x8x128xf32>,
    return
  }
  func.func @transform_0(%arg0: i32) -> (i32, i32, i32) {
    %c0_i32 = arith.constant 0 : i32
    %c0_i32_0 = arith.constant 0 : i32
    %c0_i32_1 = arith.constant 0 : i32
    return %arg0, %c0_i32, %c0_i32_0 : i32, i32, i32
  }
  func.func @transform_1(%arg0: i32) -> (i32, i32) {
    %c0_i32 = arith.constant 0 : i32
    %c0_i32_0 = arith.constant 0 : i32
    %c0_i32_1 = arith.constant 0 : i32
    return %c0_i32, %c0_i32_0 : i32, i32
  }
  func.func @transform_2(%arg0: i32) -> (i32, i32) {
    %c0_i32 = arith.constant 0 : i32
    %c0_i32_0 = arith.constant 0 : i32
    %c0_i32_1 = arith.constant 0 : i32
    return %c0_i32, %c0_i32_0 : i32, i32
  }
  func.func @transform_3(%arg0: i32) -> (i32, i32, i32) {
    %c0_i32 = arith.constant 0 : i32
    %c0_i32_0 = arith.constant 0 : i32
    %c0_i32_1 = arith.constant 0 : i32
    %c0_i32_2 = arith.constant 0 : i32
    return %c0_i32, %c0_i32_0, %c0_i32_1 : i32, i32, i32
  }
  func.func @transform_4(%arg0: i32) -> (i32, i32) {
    %c0_i32 = arith.constant 0 : i32
    %c0_i32_0 = arith.constant 0 : i32
    %c0_i32_1 = arith.constant 0 : i32
    return %c0_i32, %c0_i32_0 : i32, i32
  }
  func.func @transform_5(%arg0: i32) -> (i32, i32, i32) {
    %c0_i32 = arith.constant 0 : i32
    %c0_i32_0 = arith.constant 0 : i32
    %c0_i32_1 = arith.constant 0 : i32
    %c0_i32_2 = arith.constant 0 : i32
    return %c0_i32, %c0_i32_0, %c0_i32_1 : i32, i32, i32
  }
  func.func @transform_6(%arg0: i32) -> (i32, i32) {
    %c0_i32 = arith.constant 0 : i32
    %c0_i32_0 = arith.constant 0 : i32
    %c0_i32_1 = arith.constant 0 : i32
    return %c0_i32, %c0_i32_0 : i32, i32
  }
  func.func @transform_7(%arg0: i32) -> (i32, i32, i32, i32) {
    %c0_i32 = arith.constant 0 : i32
    %c0_i32_0 = arith.constant 0 : i32
    %c0_i32_1 = arith.constant 0 : i32
    %c0_i32_2 = arith.constant 0 : i32
    return %arg0, %c0_i32, %c0_i32_0, %c0_i32_1 : i32, i32, i32, i32
  }
}

</mosaic_0001>

<bundles_post_ra>
// kernel: cnn_forward.1
= control target key start
LH: loop header
LB: loop body
LE: loop exit
PB: predicated region body
PF: predicated region fallthrough
CT: control target
= control target key end

     0   :  { %s20923_s24 = smov 0   ;;  %s24757_s0 = inlined_call_operand.vmem [shape: bf16[2,1536,27], index: 0, kind: input, shape index: {}]   ;;  %s24758_s1 = inlined_call_operand.vmem [shape: bf16[27,32], index: 1, kind: input, shape index: {}]   ;;  %s24759_s2 = inlined_call_operand.vmem [shape: f32[1,32], index: 2, kind: input, shape index: {}]   ;;  %s24760_s3 = inlined_call_operand.vmem [shape: bf16[9,32,64], index: 3, kind: input, shape index: {}]   ;;  %s24761_s4 = inlined_call_operand.vmem [shape: f32[1,64], index: 4, kind: input, shape index: {}]   ;;  %s24762_s5 = inlined_call_operand.vmem [shape: bf16[9,64,128], index: 5, kind: input, shape index: {}]   ;;  %s24763_s6 = inlined_call_operand.vmem [shape: f32[1,128], index: 6, kind: input, shape index: {}]   ;;  %s24764_s7 = inlined_call_operand.vmem [shape: f32[2,3,8,128], index: 7, kind: output, shape index: {}]  }
   0x1 LB: > { %s17474_s25 = sadd.s32 4294967295, %s20877_s24   ;;  %p17478_p0 = scmp.ge.s32.totalorder %s20877_s24, 1  ;;  %s20877_s24 = sphi %s20923_s24, %s17_s24  }
   0x2   : > { %p237_p1 = scmp.lt.s32.totalorder %s20877_s24, 3 }
   0x4   : > { %p238_p2 = pnand %p17478_p0, %p237_p1 }
   0x6   : > { %241 = sbr.rel (%p238_p2) target bundleno = 2695 (0xa87), region = 48 }
   0xd   : > { %v20716_v0 = vld [vmem:[%s24758_s1] sm:$0xff]   ;;  %vm1358_vm0 = vcmask 1044480   ;;  %v20717_v1 = vld [vmem:[%s24758_s1 + $0x8] sm:$0x3f]   ;;  %vm1359_vm1 = vcmask 1045504   ;;  %p269_p3 = scmp.lt.s32.totalorder %s17474_s25, 1 }
   0xe   : > { %18830 = vmatprep.subr.bf16.mxu0 %v20716_v0  ;;  %v20879_v2 = vmov 65535   ;;  %vm1069_vm2 = vcmask 220160   ;;  %vm280_vm3 = vcmask 261120   ;;  %v24767_v39 = vmov 0.0  }
   0xf   : > { %18831 = vmatpush3.bf16.msra.mxu0 %v20716_v0  ;;  %v1360_v3 = vsel %vm1358_vm0, 4294967295, %v20879_v2  ;;  %s24880_s25 = smov (!%p269_p3, %s17474_s25), 1  ;;  %281 = vst.msk [vmem:[#allocation5] sm:$0xff] %vm280_vm3, %v24767_v39  ;;  %282 = vst.msk [vmem:[#allocation5 + $0x8] sm:$0xff] %vm280_vm3, %v24767_v39  ;;  %vm355_vm4 = vcmask 523264  }
  0x10   : > { %v1361_v4 = vsel %vm1359_vm1, %v1360_v3, 0  ;;  %s20702_s30 = smul.u32 768, %s24880_s25  ;;  %283 = vst.msk [vmem:[#allocation5 + $0x10] sm:$0xff] %vm280_vm3, %v24767_v39  ;;  %284 = vst.msk [vmem:[#allocation5 + $0x18] sm:$0xff] %vm280_vm3, %v24767_v39 }
  0x11   : > { %v1363_v5 = vand.u32 %v20717_v1, %v1361_v4  ;;  %285 = vst.msk [vmem:[#allocation5 + $0x20] sm:$0xff] %vm280_vm3, %v24767_v39  ;;  %286 = vst.msk [vmem:[#allocation5 + $0x28] sm:$0xff] %vm280_vm3, %v24767_v39  ;;  %s20703_s9 = smul.u32 24, %s24880_s25 }
  0x12   : > { %s20943_s10 = scalar_lea.vmem %s24757_s0, %s20702_s30  ;;  %287 = vst.msk [vmem:[#allocation5 + $0x30] sm:$0xff] %vm280_vm3, %v24767_v39  ;;  %288 = vst.msk [vmem:[#allocation5 + $0x38] sm:$0xff] %vm280_vm3, %v24767_v39 }
  0x13   : > { %18832 = vmatprep.subr.bf16.mxu0 %v1363_v5  ;;  %v20718_v6 = vld [vmem:[%s20943_s10] sm:$0xff]   ;;  %v20719_v7 = vld [vmem:[%s20943_s10 + $0x8] sm:$0xff]   ;;  %v20720_v8 = vld [vmem:[%s20943_s10 + $0x10] sm:$0xff]   ;;  %289 = vst.msk [vmem:[#allocation5 + $0x40] sm:$0xff] %vm280_vm3, %v24767_v39  ;;  %s24647_s11 = scalar_lea.vmem %s24764_s7, %s20703_s9 }
  0x14   : > { %18833 = vmatpush3.bf16.msra.mxu0 %v1363_v5  ;;  %18834 = vmatprep.mubr.msk.bf16.mxu0 %vm1069_vm2, %v20718_v6  ;;  %v20721_v9 = vld [vmem:[%s20943_s10 + $0x18] sm:$0xff]   ;;  %v20722_v10 = vld [vmem:[%s20943_s10 + $0x20] sm:$0xff]   ;;  %v20723_v11 = vld [vmem:[%s20943_s10 + $0x28] sm:$0xff]   ;;  %290 = vst.msk [vmem:[#allocation5 + $0x48] sm:$0xff] %vm280_vm3, %v24767_v39 }
  0x15   : > { %v20724_v12 = vld [vmem:[%s20943_s10 + $0x30] sm:$0xff]   ;;  %v20725_v13 = vld [vmem:[%s20943_s10 + $0x38] sm:$0xff]   ;;  %v20726_v14 = vld [vmem:[%s20943_s10 + $0x40] sm:$0xff]   ;;  %291 = vst.msk [vmem:[#allocation5 + $0x50] sm:$0xff] %vm280_vm3, %v24767_v39 }
  0x16   : > { %v20727_v15 = vld [vmem:[%s20943_s10 + $0x48] sm:$0xff]   ;;  %v20728_v16 = vld [vmem:[%s20943_s10 + $0x50] sm:$0xff]   ;;  %v20729_v17 = vld [vmem:[%s20943_s10 + $0x58] sm:$0xff]   ;;  %292 = vst.msk [vmem:[#allocation5 + $0x58] sm:$0xff] %vm280_vm3, %v24767_v39 }
  0x17   : > { %18835 = vmatmul.mubr.msk.bf16.vlgmr.msra.gmra.mrb[0].mxu0 %vm1069_vm2, %v20719_v7  ;;  %v20730_v18 = vld [vmem:[%s20943_s10 + $0x60] sm:$0xff]   ;;  %v20731_v19 = vld [vmem:[%s20943_s10 + $0x68] sm:$0xff]   ;;  %v20732_v20 = vld [vmem:[%s20943_s10 + $0x70] sm:$0xff]   ;;  %293 = vst.msk [vmem:[#allocation5 + $0x60] sm:$0xff] %vm280_vm3, %v24767_v39 }
  0x18   : > { %18838 = vmatprep.mubr.msk.bf16.mxu0 %vm1069_vm2, %v20720_v8  ;;  %v20733_v21 = vld [vmem:[%s20943_s10 + $0x78] sm:$0xff]   ;;  %v20734_v22 = vld [vmem:[%s20943_s10 + $0x80] sm:$0xff]   ;;  %v20735_v23 = vld [vmem:[%s20943_s10 + $0x88] sm:$0xff]   ;;  %294 = vst.msk [vmem:[#allocation5 + $0x68] sm:$0xff] %vm280_vm3, %v24767_v39 }
  0x19   : > { %v20736_v24 = vld [vmem:[%s20943_s10 + $0x90] sm:$0xff]   ;;  %v20737_v25 = vld [vmem:[%s20943_s10 + $0x98] sm:$0xff]   ;;  %v20738_v26 = vld [vmem:[%s20943_s10 + $0xa0] sm:$0xff]   ;;  %295 = vst.msk [vmem:[#allocation5 + $0x70] sm:$0xff] %vm280_vm3, %v24767_v39 }
  0x1a   : > { %v20739_v27 = vld [vmem:[%s20943_s10 + $0xa8] sm:$0xff]   ;;  %v20740_v28 = vld [vmem:[%s20943_s10 + $0xb0] sm:$0xff]   ;;  %v20741_v29 = vld [vmem:[%s20943_s10 + $0xb8] sm:$0xff]   ;;  %296 = vst.msk [vmem:[#allocation5 + $0x78] sm:$0xff] %vm280_vm3, %v24767_v39 }
  0x1b   : > { %v20742_v30 = vld [vmem:[%s20943_s10 + $0xc0] sm:$0xff]   ;;  %v20743_v31 = vld [vmem:[%s20943_s10 + $0xc8] sm:$0xff]   ;;  %v20744_v32 = vld [vmem:[%s20943_s10 + $0xd0] sm:$0xff]   ;;  %297 = vst.msk [vmem:[#allocation5 + $0x80] sm:$0xff] %vm280_vm3, %v24767_v39 }
  0x1c   : > { %v20745_v33 = vld [vmem:[%s20943_s10 + $0xd8] sm:$0xff]   ;;  %v20746_v34 = vld [vmem:[%s20943_s10 + $0xe0] sm:$0xff]   ;;  %v20747_v35 = vld [vmem:[%s20943_s10 + $0xe8] sm:$0xff]   ;;  %298 = vst.msk [vmem:[#allocation5 + $0x88] sm:$0xff] %vm280_vm3, %v24767_v39 }
  0x1d   : > { %v20748_v36 = vld [vmem:[%s20943_s10 + $0xf0] sm:$0xff]   ;;  %v20749_v37 = vld [vmem:[%s20943_s10 + $0xf8] sm:$0xff]   ;;  %v20750_v38 = vld [vmem:[%s20943_s10 + $0x100] sm:$0xff]   ;;  %299 = vst.msk [vmem:[#allocation5 + $0x90] sm:$0xff] %vm280_vm3, %v24767_v39 }
  0x1e   : > { %300 = vst.msk [vmem:[#allocation5 + $0x98] sm:$0xff] %vm280_vm3, %v24767_v39  ;;  %301 = vst.msk [vmem:[#allocation5 + $0xa0] sm:$0xff] %vm280_vm3, %v24767_v39  ;;  %v20751_v40 = vld [vmem:[%s20943_s10 + $0x108] sm:$0xff]   ;;  %v20752_v41 = vld [vmem:[%s20943_s10 + $0x110] sm:$0xff]  }
  0x1f   : > { %18839 = vmatmul.mubr.msk.bf16.gmra.mrb[4].mxu0 %vm1069_vm2, %v20721_v9  ;;  %302 = vst.msk [vmem:[#allocation5 + $0xa8] sm:$0xff] %vm280_vm3, %v24767_v39  ;;  %303 = vst.msk [vmem:[#allocation5 + $0xb0] sm:$0xff] %vm280_vm3, %v24767_v39  ;;  %v20753_v42 = vld [vmem:[%s20943_s10 + $0x118] sm:$0xff]   ;;  %v20754_v43 = vld [vmem:[%s20943_s10 + $0x120] sm:$0xff]  }
  0x20   : > { %18842 = vmatprep.mubr.msk.bf16.mxu0 %vm1069_vm2, %v20722_v10  ;;  %304 = vst.msk [vmem:[#allocation5 + $0xb8] sm:$0xff] %vm280_vm3, %v24767_v39  ;;  %305 = vst.msk [vmem:[#allocation5 + $0xc0] sm:$0xff] %vm280_vm3, %v24767_v39  ;;  %v20755_v44 = vld [vmem:[%s20943_s10 + $0x128] sm:$0xff]   ;;  %v20756_v45 = vld [vmem:[%s20943_s10 + $0x130] sm:$0xff]  }
  0x21   : > { %306 = vst.msk [vmem:[#allocation5 + $0xc8] sm:$0xff] %vm280_vm3, %v24767_v39  ;;  %307 = vst.msk [vmem:[#allocation5 + $0xd0] sm:$0xff] %vm280_vm3, %v24767_v39  ;;  %v20757_v46 = vld [vmem:[%s20943_s10 + $0x138] sm:$0xff]   ;;  %v20758_v47 = vld [vmem:[%s20943_s10 + $0x140] sm:$0xff]  }
  0x22   : > { %308 = vst.msk [vmem:[#allocation5 + $0xd8] sm:$0xff] %vm280_vm3, %v24767_v39  ;;  %309 = vst.msk [vmem:[#allocation5 + $0xe0] sm:$0xff] %vm280_vm3, %v24767_v39  ;;  %v20759_v48 = vld [vmem:[%s20943_s10 + $0x148] sm:$0xff]   ;;  %v20760_v49 = vld [vmem:[%s20943_s10 + $0x150] sm:$0xff]  }
  0x23   : > { %310 = vst.msk [vmem:[#allocation5 + $0xe8] sm:$0xff] %vm280_vm3, %v24767_v39  ;;  %311 = vst.msk [vmem:[#allocation5 + $0xf0] sm:$0xff] %vm280_vm3, %v24767_v39  ;;  %v20761_v50 = vld [vmem:[%s20943_s10 + $0x158] sm:$0xff]   ;;  %v20762_v51 = vld [vmem:[%s20943_s10 + $0x160] sm:$0xff]  }
  0x24   : > { %312 = vst.msk [vmem:[#allocation5 + $0xf8] sm:$0xff] %vm280_vm3, %v24767_v39  ;;  %313 = vst.msk [vmem:[#allocation5 + $0x100] sm:$0xff] %vm280_vm3, %v24767_v39  ;;  %v20763_v52 = vld [vmem:[%s20943_s10 + $0x168] sm:$0xff]   ;;  %v20764_v53 = vld [vmem:[%s20943_s10 + $0x170] sm:$0xff]  }
  0x25   : > { %314 = vst.msk [vmem:[#allocation5 + $0x108] sm:$0xff] %vm280_vm3, %v24767_v39  ;;  %315 = vst.msk [vmem:[#allocation5 + $0x110] sm:$0xff] %vm280_vm3, %v24767_v39  ;;  %v20765_v54 = vld [vmem:[%s20943_s10 + $0x178] sm:$0xff]   ;;  %v20766_v55 = vld [vmem:[%s20943_s10 + $0x180] sm:$0xff]  }
  0x26   : > { %316 = vst.msk [vmem:[#allocation5 + $0x118] sm:$0xff] %vm280_vm3, %v24767_v39  ;;  %317 = vst.msk [vmem:[#allocation5 + $0x120] sm:$0xff] %vm280_vm3, %v24767_v39  ;;  %v20767_v56 = vld [vmem:[%s20943_s10 + $0x188] sm:$0xff]   ;;  %v20768_v57 = vld [vmem:[%s20943_s10 + $0x190] sm:$0xff]  }
  0x27   : > { %18843 = vmatmul.mubr.msk.bf16.gmra.mrb[8].mxu0 %vm1069_vm2, %v20723_v11  ;;  %318 = vst.msk [vmem:[#allocation5 + $0x128] sm:$0xff] %vm280_vm3, %v24767_v39  ;;  %319 = vst.msk [vmem:[#allocation5 + $0x130] sm:$0xff] %vm280_vm3, %v24767_v39  ;;  %v20769_v58 = vld [vmem:[%s20943_s10 + $0x198] sm:$0xff]   ;;  %v20770_v59 = vld [vmem:[%s20943_s10 + $0x1a0] sm:$0xff]  }
  0x28   : > { %18846 = vmatprep.mubr.msk.bf16.mxu0 %vm1069_vm2, %v20724_v12  ;;  %320 = vst.msk [vmem:[#allocation5 + $0x138] sm:$0xff] %vm280_vm3, %v24767_v39  ;;  %321 = vst.msk [vmem:[#allocation5 + $0x140] sm:$0xff] %vm280_vm3, %v24767_v39  ;;  %v20771_v60 = vld [vmem:[%s20943_s10 + $0x1a8] sm:$0xff]   ;;  %v20772_v61 = vld [vmem:[%s20943_s10 + $0x1b0] sm:$0xff]  }
  0x29   : > { %322 = vst.msk [vmem:[#allocation5 + $0x148] sm:$0xff] %vm280_vm3, %v24767_v39  ;;  %323 = vst.msk [vmem:[#allocation5 + $0x150] sm:$0xff] %vm280_vm3, %v24767_v39  ;;  %v20773_v0 = vld [vmem:[%s20943_s10 + $0x1b8] sm:$0xff]   ;;  %v20774_v2 = vld [vmem:[%s20943_s10 + $0x1c0] sm:$0xff]  }
  0x2a   : > { %324 = vst.msk [vmem:[#allocation5 + $0x158] sm:$0xff] %vm280_vm3, %v24767_v39  ;;  %325 = vst.msk [vmem:[#allocation5 + $0x160] sm:$0xff] %vm280_vm3, %v24767_v39  ;;  %v20775_v6 = vld [vmem:[%s20943_s10 + $0x1c8] sm:$0xff]   ;;  %v20776_v8 = vld [vmem:[%s20943_s10 + $0x1d0] sm:$0xff]  }
  0x2b   : > { %326 = vst.msk [vmem:[#allocation5 + $0x168] sm:$0xff] %vm280_vm3, %v24767_v39  ;;  %327 = vst.msk [vmem:[#allocation5 + $0x170] sm:$0xff] %vm280_vm3, %v24767_v39 }
  0x2c   : > { %328 = vst.msk [vmem:[#allocation5 + $0x178] sm:$0xff] %vm280_vm3, %v24767_v39  ;;  %329 = vst.msk [vmem:[#allocation5 + $0x180] sm:$0xff] %vm280_vm3, %v24767_v39 }
  0x2d   : > { %330 = vst.msk [vmem:[#allocation5 + $0x188] sm:$0xff] %vm280_vm3, %v24767_v39  ;;  %331 = vst.msk [vmem:[#allocation5 + $0x190] sm:$0xff] %vm280_vm3, %v24767_v39 }
  0x2e   : > { %332 = vst.msk [vmem:[#allocation5 + $0x198] sm:$0xff] %vm280_vm3, %v24767_v39  ;;  %333 = vst.msk [vmem:[#allocation5 + $0x1a0] sm:$0xff] %vm280_vm3, %v24767_v39 }
  0x2f   : > { %18847 = vmatmul.mubr.msk.bf16.gmra.mrb[12].mxu0 %vm1069_vm2, %v20725_v13  ;;  %334 = vst.msk [vmem:[#allocation5 + $0x1a8] sm:$0xff] %vm280_vm3, %v24767_v39  ;;  %335 = vst.msk [vmem:[#allocation5 + $0x1b0] sm:$0xff] %vm280_vm3, %v24767_v39 }
  0x30   : > { %18850 = vmatprep.mubr.msk.bf16.mxu0 %vm1069_vm2, %v20726_v14  ;;  %336 = vst.msk [vmem:[#allocation5 + $0x1b8] sm:$0xff] %vm280_vm3, %v24767_v39  ;;  %337 = vst.msk [vmem:[#allocation5 + $0x1c0] sm:$0xff] %vm280_vm3, %v24767_v39 }
  0x31   : > { %338 = vst.msk [vmem:[#allocation5 + $0x1c8] sm:$0xff] %vm280_vm3, %v24767_v39  ;;  %339 = vst.msk [vmem:[#allocation5 + $0x1d0] sm:$0xff] %vm280_vm3, %v24767_v39 }
  0x32   : > { %340 = vst.msk [vmem:[#allocation5 + $0x1d8] sm:$0xff] %vm280_vm3, %v24767_v39  ;;  %341 = vst.msk [vmem:[#allocation5 + $0x1e0] sm:$0xff] %vm280_vm3, %v24767_v39 }
  0x33   : > { %342 = vst.msk [vmem:[#allocation5 + $0x1e8] sm:$0xff] %vm280_vm3, %v24767_v39  ;;  %343 = vst.msk [vmem:[#allocation5 + $0x1f0] sm:$0xff] %vm280_vm3, %v24767_v39 }
  0x34   : > { %344 = vst.msk [vmem:[#allocation5 + $0x1f8] sm:$0xff] %vm280_vm3, %v24767_v39  ;;  %345 = vst.msk [vmem:[#allocation5 + $0x200] sm:$0xff] %vm280_vm3, %v24767_v39 }
  0x35   : > { %346 = vst.msk [vmem:[#allocation5 + $0x208] sm:$0xff] %vm280_vm3, %v24767_v39  ;;  %347 = vst.msk [vmem:[#allocation5 + $0x210] sm:$0xff] %vm280_vm3, %v24767_v39 }
  0x36   : > { %348 = vst.msk [vmem:[#allocation5 + $0x218] sm:$0xff] %vm280_vm3, %v24767_v39  ;;  %349 = vst.msk [vmem:[#allocation5 + $0x220] sm:$0xff] %vm280_vm3, %v24767_v39 }
  0x37   : > { %18851 = vmatmul.mubr.msk.bf16.gmra.mrb[16].mxu0 %vm1069_vm2, %v20727_v15  ;;  %350 = vst.msk [vmem:[#allocation5 + $0x228] sm:$0xff] %vm280_vm3, %v24767_v39  ;;  %351 = vst.msk [vmem:[#allocation5 + $0x230] sm:$0xff] %vm280_vm3, %v24767_v39  ;;  %v20881_v15 = vmov 1983009808  }
  0x38   : > { %18854 = vmatprep.mubr.msk.bf16.mxu0 %vm1069_vm2, %v20728_v16  ;;  %352 = vst.msk [vmem:[#allocation5 + $0x238] sm:$0xff] %vm280_vm3, %v24767_v39  ;;  %353 = vst.msk [vmem:[#allocation5 + $0x240] sm:$0xff] %vm280_vm3, %v24767_v39  ;;  %v2644_v16 = vunpack.c.l.s4 %v20881_v15 }
  0x3f   : > { %18855 = vmatmul.mubr.msk.bf16.gmra.mrb[20].mxu0 %vm1069_vm2, %v20729_v17  ;;  %v24765_v17 = vlaneseq }
  0x40   : > { %18858 = vmatprep.mubr.msk.bf16.mxu0 %vm1069_vm2, %v20730_v18 }
  0x47   : > { %18859 = vmatmul.mubr.msk.bf16.gmra.mrb[24].mxu0 %vm1069_vm2, %v20731_v19 }
  0x48   : > { %18862 = vmatprep.mubr.msk.bf16.mxu0 %vm1069_vm2, %v20732_v20  ;;  %v20777_v20 = vld [vmem:[%s20943_s10 + $0x1d8] sm:$0xff]  }
  0x4f   : > { %18863 = vmatmul.mubr.msk.bf16.gmra.mrb[28].mxu0 %vm1069_vm2, %v20733_v21 }
  0x50   : > { %18866 = vmatprep.mubr.msk.bf16.mxu0 %vm1069_vm2, %v20734_v22 }
  0x57   : > { %18867 = vmatmul.mubr.msk.bf16.gmra.mrb[32].mxu0 %vm1069_vm2, %v20735_v23 }
  0x58   : > { %18870 = vmatprep.mubr.msk.bf16.mxu0 %vm1069_vm2, %v20736_v24 }
  0x5f   : > { %18871 = vmatmul.mubr.msk.bf16.gmra.mrb[36].mxu0 %vm1069_vm2, %v20737_v25  ;;  %v20778_v25 = vld [vmem:[%s20943_s10 + $0x1e0] sm:$0xff]  }
  0x60   : > { %18874 = vmatprep.mubr.msk.bf16.mxu0 %vm1069_vm2, %v20738_v26 }
  0x67   : > { %18875 = vmatmul.mubr.msk.bf16.gmra.mrb[40].mxu0 %vm1069_vm2, %v20739_v27 }
  0x68   : > { %18878 = vmatprep.mubr.msk.bf16.mxu0 %vm1069_vm2, %v20740_v28 }
  0x6f   : > { %18879 = vmatmul.mubr.msk.bf16.gmra.mrb[44].mxu0 %vm1069_vm2, %v20741_v29 }
  0x70   : > { %18882 = vmatprep.mubr.msk.bf16.mxu0 %vm1069_vm2, %v20742_v30 }
  0x77   : > { %18883 = vmatmul.mubr.msk.bf16.gmra.mrb[48].mxu0 %vm1069_vm2, %v20743_v31  ;;  %v2645_v31 = vunpack.c.0.s8 %v2644_v16 }
  0x78   : > { %18886 = vmatprep.mubr.msk.bf16.mxu0 %vm1069_vm2, %v20744_v32  ;;  %v21224_v32 = vshrl.u32 %v24765_v17, 7 }
  0x7f   : > { %18887 = vmatmul.mubr.msk.bf16.gmra.mrb[52].mxu0 %vm1069_vm2, %v20745_v33 }
  0x80   : > { %18890 = vmatprep.mubr.msk.bf16.mxu0 %vm1069_vm2, %v20746_v34  ;;  %v21231_v34 = vld [vmem:[%s24759_s2] ss:$0 sm:$0xff] }
  0x87   : > { %18891 = vmatmul.mubr.msk.bf16.gmra.mrb[56].mxu0 %vm1069_vm2, %v20747_v35 }
  0x88   : > { %18894 = vmatprep.mubr.msk.bf16.mxu0 %vm1069_vm2, %v20748_v36 }
  0x8f   : > { %18895 = vmatmul.mubr.msk.bf16.gmra.mrb[60].mxu0 %vm1069_vm2, %v20749_v37 }
  0x90   : > { %18898 = vmatprep.mubr.msk.bf16.mxu0 %vm1069_vm2, %v20750_v38 }
  0x97   : > { %18899 = vmatmul.mubr.msk.bf16.gmra.mrb[64].mxu0 %vm1069_vm2, %v20751_v40 }
  0x98   : > { %18902 = vmatprep.mubr.msk.bf16.mxu0 %vm1069_vm2, %v20752_v41 }
  0x9f   : > { %18903 = vmatmul.mubr.msk.bf16.gmra.mrb[68].mxu0 %vm1069_vm2, %v20753_v42  ;;  %v21238_v42 = vsub.s32 %v2645_v31, %v21224_v32 }
  0xa0   : > { %18906 = vmatprep.mubr.msk.bf16.mxu0 %vm1069_vm2, %v20754_v43 }
  0xa1   : > { %24773 = vst [vmem:[#allocation7_spill] sm:$0xff] %v21238_v42 }
  0xa7   : > { %18907 = vmatmul.mubr.msk.bf16.gmra.mrb[72].mxu0 %vm1069_vm2, %v20755_v44 }
  0xa8   : > { %18910 = vmatprep.mubr.msk.bf16.mxu0 %vm1069_vm2, %v20756_v45  ;;  %v20779_v45 = vld [vmem:[%s20943_s10 + $0x1e8] sm:$0xff]  }
  0xaf   : > { %18911 = vmatmul.mubr.msk.bf16.gmra.mrb[76].mxu0 %vm1069_vm2, %v20757_v46 }
  0xb0   : > { %18914 = vmatprep.mubr.msk.bf16.mxu0 %vm1069_vm2, %v20758_v47 }
  0xb7   : > { %18915 = vmatmul.mubr.msk.bf16.gmra.mrb[80].mxu0 %vm1069_vm2, %v20759_v48  ;;  %v20780_v48 = vld [vmem:[%s20943_s10 + $0x1f0] sm:$0xff]  }
  0xb8   : > { %18918 = vmatprep.mubr.msk.bf16.mxu0 %vm1069_vm2, %v20760_v49 }
  0xbf   : > { %18919 = vmatmul.mubr.msk.bf16.gmra.mrb[84].mxu0 %vm1069_vm2, %v20761_v50 }
  0xc0   : > { %18922 = vmatprep.mubr.msk.bf16.mxu0 %vm1069_vm2, %v20762_v51 }
  0xc7   : > { %18923 = vmatmul.mubr.msk.bf16.gmra.mrb[88].mxu0 %vm1069_vm2, %v20763_v52 }
  0xc8   : > { %18926 = vmatprep.mubr.msk.bf16.mxu0 %vm1069_vm2, %v20764_v53 }
  0xcf   : > { %18927 = vmatmul.mubr.msk.bf16.gmra.mrb[92].mxu0 %vm1069_vm2, %v20765_v54 }
  0xd0   : > { %18930 = vmatprep.mubr.msk.bf16.mxu0 %vm1069_vm2, %v20766_v55 }
  0xd7   : > { %18931 = vmatmul.mubr.msk.bf16.gmra.mrb[96].mxu0 %vm1069_vm2, %v20767_v56 }
  0xd8   : > { %18934 = vmatprep.mubr.msk.bf16.mxu0 %vm1069_vm2, %v20768_v57 }
  0xdf   : > { %18935 = vmatmul.mubr.msk.bf16.gmra.mrb[100].mxu0 %vm1069_vm2, %v20769_v58 }
  0xe0   : > { %18938 = vmatprep.mubr.msk.bf16.mxu0 %vm1069_vm2, %v20770_v59 }
  0xe7   : > { %18939 = vmatmul.mubr.msk.bf16.gmra.mrb[104].mxu0 %vm1069_vm2, %v20771_v60 }
  0xe8   : > { %18942 = vmatprep.mubr.msk.bf16.mxu0 %vm1069_vm2, %v20772_v61 }
  0xea   : > { %v18836_v62 = vpop.f32.mrb[0].mxu0 }
  0xeb   : > { %2168 = vst.msk [vmem:[#allocation2 + $0x10] sm:$0xff] %vm280_vm3, %v18836_v62  ;;  %v1399_v63 = vpop.f32.mrb[1].mxu0 }
  0xec   : > { %2166 = vst.msk [vmem:[#allocation2] sm:$0xff] %vm280_vm3, %v1399_v63  ;;  %v18837_v1 = vpop.f32.mrb[2].mxu0 }
  0xed   : > { %2169 = vst.msk [vmem:[#allocation2 + $0x18] sm:$0xff] %vm280_vm3, %v18837_v1  ;;  %v1402_v3 = vpop.f32.mrb[3].mxu0 }
  0xee   : > { %2167 = vst.msk [vmem:[#allocation2 + $0x8] sm:$0xff] %vm280_vm3, %v1402_v3 }
  0xef   : > { %18943 = vmatmul.mubr.msk.bf16.gmra.mrb[108].mxu0 %vm1069_vm2, %v20773_v0 }
  0xf0   : > { %18946 = vmatprep.mubr.msk.bf16.mxu0 %vm1069_vm2, %v20774_v2 }
  0xf2   : > { %v18840_v4 = vpop.f32.mrb[4].mxu0 }
  0xf3   : > { %2172 = vst.msk [vmem:[#allocation2 + $0x30] sm:$0xff] %vm280_vm3, %v18840_v4  ;;  %v1415_v5 = vpop.f32.mrb[5].mxu0 }
  0xf4   : > { %2170 = vst.msk [vmem:[#allocation2 + $0x20] sm:$0xff] %vm280_vm3, %v1415_v5  ;;  %v18841_v7 = vpop.f32.mrb[6].mxu0  ;;  %v2360_v10 = vld [vmem:[#allocation2 + $0x10] ss:$2 sm:$0xff]  ;;  %v2424_v11 = vld [vmem:[#allocation2 + $0x11] ss:$2 sm:$0xff] }
  0xf5   : > { %2173 = vst.msk [vmem:[#allocation2 + $0x38] sm:$0xff] %vm280_vm3, %v18841_v7  ;;  %v1418_v9 = vpop.f32.mrb[7].mxu0  ;;  %v2358_v12 = vld [vmem:[#allocation2] ss:$2 sm:$0xff]  ;;  %v2422_v13 = vld [vmem:[#allocation2 + $0x1] ss:$2 sm:$0xff]  ;;  %v2486_v18 = vmax.f32 %v2360_v10, %v2424_v11 }
  0xf6   : > { %2171 = vst.msk [vmem:[#allocation2 + $0x28] sm:$0xff] %vm280_vm3, %v1418_v9  ;;  %v2485_v21 = vmax.f32 %v2358_v12, %v2422_v13  ;;  %v20781_v5 = vld [vmem:[%s20943_s10 + $0x1f8] sm:$0xff]   ;;  %v20782_v9 = vld [vmem:[%s20943_s10 + $0x200] sm:$0xff]  }
  0xf7   : > { %18947 = vmatmul.mubr.msk.bf16.gmra.mrb[112].mxu0 %vm1069_vm2, %v20775_v6  ;;  %v2520_v33 = vsel %vm280_vm3, %v2486_v18, -inf }
  0xf8   : > { %18950 = vmatprep.mubr.msk.bf16.mxu0 %vm1069_vm2, %v20776_v8  ;;  %v2517_v36 = vsel %vm280_vm3, %v2485_v21, -inf }
  0xfa   : > { %v18844_v14 = vpop.f32.mrb[8].mxu0 }
  0xfb   : > { %2176 = vst.msk [vmem:[#allocation2 + $0x50] sm:$0xff] %vm280_vm3, %v18844_v14  ;;  %v1431_v19 = vpop.f32.mrb[9].mxu0  ;;  %v20814_v14 = vld [vmem:[%s24760_s3 + $0x10] sm:$0xff]  }
  0xfc   : > { %v2364_v22 = vld [vmem:[#allocation2 + $0x30] ss:$2 sm:$0xff]  ;;  %v2428_v23 = vld [vmem:[#allocation2 + $0x31] ss:$2 sm:$0xff]  ;;  %2174 = vst.msk [vmem:[#allocation2 + $0x40] sm:$0xff] %vm280_vm3, %v1431_v19  ;;  %v18845_v24 = vpop.f32.mrb[10].mxu0  ;;  %19026 = vmatprep.subr.bf16.mxu0 %v20814_v14 }
  0xfd   : > { %v2488_v26 = vmax.f32 %v2364_v22, %v2428_v23  ;;  %v2362_v27 = vld [vmem:[#allocation2 + $0x20] ss:$2 sm:$0xff]  ;;  %v2426_v28 = vld [vmem:[#allocation2 + $0x21] ss:$2 sm:$0xff]  ;;  %2177 = vst.msk [vmem:[#allocation2 + $0x58] sm:$0xff] %vm280_vm3, %v18845_v24  ;;  %v1434_v29 = vpop.f32.mrb[11].mxu0  ;;  %19027 = vmatpush3.bf16.msra.mxu0 %v20814_v14 }
  0xfe   : > { %v2487_v30 = vmax.f32 %v2362_v27, %v2426_v28  ;;  %2175 = vst.msk [vmem:[#allocation2 + $0x48] sm:$0xff] %vm280_vm3, %v1434_v29 }
  0xff   : > { %18951 = vmatmul.mubr.msk.bf16.gmra.mrb[116].mxu0 %vm1069_vm2, %v20777_v20  ;;  %v2521_v35 = vsel %vm280_vm3, %v2488_v26, -inf }
 0x100   : > { %18954 = vmatprep.mubr.msk.bf16.mxu0 %vm1069_vm2, %v20778_v25  ;;  %v2518_v37 = vsel %vm280_vm3, %v2487_v30, -inf  ;;  %v2522_v38 = vmax.f32 %v2520_v33, %v2521_v35  ;;  %v20815_v30 = vld [vmem:[%s24760_s3 + $0x18] sm:$0xff]  }
 0x101   : > { %v2519_v40 = vmax.f32 %v2517_v36, %v2518_v37  ;;  %19028 = vmatprep.subr.bf16.mxu0 %v20815_v30 }
 0x102   : > { %v18848_v41 = vpop.f32.mrb[12].mxu0  ;;  %v2573_v43 = vadd.f32 %v21231_v34, %v2522_v38  ;;  %19029 = vmatpush3.bf16.msra.mxu0 %v20815_v30 }
 0x103   : > { %2180 = vst.msk [vmem:[#allocation2 + $0x70] sm:$0xff] %vm280_vm3, %v18848_v41  ;;  %v1447_v44 = vpop.f32.mrb[13].mxu0  ;;  %v2572_v46 = vadd.f32 %v21231_v34, %v2519_v40  ;;  %v20783_v41 = vld [vmem:[%s20943_s10 + $0x208] sm:$0xff]  }
 0x104   : > { %2178 = vst.msk [vmem:[#allocation2 + $0x60] sm:$0xff] %vm280_vm3, %v1447_v44  ;;  %v18849_v47 = vpop.f32.mrb[14].mxu0  ;;  %v2589_v49 = vmax.f32 %v2573_v43, 0.0  ;;  %v2368_v56 = vld [vmem:[#allocation2 + $0x50] ss:$2 sm:$0xff] }
 0x105   : > { %2181 = vst.msk [vmem:[#allocation2 + $0x78] sm:$0xff] %vm280_vm3, %v18849_v47  ;;  %v1450_v50 = vpop.f32.mrb[15].mxu0  ;;  %v2588_v51 = vmax.f32 %v2572_v46, 0.0  ;;  %v2432_v57 = vld [vmem:[#allocation2 + $0x51] ss:$2 sm:$0xff] }
 0x106   : > { %2179 = vst.msk [vmem:[#allocation2 + $0x68] sm:$0xff] %vm280_vm3, %v1450_v50  ;;  %v2659_v52 = vcombine.high %v2589_v49, %v2589_v49  ;;  %v2666_v53 = vrot.slane %v2589_v49, %v21238_v42  ;;  %v2366_v1 = vld [vmem:[#allocation2 + $0x40] ss:$2 sm:$0xff]  ;;  %v2430_v2 = vld [vmem:[#allocation2 + $0x41] ss:$2 sm:$0xff]  ;;  %v2490_v3 = vmax.f32 %v2368_v56, %v2432_v57  ;;  %v20784_v44 = vld [vmem:[%s20943_s10 + $0x210] sm:$0xff]  }
 0x107   : > { %18955 = vmatmul.mubr.msk.bf16.gmra.mrb[120].mxu0 %vm1069_vm2, %v20779_v45  ;;  %v2642_v54 = vcombine.high %v2588_v51, %v2588_v51  ;;  %v2649_v55 = vrot.slane %v2588_v51, %v21238_v42  ;;  %v2489_v18 = vmax.f32 %v2366_v1, %v2430_v2  ;;  %v20785_v1 = vld [vmem:[%s20943_s10 + $0x218] sm:$0xff]  }
 0x108   : > { %18958 = vmatprep.mubr.msk.bf16.mxu0 %vm1069_vm2, %v20780_v48  ;;  %v2673_v58 = vrot.slane %v2659_v52, %v21238_v42  ;;  %v2674_v59 = vcombine.high %v2666_v53, %v2666_v53  ;;  %v2526_v23 = vsel %vm280_vm3, %v2490_v3, -inf  ;;  %v21288_v48 = vrot.slane %v24767_v39, %v21238_v42 }
 0x109   : > { %v2656_v60 = vrot.slane %v2642_v54, %v21238_v42  ;;  %v2657_v61 = vcombine.high %v2649_v55, %v2649_v55  ;;  %v2523_v33 = vsel %vm280_vm3, %v2489_v18, -inf }
 0x10a   : > { %v18852_v62 = vpop.f32.mrb[16].mxu0  ;;  %v2675_v63 = vcombine.high %v2673_v58, %v2673_v58  ;;  %v2938_v0 = vcombine.low %v2666_v53, %v2674_v59  ;;  %24774 = vst [vmem:[#allocation8_spill] sm:$0xff] %v21288_v48 }
 0x10b   : > { %2184 = vst.msk [vmem:[#allocation2 + $0x90] sm:$0xff] %vm280_vm3, %v18852_v62  ;;  %v1463_v4 = vpop.f32.mrb[17].mxu0  ;;  %v2658_v6 = vcombine.high %v2656_v60, %v2656_v60  ;;  %v2921_v7 = vcombine.low %v2649_v55, %v2657_v61 }
 0x10c   : > { %2182 = vst.msk [vmem:[#allocation2 + $0x80] sm:$0xff] %vm280_vm3, %v1463_v4  ;;  %v18853_v8 = vpop.f32.mrb[18].mxu0  ;;  %v2939_v10 = vcombine.low %v2673_v58, %v2675_v63  ;;  %v2372_v11 = vld [vmem:[#allocation2 + $0x70] ss:$2 sm:$0xff]  ;;  %v2436_v12 = vld [vmem:[#allocation2 + $0x71] ss:$2 sm:$0xff]  ;;  %v2946_v20 = vrot.slane %v2938_v0, %v21238_v42 }
 0x10d   : > { %2185 = vst.msk [vmem:[#allocation2 + $0x98] sm:$0xff] %vm280_vm3, %v18853_v8  ;;  %v1466_v13 = vpop.f32.mrb[19].mxu0  ;;  %v2922_v15 = vcombine.low %v2656_v60, %v2658_v6  ;;  %v2370_v16 = vld [vmem:[#allocation2 + $0x60] ss:$2 sm:$0xff]  ;;  %v2492_v19 = vmax.f32 %v2372_v11, %v2436_v12  ;;  %v2434_v22 = vld [vmem:[#allocation2 + $0x61] ss:$2 sm:$0xff]  ;;  %v2929_v24 = vrot.slane %v2921_v7, %v21238_v42 }
 0x10e   : > { %2183 = vst.msk [vmem:[#allocation2 + $0x88] sm:$0xff] %vm280_vm3, %v1466_v13  ;;  %v2953_v21 = vrot.slane %v2939_v10, %v21238_v42  ;;  %v2491_v26 = vmax.f32 %v2370_v16, %v2434_v22  ;;  %v20786_v8 = vld [vmem:[%s20943_s10 + $0x220] sm:$0xff]  }
 0x10f   : > { %18959 = vmatmul.mubr.msk.bf16.gmra.mrb[124].mxu0 %vm1069_vm2, %v20781_v5  ;;  %v2936_v25 = vrot.slane %v2922_v15, %v21238_v42  ;;  %v2527_v27 = vsel %vm280_vm3, %v2492_v19, -inf }
 0x110   : > { %18962 = vmatprep.mubr.msk.bf16.mxu0 %vm1069_vm2, %v20782_v9  ;;  %v2954_v28 = vcombine.low %v2946_v20, %v2953_v21  ;;  %v2528_v29 = vmax.f32 %v2526_v23, %v2527_v27  ;;  %v2524_v35 = vsel %vm280_vm3, %v2491_v26, -inf }
 0x111   : > { %v2937_v31 = vcombine.low %v2929_v24, %v2936_v25  ;;  %v2525_v37 = vmax.f32 %v2523_v33, %v2524_v35  ;;  %v20787_v35 = vld [vmem:[%s20943_s10 + $0x228] sm:$0xff]  }
 0x112   : > { %v18856_v36 = vpop.f32.mrb[20].mxu0  ;;  %3246 = vst.msk [vmem:[#allocation5 + $0x1b] sm:$0xff] %vm280_vm3, %v2954_v28  ;;  %v2575_v38 = vadd.f32 %v21231_v34, %v2528_v29 }
 0x113   : > { %2188 = vst.msk [vmem:[#allocation2 + $0xb0] sm:$0xff] %vm280_vm3, %v18856_v36  ;;  %v1479_v40 = vpop.f32.mrb[21].mxu0  ;;  %3245 = vst.msk [vmem:[#allocation5 + $0x13] sm:$0xff] %vm280_vm3, %v2937_v31  ;;  %v2574_v45 = vadd.f32 %v21231_v34, %v2525_v37 }
 0x114   : > { %2186 = vst.msk [vmem:[#allocation2 + $0xa0] sm:$0xff] %vm280_vm3, %v1479_v40  ;;  %v18857_v43 = vpop.f32.mrb[22].mxu0  ;;  %v2591_v46 = vmax.f32 %v2575_v38, 0.0  ;;  %v2376_v52 = vld [vmem:[#allocation2 + $0x90] ss:$2 sm:$0xff] }
 0x115   : > { %2189 = vst.msk [vmem:[#allocation2 + $0xb8] sm:$0xff] %vm280_vm3, %v18857_v43  ;;  %v1482_v47 = vpop.f32.mrb[23].mxu0  ;;  %v2590_v49 = vmax.f32 %v2574_v45, 0.0  ;;  %v2440_v53 = vld [vmem:[#allocation2 + $0x91] ss:$2 sm:$0xff] }
 0x116   : > { %2187 = vst.msk [vmem:[#allocation2 + $0xa8] sm:$0xff] %vm280_vm3, %v1482_v47  ;;  %v2700_v50 = vcombine.high %v2591_v46, %v2591_v46  ;;  %v2707_v51 = vrot.slane %v2591_v46, %v21238_v42  ;;  %v2374_v58 = vld [vmem:[#allocation2 + $0x80] ss:$2 sm:$0xff]  ;;  %v2438_v59 = vld [vmem:[#allocation2 + $0x81] ss:$2 sm:$0xff]  ;;  %v2494_v2 = vmax.f32 %v2376_v52, %v2440_v53  ;;  %v20788_v40 = vld [vmem:[%s20943_s10 + $0x230] sm:$0xff]  }
 0x117   : > { %18963 = vmatmul.mubr.msk.bf16.gmra.mrb[128].mxu0 %vm1069_vm2, %v20783_v41  ;;  %v2683_v54 = vcombine.high %v2590_v49, %v2590_v49  ;;  %v2690_v55 = vrot.slane %v2590_v49, %v21238_v42  ;;  %v2493_v4 = vmax.f32 %v2374_v58, %v2438_v59 }
 0x118   : > { %18966 = vmatprep.mubr.msk.bf16.mxu0 %vm1069_vm2, %v20784_v44  ;;  %v21295_v56 = vrot.slane %v2700_v50, %v21238_v42  ;;  %v2715_v57 = vcombine.high %v2707_v51, %v2707_v51  ;;  %v2532_v20 = vsel %vm280_vm3, %v2494_v2, -inf }
 0x119   : > { %v2697_v61 = vrot.slane %v2683_v54, %v21238_v42  ;;  %v2698_v62 = vcombine.high %v2690_v55, %v2690_v55  ;;  %v2955_v63 = vcombine.low %v21288_v48, %v2690_v55  ;;  %v2529_v23 = vsel %vm280_vm3, %v2493_v4, -inf  ;;  %v7289_v39 = vld [vmem:[#allocation5 + $0x1b] sm:$0xff] }
 0x11a   : > { %v18860_v60 = vpop.f32.mrb[24].mxu0  ;;  %v2973_v3 = vcombine.low %v2715_v57, %v21295_v56  ;;  %v2716_v44 = vcombine.high %v21295_v56, %v21295_v56  ;;  %v7288_v17 = vld [vmem:[#allocation5 + $0x13] sm:$0xff] }
 0x11b   : > { %2192 = vst.msk [vmem:[#allocation2 + $0xd0] sm:$0xff] %vm280_vm3, %v18860_v60  ;;  %v1495_v0 = vpop.f32.mrb[25].mxu0  ;;  %v2699_v9 = vcombine.high %v2697_v61, %v2697_v61  ;;  %v2956_v10 = vcombine.low %v2698_v62, %v2697_v61  ;;  %v2963_v15 = vrot.slane %v2955_v63, %v21238_v42  ;;  %v20789_v61 = vld [vmem:[%s20943_s10 + $0x238] sm:$0xff]  }
 0x11c   : > { %2190 = vst.msk [vmem:[#allocation2 + $0xc0] sm:$0xff] %vm280_vm3, %v1495_v0  ;;  %v18861_v5 = vpop.f32.mrb[26].mxu0  ;;  %v2380_v6 = vld [vmem:[#allocation2 + $0xb0] ss:$2 sm:$0xff]  ;;  %v2444_v7 = vld [vmem:[#allocation2 + $0xb1] ss:$2 sm:$0xff]  ;;  %v2987_v22 = vrot.slane %v2973_v3, %v21238_v42  ;;  %v2989_v56 = vcombine.low %v2716_v44, %v21288_v48 }
 0x11d   : > { %2193 = vst.msk [vmem:[#allocation2 + $0xd8] sm:$0xff] %vm280_vm3, %v18861_v5  ;;  %v1498_v11 = vpop.f32.mrb[27].mxu0  ;;  %v2496_v12 = vmax.f32 %v2380_v6, %v2444_v7  ;;  %v2378_v13 = vld [vmem:[#allocation2 + $0xa0] ss:$2 sm:$0xff]  ;;  %v2442_v14 = vld [vmem:[#allocation2 + $0xa1] ss:$2 sm:$0xff]  ;;  %v2970_v16 = vrot.slane %v2956_v10, %v21238_v42  ;;  %v2972_v18 = vcombine.low %v2699_v9, %v2707_v51 }
 0x11e   : > { %2191 = vst.msk [vmem:[#allocation2 + $0xc8] sm:$0xff] %vm280_vm3, %v1498_v11  ;;  %v2495_v19 = vmax.f32 %v2378_v13, %v2442_v14  ;;  %v20790_v5 = vld [vmem:[%s20943_s10 + $0x240] sm:$0xff]   ;;  %v2997_v10 = vrot.slane %v2989_v56, %v21238_v42 }
 0x11f   : > { %18967 = vmatmul.mubr.msk.bf16.gmra.mrb[132].mxu0 %vm1069_vm2, %v20785_v1  ;;  %v2533_v21 = vsel %vm280_vm3, %v2496_v12, -inf  ;;  %v2971_v25 = vcombine.low %v2963_v15, %v2970_v16  ;;  %v2980_v26 = vrot.slane %v2972_v18, %v21238_v42 }
 0x120   : > { %v2534_v24 = vmax.f32 %v2532_v20, %v2533_v21  ;;  %18970 = vmatprep.mubr.msk.bf16.mxu0 %vm1069_vm2, %v20786_v8  ;;  %v2530_v27 = vsel %vm280_vm3, %v2495_v19, -inf }
 0x121   : > { %v2531_v28 = vmax.f32 %v2529_v23, %v2530_v27  ;;  %v2988_v31 = vcombine.low %v2980_v26, %v2987_v22  ;;  %3247 = vst.msk [vmem:[#allocation5 + $0x23] sm:$0xff] %vm280_vm3, %v2971_v25 }
 0x122   : > { %v18864_v29 = vpop.f32.mrb[28].mxu0  ;;  %v2577_v30 = vadd.f32 %v21231_v34, %v2534_v24 }
 0x123   : > { %2196 = vst.msk [vmem:[#allocation2 + $0xf0] sm:$0xff] %vm280_vm3, %v18864_v29  ;;  %v1511_v33 = vpop.f32.mrb[29].mxu0  ;;  %v2576_v36 = vadd.f32 %v21231_v34, %v2531_v28  ;;  %3248 = vst.msk [vmem:[#allocation5 + $0x2b] sm:$0xff] %vm280_vm3, %v2988_v31  ;;  %v20791_v31 = vld [vmem:[%s20943_s10 + $0x248] sm:$0xff]  }
 0x124   : > { %2194 = vst.msk [vmem:[#allocation2 + $0xe0] sm:$0xff] %vm280_vm3, %v1511_v33  ;;  %v18865_v37 = vpop.f32.mrb[30].mxu0  ;;  %v2593_v38 = vmax.f32 %v2577_v30, 0.0  ;;  %v2384_v46 = vld [vmem:[#allocation2 + $0xd0] ss:$2 sm:$0xff] }
 0x125   : > { %2197 = vst.msk [vmem:[#allocation2 + $0xf8] sm:$0xff] %vm280_vm3, %v18865_v37  ;;  %v1514_v41 = vpop.f32.mrb[31].mxu0  ;;  %v2592_v43 = vmax.f32 %v2576_v36, 0.0  ;;  %v2448_v47 = vld [vmem:[#allocation2 + $0xd1] ss:$2 sm:$0xff] }
 0x126   : > { %2195 = vst.msk [vmem:[#allocation2 + $0xe8] sm:$0xff] %vm280_vm3, %v1514_v41  ;;  %v2741_v45 = vrot.slane %v2593_v38, %v21238_v42  ;;  %v2382_v52 = vld [vmem:[#allocation2 + $0xc0] ss:$2 sm:$0xff]  ;;  %v2446_v53 = vld [vmem:[#allocation2 + $0xc1] ss:$2 sm:$0xff]  ;;  %v2498_v57 = vmax.f32 %v2384_v46, %v2448_v47  ;;  %v2734_v58 = vcombine.high %v2593_v38, %v2593_v38  ;;  %v20792_v36 = vld [vmem:[%s20943_s10 + $0x250] sm:$0xff]  }
 0x127   : > { %18971 = vmatmul.mubr.msk.bf16.gmra.mrb[136].mxu0 %vm1069_vm2, %v20787_v35  ;;  %v2717_v49 = vcombine.high %v2592_v43, %v2592_v43  ;;  %v2724_v50 = vrot.slane %v2592_v43, %v21238_v42  ;;  %v2497_v3 = vmax.f32 %v2382_v52, %v2446_v53 }
 0x128   : > { %18974 = vmatprep.mubr.msk.bf16.mxu0 %vm1069_vm2, %v20788_v40  ;;  %v2749_v51 = vcombine.high %v2741_v45, %v2741_v45  ;;  %v2538_v13 = vsel %vm280_vm3, %v2498_v57, -inf  ;;  %v2748_v15 = vrot.slane %v2734_v58, %v21238_v42 }
 0x129   : > { %v2731_v54 = vrot.slane %v2717_v49, %v21238_v42  ;;  %v2732_v55 = vcombine.high %v2724_v50, %v2724_v50  ;;  %v2535_v22 = vsel %vm280_vm3, %v2497_v3, -inf }
 0x12a   : > { %v18868_v59 = vpop.f32.mrb[32].mxu0  ;;  %v3007_v0 = vcombine.low %v2741_v45, %v2749_v51  ;;  %v2750_v27 = vcombine.high %v2748_v15, %v2748_v15 }
 0x12b   : > { %2200 = vst.msk [vmem:[#allocation2 + $0x110] sm:$0xff] %vm280_vm3, %v18868_v59  ;;  %v1527_v60 = vpop.f32.mrb[33].mxu0  ;;  %v2733_v62 = vcombine.high %v2731_v54, %v2731_v54  ;;  %v2990_v63 = vcombine.low %v2724_v50, %v2732_v55 }
 0x12c   : > { %v2388_v1 = vld [vmem:[#allocation2 + $0xf0] ss:$2 sm:$0xff]  ;;  %v2452_v2 = vld [vmem:[#allocation2 + $0xf1] ss:$2 sm:$0xff]  ;;  %2198 = vst.msk [vmem:[#allocation2 + $0x100] sm:$0xff] %vm280_vm3, %v1527_v60  ;;  %v18869_v4 = vpop.f32.mrb[34].mxu0  ;;  %v3021_v20 = vrot.slane %v3007_v0, %v21238_v42  ;;  %v3023_v43 = vcombine.low %v2748_v15, %v2750_v27 }
 0x12d   : > { %v2500_v6 = vmax.f32 %v2388_v1, %v2452_v2  ;;  %v2386_v7 = vld [vmem:[#allocation2 + $0xe0] ss:$2 sm:$0xff]  ;;  %v2450_v8 = vld [vmem:[#allocation2 + $0xe1] ss:$2 sm:$0xff]  ;;  %2201 = vst.msk [vmem:[#allocation2 + $0x118] sm:$0xff] %vm280_vm3, %v18869_v4  ;;  %v1530_v9 = vpop.f32.mrb[35].mxu0  ;;  %v3004_v11 = vrot.slane %v2990_v63, %v21238_v42  ;;  %v3006_v12 = vcombine.low %v2731_v54, %v2733_v62 }
 0x12e   : > { %v2499_v14 = vmax.f32 %v2386_v7, %v2450_v8  ;;  %2199 = vst.msk [vmem:[#allocation2 + $0x108] sm:$0xff] %vm280_vm3, %v1530_v9  ;;  %v3031_v58 = vrot.slane %v3023_v43, %v21238_v42  ;;  %v20793_v1 = vld [vmem:[%s20943_s10 + $0x258] sm:$0xff]   ;;  %v20794_v7 = vld [vmem:[%s20943_s10 + $0x260] sm:$0xff]  }
 0x12f   : > { %v2539_v16 = vsel %vm280_vm3, %v2500_v6, -inf  ;;  %18975 = vmatmul.mubr.msk.bf16.gmra.mrb[140].mxu0 %vm1069_vm2, %v20789_v61  ;;  %v3005_v18 = vcombine.low %v2997_v10, %v3004_v11  ;;  %v3014_v19 = vrot.slane %v3006_v12, %v21238_v42 }
 0x130   : > { %v2540_v21 = vmax.f32 %v2538_v13, %v2539_v16  ;;  %v2536_v23 = vsel %vm280_vm3, %v2499_v14, -inf  ;;  %18978 = vmatprep.mubr.msk.bf16.mxu0 %vm1069_vm2, %v20790_v5 }
 0x131   : > { %v2537_v24 = vmax.f32 %v2535_v22, %v2536_v23  ;;  %v3022_v25 = vcombine.low %v3014_v19, %v3021_v20  ;;  %3249 = vst.msk [vmem:[#allocation5 + $0x33] sm:$0xff] %vm280_vm3, %v3005_v18 }
 0x132   : > { %v2579_v26 = vadd.f32 %v21231_v34, %v2540_v21  ;;  %v18872_v28 = vpop.f32.mrb[36].mxu0 }
 0x133   : > { %v2578_v29 = vadd.f32 %v21231_v34, %v2537_v24  ;;  %2204 = vst.msk [vmem:[#allocation2 + $0x130] sm:$0xff] %vm280_vm3, %v18872_v28  ;;  %v1543_v30 = vpop.f32.mrb[37].mxu0  ;;  %3250 = vst.msk [vmem:[#allocation5 + $0x3b] sm:$0xff] %vm280_vm3, %v3022_v25 }
 0x134   : > { %v2595_v33 = vmax.f32 %v2579_v26, 0.0  ;;  %2202 = vst.msk [vmem:[#allocation2 + $0x120] sm:$0xff] %vm280_vm3, %v1543_v30  ;;  %v18873_v35 = vpop.f32.mrb[38].mxu0  ;;  %v2392_v49 = vld [vmem:[#allocation2 + $0x110] ss:$2 sm:$0xff] }
 0x135   : > { %v2594_v37 = vmax.f32 %v2578_v29, 0.0  ;;  %2205 = vst.msk [vmem:[#allocation2 + $0x138] sm:$0xff] %vm280_vm3, %v18873_v35  ;;  %v1546_v38 = vpop.f32.mrb[39].mxu0  ;;  %v2456_v50 = vld [vmem:[#allocation2 + $0x111] ss:$2 sm:$0xff] }
 0x136   : > { %v2768_v40 = vcombine.high %v2595_v33, %v2595_v33  ;;  %v2775_v41 = vrot.slane %v2595_v33, %v21238_v42  ;;  %2203 = vst.msk [vmem:[#allocation2 + $0x128] sm:$0xff] %vm280_vm3, %v1546_v38  ;;  %v2390_v54 = vld [vmem:[#allocation2 + $0x100] ss:$2 sm:$0xff]  ;;  %v2454_v55 = vld [vmem:[#allocation2 + $0x101] ss:$2 sm:$0xff]  ;;  %v2502_v63 = vmax.f32 %v2392_v49, %v2456_v50 }
 0x137   : > { %v2751_v44 = vcombine.high %v2594_v37, %v2594_v37  ;;  %v2758_v45 = vrot.slane %v2594_v37, %v21238_v42  ;;  %18979 = vmatmul.mubr.msk.bf16.gmra.mrb[144].mxu0 %vm1069_vm2, %v20791_v31  ;;  %v2501_v3 = vmax.f32 %v2390_v54, %v2454_v55  ;;  %v20795_v33 = vld [vmem:[%s20943_s10 + $0x268] sm:$0xff]   ;;  %v20796_v37 = vld [vmem:[%s20943_s10 + $0x270] sm:$0xff]  }
 0x138   : > { %v2782_v46 = vrot.slane %v2768_v40, %v21238_v42  ;;  %v2783_v47 = vcombine.high %v2775_v41, %v2775_v41  ;;  %18982 = vmatprep.mubr.msk.bf16.mxu0 %vm1069_vm2, %v20792_v36  ;;  %v2544_v20 = vsel %vm280_vm3, %v2502_v63, -inf }
 0x139   : > { %v2765_v51 = vrot.slane %v2751_v44, %v21238_v42  ;;  %v2766_v52 = vcombine.high %v2758_v45, %v2758_v45  ;;  %v3024_v53 = vcombine.low %v21288_v48, %v2758_v45  ;;  %v2541_v22 = vsel %vm280_vm3, %v2501_v3, -inf }
 0x13a   : > { %v2784_v56 = vcombine.high %v2782_v46, %v2782_v46  ;;  %v3057_v57 = vcombine.low %v2783_v47, %v2782_v46  ;;  %v18876_v59 = vpop.f32.mrb[40].mxu0 }
 0x13b   : > { %v2767_v60 = vcombine.high %v2765_v51, %v2765_v51  ;;  %v3038_v61 = vrot.slane %v3024_v53, %v21238_v42  ;;  %v3040_v62 = vcombine.low %v2766_v52, %v2765_v51  ;;  %2208 = vst.msk [vmem:[#allocation2 + $0x150] sm:$0xff] %vm280_vm3, %v18876_v59  ;;  %v1559_v0 = vpop.f32.mrb[41].mxu0 }
 0x13c   : > { %v3058_v2 = vcombine.low %v2784_v56, %v21288_v48  ;;  %v2396_v4 = vld [vmem:[#allocation2 + $0x130] ss:$2 sm:$0xff]  ;;  %v2460_v5 = vld [vmem:[#allocation2 + $0x131] ss:$2 sm:$0xff]  ;;  %2206 = vst.msk [vmem:[#allocation2 + $0x140] sm:$0xff] %vm280_vm3, %v1559_v0  ;;  %v18877_v6 = vpop.f32.mrb[42].mxu0  ;;  %v3065_v14 = vrot.slane %v3057_v57, %v21238_v42 }
 0x13d   : > { %v3039_v8 = vcombine.low %v3031_v58, %v3038_v61  ;;  %v3041_v9 = vcombine.low %v2767_v60, %v2775_v41  ;;  %v2504_v10 = vmax.f32 %v2396_v4, %v2460_v5  ;;  %v2394_v11 = vld [vmem:[#allocation2 + $0x120] ss:$2 sm:$0xff]  ;;  %v2458_v12 = vld [vmem:[#allocation2 + $0x121] ss:$2 sm:$0xff]  ;;  %2209 = vst.msk [vmem:[#allocation2 + $0x158] sm:$0xff] %vm280_vm3, %v18877_v6  ;;  %v1562_v13 = vpop.f32.mrb[43].mxu0  ;;  %v3048_v18 = vrot.slane %v3040_v62, %v21238_v42 }
 0x13e   : > { %v3072_v15 = vrot.slane %v3058_v2, %v21238_v42  ;;  %v2503_v16 = vmax.f32 %v2394_v11, %v2458_v12  ;;  %2207 = vst.msk [vmem:[#allocation2 + $0x148] sm:$0xff] %vm280_vm3, %v1562_v13  ;;  %v20797_v62 = vld [vmem:[%s20943_s10 + $0x278] sm:$0xff]   ;;  %v20798_v4 = vld [vmem:[%s20943_s10 + $0x280] sm:$0xff]  }
 0x13f   : > { %v3055_v19 = vrot.slane %v3041_v9, %v21238_v42  ;;  %3251 = vst.msk [vmem:[#allocation5 + $0x43] sm:$0xff] %vm280_vm3, %v3039_v8  ;;  %v2545_v21 = vsel %vm280_vm3, %v2504_v10, -inf  ;;  %18983 = vmatmul.mubr.msk.bf16.gmra.mrb[148].mxu0 %vm1069_vm2, %v20793_v1 }
 0x140   : > { %v2546_v23 = vmax.f32 %v2544_v20, %v2545_v21  ;;  %v2542_v24 = vsel %vm280_vm3, %v2503_v16, -inf  ;;  %18986 = vmatprep.mubr.msk.bf16.mxu0 %vm1069_vm2, %v20794_v7  ;;  %v3073_v25 = vcombine.low %v3065_v14, %v3072_v15 }
 0x141   : > { %v2543_v26 = vmax.f32 %v2541_v22, %v2542_v24  ;;  %v3056_v27 = vcombine.low %v3048_v18, %v3055_v19 }
 0x142   : > { %v2581_v28 = vadd.f32 %v21231_v34, %v2546_v23  ;;  %v18880_v29 = vpop.f32.mrb[44].mxu0  ;;  %3253 = vst.msk [vmem:[#allocation5 + $0x53] sm:$0xff] %vm280_vm3, %v3073_v25 }
 0x143   : > { %v2580_v30 = vadd.f32 %v21231_v34, %v2543_v26  ;;  %2212 = vst.msk [vmem:[#allocation2 + $0x170] sm:$0xff] %vm280_vm3, %v18880_v29  ;;  %v1575_v31 = vpop.f32.mrb[45].mxu0  ;;  %3252 = vst.msk [vmem:[#allocation5 + $0x4b] sm:$0xff] %vm280_vm3, %v3056_v27 }
 0x144   : > { %v2597_v35 = vmax.f32 %v2581_v28, 0.0  ;;  %2210 = vst.msk [vmem:[#allocation2 + $0x160] sm:$0xff] %vm280_vm3, %v1575_v31  ;;  %v18881_v36 = vpop.f32.mrb[46].mxu0  ;;  %v2400_v49 = vld [vmem:[#allocation2 + $0x150] ss:$2 sm:$0xff]  ;;  %v20799_v28 = vld [vmem:[%s20943_s10 + $0x288] sm:$0xff]  }
 0x145   : > { %v2596_v38 = vmax.f32 %v2580_v30, 0.0  ;;  %2213 = vst.msk [vmem:[#allocation2 + $0x178] sm:$0xff] %vm280_vm3, %v18881_v36  ;;  %v1578_v40 = vpop.f32.mrb[47].mxu0  ;;  %v2464_v50 = vld [vmem:[#allocation2 + $0x151] ss:$2 sm:$0xff] }
 0x146   : > { %v2802_v41 = vcombine.high %v2597_v35, %v2597_v35  ;;  %v2809_v43 = vrot.slane %v2597_v35, %v21238_v42  ;;  %2211 = vst.msk [vmem:[#allocation2 + $0x168] sm:$0xff] %vm280_vm3, %v1578_v40  ;;  %v2398_v53 = vld [vmem:[#allocation2 + $0x140] ss:$2 sm:$0xff]  ;;  %v2462_v54 = vld [vmem:[#allocation2 + $0x141] ss:$2 sm:$0xff]  ;;  %v2506_v60 = vmax.f32 %v2400_v49, %v2464_v50  ;;  %v20800_v31 = vld [vmem:[%s20943_s10 + $0x290] sm:$0xff]  }
 0x147   : > { %v2785_v44 = vcombine.high %v2596_v38, %v2596_v38  ;;  %v2792_v45 = vrot.slane %v2596_v38, %v21238_v42  ;;  %18987 = vmatmul.mubr.msk.bf16.gmra.mrb[152].mxu0 %vm1069_vm2, %v20795_v33  ;;  %v2505_v0 = vmax.f32 %v2398_v53, %v2462_v54 }
 0x148   : > { %v2816_v46 = vrot.slane %v2802_v41, %v21238_v42  ;;  %v2817_v47 = vcombine.high %v2809_v43, %v2809_v43  ;;  %18990 = vmatprep.mubr.msk.bf16.mxu0 %vm1069_vm2, %v20796_v37  ;;  %v2550_v15 = vsel %vm280_vm3, %v2506_v60, -inf }
 0x149   : > { %v2799_v51 = vrot.slane %v2785_v44, %v21238_v42  ;;  %v2800_v52 = vcombine.high %v2792_v45, %v2792_v45  ;;  %v2547_v19 = vsel %vm280_vm3, %v2505_v0, -inf }
 0x14a   : > { %v2818_v55 = vcombine.high %v2816_v46, %v2816_v46  ;;  %v3091_v56 = vcombine.low %v2809_v43, %v2817_v47  ;;  %v18884_v57 = vpop.f32.mrb[48].mxu0 }
 0x14b   : > { %v2801_v58 = vcombine.high %v2799_v51, %v2799_v51  ;;  %v3074_v59 = vcombine.low %v2792_v45, %v2800_v52  ;;  %2216 = vst.msk [vmem:[#allocation2 + $0x190] sm:$0xff] %vm280_vm3, %v18884_v57  ;;  %v1591_v61 = vpop.f32.mrb[49].mxu0 }
 0x14c   : > { %v3092_v63 = vcombine.low %v2816_v46, %v2818_v55  ;;  %v2404_v1 = vld [vmem:[#allocation2 + $0x170] ss:$2 sm:$0xff]  ;;  %v2468_v2 = vld [vmem:[#allocation2 + $0x171] ss:$2 sm:$0xff]  ;;  %2214 = vst.msk [vmem:[#allocation2 + $0x180] sm:$0xff] %vm280_vm3, %v1591_v61  ;;  %v18885_v3 = vpop.f32.mrb[50].mxu0  ;;  %v3099_v10 = vrot.slane %v3091_v56, %v21238_v42 }
 0x14d   : > { %v3075_v5 = vcombine.low %v2799_v51, %v2801_v58  ;;  %v2508_v6 = vmax.f32 %v2404_v1, %v2468_v2  ;;  %v2402_v7 = vld [vmem:[#allocation2 + $0x160] ss:$2 sm:$0xff]  ;;  %v2466_v8 = vld [vmem:[#allocation2 + $0x161] ss:$2 sm:$0xff]  ;;  %2217 = vst.msk [vmem:[#allocation2 + $0x198] sm:$0xff] %vm280_vm3, %v18885_v3  ;;  %v1594_v9 = vpop.f32.mrb[51].mxu0  ;;  %v3082_v13 = vrot.slane %v3074_v59, %v21238_v42 }
 0x14e   : > { %v3106_v11 = vrot.slane %v3092_v63, %v21238_v42  ;;  %v2507_v12 = vmax.f32 %v2402_v7, %v2466_v8  ;;  %2215 = vst.msk [vmem:[#allocation2 + $0x188] sm:$0xff] %vm280_vm3, %v1594_v9  ;;  %v20801_v58 = vld [vmem:[%s20943_s10 + $0x298] sm:$0xff]   ;;  %v20802_v63 = vld [vmem:[%s20943_s10 + $0x2a0] sm:$0xff]  }
 0x14f   : > { %v3089_v14 = vrot.slane %v3075_v5, %v21238_v42  ;;  %v2551_v16 = vsel %vm280_vm3, %v2508_v6, -inf  ;;  %18991 = vmatmul.mubr.msk.bf16.gmra.mrb[156].mxu0 %vm1069_vm2, %v20797_v62 }
 0x150   : > { %v3107_v18 = vcombine.low %v3099_v10, %v3106_v11  ;;  %v2552_v20 = vmax.f32 %v2550_v15, %v2551_v16  ;;  %v2548_v21 = vsel %vm280_vm3, %v2507_v12, -inf  ;;  %18994 = vmatprep.mubr.msk.bf16.mxu0 %vm1069_vm2, %v20798_v4 }
 0x151   : > { %v3090_v22 = vcombine.low %v3082_v13, %v3089_v14  ;;  %v2549_v23 = vmax.f32 %v2547_v19, %v2548_v21 }
 0x152   : > { %3255 = vst.msk [vmem:[#allocation5 + $0x63] sm:$0xff] %vm280_vm3, %v3107_v18  ;;  %v2583_v24 = vadd.f32 %v21231_v34, %v2552_v20  ;;  %v18888_v25 = vpop.f32.mrb[52].mxu0 }
 0x153   : > { %3254 = vst.msk [vmem:[#allocation5 + $0x5b] sm:$0xff] %vm280_vm3, %v3090_v22  ;;  %v2582_v26 = vadd.f32 %v21231_v34, %v2549_v23  ;;  %2220 = vst.msk [vmem:[#allocation2 + $0x1b0] sm:$0xff] %vm280_vm3, %v18888_v25  ;;  %v1607_v27 = vpop.f32.mrb[53].mxu0  ;;  %v20803_v23 = vld [vmem:[%s20943_s10 + $0x2a8] sm:$0xff]  }
 0x154   : > { %v2599_v29 = vmax.f32 %v2583_v24, 0.0  ;;  %2218 = vst.msk [vmem:[#allocation2 + $0x1a0] sm:$0xff] %vm280_vm3, %v1607_v27  ;;  %v18889_v30 = vpop.f32.mrb[54].mxu0  ;;  %v2408_v41 = vld [vmem:[#allocation2 + $0x190] ss:$2 sm:$0xff]  ;;  %v21465_v24 = vld [vmem:[%s24760_s3] sm:$0xff]  }
 0x155   : > { %v2598_v33 = vmax.f32 %v2582_v26, 0.0  ;;  %2221 = vst.msk [vmem:[#allocation2 + $0x1b8] sm:$0xff] %vm280_vm3, %v18889_v30  ;;  %v1610_v35 = vpop.f32.mrb[55].mxu0  ;;  %v2472_v43 = vld [vmem:[#allocation2 + $0x191] ss:$2 sm:$0xff]  ;;  %19962 = vmatprep.subr.bf16.mxu1 %v21465_v24  ;;  %19098 = vmatprep.subr.bf16.mxu0 %v21465_v24 }
 0x156   : > { %v2836_v36 = vcombine.high %v2599_v29, %v2599_v29  ;;  %v2843_v37 = vrot.slane %v2599_v29, %v21238_v42  ;;  %2219 = vst.msk [vmem:[#allocation2 + $0x1a8] sm:$0xff] %vm280_vm3, %v1610_v35  ;;  %v2406_v50 = vld [vmem:[#allocation2 + $0x180] ss:$2 sm:$0xff]  ;;  %v2470_v51 = vld [vmem:[#allocation2 + $0x181] ss:$2 sm:$0xff]  ;;  %v2510_v52 = vmax.f32 %v2408_v41, %v2472_v43  ;;  %v20804_v27 = vld [vmem:[%s20943_s10 + $0x2b0] sm:$0xff]   ;;  %19964 = vmatpush3.bf16.msra.mxu1 %v21465_v24 }
 0x157   : > { %v2819_v38 = vcombine.high %v2598_v33, %v2598_v33  ;;  %v2826_v40 = vrot.slane %v2598_v33, %v21238_v42  ;;  %18995 = vmatmul.mubr.msk.bf16.gmra.mrb[160].mxu0 %vm1069_vm2, %v20799_v28  ;;  %v2509_v59 = vmax.f32 %v2406_v50, %v2470_v51 }
 0x158   : > { %v21434_v44 = vrot.slane %v2836_v36, %v21238_v42  ;;  %v2851_v45 = vcombine.high %v2843_v37, %v2843_v37  ;;  %18998 = vmatprep.mubr.msk.bf16.mxu0 %vm1069_vm2, %v20800_v31  ;;  %v2556_v7 = vsel %vm280_vm3, %v2510_v52, -inf }
 0x159   : > { %v2833_v46 = vrot.slane %v2819_v38, %v21238_v42  ;;  %v2834_v47 = vcombine.high %v2826_v40, %v2826_v40  ;;  %v3108_v49 = vcombine.low %v21288_v48, %v2826_v40  ;;  %v2553_v13 = vsel %vm280_vm3, %v2509_v59, -inf  ;;  %v21482_v38 = vld [vmem:[%s24760_s3 + $0x8] sm:$0xff]  }
 0x15a   : > { %v18892_v53 = vpop.f32.mrb[56].mxu0  ;;  %v3126_v54 = vcombine.low %v2851_v45, %v21434_v44  ;;  %v2852_v28 = vcombine.high %v21434_v44, %v21434_v44  ;;  %19963 = vmatprep.subr.bf16.mxu1 %v21482_v38 }
 0x15b   : > { %v2835_v55 = vcombine.high %v2833_v46, %v2833_v46  ;;  %v3109_v56 = vcombine.low %v2834_v47, %v2833_v46  ;;  %2224 = vst.msk [vmem:[#allocation2 + $0x1d0] sm:$0xff] %vm280_vm3, %v18892_v53  ;;  %v1623_v57 = vpop.f32.mrb[57].mxu0  ;;  %v3116_v0 = vrot.slane %v3108_v49, %v21238_v42  ;;  %19965 = vmatpush3.bf16.msra.mxu1 %v21482_v38 }
 0x15c   : > { %v2412_v60 = vld [vmem:[#allocation2 + $0x1b0] ss:$2 sm:$0xff]  ;;  %v2476_v61 = vld [vmem:[#allocation2 + $0x1b1] ss:$2 sm:$0xff]  ;;  %2222 = vst.msk [vmem:[#allocation2 + $0x1c0] sm:$0xff] %vm280_vm3, %v1623_v57  ;;  %v18893_v62 = vpop.f32.mrb[58].mxu0  ;;  %v3140_v9 = vrot.slane %v3126_v54, %v21238_v42  ;;  %v3142_v41 = vcombine.low %v2852_v28, %v21288_v48 }
 0x15d   : > { %v3123_v1 = vrot.slane %v3109_v56, %v21238_v42  ;;  %v3125_v2 = vcombine.low %v2835_v55, %v2843_v37  ;;  %v2512_v3 = vmax.f32 %v2412_v60, %v2476_v61  ;;  %v2410_v4 = vld [vmem:[#allocation2 + $0x1a0] ss:$2 sm:$0xff]  ;;  %v2474_v5 = vld [vmem:[#allocation2 + $0x1a1] ss:$2 sm:$0xff]  ;;  %2225 = vst.msk [vmem:[#allocation2 + $0x1d8] sm:$0xff] %vm280_vm3, %v18893_v62  ;;  %v1626_v6 = vpop.f32.mrb[59].mxu0 }
 0x15e   : > { %v2511_v8 = vmax.f32 %v2410_v4, %v2474_v5  ;;  %2223 = vst.msk [vmem:[#allocation2 + $0x1c8] sm:$0xff] %vm280_vm3, %v1626_v6  ;;  %v20805_v55 = vld [vmem:[%s20943_s10 + $0x2b8] sm:$0xff]   ;;  %v20806_v60 = vld [vmem:[%s20943_s10 + $0x2c0] sm:$0xff]   ;;  %v3150_v61 = vrot.slane %v3142_v41, %v21238_v42 }
 0x15f   : > { %v3124_v10 = vcombine.low %v3116_v0, %v3123_v1  ;;  %v3133_v11 = vrot.slane %v3125_v2, %v21238_v42  ;;  %v2557_v12 = vsel %vm280_vm3, %v2512_v3, -inf  ;;  %18999 = vmatmul.mubr.msk.bf16.gmra.mrb[164].mxu0 %vm1069_vm2, %v20801_v58 }
 0x160   : > { %v2558_v14 = vmax.f32 %v2556_v7, %v2557_v12  ;;  %v2554_v15 = vsel %vm280_vm3, %v2511_v8, -inf  ;;  %19002 = vmatprep.mubr.msk.bf16.mxu0 %vm1069_vm2, %v20802_v63 }
 0x161   : > { %3256 = vst.msk [vmem:[#allocation5 + $0x6b] sm:$0xff] %vm280_vm3, %v3124_v10  ;;  %v2555_v16 = vmax.f32 %v2553_v13, %v2554_v15  ;;  %v3141_v18 = vcombine.low %v3133_v11, %v3140_v9 }
 0x162   : > { %v2585_v19 = vadd.f32 %v21231_v34, %v2558_v14  ;;  %v18896_v20 = vpop.f32.mrb[60].mxu0 }
 0x163   : > { %v2584_v21 = vadd.f32 %v21231_v34, %v2555_v16  ;;  %2228 = vst.msk [vmem:[#allocation2 + $0x1f0] sm:$0xff] %vm280_vm3, %v18896_v20  ;;  %v1639_v22 = vpop.f32.mrb[61].mxu0  ;;  %3257 = vst.msk [vmem:[#allocation5 + $0x73] sm:$0xff] %vm280_vm3, %v3141_v18 }
 0x164   : > { %v2601_v25 = vmax.f32 %v2585_v19, 0.0  ;;  %2226 = vst.msk [vmem:[#allocation2 + $0x1e0] sm:$0xff] %vm280_vm3, %v1639_v22  ;;  %v18897_v26 = vpop.f32.mrb[62].mxu0  ;;  %v2416_v36 = vld [vmem:[#allocation2 + $0x1d0] ss:$2 sm:$0xff]  ;;  %v20807_v22 = vld [vmem:[%s20943_s10 + $0x2c8] sm:$0xff]  }
 0x165   : > { %v2600_v29 = vmax.f32 %v2584_v21, 0.0  ;;  %2229 = vst.msk [vmem:[#allocation2 + $0x1f8] sm:$0xff] %vm280_vm3, %v18897_v26  ;;  %v1642_v30 = vpop.f32.mrb[63].mxu0  ;;  %v2480_v37 = vld [vmem:[#allocation2 + $0x1d1] ss:$2 sm:$0xff] }
 0x166   : > { %v2877_v31 = vrot.slane %v2601_v25, %v21238_v42  ;;  %2227 = vst.msk [vmem:[#allocation2 + $0x1e8] sm:$0xff] %vm280_vm3, %v1642_v30  ;;  %v2414_v45 = vld [vmem:[#allocation2 + $0x1c0] ss:$2 sm:$0xff]  ;;  %v2478_v46 = vld [vmem:[#allocation2 + $0x1c1] ss:$2 sm:$0xff]  ;;  %v2870_v47 = vcombine.high %v2601_v25, %v2601_v25  ;;  %v2514_v49 = vmax.f32 %v2416_v36, %v2480_v37  ;;  %v20808_v26 = vld [vmem:[%s20943_s10 + $0x2d0] sm:$0xff]  }
 0x167   : > { %v2853_v33 = vcombine.high %v2600_v29, %v2600_v29  ;;  %v2860_v35 = vrot.slane %v2600_v29, %v21238_v42  ;;  %19003 = vmatmul.mubr.msk.bf16.gmra.mrb[168].mxu0 %vm1069_vm2, %v20803_v23  ;;  %v2513_v56 = vmax.f32 %v2414_v45, %v2478_v46 }
 0x168   : > { %v2885_v40 = vcombine.high %v2877_v31, %v2877_v31  ;;  %19006 = vmatprep.mubr.msk.bf16.mxu0 %vm1069_vm2, %v20804_v27  ;;  %v2884_v4 = vrot.slane %v2870_v47, %v21238_v42  ;;  %v2562_v5 = vsel %vm280_vm3, %v2514_v49, -inf }
 0x169   : > { %v2867_v43 = vrot.slane %v2853_v33, %v21238_v42  ;;  %v2868_v44 = vcombine.high %v2860_v35, %v2860_v35  ;;  %v2559_v11 = vsel %vm280_vm3, %v2513_v56, -inf }
 0x16a   : > { %v18900_v50 = vpop.f32.mrb[64].mxu0  ;;  %v3160_v51 = vcombine.low %v2877_v31, %v2885_v40  ;;  %v2886_v16 = vcombine.high %v2884_v4, %v2884_v4 }
 0x16b   : > { %v2869_v52 = vcombine.high %v2867_v43, %v2867_v43  ;;  %v3143_v53 = vcombine.low %v2860_v35, %v2868_v44  ;;  %2232 = vst.msk [vmem:[#allocation2 + $0x210] sm:$0xff] %vm280_vm3, %v18900_v50  ;;  %v1655_v54 = vpop.f32.mrb[65].mxu0 }
 0x16c   : > { %v2420_v57 = vld [vmem:[#allocation2 + $0x1f0] ss:$2 sm:$0xff]  ;;  %v2484_v58 = vld [vmem:[#allocation2 + $0x1f1] ss:$2 sm:$0xff]  ;;  %2230 = vst.msk [vmem:[#allocation2 + $0x200] sm:$0xff] %vm280_vm3, %v1655_v54  ;;  %v18901_v59 = vpop.f32.mrb[66].mxu0  ;;  %v3174_v7 = vrot.slane %v3160_v51, %v21238_v42  ;;  %v3176_v29 = vcombine.low %v2884_v4, %v2886_v16 }
 0x16d   : > { %v3157_v62 = vrot.slane %v3143_v53, %v21238_v42  ;;  %v3159_v63 = vcombine.low %v2867_v43, %v2869_v52  ;;  %v2516_v0 = vmax.f32 %v2420_v57, %v2484_v58  ;;  %v2418_v1 = vld [vmem:[#allocation2 + $0x1e0] ss:$2 sm:$0xff]  ;;  %v2482_v2 = vld [vmem:[#allocation2 + $0x1e1] ss:$2 sm:$0xff]  ;;  %2233 = vst.msk [vmem:[#allocation2 + $0x218] sm:$0xff] %vm280_vm3, %v18901_v59  ;;  %v1658_v3 = vpop.f32.mrb[67].mxu0 }
 0x16e   : > { %v2515_v6 = vmax.f32 %v2418_v1, %v2482_v2  ;;  %2231 = vst.msk [vmem:[#allocation2 + $0x208] sm:$0xff] %vm280_vm3, %v1658_v3  ;;  %v3184_v47 = vrot.slane %v3176_v29, %v21238_v42  ;;  %v20809_v57 = vld [vmem:[%s20943_s10 + $0x2d8] sm:$0xff]   ;;  %v20812_v29 = vld [vmem:[%s20943_s10 + $0x2f0] sm:$0xff]  }
 0x16f   : > { %v3158_v8 = vcombine.low %v3150_v61, %v3157_v62  ;;  %v3167_v9 = vrot.slane %v3159_v63, %v21238_v42  ;;  %v2563_v10 = vsel %vm280_vm3, %v2516_v0, -inf  ;;  %19007 = vmatmul.mubr.msk.bf16.gmra.mrb[172].mxu0 %vm1069_vm2, %v20805_v55  ;;  %v20810_v63 = vld [vmem:[%s20943_s10 + $0x2e0] sm:$0xff]  }
 0x170   : > { %v2564_v12 = vmax.f32 %v2562_v5, %v2563_v10  ;;  %v2560_v13 = vsel %vm280_vm3, %v2515_v6, -inf  ;;  %19010 = vmatprep.mubr.msk.bf16.mxu0 %vm1069_vm2, %v20806_v60 }
 0x171   : > { %3258 = vst.msk [vmem:[#allocation5 + $0x7b] sm:$0xff] %vm280_vm3, %v3158_v8  ;;  %v2561_v14 = vmax.f32 %v2559_v11, %v2560_v13  ;;  %v3175_v15 = vcombine.low %v3167_v9, %v3174_v7 }
 0x172   : > { %v2587_v18 = vadd.f32 %v21231_v34, %v2564_v12  ;;  %v18904_v19 = vpop.f32.mrb[68].mxu0 }
 0x173   : > { %v2586_v20 = vadd.f32 %v21231_v34, %v2561_v14  ;;  %2236 = vst.msk [vmem:[#allocation2 + $0x230] sm:$0xff] %vm280_vm3, %v18904_v19  ;;  %v1671_v21 = vpop.f32.mrb[69].mxu0  ;;  %3259 = vst.msk [vmem:[#allocation5 + $0x83] sm:$0xff] %vm280_vm3, %v3175_v15 }
 0x174   : > { %v2603_v23 = vmax.f32 %v2587_v18, 0.0  ;;  %2234 = vst.msk [vmem:[#allocation2 + $0x220] sm:$0xff] %vm280_vm3, %v1671_v21  ;;  %v18905_v25 = vpop.f32.mrb[70].mxu0  ;;  %v3266_v37 = vld [vmem:[#allocation2 + $0x210] ss:$2 sm:$0xff] }
 0x175   : > { %v2602_v27 = vmax.f32 %v2586_v20, 0.0  ;;  %2237 = vst.msk [vmem:[#allocation2 + $0x238] sm:$0xff] %vm280_vm3, %v18905_v25  ;;  %v1674_v28 = vpop.f32.mrb[71].mxu0  ;;  %v3330_v40 = vld [vmem:[#allocation2 + $0x211] ss:$2 sm:$0xff] }
 0x176   : > { %v2904_v30 = vcombine.high %v2603_v23, %v2603_v23  ;;  %v2911_v31 = vrot.slane %v2603_v23, %v21238_v42  ;;  %2235 = vst.msk [vmem:[#allocation2 + $0x228] sm:$0xff] %vm280_vm3, %v1674_v28  ;;  %v3264_v45 = vld [vmem:[#allocation2 + $0x200] ss:$2 sm:$0xff]  ;;  %v3328_v46 = vld [vmem:[#allocation2 + $0x201] ss:$2 sm:$0xff]  ;;  %v3392_v55 = vmax.f32 %v3266_v37, %v3330_v40 }
 0x177   : > { %v2887_v34 = vcombine.high %v2602_v27, %v2602_v27  ;;  %v2894_v33 = vrot.slane %v2602_v27, %v21238_v42  ;;  %19011 = vmatmul.mubr.msk.bf16.gmra.mrb[176].mxu0 %vm1069_vm2, %v20807_v22  ;;  %v3391_v59 = vmax.f32 %v3264_v45, %v3328_v46  ;;  %v21546_v20 = vld [vmem:[%s24759_s2] ss:$0 sm:$0xff] }
 0x178   : > { %v2918_v35 = vrot.slane %v2904_v30, %v21238_v42  ;;  %v2919_v36 = vcombine.high %v2911_v31, %v2911_v31  ;;  %19014 = vmatprep.mubr.msk.bf16.mxu0 %vm1069_vm2, %v20808_v26  ;;  %v3426_v11 = vsel %vm280_vm3, %v3392_v55, -inf  ;;  %v20811_v26 = vld [vmem:[%s20943_s10 + $0x2e8] sm:$0xff]  }
 0x179   : > { %v2901_v41 = vrot.slane %v2887_v34, %v21238_v42  ;;  %v2902_v43 = vcombine.high %v2894_v33, %v2894_v33  ;;  %v3177_v44 = vcombine.low %v21288_v48, %v2894_v33  ;;  %v3423_v13 = vsel %vm280_vm3, %v3391_v59, -inf }
 0x17a   : > { %v2920_v49 = vcombine.high %v2918_v35, %v2918_v35  ;;  %v3210_v50 = vcombine.low %v2919_v36, %v2918_v35  ;;  %v18908_v51 = vpop.f32.mrb[72].mxu0 }
 0x17b   : > { %v2903_v52 = vcombine.high %v2901_v41, %v2901_v41  ;;  %v3191_v53 = vrot.slane %v3177_v44, %v21238_v42  ;;  %v3193_v54 = vcombine.low %v2902_v43, %v2901_v41  ;;  %2240 = vst.msk [vmem:[#allocation2 + $0x250] sm:$0xff] %vm280_vm3, %v18908_v51  ;;  %v1687_v56 = vpop.f32.mrb[73].mxu0  ;;  %v5155_v44 = vld [vmem:[#allocation5 + $0x1] sm:$0xff] }
 0x17c   : > { %v3211_v58 = vcombine.low %v2920_v49, %v21288_v48  ;;  %v3270_v60 = vld [vmem:[#allocation2 + $0x230] ss:$2 sm:$0xff]  ;;  %v3334_v61 = vld [vmem:[#allocation2 + $0x231] ss:$2 sm:$0xff]  ;;  %2238 = vst.msk [vmem:[#allocation2 + $0x240] sm:$0xff] %vm280_vm3, %v1687_v56  ;;  %v18909_v62 = vpop.f32.mrb[74].mxu0  ;;  %v3218_v6 = vrot.slane %v3210_v50, %v21238_v42 }
 0x17d   : > { %v3192_v0 = vcombine.low %v3184_v47, %v3191_v53  ;;  %v3194_v1 = vcombine.low %v2903_v52, %v2911_v31  ;;  %v3394_v2 = vmax.f32 %v3270_v60, %v3334_v61  ;;  %v3268_v3 = vld [vmem:[#allocation2 + $0x220] ss:$2 sm:$0xff]  ;;  %v3332_v4 = vld [vmem:[#allocation2 + $0x221] ss:$2 sm:$0xff]  ;;  %2241 = vst.msk [vmem:[#allocation2 + $0x258] sm:$0xff] %vm280_vm3, %v18909_v62  ;;  %v1690_v5 = vpop.f32.mrb[75].mxu0  ;;  %v3201_v9 = vrot.slane %v3193_v54, %v21238_v42 }
 0x17e   : > { %v3225_v7 = vrot.slane %v3211_v58, %v21238_v42  ;;  %v3393_v8 = vmax.f32 %v3268_v3, %v3332_v4  ;;  %2239 = vst.msk [vmem:[#allocation2 + $0x248] sm:$0xff] %vm280_vm3, %v1690_v5  ;;  %v5156_v50 = vld [vmem:[#allocation5 + $0x9] sm:$0xff]  ;;  %v20813_v58 = vld [vmem:[%s20943_s10 + $0x2f8] sm:$0xff]  }
 0x17f   : > { %v3208_v10 = vrot.slane %v3194_v1, %v21238_v42  ;;  %3260 = vst.msk [vmem:[#allocation5 + $0x8b] sm:$0xff] %vm280_vm3, %v3192_v0  ;;  %v3427_v12 = vsel %vm280_vm3, %v3394_v2, -inf  ;;  %19015 = vmatmul.mubr.msk.bf16.gmra.mrb[180].mxu0 %vm1069_vm2, %v20809_v57  ;;  %v5223_v0 = vpack.c.bf16 %v5156_v50, %v5155_v44 }
 0x180   : > { %v3428_v14 = vmax.f32 %v3426_v11, %v3427_v12  ;;  %v3424_v15 = vsel %vm280_vm3, %v3393_v8, -inf  ;;  %19018 = vmatprep.mubr.msk.bf16.mxu0 %vm1069_vm2, %v20810_v63  ;;  %v3226_v16 = vcombine.low %v3218_v6, %v3225_v7 }
 0x181   : > { %v3425_v18 = vmax.f32 %v3423_v13, %v3424_v15  ;;  %v3209_v19 = vcombine.low %v3201_v9, %v3208_v10 }
 0x182   : > { %v3479_v21 = vadd.f32 %v21546_v20, %v3428_v14  ;;  %v18912_v22 = vpop.f32.mrb[76].mxu0  ;;  %3262 = vst.msk [vmem:[#allocation5 + $0x9b] sm:$0xff] %vm280_vm3, %v3226_v16 }
 0x183   : > { %v3478_v23 = vadd.f32 %v21546_v20, %v3425_v18  ;;  %2244 = vst.msk [vmem:[#allocation2 + $0x270] sm:$0xff] %vm280_vm3, %v18912_v22  ;;  %v1703_v25 = vpop.f32.mrb[77].mxu0  ;;  %3261 = vst.msk [vmem:[#allocation5 + $0x93] sm:$0xff] %vm280_vm3, %v3209_v19 }
 0x184   : > { %v3495_v27 = vmax.f32 %v3479_v21, 0.0  ;;  %2242 = vst.msk [vmem:[#allocation2 + $0x260] sm:$0xff] %vm280_vm3, %v1703_v25  ;;  %v18913_v28 = vpop.f32.mrb[78].mxu0  ;;  %v3274_v41 = vld [vmem:[#allocation2 + $0x250] ss:$2 sm:$0xff] }
 0x185   : > { %v3494_v30 = vmax.f32 %v3478_v23, 0.0  ;;  %2245 = vst.msk [vmem:[#allocation2 + $0x278] sm:$0xff] %vm280_vm3, %v18913_v28  ;;  %v1706_v31 = vpop.f32.mrb[79].mxu0  ;;  %v3338_v43 = vld [vmem:[#allocation2 + $0x251] ss:$2 sm:$0xff]  ;;  %v5157_v23 = vld [vmem:[#allocation5 + $0x11] sm:$0xff] }
 0x186   : > { %v3559_v34 = vcombine.high %v3495_v27, %v3495_v27  ;;  %v3566_v33 = vrot.slane %v3495_v27, %v21238_v42  ;;  %2243 = vst.msk [vmem:[#allocation2 + $0x268] sm:$0xff] %vm280_vm3, %v1706_v31  ;;  %v3272_v47 = vld [vmem:[#allocation2 + $0x240] ss:$2 sm:$0xff]  ;;  %v3336_v49 = vld [vmem:[#allocation2 + $0x241] ss:$2 sm:$0xff]  ;;  %v3396_v56 = vmax.f32 %v3274_v41, %v3338_v43  ;;  %v5158_v25 = vld [vmem:[#allocation5 + $0x19] sm:$0xff] }
 0x187   : > { %v3542_v35 = vcombine.high %v3494_v30, %v3494_v30  ;;  %v3549_v36 = vrot.slane %v3494_v30, %v21238_v42  ;;  %19019 = vmatmul.mubr.msk.bf16.gmra.mrb[184].mxu0 %vm1069_vm2, %v20811_v26  ;;  %v3395_v60 = vmax.f32 %v3272_v47, %v3336_v49  ;;  %v5160_v28 = vld [vmem:[#allocation5 + $0x29] sm:$0xff] }
 0x188   : > { %v3573_v37 = vrot.slane %v3559_v34, %v21238_v42  ;;  %v3574_v40 = vcombine.high %v3566_v33, %v3566_v33  ;;  %19022 = vmatprep.mubr.msk.bf16.mxu0 %vm1069_vm2, %v20812_v29  ;;  %v3432_v11 = vsel %vm280_vm3, %v3396_v56, -inf }
 0x189   : > { %v3556_v45 = vrot.slane %v3542_v35, %v21238_v42  ;;  %v3557_v46 = vcombine.high %v3549_v36, %v3549_v36  ;;  %v3429_v14 = vsel %vm280_vm3, %v3395_v60, -inf  ;;  %v5159_v35 = vld [vmem:[#allocation5 + $0x21] sm:$0xff] }
 0x18a   : > { %v3575_v51 = vcombine.high %v3573_v37, %v3573_v37  ;;  %v3831_v52 = vcombine.low %v3566_v33, %v3574_v40  ;;  %v18916_v53 = vpop.f32.mrb[80].mxu0  ;;  %v5224_v33 = vpack.c.bf16 %v5158_v25, %v5157_v23  ;;  %v5225_v40 = vpack.c.bf16 %v5160_v28, %v5159_v35 }
 0x18b   : > { %v3558_v54 = vcombine.high %v3556_v45, %v3556_v45  ;;  %v3814_v55 = vcombine.low %v3549_v36, %v3557_v46  ;;  %2248 = vst.msk [vmem:[#allocation2 + $0x290] sm:$0xff] %vm280_vm3, %v18916_v53  ;;  %v1719_v57 = vpop.f32.mrb[81].mxu0 }
 0x18c   : > { %v3832_v59 = vcombine.low %v3573_v37, %v3575_v51  ;;  %v3278_v61 = vld [vmem:[#allocation2 + $0x270] ss:$2 sm:$0xff]  ;;  %v3342_v62 = vld [vmem:[#allocation2 + $0x271] ss:$2 sm:$0xff]  ;;  %2246 = vst.msk [vmem:[#allocation2 + $0x280] sm:$0xff] %vm280_vm3, %v1719_v57  ;;  %v18917_v63 = vpop.f32.mrb[82].mxu0  ;;  %v3839_v6 = vrot.slane %v3831_v52, %v21238_v42 }
 0x18d   : > { %v3815_v1 = vcombine.low %v3556_v45, %v3558_v54  ;;  %v3398_v2 = vmax.f32 %v3278_v61, %v3342_v62  ;;  %v3276_v3 = vld [vmem:[#allocation2 + $0x260] ss:$2 sm:$0xff]  ;;  %v3340_v4 = vld [vmem:[#allocation2 + $0x261] ss:$2 sm:$0xff]  ;;  %2249 = vst.msk [vmem:[#allocation2 + $0x298] sm:$0xff] %vm280_vm3, %v18917_v63  ;;  %v1722_v5 = vpop.f32.mrb[83].mxu0  ;;  %v3822_v9 = vrot.slane %v3814_v55, %v21238_v42 }
 0x18e   : > { %v3846_v7 = vrot.slane %v3832_v59, %v21238_v42  ;;  %v3397_v8 = vmax.f32 %v3276_v3, %v3340_v4  ;;  %2247 = vst.msk [vmem:[#allocation2 + $0x288] sm:$0xff] %vm280_vm3, %v1722_v5  ;;  %v5162_v54 = vld [vmem:[#allocation5 + $0x39] sm:$0xff]  ;;  %v5164_v61 = vld [vmem:[#allocation5 + $0x49] sm:$0xff] }
 0x18f   : > { %v3829_v10 = vrot.slane %v3815_v1, %v21238_v42  ;;  %v3433_v12 = vsel %vm280_vm3, %v3398_v2, -inf  ;;  %19023 = vmatmul.mubr.msk.bf16.gmra.mrb[188].mxu0 %vm1069_vm2, %v20813_v58 }
 0x190   : > { %v3847_v13 = vcombine.low %v3839_v6, %v3846_v7  ;;  %v3434_v15 = vmax.f32 %v3432_v11, %v3433_v12  ;;  %v3430_v16 = vsel %vm280_vm3, %v3397_v8, -inf  ;;  %19030 = vmatprep.mubr.msk.bf16.mxu0 %vm280_vm3, %v5223_v0 }
 0x191   : > { %v3830_v18 = vcombine.low %v3822_v9, %v3829_v10  ;;  %v3431_v19 = vmax.f32 %v3429_v14, %v3430_v16  ;;  %v5163_v10 = vld [vmem:[#allocation5 + $0x41] sm:$0xff] }
 0x192   : > { %4139 = vst.msk [vmem:[#allocation5 + $0xcf] sm:$0xff] %vm280_vm3, %v3847_v13  ;;  %v3481_v21 = vadd.f32 %v21546_v20, %v3434_v15  ;;  %v18920_v22 = vpop.f32.mrb[84].mxu0  ;;  %v5227_v13 = vpack.c.bf16 %v5164_v61, %v5163_v10 }
 0x193   : > { %4138 = vst.msk [vmem:[#allocation5 + $0xc7] sm:$0xff] %vm280_vm3, %v3830_v18  ;;  %v3480_v26 = vadd.f32 %v21546_v20, %v3431_v19  ;;  %2252 = vst.msk [vmem:[#allocation2 + $0x2b0] sm:$0xff] %vm280_vm3, %v18920_v22  ;;  %v1735_v27 = vpop.f32.mrb[85].mxu0 }
 0x194   : > { %v3497_v29 = vmax.f32 %v3481_v21, 0.0  ;;  %2250 = vst.msk [vmem:[#allocation2 + $0x2a0] sm:$0xff] %vm280_vm3, %v1735_v27  ;;  %v18921_v30 = vpop.f32.mrb[86].mxu0  ;;  %v3282_v44 = vld [vmem:[#allocation2 + $0x290] ss:$2 sm:$0xff] }
 0x195   : > { %v3496_v31 = vmax.f32 %v3480_v26, 0.0  ;;  %2253 = vst.msk [vmem:[#allocation2 + $0x2b8] sm:$0xff] %vm280_vm3, %v18921_v30  ;;  %v1738_v34 = vpop.f32.mrb[87].mxu0  ;;  %v3346_v45 = vld [vmem:[#allocation2 + $0x291] ss:$2 sm:$0xff]  ;;  %v5168_v30 = vld [vmem:[#allocation5 + $0x69] sm:$0xff] }
 0x196   : > { %v3593_v36 = vcombine.high %v3497_v29, %v3497_v29  ;;  %v3600_v37 = vrot.slane %v3497_v29, %v21238_v42  ;;  %2251 = vst.msk [vmem:[#allocation2 + $0x2a8] sm:$0xff] %vm280_vm3, %v1738_v34  ;;  %v3280_v52 = vld [vmem:[#allocation2 + $0x280] ss:$2 sm:$0xff]  ;;  %v3344_v53 = vld [vmem:[#allocation2 + $0x281] ss:$2 sm:$0xff]  ;;  %v3400_v55 = vmax.f32 %v3282_v44, %v3346_v45  ;;  %v5166_v27 = vld [vmem:[#allocation5 + $0x59] sm:$0xff] }
 0x197   : > { %v3576_v41 = vcombine.high %v3496_v31, %v3496_v31  ;;  %v3583_v43 = vrot.slane %v3496_v31, %v21238_v42  ;;  %19031 = vmatmul.mubr.msk.bf16.vlgmr.msra.gmra.mrb[192].mxu0 %vm280_vm3, %v5224_v33  ;;  %v3399_v62 = vmax.f32 %v3280_v52, %v3344_v53  ;;  %v5165_v33 = vld [vmem:[#allocation5 + $0x51] sm:$0xff] }
 0x198   : > { %v21591_v46 = vrot.slane %v3593_v36, %v21238_v42  ;;  %v3608_v47 = vcombine.high %v3600_v37, %v3600_v37  ;;  %19034 = vmatprep.mubr.msk.bf16.mxu0 %vm280_vm3, %v5225_v40  ;;  %19099 = vmatpush3.bf16.msra.mxu0 %v21465_v24  ;;  %v5161_v24 = vld [vmem:[#allocation5 + $0x31] sm:$0xff]  ;;  %v3438_v11 = vsel %vm280_vm3, %v3400_v55, -inf  ;;  %v5228_v40 = vpack.c.bf16 %v5166_v27, %v5165_v33  ;;  %v5174_v33 = vld [vmem:[#allocation5 + $0x99] sm:$0xff] }
 0x199   : > { %v3590_v49 = vrot.slane %v3576_v41, %v21238_v42  ;;  %v3591_v50 = vcombine.high %v3583_v43, %v3583_v43  ;;  %v3848_v51 = vcombine.low %v21288_v48, %v3583_v43  ;;  %19100 = vmatprep.subr.bf16.mxu0 %v21482_v38  ;;  %v5226_v2 = vpack.c.bf16 %v5162_v54, %v5161_v24  ;;  %v5167_v41 = vld [vmem:[#allocation5 + $0x61] sm:$0xff] }
 0x19a   : > { %v18924_v56 = vpop.f32.mrb[88].mxu0  ;;  %v3866_v57 = vcombine.low %v3608_v47, %v21591_v46  ;;  %v3435_v18 = vsel %vm280_vm3, %v3399_v62, -inf  ;;  %v3609_v35 = vcombine.high %v21591_v46, %v21591_v46  ;;  %v5229_v44 = vpack.c.bf16 %v5168_v30, %v5167_v41 }
 0x19b   : > { %v3592_v58 = vcombine.high %v3590_v49, %v3590_v49  ;;  %v3849_v59 = vcombine.low %v3591_v50, %v3590_v49  ;;  %2256 = vst.msk [vmem:[#allocation2 + $0x2d0] sm:$0xff] %vm280_vm3, %v18924_v56  ;;  %v1751_v60 = vpop.f32.mrb[89].mxu0  ;;  %v3856_v3 = vrot.slane %v3848_v51, %v21238_v42  ;;  %v5170_v56 = vld [vmem:[#allocation5 + $0x79] sm:$0xff] }
 0x19c   : > { %v3286_v63 = vld [vmem:[#allocation2 + $0x2b0] ss:$2 sm:$0xff]  ;;  %v3350_v0 = vld [vmem:[#allocation2 + $0x2b1] ss:$2 sm:$0xff]  ;;  %2254 = vst.msk [vmem:[#allocation2 + $0x2c0] sm:$0xff] %vm280_vm3, %v1751_v60  ;;  %v18925_v1 = vpop.f32.mrb[90].mxu0  ;;  %19101 = vmatpush3.bf16.msra.mxu0 %v21482_v38  ;;  %v3880_v38 = vrot.slane %v3866_v57, %v21238_v42  ;;  %v3882_v46 = vcombine.low %v3609_v35, %v21288_v48 }
 0x19d   : > { %v3863_v4 = vrot.slane %v3849_v59, %v21238_v42  ;;  %v3865_v5 = vcombine.low %v3592_v58, %v3600_v37  ;;  %v3402_v6 = vmax.f32 %v3286_v63, %v3350_v0  ;;  %v3284_v7 = vld [vmem:[#allocation2 + $0x2a0] ss:$2 sm:$0xff]  ;;  %v3348_v8 = vld [vmem:[#allocation2 + $0x2a1] ss:$2 sm:$0xff]  ;;  %2257 = vst.msk [vmem:[#allocation2 + $0x2d8] sm:$0xff] %vm280_vm3, %v18925_v1  ;;  %v1754_v9 = vpop.f32.mrb[91].mxu0 }
 0x19e   : > { %v3401_v12 = vmax.f32 %v3284_v7, %v3348_v8  ;;  %2255 = vst.msk [vmem:[#allocation2 + $0x2c8] sm:$0xff] %vm280_vm3, %v1754_v9  ;;  %v5169_v63 = vld [vmem:[#allocation5 + $0x71] sm:$0xff]  ;;  %v5172_v0 = vld [vmem:[#allocation5 + $0x89] sm:$0xff] }
 0x19f   : > { %v3864_v14 = vcombine.low %v3856_v3, %v3863_v4  ;;  %v3873_v15 = vrot.slane %v3865_v5, %v21238_v42  ;;  %v3439_v16 = vsel %vm280_vm3, %v3402_v6, -inf  ;;  %19035 = vmatmul.mubr.msk.bf16.gmra.mrb[196].mxu0 %vm280_vm3, %v5226_v2  ;;  %v5230_v5 = vpack.c.bf16 %v5170_v56, %v5169_v63 }
 0x1a0   : > { %v3440_v19 = vmax.f32 %v3438_v11, %v3439_v16  ;;  %v3436_v21 = vsel %vm280_vm3, %v3401_v12, -inf  ;;  %19038 = vmatprep.mubr.msk.bf16.mxu0 %vm280_vm3, %v5227_v13  ;;  %v3890_v6 = vrot.slane %v3882_v46, %v21238_v42  ;;  %v5171_v13 = vld [vmem:[#allocation5 + $0x81] sm:$0xff] }
 0x1a1   : > { %4140 = vst.msk [vmem:[#allocation5 + $0xd7] sm:$0xff] %vm280_vm3, %v3864_v14  ;;  %v3437_v22 = vmax.f32 %v3435_v18, %v3436_v21  ;;  %v3881_v23 = vcombine.low %v3873_v15, %v3880_v38  ;;  %v5231_v16 = vpack.c.bf16 %v5172_v0, %v5171_v13 }
 0x1a2   : > { %v3483_v25 = vadd.f32 %v21546_v20, %v3440_v19  ;;  %v18928_v26 = vpop.f32.mrb[92].mxu0 }
 0x1a3   : > { %v3482_v28 = vadd.f32 %v21546_v20, %v3437_v22  ;;  %2260 = vst.msk [vmem:[#allocation2 + $0x2f0] sm:$0xff] %vm280_vm3, %v18928_v26  ;;  %v1767_v29 = vpop.f32.mrb[93].mxu0  ;;  %4141 = vst.msk [vmem:[#allocation5 + $0xdf] sm:$0xff] %vm280_vm3, %v3881_v23 }
 0x1a4   : > { %v3499_v31 = vmax.f32 %v3483_v25, 0.0  ;;  %2258 = vst.msk [vmem:[#allocation2 + $0x2e0] sm:$0xff] %vm280_vm3, %v1767_v29  ;;  %v18929_v34 = vpop.f32.mrb[94].mxu0  ;;  %v3290_v49 = vld [vmem:[#allocation2 + $0x2d0] ss:$2 sm:$0xff] }
 0x1a5   : > { %v3498_v36 = vmax.f32 %v3482_v28, 0.0  ;;  %2261 = vst.msk [vmem:[#allocation2 + $0x2f8] sm:$0xff] %vm280_vm3, %v18929_v34  ;;  %v1770_v37 = vpop.f32.mrb[95].mxu0  ;;  %v3354_v50 = vld [vmem:[#allocation2 + $0x2d1] ss:$2 sm:$0xff]  ;;  %v5173_v34 = vld [vmem:[#allocation5 + $0x91] sm:$0xff] }
 0x1a6   : > { %v3634_v43 = vrot.slane %v3499_v31, %v21238_v42  ;;  %2259 = vst.msk [vmem:[#allocation2 + $0x2e8] sm:$0xff] %vm280_vm3, %v1770_v37  ;;  %v3288_v54 = vld [vmem:[#allocation2 + $0x2c0] ss:$2 sm:$0xff]  ;;  %v3352_v55 = vld [vmem:[#allocation2 + $0x2c1] ss:$2 sm:$0xff]  ;;  %v3627_v57 = vcombine.high %v3499_v31, %v3499_v31  ;;  %v3404_v58 = vmax.f32 %v3290_v49, %v3354_v50 }
 0x1a7   : > { %v3610_v45 = vcombine.high %v3498_v36, %v3498_v36  ;;  %v3617_v47 = vrot.slane %v3498_v36, %v21238_v42  ;;  %19039 = vmatmul.mubr.msk.bf16.gmra.mrb[200].mxu0 %vm280_vm3, %v5228_v40  ;;  %v3403_v1 = vmax.f32 %v3288_v54, %v3352_v55  ;;  %v5175_v37 = vld [vmem:[#allocation5 + $0xa1] sm:$0xff]  ;;  %v5176_v40 = vld [vmem:[#allocation5 + $0xa9] sm:$0xff]  ;;  %v5177_v54 = vld [vmem:[#allocation5 + $0xb1] sm:$0xff] }
 0x1a8   : > { %v3642_v51 = vcombine.high %v3634_v43, %v3634_v43  ;;  %19042 = vmatprep.mubr.msk.bf16.mxu0 %vm280_vm3, %v5229_v44  ;;  %v3641_v38 = vrot.slane %v3627_v57, %v21238_v42  ;;  %v3444_v14 = vsel %vm280_vm3, %v3404_v58, -inf  ;;  %v5233_v46 = vpack.c.bf16 %v5176_v40, %v5175_v37  ;;  %v5178_v55 = vld [vmem:[#allocation5 + $0xb9] sm:$0xff] }
 0x1a9   : > { %v3624_v52 = vrot.slane %v3610_v45, %v21238_v42  ;;  %v3625_v53 = vcombine.high %v3617_v47, %v3617_v47  ;;  %v3441_v23 = vsel %vm280_vm3, %v3403_v1, -inf }
 0x1aa   : > { %v18932_v59 = vpop.f32.mrb[96].mxu0  ;;  %v3900_v60 = vcombine.low %v3634_v43, %v3642_v51  ;;  %v3643_v29 = vcombine.high %v3641_v38, %v3641_v38 }
 0x1ab   : > { %v3626_v24 = vcombine.high %v3624_v52, %v3624_v52  ;;  %v3883_v61 = vcombine.low %v3617_v47, %v3625_v53  ;;  %2264 = vst.msk [vmem:[#allocation2 + $0x310] sm:$0xff] %vm280_vm3, %v18932_v59  ;;  %v1783_v62 = vpop.f32.mrb[97].mxu0  ;;  %v5232_v47 = vpack.c.bf16 %v5174_v33, %v5173_v34 }
 0x1ac   : > { %v3294_v2 = vld [vmem:[#allocation2 + $0x2f0] ss:$2 sm:$0xff]  ;;  %v3358_v3 = vld [vmem:[#allocation2 + $0x2f1] ss:$2 sm:$0xff]  ;;  %2262 = vst.msk [vmem:[#allocation2 + $0x300] sm:$0xff] %vm280_vm3, %v1783_v62  ;;  %v18933_v4 = vpop.f32.mrb[98].mxu0  ;;  %v3914_v18 = vrot.slane %v3900_v60, %v21238_v42  ;;  %v3916_v49 = vcombine.low %v3641_v38, %v3643_v29 }
 0x1ad   : > { %v3897_v7 = vrot.slane %v3883_v61, %v21238_v42  ;;  %v3899_v8 = vcombine.low %v3624_v52, %v3626_v24  ;;  %v3406_v9 = vmax.f32 %v3294_v2, %v3358_v3  ;;  %v3292_v10 = vld [vmem:[#allocation2 + $0x2e0] ss:$2 sm:$0xff]  ;;  %v3356_v11 = vld [vmem:[#allocation2 + $0x2e1] ss:$2 sm:$0xff]  ;;  %2265 = vst.msk [vmem:[#allocation2 + $0x318] sm:$0xff] %vm280_vm3, %v18933_v4  ;;  %v1786_v12 = vpop.f32.mrb[99].mxu0  ;;  %v5234_v4 = vpack.c.bf16 %v5178_v55, %v5177_v54 }
 0x1ae   : > { %v3405_v15 = vmax.f32 %v3292_v10, %v3356_v11  ;;  %2263 = vst.msk [vmem:[#allocation2 + $0x308] sm:$0xff] %vm280_vm3, %v1786_v12  ;;  %v3924_v0 = vrot.slane %v3916_v49, %v21238_v42  ;;  %v5179_v10 = vld [vmem:[#allocation5 + $0xc1] sm:$0xff]  ;;  %v5180_v11 = vld [vmem:[#allocation5 + $0xc9] sm:$0xff] }
 0x1af   : > { %v3898_v19 = vcombine.low %v3890_v6, %v3897_v7  ;;  %v3907_v21 = vrot.slane %v3899_v8, %v21238_v42  ;;  %v3445_v22 = vsel %vm280_vm3, %v3406_v9, -inf  ;;  %19043 = vmatmul.mubr.msk.bf16.gmra.mrb[204].mxu0 %vm280_vm3, %v5230_v5 }
 0x1b0   : > { %v3446_v25 = vmax.f32 %v3444_v14, %v3445_v22  ;;  %v3442_v26 = vsel %vm280_vm3, %v3405_v15, -inf  ;;  %19046 = vmatprep.mubr.msk.bf16.mxu0 %vm280_vm3, %v5231_v16 }
 0x1b1   : > { %4142 = vst.msk [vmem:[#allocation5 + $0xe7] sm:$0xff] %vm280_vm3, %v3898_v19  ;;  %v3443_v27 = vmax.f32 %v3441_v23, %v3442_v26  ;;  %v3915_v28 = vcombine.low %v3907_v21, %v3914_v18 }
 0x1b2   : > { %v3485_v30 = vadd.f32 %v21546_v20, %v3446_v25  ;;  %v18936_v31 = vpop.f32.mrb[100].mxu0 }
 0x1b3   : > { %v3484_v35 = vadd.f32 %v21546_v20, %v3443_v27  ;;  %2268 = vst.msk [vmem:[#allocation2 + $0x330] sm:$0xff] %vm280_vm3, %v18936_v31  ;;  %v1799_v36 = vpop.f32.mrb[101].mxu0  ;;  %4143 = vst.msk [vmem:[#allocation5 + $0xef] sm:$0xff] %vm280_vm3, %v3915_v28  ;;  %v5235_v28 = vpack.c.bf16 %v5180_v11, %v5179_v10 }
 0x1b4   : > { %v3501_v41 = vmax.f32 %v3485_v30, 0.0  ;;  %2266 = vst.msk [vmem:[#allocation2 + $0x320] sm:$0xff] %vm280_vm3, %v1799_v36  ;;  %v18937_v43 = vpop.f32.mrb[102].mxu0  ;;  %v3298_v58 = vld [vmem:[#allocation2 + $0x310] ss:$2 sm:$0xff] }
 0x1b5   : > { %v3500_v44 = vmax.f32 %v3484_v35, 0.0  ;;  %2269 = vst.msk [vmem:[#allocation2 + $0x338] sm:$0xff] %vm280_vm3, %v18937_v43  ;;  %v1802_v45 = vpop.f32.mrb[103].mxu0  ;;  %v3362_v59 = vld [vmem:[#allocation2 + $0x311] ss:$2 sm:$0xff] }
 0x1b6   : > { %v3661_v50 = vcombine.high %v3501_v41, %v3501_v41  ;;  %v3668_v51 = vrot.slane %v3501_v41, %v21238_v42  ;;  %2267 = vst.msk [vmem:[#allocation2 + $0x328] sm:$0xff] %vm280_vm3, %v1802_v45  ;;  %v3296_v62 = vld [vmem:[#allocation2 + $0x300] ss:$2 sm:$0xff]  ;;  %v3360_v63 = vld [vmem:[#allocation2 + $0x301] ss:$2 sm:$0xff]  ;;  %v3408_v8 = vmax.f32 %v3298_v58, %v3362_v59  ;;  %v5182_v45 = vld [vmem:[#allocation5 + $0xd9] sm:$0xff] }
 0x1b7   : > { %v3644_v52 = vcombine.high %v3500_v44, %v3500_v44  ;;  %v3651_v53 = vrot.slane %v3500_v44, %v21238_v42  ;;  %19047 = vmatmul.mubr.msk.bf16.gmra.mrb[208].mxu0 %vm280_vm3, %v5232_v47  ;;  %v3407_v13 = vmax.f32 %v3296_v62, %v3360_v63 }
 0x1b8   : > { %v3675_v56 = vrot.slane %v3661_v50, %v21238_v42  ;;  %v3676_v57 = vcombine.high %v3668_v51, %v3668_v51  ;;  %19050 = vmatprep.mubr.msk.bf16.mxu0 %vm280_vm3, %v5233_v46  ;;  %v3450_v31 = vsel %vm280_vm3, %v3408_v8, -inf }
 0x1b9   : > { %v3658_v60 = vrot.slane %v3644_v52, %v21238_v42  ;;  %v3659_v24 = vcombine.high %v3651_v53, %v3651_v53  ;;  %v3917_v61 = vcombine.low %v21288_v48, %v3651_v53  ;;  %v3447_v33 = vsel %vm280_vm3, %v3407_v13, -inf  ;;  %v5181_v52 = vld [vmem:[#allocation5 + $0xd1] sm:$0xff] }
 0x1ba   : > { %v3677_v1 = vcombine.high %v3675_v56, %v3675_v56  ;;  %v3950_v2 = vcombine.low %v3676_v57, %v3675_v56  ;;  %v18940_v3 = vpop.f32.mrb[104].mxu0  ;;  %v5184_v50 = vld [vmem:[#allocation5 + $0xe9] sm:$0xff]  ;;  %v5236_v55 = vpack.c.bf16 %v5182_v45, %v5181_v52  ;;  %v5183_v56 = vld [vmem:[#allocation5 + $0xe1] sm:$0xff] }
 0x1bb   : > { %v3660_v5 = vcombine.high %v3658_v60, %v3658_v60  ;;  %v3931_v6 = vrot.slane %v3917_v61, %v21238_v42  ;;  %v3933_v7 = vcombine.low %v3659_v24, %v3658_v60  ;;  %2272 = vst.msk [vmem:[#allocation2 + $0x350] sm:$0xff] %vm280_vm3, %v18940_v3  ;;  %v1815_v9 = vpop.f32.mrb[105].mxu0  ;;  %v5237_v59 = vpack.c.bf16 %v5184_v50, %v5183_v56 }
 0x1bc   : > { %v3951_v12 = vcombine.low %v3677_v1, %v21288_v48  ;;  %v3302_v38 = vld [vmem:[#allocation2 + $0x330] ss:$2 sm:$0xff]  ;;  %v3366_v14 = vld [vmem:[#allocation2 + $0x331] ss:$2 sm:$0xff]  ;;  %2270 = vst.msk [vmem:[#allocation2 + $0x340] sm:$0xff] %vm280_vm3, %v1815_v9  ;;  %v18941_v15 = vpop.f32.mrb[106].mxu0  ;;  %v3958_v25 = vrot.slane %v3950_v2, %v21238_v42 }
 0x1bd   : > { %v3932_v16 = vcombine.low %v3924_v0, %v3931_v6  ;;  %v3934_v18 = vcombine.low %v3660_v5, %v3668_v51  ;;  %v3410_v19 = vmax.f32 %v3302_v38, %v3366_v14  ;;  %v3300_v21 = vld [vmem:[#allocation2 + $0x320] ss:$2 sm:$0xff]  ;;  %v3364_v22 = vld [vmem:[#allocation2 + $0x321] ss:$2 sm:$0xff]  ;;  %2273 = vst.msk [vmem:[#allocation2 + $0x358] sm:$0xff] %vm280_vm3, %v18941_v15  ;;  %v1818_v23 = vpop.f32.mrb[107].mxu0  ;;  %v3941_v29 = vrot.slane %v3933_v7, %v21238_v42 }
 0x1be   : > { %v3965_v26 = vrot.slane %v3951_v12, %v21238_v42  ;;  %v3409_v27 = vmax.f32 %v3300_v21, %v3364_v22  ;;  %2271 = vst.msk [vmem:[#allocation2 + $0x348] sm:$0xff] %vm280_vm3, %v1818_v23 }
 0x1bf   : > { %v3948_v30 = vrot.slane %v3934_v18, %v21238_v42  ;;  %4144 = vst.msk [vmem:[#allocation5 + $0xf7] sm:$0xff] %vm280_vm3, %v3932_v16  ;;  %v3451_v34 = vsel %vm280_vm3, %v3410_v19, -inf  ;;  %19051 = vmatmul.mubr.msk.bf16.gmra.mrb[212].mxu0 %vm280_vm3, %v5234_v4 }
 0x1c0   : > { %v3452_v35 = vmax.f32 %v3450_v31, %v3451_v34  ;;  %v3448_v36 = vsel %vm280_vm3, %v3409_v27, -inf  ;;  %19054 = vmatprep.mubr.msk.bf16.mxu0 %vm280_vm3, %v5235_v28  ;;  %v3966_v37 = vcombine.low %v3958_v25, %v3965_v26 }
 0x1c1   : > { %v3449_v40 = vmax.f32 %v3447_v33, %v3448_v36  ;;  %v3949_v41 = vcombine.low %v3941_v29, %v3948_v30 }
 0x1c2   : > { %v3487_v43 = vadd.f32 %v21546_v20, %v3452_v35  ;;  %v18944_v44 = vpop.f32.mrb[108].mxu0  ;;  %4146 = vst.msk [vmem:[#allocation5 + $0x107] sm:$0xff] %vm280_vm3, %v3966_v37 }
 0x1c3   : > { %v3486_v47 = vadd.f32 %v21546_v20, %v3449_v40  ;;  %2276 = vst.msk [vmem:[#allocation2 + $0x370] sm:$0xff] %vm280_vm3, %v18944_v44  ;;  %v1831_v49 = vpop.f32.mrb[109].mxu0  ;;  %4145 = vst.msk [vmem:[#allocation5 + $0xff] sm:$0xff] %vm280_vm3, %v3949_v41 }
 0x1c4   : > { %v3503_v51 = vmax.f32 %v3487_v43, 0.0  ;;  %2274 = vst.msk [vmem:[#allocation2 + $0x360] sm:$0xff] %vm280_vm3, %v1831_v49  ;;  %v18945_v46 = vpop.f32.mrb[110].mxu0  ;;  %v3306_v63 = vld [vmem:[#allocation2 + $0x350] ss:$2 sm:$0xff] }
 0x1c5   : > { %v3502_v53 = vmax.f32 %v3486_v47, 0.0  ;;  %2277 = vst.msk [vmem:[#allocation2 + $0x378] sm:$0xff] %vm280_vm3, %v18945_v46  ;;  %v1834_v54 = vpop.f32.mrb[111].mxu0  ;;  %v3370_v0 = vld [vmem:[#allocation2 + $0x351] ss:$2 sm:$0xff] }
 0x1c6   : > { %v3695_v57 = vcombine.high %v3503_v51, %v3503_v51  ;;  %v3702_v58 = vrot.slane %v3503_v51, %v21238_v42  ;;  %2275 = vst.msk [vmem:[#allocation2 + $0x368] sm:$0xff] %vm280_vm3, %v1834_v54  ;;  %v3304_v3 = vld [vmem:[#allocation2 + $0x340] ss:$2 sm:$0xff]  ;;  %v3368_v4 = vld [vmem:[#allocation2 + $0x341] ss:$2 sm:$0xff]  ;;  %v3412_v11 = vmax.f32 %v3306_v63, %v3370_v0 }
 0x1c7   : > { %v3678_v60 = vcombine.high %v3502_v53, %v3502_v53  ;;  %v3685_v24 = vrot.slane %v3502_v53, %v21238_v42  ;;  %19055 = vmatmul.mubr.msk.bf16.gmra.mrb[216].mxu0 %vm280_vm3, %v5236_v55  ;;  %v3411_v38 = vmax.f32 %v3304_v3, %v3368_v4  ;;  %v5185_v18 = vld [vmem:[#allocation5 + $0xf1] sm:$0xff] }
 0x1c8   : > { %v3709_v61 = vrot.slane %v3695_v57, %v21238_v42  ;;  %v3710_v62 = vcombine.high %v3702_v58, %v3702_v58  ;;  %19058 = vmatprep.mubr.msk.bf16.mxu0 %vm280_vm3, %v5237_v59  ;;  %v3456_v34 = vsel %vm280_vm3, %v3412_v11, -inf }
 0x1c9   : > { %v3692_v1 = vrot.slane %v3678_v60, %v21238_v42  ;;  %v3693_v2 = vcombine.high %v3685_v24, %v3685_v24  ;;  %v3453_v36 = vsel %vm280_vm3, %v3411_v38, -inf }
 0x1ca   : > { %v3711_v5 = vcombine.high %v3709_v61, %v3709_v61  ;;  %v3984_v6 = vcombine.low %v3702_v58, %v3710_v62  ;;  %v18948_v7 = vpop.f32.mrb[112].mxu0  ;;  %v5186_v8 = vld [vmem:[#allocation5 + $0xf9] sm:$0xff]  ;;  %v5187_v3 = vld [vmem:[#allocation5 + $0x101] sm:$0xff] }
 0x1cb   : > { %v3694_v9 = vcombine.high %v3692_v1, %v3692_v1  ;;  %v3967_v10 = vcombine.low %v3685_v24, %v3693_v2  ;;  %2280 = vst.msk [vmem:[#allocation2 + $0x390] sm:$0xff] %vm280_vm3, %v18948_v7  ;;  %v1847_v12 = vpop.f32.mrb[113].mxu0  ;;  %v5238_v26 = vpack.c.bf16 %v5186_v8, %v5185_v18  ;;  %v5081_v11 = vld [vmem:[#allocation5 + $0x100] sm:$0xff] }
 0x1cc   : > { %v3985_v13 = vcombine.low %v3709_v61, %v3711_v5  ;;  %v3310_v14 = vld [vmem:[#allocation2 + $0x370] ss:$2 sm:$0xff]  ;;  %v3374_v15 = vld [vmem:[#allocation2 + $0x371] ss:$2 sm:$0xff]  ;;  %2278 = vst.msk [vmem:[#allocation2 + $0x380] sm:$0xff] %vm280_vm3, %v1847_v12  ;;  %v18949_v16 = vpop.f32.mrb[114].mxu0  ;;  %v3992_v27 = vrot.slane %v3984_v6, %v21238_v42 }
 0x1cd   : > { %v3968_v19 = vcombine.low %v3692_v1, %v3694_v9  ;;  %v3414_v21 = vmax.f32 %v3310_v14, %v3374_v15  ;;  %v3308_v22 = vld [vmem:[#allocation2 + $0x360] ss:$2 sm:$0xff]  ;;  %v3372_v23 = vld [vmem:[#allocation2 + $0x361] ss:$2 sm:$0xff]  ;;  %2281 = vst.msk [vmem:[#allocation2 + $0x398] sm:$0xff] %vm280_vm3, %v18949_v16  ;;  %v1850_v25 = vpop.f32.mrb[115].mxu0  ;;  %v3975_v30 = vrot.slane %v3967_v10, %v21238_v42 }
 0x1ce   : > { %v3999_v28 = vrot.slane %v3985_v13, %v21238_v42  ;;  %v3413_v29 = vmax.f32 %v3308_v22, %v3372_v23  ;;  %2279 = vst.msk [vmem:[#allocation2 + $0x388] sm:$0xff] %vm280_vm3, %v1850_v25 }
 0x1cf   : > { %v3982_v31 = vrot.slane %v3968_v19, %v21238_v42  ;;  %v3457_v33 = vsel %vm280_vm3, %v3414_v21, -inf  ;;  %19059 = vmatmul.mubr.msk.bf16.gmra.mrb[220].mxu0 %vm280_vm3, %v5238_v26 }
 0x1d0   : > { %v4000_v35 = vcombine.low %v3992_v27, %v3999_v28  ;;  %v3458_v37 = vmax.f32 %v3456_v34, %v3457_v33  ;;  %v3454_v40 = vsel %vm280_vm3, %v3413_v29, -inf }
 0x1d1   : > { %v3983_v41 = vcombine.low %v3975_v30, %v3982_v31  ;;  %v3455_v43 = vmax.f32 %v3453_v36, %v3454_v40 }
 0x1d2   : > { %4148 = vst.msk [vmem:[#allocation5 + $0x117] sm:$0xff] %vm280_vm3, %v4000_v35  ;;  %v3489_v44 = vadd.f32 %v21546_v20, %v3458_v37  ;;  %v18952_v45 = vpop.f32.mrb[116].mxu0 }
 0x1d3   : > { %4147 = vst.msk [vmem:[#allocation5 + $0x10f] sm:$0xff] %vm280_vm3, %v3983_v41  ;;  %v3488_v47 = vadd.f32 %v21546_v20, %v3455_v43  ;;  %2284 = vst.msk [vmem:[#allocation2 + $0x3b0] sm:$0xff] %vm280_vm3, %v18952_v45  ;;  %v1863_v49 = vpop.f32.mrb[117].mxu0 }
 0x1d4   : > { %v3505_v50 = vmax.f32 %v3489_v44, 0.0  ;;  %2282 = vst.msk [vmem:[#allocation2 + $0x3a0] sm:$0xff] %vm280_vm3, %v1863_v49  ;;  %v18953_v51 = vpop.f32.mrb[118].mxu0  ;;  %v3314_v57 = vld [vmem:[#allocation2 + $0x390] ss:$2 sm:$0xff] }
 0x1d5   : > { %v3504_v46 = vmax.f32 %v3488_v47, 0.0  ;;  %2285 = vst.msk [vmem:[#allocation2 + $0x3b8] sm:$0xff] %vm280_vm3, %v18953_v51  ;;  %v1866_v52 = vpop.f32.mrb[119].mxu0  ;;  %v3378_v58 = vld [vmem:[#allocation2 + $0x391] ss:$2 sm:$0xff] }
 0x1d6   : > { %v3729_v53 = vcombine.high %v3505_v50, %v3505_v50  ;;  %v3736_v54 = vrot.slane %v3505_v50, %v21238_v42  ;;  %2283 = vst.msk [vmem:[#allocation2 + $0x3a8] sm:$0xff] %vm280_vm3, %v1866_v52  ;;  %v3312_v63 = vld [vmem:[#allocation2 + $0x380] ss:$2 sm:$0xff]  ;;  %v3376_v0 = vld [vmem:[#allocation2 + $0x381] ss:$2 sm:$0xff]  ;;  %v3416_v1 = vmax.f32 %v3314_v57, %v3378_v58 }
 0x1d7   : > { %v3712_v55 = vcombine.high %v3504_v46, %v3504_v46  ;;  %v3719_v56 = vrot.slane %v3504_v46, %v21238_v42  ;;  %v3415_v12 = vmax.f32 %v3312_v63, %v3376_v0 }
 0x1d8   : > { %v21716_v59 = vrot.slane %v3729_v53, %v21238_v42  ;;  %v3744_v60 = vcombine.high %v3736_v54, %v3736_v54  ;;  %v3462_v26 = vsel %vm280_vm3, %v3416_v1, -inf }
 0x1d9   : > { %v3726_v24 = vrot.slane %v3712_v55, %v21238_v42  ;;  %v3727_v61 = vcombine.high %v3719_v56, %v3719_v56  ;;  %v4001_v62 = vcombine.low %v21288_v48, %v3719_v56  ;;  %v3459_v34 = vsel %vm280_vm3, %v3415_v12, -inf }
 0x1da   : > { %v18956_v2 = vpop.f32.mrb[120].mxu0  ;;  %v5188_v4 = vld [vmem:[#allocation5 + $0x109] sm:$0xff]  ;;  %v4019_v6 = vcombine.low %v3744_v60, %v21716_v59  ;;  %v3745_v45 = vcombine.high %v21716_v59, %v21716_v59  ;;  %v5189_v55 = vld [vmem:[#allocation5 + $0x111] sm:$0xff] }
 0x1db   : > { %v5082_v5 = vld [vmem:[#allocation5 + $0x108] sm:$0xff]  ;;  %v3728_v7 = vcombine.high %v3726_v24, %v3726_v24  ;;  %v4002_v8 = vcombine.low %v3727_v61, %v3726_v24  ;;  %2288 = vst.msk [vmem:[#allocation2 + $0x3d0] sm:$0xff] %vm280_vm3, %v18956_v2  ;;  %v1879_v9 = vpop.f32.mrb[121].mxu0  ;;  %v5239_v10 = vpack.c.bf16 %v5188_v4, %v5187_v3  ;;  %v4009_v16 = vrot.slane %v4001_v62, %v21238_v42  ;;  %v5083_v59 = vld [vmem:[#allocation5 + $0x110] sm:$0xff] }
 0x1dc   : > { %v3318_v13 = vld [vmem:[#allocation2 + $0x3b0] ss:$2 sm:$0xff]  ;;  %v3382_v38 = vld [vmem:[#allocation2 + $0x3b1] ss:$2 sm:$0xff]  ;;  %2286 = vst.msk [vmem:[#allocation2 + $0x3c0] sm:$0xff] %vm280_vm3, %v1879_v9  ;;  %v18957_v14 = vpop.f32.mrb[122].mxu0  ;;  %v5133_v15 = vpack.c.bf16 %v5082_v5, %v5081_v11  ;;  %v4033_v28 = vrot.slane %v4019_v6, %v21238_v42  ;;  %v4035_v56 = vcombine.low %v3745_v45, %v21288_v48 }
 0x1dd   : > { %v4016_v18 = vrot.slane %v4002_v8, %v21238_v42  ;;  %v4018_v19 = vcombine.low %v3728_v7, %v3736_v54  ;;  %v3418_v21 = vmax.f32 %v3318_v13, %v3382_v38  ;;  %v3316_v22 = vld [vmem:[#allocation2 + $0x3a0] ss:$2 sm:$0xff]  ;;  %v3380_v23 = vld [vmem:[#allocation2 + $0x3a1] ss:$2 sm:$0xff]  ;;  %2289 = vst.msk [vmem:[#allocation2 + $0x3d8] sm:$0xff] %vm280_vm3, %v18957_v14  ;;  %v1882_v25 = vpop.f32.mrb[123].mxu0  ;;  %19062 = vmatprep.mubr.msk.bf16.mxu0 %vm280_vm3, %v5239_v10 }
 0x1de   : > { %v3417_v27 = vmax.f32 %v3316_v22, %v3380_v23  ;;  %2287 = vst.msk [vmem:[#allocation2 + $0x3c8] sm:$0xff] %vm280_vm3, %v1882_v25  ;;  %19134 = vmatprep.mubr.msk.bf16.mxu1 %vm280_vm3, %v5133_v15  ;;  %v4043_v13 = vrot.slane %v4035_v56, %v21238_v42  ;;  %v20818_v25 = vld [vmem:[%s24760_s3 + $0x20] sm:$0xff]  }
 0x1df   : > { %v4017_v29 = vcombine.low %v4009_v16, %v4016_v18  ;;  %v4026_v30 = vrot.slane %v4018_v19, %v21238_v42  ;;  %v3463_v31 = vsel %vm280_vm3, %v3418_v21, -inf  ;;  %19170 = vmatprep.subr.bf16.mxu1 %v20818_v25 }
 0x1e0   : > { %v3464_v33 = vmax.f32 %v3462_v26, %v3463_v31  ;;  %v3460_v35 = vsel %vm280_vm3, %v3417_v27, -inf }
 0x1e1   : > { %4149 = vst.msk [vmem:[#allocation5 + $0x11f] sm:$0xff] %vm280_vm3, %v4017_v29  ;;  %v3461_v36 = vmax.f32 %v3459_v34, %v3460_v35  ;;  %v4034_v37 = vcombine.low %v4026_v30, %v4033_v28 }
 0x1e2   : > { %v3491_v40 = vadd.f32 %v21546_v20, %v3464_v33  ;;  %v18960_v41 = vpop.f32.mrb[124].mxu0 }
 0x1e3   : > { %v3490_v43 = vadd.f32 %v21546_v20, %v3461_v36  ;;  %2292 = vst.msk [vmem:[#allocation2 + $0x3f0] sm:$0xff] %vm280_vm3, %v18960_v41  ;;  %v1895_v44 = vpop.f32.mrb[125].mxu0  ;;  %4150 = vst.msk [vmem:[#allocation5 + $0x127] sm:$0xff] %vm280_vm3, %v4034_v37  ;;  %v20869_v37 = vld [vmem:[%s24759_s2] ss:$0 sm:$0xff] }
 0x1e4   : > { %v3507_v47 = vmax.f32 %v3491_v40, 0.0  ;;  %2290 = vst.msk [vmem:[#allocation2 + $0x3e0] sm:$0xff] %vm280_vm3, %v1895_v44  ;;  %v18961_v49 = vpop.f32.mrb[126].mxu0  ;;  %v3322_v53 = vld [vmem:[#allocation2 + $0x3d0] ss:$2 sm:$0xff] }
 0x1e5   : > { %v3506_v50 = vmax.f32 %v3490_v43, 0.0  ;;  %2293 = vst.msk [vmem:[#allocation2 + $0x3f8] sm:$0xff] %vm280_vm3, %v18961_v49  ;;  %v1898_v51 = vpop.f32.mrb[127].mxu0  ;;  %v3386_v54 = vld [vmem:[#allocation2 + $0x3d1] ss:$2 sm:$0xff] }
 0x1e6   : > { %v3770_v46 = vrot.slane %v3507_v47, %v21238_v42  ;;  %2291 = vst.msk [vmem:[#allocation2 + $0x3e8] sm:$0xff] %vm280_vm3, %v1898_v51  ;;  %v3320_v62 = vld [vmem:[#allocation2 + $0x3c0] ss:$2 sm:$0xff]  ;;  %v3384_v63 = vld [vmem:[#allocation2 + $0x3c1] ss:$2 sm:$0xff]  ;;  %v3763_v2 = vcombine.high %v3507_v47, %v3507_v47  ;;  %v3420_v3 = vmax.f32 %v3322_v53, %v3386_v54 }
 0x1e7   : > { %v3746_v20 = vcombine.high %v3506_v50, %v3506_v50  ;;  %v3753_v52 = vrot.slane %v3506_v50, %v21238_v42  ;;  %v3419_v9 = vmax.f32 %v3320_v62, %v3384_v63 }
 0x1e8   : > { %v3778_v57 = vcombine.high %v3770_v46, %v3770_v46  ;;  %v5190_v58 = vld [vmem:[#allocation5 + $0x119] sm:$0xff]  ;;  %v3777_v21 = vrot.slane %v3763_v2, %v21238_v42  ;;  %v3468_v22 = vsel %vm280_vm3, %v3420_v3, -inf }
 0x1e9   : > { %v5084_v60 = vld [vmem:[#allocation5 + $0x118] sm:$0xff]  ;;  %v3760_v24 = vrot.slane %v3746_v20, %v21238_v42  ;;  %v3761_v61 = vcombine.high %v3753_v52, %v3753_v52  ;;  %v5240_v0 = vpack.c.bf16 %v5190_v58, %v5189_v55  ;;  %v3465_v30 = vsel %vm280_vm3, %v3419_v9, -inf }
 0x1ea   : > { %v5134_v1 = vpack.c.bf16 %v5084_v60, %v5083_v59  ;;  %v18964_v4 = vpop.f32.mrb[128].mxu0  ;;  %v4053_v5 = vcombine.low %v3770_v46, %v3778_v57  ;;  %v3779_v36 = vcombine.high %v3777_v21, %v3777_v21  ;;  %v5191_v55 = vld [vmem:[#allocation5 + $0x121] sm:$0xff] }
 0x1eb   : > { %v3762_v6 = vcombine.high %v3760_v24, %v3760_v24  ;;  %v4036_v7 = vcombine.low %v3753_v52, %v3761_v61  ;;  %2296 = vst.msk [vmem:[#allocation2 + $0x410] sm:$0xff] %vm280_vm3, %v18964_v4  ;;  %v1911_v8 = vpop.f32.mrb[129].mxu0  ;;  %19063 = vmatmul.mubr.msk.bf16.gmra.mrb[224].mxu0 %vm280_vm3, %v5240_v0  ;;  %v5085_v2 = vld [vmem:[#allocation5 + $0x120] sm:$0xff] }
 0x1ec   : > { %19135 = vmatmul.mubr.msk.bf16.vlgmr.msra.gmra.mrb[0].mxu1 %vm280_vm3, %v5134_v1  ;;  %v3326_v10 = vld [vmem:[#allocation2 + $0x3f0] ss:$2 sm:$0xff]  ;;  %v3390_v11 = vld [vmem:[#allocation2 + $0x3f1] ss:$2 sm:$0xff]  ;;  %2294 = vst.msk [vmem:[#allocation2 + $0x400] sm:$0xff] %vm280_vm3, %v1911_v8  ;;  %v18965_v12 = vpop.f32.mrb[130].mxu0  ;;  %v4067_v26 = vrot.slane %v4053_v5, %v21238_v42  ;;  %v4069_v51 = vcombine.low %v3777_v21, %v3779_v36 }
 0x1ed   : > { %v4050_v38 = vrot.slane %v4036_v7, %v21238_v42  ;;  %v4052_v14 = vcombine.low %v3760_v24, %v3762_v6  ;;  %v3422_v15 = vmax.f32 %v3326_v10, %v3390_v11  ;;  %v3324_v16 = vld [vmem:[#allocation2 + $0x3e0] ss:$2 sm:$0xff]  ;;  %v3388_v18 = vld [vmem:[#allocation2 + $0x3e1] ss:$2 sm:$0xff]  ;;  %2297 = vst.msk [vmem:[#allocation2 + $0x418] sm:$0xff] %vm280_vm3, %v18965_v12  ;;  %v1914_v19 = vpop.f32.mrb[131].mxu0  ;;  %19171 = vmatpush3.bf16.msra.mxu1 %v20818_v25 }
 0x1ee   : > { %v3421_v23 = vmax.f32 %v3324_v16, %v3388_v18  ;;  %2295 = vst.msk [vmem:[#allocation2 + $0x408] sm:$0xff] %vm280_vm3, %v1914_v19  ;;  %v4077_v3 = vrot.slane %v4069_v51, %v21238_v42 }
 0x1ef   : > { %v4051_v27 = vcombine.low %v4043_v13, %v4050_v38  ;;  %v4060_v28 = vrot.slane %v4052_v14, %v21238_v42  ;;  %v3469_v29 = vsel %vm280_vm3, %v3422_v15, -inf }
 0x1f0   : > { %v3470_v31 = vmax.f32 %v3468_v22, %v3469_v29  ;;  %v3466_v34 = vsel %vm280_vm3, %v3421_v23, -inf }
 0x1f1   : > { %4151 = vst.msk [vmem:[#allocation5 + $0x12f] sm:$0xff] %vm280_vm3, %v4051_v27  ;;  %v3467_v33 = vmax.f32 %v3465_v30, %v3466_v34  ;;  %v4068_v35 = vcombine.low %v4060_v28, %v4067_v26 }
 0x1f2   : > { %v3493_v40 = vadd.f32 %v20869_v37, %v3470_v31  ;;  %v18968_v41 = vpop.f32.mrb[132].mxu0 }
 0x1f3   : > { %v3492_v43 = vadd.f32 %v20869_v37, %v3467_v33  ;;  %2300 = vst.msk [vmem:[#allocation2 + $0x430] sm:$0xff] %vm280_vm3, %v18968_v41  ;;  %v1927_v44 = vpop.f32.mrb[133].mxu0  ;;  %4152 = vst.msk [vmem:[#allocation5 + $0x137] sm:$0xff] %vm280_vm3, %v4068_v35  ;;  %v21800_v33 = vld [vmem:[%s24759_s2] ss:$0 sm:$0xff]  ;;  %v20819_v35 = vld [vmem:[%s24760_s3 + $0x28] sm:$0xff]  }
 0x1f4   : > { %v3509_v45 = vmax.f32 %v3493_v40, 0.0  ;;  %2298 = vst.msk [vmem:[#allocation2 + $0x420] sm:$0xff] %vm280_vm3, %v1927_v44  ;;  %v18969_v47 = vpop.f32.mrb[134].mxu0  ;;  %v4159_v54 = vld [vmem:[#allocation2 + $0x410] ss:$2 sm:$0xff]  ;;  %19172 = vmatprep.subr.bf16.mxu1 %v20819_v35 }
 0x1f5   : > { %v3508_v49 = vmax.f32 %v3492_v43, 0.0  ;;  %2301 = vst.msk [vmem:[#allocation2 + $0x438] sm:$0xff] %vm280_vm3, %v18969_v47  ;;  %v1930_v50 = vpop.f32.mrb[135].mxu0  ;;  %v4223_v58 = vld [vmem:[#allocation2 + $0x411] ss:$2 sm:$0xff]  ;;  %19173 = vmatpush3.bf16.msra.mxu1 %v20819_v35 }
 0x1f6   : > { %v3797_v46 = vcombine.high %v3509_v45, %v3509_v45  ;;  %v3804_v20 = vrot.slane %v3509_v45, %v21238_v42  ;;  %2299 = vst.msk [vmem:[#allocation2 + $0x428] sm:$0xff] %vm280_vm3, %v1930_v50  ;;  %v4157_v63 = vld [vmem:[#allocation2 + $0x400] ss:$2 sm:$0xff]  ;;  %v4221_v0 = vld [vmem:[#allocation2 + $0x401] ss:$2 sm:$0xff]  ;;  %v4285_v11 = vmax.f32 %v4159_v54, %v4223_v58 }
 0x1f7   : > { %v3780_v52 = vcombine.high %v3508_v49, %v3508_v49  ;;  %v3787_v53 = vrot.slane %v3508_v49, %v21238_v42  ;;  %v4284_v38 = vmax.f32 %v4157_v63, %v4221_v0 }
 0x1f8   : > { %v3811_v56 = vrot.slane %v3797_v46, %v21238_v42  ;;  %v3812_v57 = vcombine.high %v3804_v20, %v3804_v20  ;;  %v5192_v59 = vld [vmem:[#allocation5 + $0x129] sm:$0xff]  ;;  %v4319_v31 = vsel %vm280_vm3, %v4285_v11, -inf }
 0x1f9   : > { %v5086_v60 = vld [vmem:[#allocation5 + $0x128] sm:$0xff]  ;;  %v3794_v24 = vrot.slane %v3780_v52, %v21238_v42  ;;  %v3795_v61 = vcombine.high %v3787_v53, %v3787_v53  ;;  %v4070_v62 = vcombine.low %v21288_v48, %v3787_v53  ;;  %v5241_v1 = vpack.c.bf16 %v5192_v59, %v5191_v55 }
 0x1fa   : > { %v3813_v4 = vcombine.high %v3811_v56, %v3811_v56  ;;  %v4103_v5 = vcombine.low %v3812_v57, %v3811_v56  ;;  %v18972_v6 = vpop.f32.mrb[136].mxu0  ;;  %v5135_v7 = vpack.c.bf16 %v5086_v60, %v5085_v2  ;;  %v4316_v36 = vsel %vm280_vm3, %v4284_v38, -inf  ;;  %v5193_v57 = vld [vmem:[#allocation5 + $0x131] sm:$0xff] }
 0x1fb   : > { %v3796_v8 = vcombine.high %v3794_v24, %v3794_v24  ;;  %v4084_v9 = vrot.slane %v4070_v62, %v21238_v42  ;;  %v4086_v10 = vcombine.low %v3795_v61, %v3794_v24  ;;  %2304 = vst.msk [vmem:[#allocation2 + $0x450] sm:$0xff] %vm280_vm3, %v18972_v6  ;;  %v1943_v12 = vpop.f32.mrb[137].mxu0  ;;  %19066 = vmatprep.mubr.msk.bf16.mxu0 %vm280_vm3, %v5241_v1  ;;  %v5087_v1 = vld [vmem:[#allocation5 + $0x130] sm:$0xff] }
 0x1fc   : > { %v4104_v13 = vcombine.low %v3813_v4, %v21288_v48  ;;  %v4163_v14 = vld [vmem:[#allocation2 + $0x430] ss:$2 sm:$0xff]  ;;  %v4227_v15 = vld [vmem:[#allocation2 + $0x431] ss:$2 sm:$0xff]  ;;  %2302 = vst.msk [vmem:[#allocation2 + $0x440] sm:$0xff] %vm280_vm3, %v1943_v12  ;;  %19138 = vmatprep.mubr.msk.bf16.mxu1 %vm280_vm3, %v5135_v7  ;;  %v18973_v16 = vpop.f32.mrb[138].mxu0  ;;  %v4111_v26 = vrot.slane %v4103_v5, %v21238_v42 }
 0x1fd   : > { %v4085_v18 = vcombine.low %v4077_v3, %v4084_v9  ;;  %v4087_v19 = vcombine.low %v3796_v8, %v3804_v20  ;;  %v4287_v21 = vmax.f32 %v4163_v14, %v4227_v15  ;;  %v4161_v22 = vld [vmem:[#allocation2 + $0x420] ss:$2 sm:$0xff]  ;;  %v4225_v23 = vld [vmem:[#allocation2 + $0x421] ss:$2 sm:$0xff]  ;;  %2305 = vst.msk [vmem:[#allocation2 + $0x458] sm:$0xff] %vm280_vm3, %v18973_v16  ;;  %v1946_v25 = vpop.f32.mrb[139].mxu0  ;;  %v4094_v29 = vrot.slane %v4086_v10, %v21238_v42 }
 0x1fe   : > { %v4118_v27 = vrot.slane %v4104_v13, %v21238_v42  ;;  %v4286_v28 = vmax.f32 %v4161_v22, %v4225_v23  ;;  %2303 = vst.msk [vmem:[#allocation2 + $0x448] sm:$0xff] %vm280_vm3, %v1946_v25  ;;  %v21818_v5 = vld [vmem:[#allocation5 + $0x161] sm:$0xff]  ;;  %v5200_v8 = vld [vmem:[#allocation5 + $0x169] sm:$0xff] }
 0x1ff   : > { %v4101_v30 = vrot.slane %v4087_v19, %v21238_v42  ;;  %4153 = vst.msk [vmem:[#allocation5 + $0x13f] sm:$0xff] %vm280_vm3, %v4085_v18  ;;  %v4320_v34 = vsel %vm280_vm3, %v4287_v21, -inf  ;;  %v21822_v9 = vld [vmem:[#allocation5 + $0x160] sm:$0xff]  ;;  %v5094_v10 = vld [vmem:[#allocation5 + $0x168] sm:$0xff] }
 0x200   : > { %v4321_v37 = vmax.f32 %v4319_v31, %v4320_v34  ;;  %v4317_v40 = vsel %vm280_vm3, %v4286_v28, -inf  ;;  %v4119_v41 = vcombine.low %v4111_v26, %v4118_v27  ;;  %v5198_v26 = vld [vmem:[#allocation5 + $0x159] sm:$0xff] }
 0x201   : > { %v4318_v43 = vmax.f32 %v4316_v36, %v4317_v40  ;;  %v4102_v44 = vcombine.low %v4094_v29, %v4101_v30  ;;  %v5092_v27 = vld [vmem:[#allocation5 + $0x158] sm:$0xff] }
 0x202   : > { %v4372_v45 = vadd.f32 %v21800_v33, %v4321_v37  ;;  %v18976_v47 = vpop.f32.mrb[140].mxu0  ;;  %4155 = vst.msk [vmem:[#allocation5 + $0x14f] sm:$0xff] %vm280_vm3, %v4119_v41 }
 0x203   : > { %v4371_v49 = vadd.f32 %v21800_v33, %v4318_v43  ;;  %2308 = vst.msk [vmem:[#allocation2 + $0x470] sm:$0xff] %vm280_vm3, %v18976_v47  ;;  %v1959_v50 = vpop.f32.mrb[141].mxu0  ;;  %4154 = vst.msk [vmem:[#allocation5 + $0x147] sm:$0xff] %vm280_vm3, %v4102_v44  ;;  %v5139_v47 = vpack.c.bf16 %v5094_v10, %v21822_v9 }
 0x204   : > { %v4388_v51 = vmax.f32 %v4372_v45, 0.0  ;;  %v4167_v46 = vld [vmem:[#allocation2 + $0x450] ss:$2 sm:$0xff]  ;;  %v4231_v20 = vld [vmem:[#allocation2 + $0x451] ss:$2 sm:$0xff]  ;;  %2306 = vst.msk [vmem:[#allocation2 + $0x460] sm:$0xff] %vm280_vm3, %v1959_v50  ;;  %v5245_v45 = vpack.c.bf16 %v5200_v8, %v21818_v5 }
 0x205   : > { %v18977_v52 = vpop.f32.mrb[142].mxu0  ;;  %v4387_v53 = vmax.f32 %v4371_v49, 0.0  ;;  %v4289_v61 = vmax.f32 %v4167_v46, %v4231_v20  ;;  %v4165_v62 = vld [vmem:[#allocation2 + $0x440] ss:$2 sm:$0xff]  ;;  %v4229_v63 = vld [vmem:[#allocation2 + $0x441] ss:$2 sm:$0xff] }
 0x206   : > { %2309 = vst.msk [vmem:[#allocation2 + $0x478] sm:$0xff] %vm280_vm3, %v18977_v52  ;;  %v1962_v54 = vpop.f32.mrb[143].mxu0  ;;  %v4452_v55 = vcombine.high %v4388_v51, %v4388_v51  ;;  %v4459_v56 = vrot.slane %v4388_v51, %v21238_v42  ;;  %v5194_v58 = vld [vmem:[#allocation5 + $0x139] sm:$0xff]  ;;  %v4288_v13 = vmax.f32 %v4165_v62, %v4229_v63 }
 0x207   : > { %2307 = vst.msk [vmem:[#allocation2 + $0x468] sm:$0xff] %vm280_vm3, %v1962_v54  ;;  %v5088_v59 = vld [vmem:[#allocation5 + $0x138] sm:$0xff]  ;;  %v4435_v60 = vcombine.high %v4387_v53, %v4387_v53  ;;  %v4442_v24 = vrot.slane %v4387_v53, %v21238_v42  ;;  %v5242_v0 = vpack.c.bf16 %v5194_v58, %v5193_v57  ;;  %v4325_v21 = vsel %vm280_vm3, %v4289_v61, -inf }
 0x208   : > { %v4466_v2 = vrot.slane %v4452_v55, %v21238_v42  ;;  %v4467_v3 = vcombine.high %v4459_v56, %v4459_v56  ;;  %v5136_v4 = vpack.c.bf16 %v5088_v59, %v5087_v1  ;;  %v4322_v51 = vsel %vm280_vm3, %v4288_v13, -inf  ;;  %v21861_v13 = vld [vmem:[%s24760_s3 + $0x30] sm:$0xff]  }
 0x209   : > { %v4449_v6 = vrot.slane %v4435_v60, %v21238_v42  ;;  %v4450_v7 = vcombine.high %v4442_v24, %v4442_v24  ;;  %19067 = vmatmul.mubr.msk.bf16.gmra.mrb[228].mxu0 %vm280_vm3, %v5242_v0  ;;  %v5197_v35 = vld [vmem:[#allocation5 + $0x151] sm:$0xff]  ;;  %19242 = vmatprep.subr.bf16.mxu1 %v21861_v13 }
 0x20a   : > { %v4468_v11 = vcombine.high %v4466_v2, %v4466_v2  ;;  %v4724_v12 = vcombine.low %v4459_v56, %v4467_v3  ;;  %19139 = vmatmul.mubr.msk.bf16.gmra.mrb[4].mxu1 %vm280_vm3, %v5136_v4  ;;  %v18980_v38 = vpop.f32.mrb[144].mxu0  ;;  %v5195_v14 = vld [vmem:[#allocation5 + $0x141] sm:$0xff]  ;;  %v5196_v15 = vld [vmem:[#allocation5 + $0x149] sm:$0xff]  ;;  %v5244_v54 = vpack.c.bf16 %v5198_v26, %v5197_v35 }
 0x20b   : > { %v5089_v16 = vld [vmem:[#allocation5 + $0x140] sm:$0xff]  ;;  %v4451_v18 = vcombine.high %v4449_v6, %v4449_v6  ;;  %v4707_v19 = vcombine.low %v4442_v24, %v4450_v7  ;;  %2312 = vst.msk [vmem:[#allocation2 + $0x490] sm:$0xff] %vm280_vm3, %v18980_v38  ;;  %v1975_v22 = vpop.f32.mrb[145].mxu0  ;;  %v5243_v23 = vpack.c.bf16 %v5196_v15, %v5195_v14  ;;  %v5090_v25 = vld [vmem:[#allocation5 + $0x148] sm:$0xff]  ;;  %v5091_v44 = vld [vmem:[#allocation5 + $0x150] sm:$0xff] }
 0x20c   : > { %v4725_v28 = vcombine.low %v4466_v2, %v4468_v11  ;;  %2310 = vst.msk [vmem:[#allocation2 + $0x480] sm:$0xff] %vm280_vm3, %v1975_v22  ;;  %v18981_v31 = vpop.f32.mrb[146].mxu0  ;;  %v5137_v34 = vpack.c.bf16 %v5090_v25, %v5089_v16  ;;  %v4732_v49 = vrot.slane %v4724_v12, %v21238_v42  ;;  %v5138_v58 = vpack.c.bf16 %v5092_v27, %v5091_v44  ;;  %v5201_v12 = vld [vmem:[#allocation5 + $0x171] sm:$0xff] }
 0x20d   : > { %v4171_v29 = vld [vmem:[#allocation2 + $0x470] ss:$2 sm:$0xff]  ;;  %v4235_v30 = vld [vmem:[#allocation2 + $0x471] ss:$2 sm:$0xff]  ;;  %v4708_v36 = vcombine.low %v4449_v6, %v4451_v18  ;;  %2313 = vst.msk [vmem:[#allocation2 + $0x498] sm:$0xff] %vm280_vm3, %v18981_v31  ;;  %v1978_v43 = vpop.f32.mrb[147].mxu0  ;;  %19070 = vmatprep.mubr.msk.bf16.mxu0 %vm280_vm3, %v5243_v23  ;;  %v4715_v20 = vrot.slane %v4707_v19, %v21238_v42 }
 0x20e   : > { %v4291_v37 = vmax.f32 %v4171_v29, %v4235_v30  ;;  %v4169_v40 = vld [vmem:[#allocation2 + $0x460] ss:$2 sm:$0xff]  ;;  %v4233_v41 = vld [vmem:[#allocation2 + $0x461] ss:$2 sm:$0xff]  ;;  %v4739_v50 = vrot.slane %v4725_v28, %v21238_v42  ;;  %2311 = vst.msk [vmem:[#allocation2 + $0x488] sm:$0xff] %vm280_vm3, %v1978_v43  ;;  %19142 = vmatprep.mubr.msk.bf16.mxu1 %vm280_vm3, %v5137_v34 }
 0x20f   : > { %v4290_v46 = vmax.f32 %v4169_v40, %v4233_v41  ;;  %v4722_v52 = vrot.slane %v4708_v36, %v21238_v42  ;;  %v5095_v19 = vld [vmem:[#allocation5 + $0x170] sm:$0xff] }
 0x210   : > { %v4326_v53 = vsel %vm280_vm3, %v4291_v37, -inf  ;;  %v4740_v55 = vcombine.low %v4732_v49, %v4739_v50 }
 0x211   : > { %v4327_v56 = vmax.f32 %v4325_v21, %v4326_v53  ;;  %v4323_v57 = vsel %vm280_vm3, %v4290_v46, -inf  ;;  %v4723_v59 = vcombine.low %v4715_v20, %v4722_v52  ;;  %19071 = vmatmul.mubr.msk.bf16.gmra.mrb[232].mxu0 %vm280_vm3, %v5244_v54 }
 0x212   : > { %v4324_v60 = vmax.f32 %v4322_v51, %v4323_v57  ;;  %5032 = vst.msk [vmem:[#allocation5 + $0x183] sm:$0xff] %vm280_vm3, %v4740_v55  ;;  %19143 = vmatmul.mubr.msk.bf16.gmra.mrb[8].mxu1 %vm280_vm3, %v5138_v58  ;;  %v18984_v61 = vpop.f32.mrb[148].mxu0  ;;  %19074 = vmatprep.mubr.msk.bf16.mxu0 %vm280_vm3, %v5245_v45 }
 0x213   : > { %v4374_v24 = vadd.f32 %v21800_v33, %v4327_v56  ;;  %5031 = vst.msk [vmem:[#allocation5 + $0x17b] sm:$0xff] %vm280_vm3, %v4723_v59  ;;  %2316 = vst.msk [vmem:[#allocation2 + $0x4b0] sm:$0xff] %vm280_vm3, %v18984_v61  ;;  %v1991_v63 = vpop.f32.mrb[149].mxu0  ;;  %19146 = vmatprep.mubr.msk.bf16.mxu1 %vm280_vm3, %v5139_v47 }
 0x214   : > { %v4373_v62 = vadd.f32 %v21800_v33, %v4324_v60  ;;  %2314 = vst.msk [vmem:[#allocation2 + $0x4a0] sm:$0xff] %vm280_vm3, %v1991_v63  ;;  %v18985_v1 = vpop.f32.mrb[150].mxu0  ;;  %v4175_v8 = vld [vmem:[#allocation2 + $0x490] ss:$2 sm:$0xff]  ;;  %v4239_v9 = vld [vmem:[#allocation2 + $0x491] ss:$2 sm:$0xff] }
 0x215   : > { %v4390_v0 = vmax.f32 %v4374_v24, 0.0  ;;  %2317 = vst.msk [vmem:[#allocation2 + $0x4b8] sm:$0xff] %vm280_vm3, %v18985_v1  ;;  %v1994_v3 = vpop.f32.mrb[151].mxu0  ;;  %v4173_v16 = vld [vmem:[#allocation2 + $0x480] ss:$2 sm:$0xff]  ;;  %v4293_v21 = vmax.f32 %v4175_v8, %v4239_v9 }
 0x216   : > { %v4389_v2 = vmax.f32 %v4373_v62, 0.0  ;;  %2315 = vst.msk [vmem:[#allocation2 + $0x4a8] sm:$0xff] %vm280_vm3, %v1994_v3  ;;  %v4237_v18 = vld [vmem:[#allocation2 + $0x481] ss:$2 sm:$0xff] }
 0x217   : > { %v4486_v4 = vcombine.high %v4390_v0, %v4390_v0  ;;  %v4493_v5 = vrot.slane %v4390_v0, %v21238_v42  ;;  %v4292_v31 = vmax.f32 %v4173_v16, %v4237_v18  ;;  %v4331_v50 = vsel %vm280_vm3, %v4293_v21, -inf }
 0x218   : > { %v4469_v6 = vcombine.high %v4389_v2, %v4389_v2  ;;  %v4476_v7 = vrot.slane %v4389_v2, %v21238_v42 }
 0x219   : > { %v21856_v10 = vrot.slane %v4486_v4, %v21238_v42  ;;  %v4501_v11 = vcombine.high %v4493_v5, %v4493_v5  ;;  %v4328_v54 = vsel %vm280_vm3, %v4292_v31, -inf }
 0x21a   : > { %v4483_v38 = vrot.slane %v4469_v6, %v21238_v42  ;;  %v4484_v14 = vcombine.high %v4476_v7, %v4476_v7  ;;  %v4741_v15 = vcombine.low %v21288_v48, %v4476_v7  ;;  %v18988_v22 = vpop.f32.mrb[152].mxu0  ;;  %v5202_v23 = vld [vmem:[#allocation5 + $0x179] sm:$0xff]  ;;  %v5203_v8 = vld [vmem:[#allocation5 + $0x181] sm:$0xff] }
 0x21b   : > { %v5096_v25 = vld [vmem:[#allocation5 + $0x178] sm:$0xff]  ;;  %v4759_v26 = vcombine.low %v4501_v11, %v21856_v10  ;;  %2320 = vst.msk [vmem:[#allocation2 + $0x4d0] sm:$0xff] %vm280_vm3, %v18988_v22  ;;  %v2007_v29 = vpop.f32.mrb[153].mxu0  ;;  %v5246_v30 = vpack.c.bf16 %v5202_v23, %v5201_v12  ;;  %v4502_v62 = vcombine.high %v21856_v10, %v21856_v10  ;;  %v5097_v12 = vld [vmem:[#allocation5 + $0x180] sm:$0xff] }
 0x21c   : > { %v4485_v27 = vcombine.high %v4483_v38, %v4483_v38  ;;  %v4742_v28 = vcombine.low %v4484_v14, %v4483_v38  ;;  %v4179_v34 = vld [vmem:[#allocation2 + $0x4b0] ss:$2 sm:$0xff]  ;;  %v4243_v35 = vld [vmem:[#allocation2 + $0x4b1] ss:$2 sm:$0xff]  ;;  %2318 = vst.msk [vmem:[#allocation2 + $0x4c0] sm:$0xff] %vm280_vm3, %v2007_v29  ;;  %v18989_v36 = vpop.f32.mrb[154].mxu0  ;;  %v5140_v37 = vpack.c.bf16 %v5096_v25, %v5095_v19  ;;  %v4749_v40 = vrot.slane %v4741_v15, %v21238_v42 }
 0x21d   : > { %v4295_v44 = vmax.f32 %v4179_v34, %v4243_v35  ;;  %v4177_v45 = vld [vmem:[#allocation2 + $0x4a0] ss:$2 sm:$0xff]  ;;  %v4241_v47 = vld [vmem:[#allocation2 + $0x4a1] ss:$2 sm:$0xff]  ;;  %2321 = vst.msk [vmem:[#allocation2 + $0x4d8] sm:$0xff] %vm280_vm3, %v18989_v36  ;;  %v2010_v49 = vpop.f32.mrb[155].mxu0  ;;  %19075 = vmatmul.mubr.msk.bf16.gmra.mrb[236].mxu0 %vm280_vm3, %v5246_v30  ;;  %v4773_v46 = vrot.slane %v4759_v26, %v21238_v42  ;;  %v4775_v9 = vcombine.low %v4502_v62, %v21288_v48 }
 0x21e   : > { %v4756_v41 = vrot.slane %v4742_v28, %v21238_v42  ;;  %v4758_v43 = vcombine.low %v4485_v27, %v4493_v5  ;;  %v4294_v51 = vmax.f32 %v4177_v45, %v4241_v47  ;;  %2319 = vst.msk [vmem:[#allocation2 + $0x4c8] sm:$0xff] %vm280_vm3, %v2010_v49  ;;  %19147 = vmatmul.mubr.msk.bf16.gmra.mrb[12].mxu1 %vm280_vm3, %v5140_v37 }
 0x21f   : > { %v4332_v53 = vsel %vm280_vm3, %v4295_v44, -inf  ;;  %v4783_v36 = vrot.slane %v4775_v9, %v21238_v42 }
 0x220   : > { %v4757_v20 = vcombine.low %v4749_v40, %v4756_v41  ;;  %v4766_v52 = vrot.slane %v4758_v43, %v21238_v42  ;;  %v4333_v55 = vmax.f32 %v4331_v50, %v4332_v53  ;;  %v4329_v56 = vsel %vm280_vm3, %v4294_v51, -inf }
 0x221   : > { %v4330_v57 = vmax.f32 %v4328_v54, %v4329_v56 }
 0x222   : > { %5033 = vst.msk [vmem:[#allocation5 + $0x18b] sm:$0xff] %vm280_vm3, %v4757_v20  ;;  %v4774_v58 = vcombine.low %v4766_v52, %v4773_v46  ;;  %v4376_v59 = vadd.f32 %v21800_v33, %v4333_v55  ;;  %v18992_v60 = vpop.f32.mrb[156].mxu0 }
 0x223   : > { %v4375_v24 = vadd.f32 %v21800_v33, %v4330_v57  ;;  %2324 = vst.msk [vmem:[#allocation2 + $0x4f0] sm:$0xff] %vm280_vm3, %v18992_v60  ;;  %v2023_v61 = vpop.f32.mrb[157].mxu0 }
 0x224   : > { %5034 = vst.msk [vmem:[#allocation5 + $0x193] sm:$0xff] %vm280_vm3, %v4774_v58  ;;  %v4392_v63 = vmax.f32 %v4376_v59, 0.0  ;;  %2322 = vst.msk [vmem:[#allocation2 + $0x4e0] sm:$0xff] %vm280_vm3, %v2023_v61  ;;  %v18993_v0 = vpop.f32.mrb[158].mxu0  ;;  %v4183_v6 = vld [vmem:[#allocation2 + $0x4d0] ss:$2 sm:$0xff] }
 0x225   : > { %v4391_v1 = vmax.f32 %v4375_v24, 0.0  ;;  %2325 = vst.msk [vmem:[#allocation2 + $0x4f8] sm:$0xff] %vm280_vm3, %v18993_v0  ;;  %v2026_v2 = vpop.f32.mrb[159].mxu0  ;;  %v4247_v7 = vld [vmem:[#allocation2 + $0x4d1] ss:$2 sm:$0xff] }
 0x226   : > { %v4527_v3 = vrot.slane %v4392_v63, %v21238_v42  ;;  %2323 = vst.msk [vmem:[#allocation2 + $0x4e8] sm:$0xff] %vm280_vm3, %v2026_v2  ;;  %v4181_v16 = vld [vmem:[#allocation2 + $0x4c0] ss:$2 sm:$0xff]  ;;  %v4245_v18 = vld [vmem:[#allocation2 + $0x4c1] ss:$2 sm:$0xff]  ;;  %v4520_v22 = vcombine.high %v4392_v63, %v4392_v63  ;;  %v4297_v23 = vmax.f32 %v4183_v6, %v4247_v7 }
 0x227   : > { %v4503_v4 = vcombine.high %v4391_v1, %v4391_v1  ;;  %v4510_v5 = vrot.slane %v4391_v1, %v21238_v42  ;;  %v4296_v30 = vmax.f32 %v4181_v16, %v4245_v18 }
 0x228   : > { %v4535_v10 = vcombine.high %v4527_v3, %v4527_v3  ;;  %v4534_v47 = vrot.slane %v4520_v22, %v21238_v42  ;;  %v4337_v49 = vsel %vm280_vm3, %v4297_v23, -inf }
 0x229   : > { %v5204_v11 = vld [vmem:[#allocation5 + $0x189] sm:$0xff]  ;;  %v4517_v14 = vrot.slane %v4503_v4, %v21238_v42  ;;  %v4518_v15 = vcombine.high %v4510_v5, %v4510_v5  ;;  %v4334_v53 = vsel %vm280_vm3, %v4296_v30, -inf }
 0x22a   : > { %v5098_v38 = vld [vmem:[#allocation5 + $0x188] sm:$0xff]  ;;  %v5247_v19 = vpack.c.bf16 %v5204_v11, %v5203_v8  ;;  %v18996_v25 = vpop.f32.mrb[160].mxu0  ;;  %v4793_v26 = vcombine.low %v4527_v3, %v4535_v10  ;;  %v4536_v58 = vcombine.high %v4534_v47, %v4534_v47 }
 0x22b   : > { %v5141_v21 = vpack.c.bf16 %v5098_v38, %v5097_v12  ;;  %v4519_v27 = vcombine.high %v4517_v14, %v4517_v14  ;;  %v4776_v28 = vcombine.low %v4510_v5, %v4518_v15  ;;  %2328 = vst.msk [vmem:[#allocation2 + $0x510] sm:$0xff] %vm280_vm3, %v18996_v25  ;;  %v2039_v29 = vpop.f32.mrb[161].mxu0  ;;  %v5205_v8 = vld [vmem:[#allocation5 + $0x191] sm:$0xff] }
 0x22c   : > { %19078 = vmatprep.mubr.msk.bf16.mxu0 %vm280_vm3, %v5247_v19  ;;  %v4187_v31 = vld [vmem:[#allocation2 + $0x4f0] ss:$2 sm:$0xff]  ;;  %v4251_v34 = vld [vmem:[#allocation2 + $0x4f1] ss:$2 sm:$0xff]  ;;  %2326 = vst.msk [vmem:[#allocation2 + $0x500] sm:$0xff] %vm280_vm3, %v2039_v29  ;;  %v18997_v35 = vpop.f32.mrb[162].mxu0  ;;  %v4807_v51 = vrot.slane %v4793_v26, %v21238_v42  ;;  %v4809_v2 = vcombine.low %v4534_v47, %v4536_v58 }
 0x22d   : > { %19150 = vmatprep.mubr.msk.bf16.mxu1 %vm280_vm3, %v5141_v21  ;;  %v4790_v37 = vrot.slane %v4776_v28, %v21238_v42  ;;  %v4792_v40 = vcombine.low %v4517_v14, %v4519_v27  ;;  %v4299_v41 = vmax.f32 %v4187_v31, %v4251_v34  ;;  %v4185_v43 = vld [vmem:[#allocation2 + $0x4e0] ss:$2 sm:$0xff]  ;;  %v4249_v44 = vld [vmem:[#allocation2 + $0x4e1] ss:$2 sm:$0xff]  ;;  %2329 = vst.msk [vmem:[#allocation2 + $0x518] sm:$0xff] %vm280_vm3, %v18997_v35  ;;  %v2042_v45 = vpop.f32.mrb[163].mxu0 }
 0x22e   : > { %v4298_v50 = vmax.f32 %v4185_v43, %v4249_v44  ;;  %2327 = vst.msk [vmem:[#allocation2 + $0x508] sm:$0xff] %vm280_vm3, %v2042_v45  ;;  %v5099_v22 = vld [vmem:[#allocation5 + $0x190] sm:$0xff]  ;;  %v4817_v23 = vrot.slane %v4809_v2, %v21238_v42 }
 0x22f   : > { %v4791_v46 = vcombine.low %v4783_v36, %v4790_v37  ;;  %v4800_v20 = vrot.slane %v4792_v40, %v21238_v42  ;;  %v4338_v52 = vsel %vm280_vm3, %v4299_v41, -inf }
 0x230   : > { %v4339_v54 = vmax.f32 %v4337_v49, %v4338_v52  ;;  %v4335_v55 = vsel %vm280_vm3, %v4298_v50, -inf }
 0x231   : > { %5035 = vst.msk [vmem:[#allocation5 + $0x19b] sm:$0xff] %vm280_vm3, %v4791_v46  ;;  %v4336_v56 = vmax.f32 %v4334_v53, %v4335_v55  ;;  %v4808_v57 = vcombine.low %v4800_v20, %v4807_v51 }
 0x232   : > { %v4378_v59 = vadd.f32 %v21800_v33, %v4339_v54  ;;  %v19000_v60 = vpop.f32.mrb[164].mxu0 }
 0x233   : > { %v4377_v24 = vadd.f32 %v21800_v33, %v4336_v56  ;;  %2332 = vst.msk [vmem:[#allocation2 + $0x530] sm:$0xff] %vm280_vm3, %v19000_v60  ;;  %v2055_v61 = vpop.f32.mrb[165].mxu0  ;;  %5036 = vst.msk [vmem:[#allocation5 + $0x1a3] sm:$0xff] %vm280_vm3, %v4808_v57 }
 0x234   : > { %v4394_v62 = vmax.f32 %v4378_v59, 0.0  ;;  %2330 = vst.msk [vmem:[#allocation2 + $0x520] sm:$0xff] %vm280_vm3, %v2055_v61  ;;  %v19001_v63 = vpop.f32.mrb[166].mxu0  ;;  %v4191_v7 = vld [vmem:[#allocation2 + $0x510] ss:$2 sm:$0xff] }
 0x235   : > { %v4393_v0 = vmax.f32 %v4377_v24, 0.0  ;;  %2333 = vst.msk [vmem:[#allocation2 + $0x538] sm:$0xff] %vm280_vm3, %v19001_v63  ;;  %v2058_v1 = vpop.f32.mrb[167].mxu0  ;;  %v4255_v11 = vld [vmem:[#allocation2 + $0x511] ss:$2 sm:$0xff] }
 0x236   : > { %v4554_v3 = vcombine.high %v4394_v62, %v4394_v62  ;;  %v4561_v4 = vrot.slane %v4394_v62, %v21238_v42  ;;  %2331 = vst.msk [vmem:[#allocation2 + $0x528] sm:$0xff] %vm280_vm3, %v2058_v1  ;;  %v4189_v18 = vld [vmem:[#allocation2 + $0x500] ss:$2 sm:$0xff]  ;;  %v4253_v19 = vld [vmem:[#allocation2 + $0x501] ss:$2 sm:$0xff]  ;;  %v4301_v34 = vmax.f32 %v4191_v7, %v4255_v11 }
 0x237   : > { %v4537_v5 = vcombine.high %v4393_v0, %v4393_v0  ;;  %v4544_v6 = vrot.slane %v4393_v0, %v21238_v42  ;;  %v4300_v37 = vmax.f32 %v4189_v18, %v4253_v19 }
 0x238   : > { %v4568_v9 = vrot.slane %v4554_v3, %v21238_v42  ;;  %v4569_v10 = vcombine.high %v4561_v4, %v4561_v4  ;;  %v5206_v12 = vld [vmem:[#allocation5 + $0x199] sm:$0xff]  ;;  %v4343_v55 = vsel %vm280_vm3, %v4301_v34, -inf }
 0x239   : > { %v5100_v38 = vld [vmem:[#allocation5 + $0x198] sm:$0xff]  ;;  %v4551_v14 = vrot.slane %v4537_v5, %v21238_v42  ;;  %v4552_v15 = vcombine.high %v4544_v6, %v4544_v6  ;;  %v4810_v16 = vcombine.low %v21288_v48, %v4544_v6  ;;  %v5248_v21 = vpack.c.bf16 %v5206_v12, %v5205_v8 }
 0x23a   : > { %v4570_v25 = vcombine.high %v4568_v9, %v4568_v9  ;;  %v4843_v26 = vcombine.low %v4569_v10, %v4568_v9  ;;  %v19004_v27 = vpop.f32.mrb[168].mxu0  ;;  %v5142_v28 = vpack.c.bf16 %v5100_v38, %v5099_v22  ;;  %v4340_v57 = vsel %vm280_vm3, %v4300_v37, -inf  ;;  %v5207_v8 = vld [vmem:[#allocation5 + $0x1a1] sm:$0xff] }
 0x23b   : > { %v4553_v29 = vcombine.high %v4551_v14, %v4551_v14  ;;  %v4824_v30 = vrot.slane %v4810_v16, %v21238_v42  ;;  %v4826_v31 = vcombine.low %v4552_v15, %v4551_v14  ;;  %2336 = vst.msk [vmem:[#allocation2 + $0x550] sm:$0xff] %vm280_vm3, %v19004_v27  ;;  %v2071_v35 = vpop.f32.mrb[169].mxu0  ;;  %19079 = vmatmul.mubr.msk.bf16.gmra.mrb[240].mxu0 %vm280_vm3, %v5248_v21  ;;  %v5101_v14 = vld [vmem:[#allocation5 + $0x1a0] sm:$0xff] }
 0x23c   : > { %v4844_v36 = vcombine.low %v4570_v25, %v21288_v48  ;;  %v4195_v40 = vld [vmem:[#allocation2 + $0x530] ss:$2 sm:$0xff]  ;;  %v4259_v41 = vld [vmem:[#allocation2 + $0x531] ss:$2 sm:$0xff]  ;;  %2334 = vst.msk [vmem:[#allocation2 + $0x540] sm:$0xff] %vm280_vm3, %v2071_v35  ;;  %19151 = vmatmul.mubr.msk.bf16.gmra.mrb[16].mxu1 %vm280_vm3, %v5142_v28  ;;  %v19005_v43 = vpop.f32.mrb[170].mxu0  ;;  %v4851_v46 = vrot.slane %v4843_v26, %v21238_v42 }
 0x23d   : > { %v4825_v44 = vcombine.low %v4817_v23, %v4824_v30  ;;  %v4827_v45 = vcombine.low %v4553_v29, %v4561_v4  ;;  %v4303_v47 = vmax.f32 %v4195_v40, %v4259_v41  ;;  %v4193_v49 = vld [vmem:[#allocation2 + $0x520] ss:$2 sm:$0xff]  ;;  %v4257_v50 = vld [vmem:[#allocation2 + $0x521] ss:$2 sm:$0xff]  ;;  %2337 = vst.msk [vmem:[#allocation2 + $0x558] sm:$0xff] %vm280_vm3, %v19005_v43  ;;  %v2074_v51 = vpop.f32.mrb[171].mxu0  ;;  %v4834_v53 = vrot.slane %v4826_v31, %v21238_v42 }
 0x23e   : > { %v4858_v20 = vrot.slane %v4844_v36, %v21238_v42  ;;  %v4302_v52 = vmax.f32 %v4193_v49, %v4257_v50  ;;  %2335 = vst.msk [vmem:[#allocation2 + $0x548] sm:$0xff] %vm280_vm3, %v2074_v51 }
 0x23f   : > { %v4841_v54 = vrot.slane %v4827_v45, %v21238_v42  ;;  %5037 = vst.msk [vmem:[#allocation5 + $0x1ab] sm:$0xff] %vm280_vm3, %v4825_v44  ;;  %v4344_v56 = vsel %vm280_vm3, %v4303_v47, -inf }
 0x240   : > { %v4345_v58 = vmax.f32 %v4343_v55, %v4344_v56  ;;  %v4341_v59 = vsel %vm280_vm3, %v4302_v52, -inf  ;;  %v4859_v60 = vcombine.low %v4851_v46, %v4858_v20 }
 0x241   : > { %v4342_v24 = vmax.f32 %v4340_v57, %v4341_v59  ;;  %v4842_v61 = vcombine.low %v4834_v53, %v4841_v54 }
 0x242   : > { %v4380_v62 = vadd.f32 %v21800_v33, %v4345_v58  ;;  %v19008_v63 = vpop.f32.mrb[172].mxu0  ;;  %5039 = vst.msk [vmem:[#allocation5 + $0x1bb] sm:$0xff] %vm280_vm3, %v4859_v60 }
 0x243   : > { %v4379_v0 = vadd.f32 %v21800_v33, %v4342_v24  ;;  %2340 = vst.msk [vmem:[#allocation2 + $0x570] sm:$0xff] %vm280_vm3, %v19008_v63  ;;  %v2087_v1 = vpop.f32.mrb[173].mxu0  ;;  %5038 = vst.msk [vmem:[#allocation5 + $0x1b3] sm:$0xff] %vm280_vm3, %v4842_v61 }
 0x244   : > { %v4396_v2 = vmax.f32 %v4380_v62, 0.0  ;;  %2338 = vst.msk [vmem:[#allocation2 + $0x560] sm:$0xff] %vm280_vm3, %v2087_v1  ;;  %v19009_v3 = vpop.f32.mrb[174].mxu0  ;;  %v4199_v18 = vld [vmem:[#allocation2 + $0x550] ss:$2 sm:$0xff] }
 0x245   : > { %v4395_v4 = vmax.f32 %v4379_v0, 0.0  ;;  %2341 = vst.msk [vmem:[#allocation2 + $0x578] sm:$0xff] %vm280_vm3, %v19009_v3  ;;  %v2090_v5 = vpop.f32.mrb[175].mxu0  ;;  %v4263_v19 = vld [vmem:[#allocation2 + $0x551] ss:$2 sm:$0xff] }
 0x246   : > { %v4588_v6 = vcombine.high %v4396_v2, %v4396_v2  ;;  %v4595_v7 = vrot.slane %v4396_v2, %v21238_v42  ;;  %2339 = vst.msk [vmem:[#allocation2 + $0x568] sm:$0xff] %vm280_vm3, %v2090_v5  ;;  %v5208_v9 = vld [vmem:[#allocation5 + $0x1a9] sm:$0xff]  ;;  %v4305_v37 = vmax.f32 %v4199_v18, %v4263_v19 }
 0x247   : > { %v5102_v10 = vld [vmem:[#allocation5 + $0x1a8] sm:$0xff]  ;;  %v4571_v11 = vcombine.high %v4395_v4, %v4395_v4  ;;  %v4578_v12 = vrot.slane %v4395_v4, %v21238_v42  ;;  %v5249_v38 = vpack.c.bf16 %v5208_v9, %v5207_v8 }
 0x248   : > { %v4602_v15 = vrot.slane %v4588_v6, %v21238_v42  ;;  %v4603_v16 = vcombine.high %v4595_v7, %v4595_v7  ;;  %v5143_v21 = vpack.c.bf16 %v5102_v10, %v5101_v14  ;;  %v4197_v25 = vld [vmem:[#allocation2 + $0x540] ss:$2 sm:$0xff]  ;;  %v4261_v26 = vld [vmem:[#allocation2 + $0x541] ss:$2 sm:$0xff]  ;;  %v4349_v60 = vsel %vm280_vm3, %v4305_v37, -inf }
 0x249   : > { %v4585_v22 = vrot.slane %v4571_v11, %v21238_v42  ;;  %v4586_v23 = vcombine.high %v4578_v12, %v4578_v12  ;;  %19082 = vmatprep.mubr.msk.bf16.mxu0 %vm280_vm3, %v5249_v38  ;;  %v4304_v45 = vmax.f32 %v4197_v25, %v4261_v26 }
 0x24a   : > { %v4604_v27 = vcombine.high %v4602_v15, %v4602_v15  ;;  %v4877_v28 = vcombine.low %v4595_v7, %v4603_v16  ;;  %19154 = vmatprep.mubr.msk.bf16.mxu1 %vm280_vm3, %v5143_v21  ;;  %v19012_v29 = vpop.f32.mrb[176].mxu0  ;;  %v5209_v30 = vld [vmem:[#allocation5 + $0x1b1] sm:$0xff]  ;;  %v5210_v31 = vld [vmem:[#allocation5 + $0x1b9] sm:$0xff] }
 0x24b   : > { %v5103_v34 = vld [vmem:[#allocation5 + $0x1b0] sm:$0xff]  ;;  %v4587_v35 = vcombine.high %v4585_v22, %v4585_v22  ;;  %v4860_v36 = vcombine.low %v4578_v12, %v4586_v23  ;;  %2344 = vst.msk [vmem:[#allocation2 + $0x590] sm:$0xff] %vm280_vm3, %v19012_v29  ;;  %v2103_v40 = vpop.f32.mrb[177].mxu0  ;;  %v5250_v41 = vpack.c.bf16 %v5210_v31, %v5209_v30  ;;  %v5104_v43 = vld [vmem:[#allocation5 + $0x1b8] sm:$0xff]  ;;  %v4346_v62 = vsel %vm280_vm3, %v4304_v45, -inf }
 0x24c   : > { %v4878_v44 = vcombine.low %v4602_v15, %v4604_v27  ;;  %v4203_v47 = vld [vmem:[#allocation2 + $0x570] ss:$2 sm:$0xff]  ;;  %v4267_v49 = vld [vmem:[#allocation2 + $0x571] ss:$2 sm:$0xff]  ;;  %2342 = vst.msk [vmem:[#allocation2 + $0x580] sm:$0xff] %vm280_vm3, %v2103_v40  ;;  %v19013_v50 = vpop.f32.mrb[178].mxu0  ;;  %v5144_v51 = vpack.c.bf16 %v5104_v43, %v5103_v34  ;;  %v4885_v55 = vrot.slane %v4877_v28, %v21238_v42 }
 0x24d   : > { %v4861_v46 = vcombine.low %v4585_v22, %v4587_v35  ;;  %v4307_v20 = vmax.f32 %v4203_v47, %v4267_v49  ;;  %v4201_v52 = vld [vmem:[#allocation2 + $0x560] ss:$2 sm:$0xff]  ;;  %v4265_v53 = vld [vmem:[#allocation2 + $0x561] ss:$2 sm:$0xff]  ;;  %2345 = vst.msk [vmem:[#allocation2 + $0x598] sm:$0xff] %vm280_vm3, %v19013_v50  ;;  %v2106_v54 = vpop.f32.mrb[179].mxu0  ;;  %19083 = vmatmul.mubr.msk.bf16.gmra.mrb[244].mxu0 %vm280_vm3, %v5250_v41  ;;  %v4868_v58 = vrot.slane %v4860_v36, %v21238_v42 }
 0x24e   : > { %v4892_v56 = vrot.slane %v4878_v44, %v21238_v42  ;;  %v4306_v57 = vmax.f32 %v4201_v52, %v4265_v53  ;;  %2343 = vst.msk [vmem:[#allocation2 + $0x588] sm:$0xff] %vm280_vm3, %v2106_v54  ;;  %19155 = vmatmul.mubr.msk.bf16.gmra.mrb[20].mxu1 %vm280_vm3, %v5144_v51 }
 0x24f   : > { %v4875_v59 = vrot.slane %v4861_v46, %v21238_v42  ;;  %v4350_v24 = vsel %vm280_vm3, %v4307_v20, -inf }
 0x250   : > { %v4893_v61 = vcombine.low %v4885_v55, %v4892_v56  ;;  %v4351_v63 = vmax.f32 %v4349_v60, %v4350_v24  ;;  %v4347_v0 = vsel %vm280_vm3, %v4306_v57, -inf }
 0x251   : > { %v4876_v1 = vcombine.low %v4868_v58, %v4875_v59  ;;  %v4348_v2 = vmax.f32 %v4346_v62, %v4347_v0 }
 0x252   : > { %5041 = vst.msk [vmem:[#allocation5 + $0x1cb] sm:$0xff] %vm280_vm3, %v4893_v61  ;;  %v4382_v3 = vadd.f32 %v21800_v33, %v4351_v63  ;;  %v19016_v4 = vpop.f32.mrb[180].mxu0 }
 0x253   : > { %5040 = vst.msk [vmem:[#allocation5 + $0x1c3] sm:$0xff] %vm280_vm3, %v4876_v1  ;;  %v4381_v5 = vadd.f32 %v21800_v33, %v4348_v2  ;;  %2348 = vst.msk [vmem:[#allocation2 + $0x5b0] sm:$0xff] %vm280_vm3, %v19016_v4  ;;  %v2119_v6 = vpop.f32.mrb[181].mxu0 }
 0x254   : > { %v4398_v7 = vmax.f32 %v4382_v3, 0.0  ;;  %2346 = vst.msk [vmem:[#allocation2 + $0x5a0] sm:$0xff] %vm280_vm3, %v2119_v6  ;;  %v19017_v8 = vpop.f32.mrb[182].mxu0  ;;  %v4207_v15 = vld [vmem:[#allocation2 + $0x590] ss:$2 sm:$0xff] }
 0x255   : > { %v4397_v9 = vmax.f32 %v4381_v5, 0.0  ;;  %2349 = vst.msk [vmem:[#allocation2 + $0x5b8] sm:$0xff] %vm280_vm3, %v19017_v8  ;;  %v2122_v10 = vpop.f32.mrb[183].mxu0  ;;  %v4271_v16 = vld [vmem:[#allocation2 + $0x591] ss:$2 sm:$0xff] }
 0x256   : > { %v4622_v11 = vcombine.high %v4398_v7, %v4398_v7  ;;  %v4629_v12 = vrot.slane %v4398_v7, %v21238_v42  ;;  %2347 = vst.msk [vmem:[#allocation2 + $0x5a8] sm:$0xff] %vm280_vm3, %v2122_v10  ;;  %v4205_v25 = vld [vmem:[#allocation2 + $0x580] ss:$2 sm:$0xff]  ;;  %v4269_v26 = vld [vmem:[#allocation2 + $0x581] ss:$2 sm:$0xff]  ;;  %v4309_v27 = vmax.f32 %v4207_v15, %v4271_v16 }
 0x257   : > { %v4605_v38 = vcombine.high %v4397_v9, %v4397_v9  ;;  %v4612_v14 = vrot.slane %v4397_v9, %v21238_v42  ;;  %v4308_v43 = vmax.f32 %v4205_v25, %v4269_v26 }
 0x258   : > { %v21980_v18 = vrot.slane %v4622_v11, %v21238_v42  ;;  %v4637_v19 = vcombine.high %v4629_v12, %v4629_v12  ;;  %v4355_v55 = vsel %vm280_vm3, %v4309_v27, -inf }
 0x259   : > { %v4619_v21 = vrot.slane %v4605_v38, %v21238_v42  ;;  %v4620_v22 = vcombine.high %v4612_v14, %v4612_v14  ;;  %v4894_v23 = vcombine.low %v21288_v48, %v4612_v14  ;;  %v4352_v24 = vsel %vm280_vm3, %v4308_v43, -inf }
 0x25a   : > { %v19020_v28 = vpop.f32.mrb[184].mxu0  ;;  %v5211_v29 = vld [vmem:[#allocation5 + $0x1c1] sm:$0xff]  ;;  %v5212_v30 = vld [vmem:[#allocation5 + $0x1c9] sm:$0xff]  ;;  %v4912_v34 = vcombine.low %v4637_v19, %v21980_v18  ;;  %v4638_v5 = vcombine.high %v21980_v18, %v21980_v18 }
 0x25b   : > { %v5105_v31 = vld [vmem:[#allocation5 + $0x1c0] sm:$0xff]  ;;  %v4621_v35 = vcombine.high %v4619_v21, %v4619_v21  ;;  %v4895_v36 = vcombine.low %v4620_v22, %v4619_v21  ;;  %2352 = vst.msk [vmem:[#allocation2 + $0x5d0] sm:$0xff] %vm280_vm3, %v19020_v28  ;;  %v2135_v37 = vpop.f32.mrb[185].mxu0  ;;  %v5251_v40 = vpack.c.bf16 %v5212_v30, %v5211_v29  ;;  %v5106_v41 = vld [vmem:[#allocation5 + $0x1c8] sm:$0xff]  ;;  %v4902_v50 = vrot.slane %v4894_v23, %v21238_v42 }
 0x25c   : > { %v4211_v44 = vld [vmem:[#allocation2 + $0x5b0] ss:$2 sm:$0xff]  ;;  %v4275_v45 = vld [vmem:[#allocation2 + $0x5b1] ss:$2 sm:$0xff]  ;;  %2350 = vst.msk [vmem:[#allocation2 + $0x5c0] sm:$0xff] %vm280_vm3, %v2135_v37  ;;  %v19021_v47 = vpop.f32.mrb[186].mxu0  ;;  %v5145_v49 = vpack.c.bf16 %v5106_v41, %v5105_v31  ;;  %v4926_v57 = vrot.slane %v4912_v34, %v21238_v42  ;;  %v4928_v14 = vcombine.low %v4638_v5, %v21288_v48 }
 0x25d   : > { %v4909_v51 = vrot.slane %v4895_v36, %v21238_v42  ;;  %v4911_v46 = vcombine.low %v4621_v35, %v4629_v12  ;;  %v4311_v20 = vmax.f32 %v4211_v44, %v4275_v45  ;;  %v4209_v52 = vld [vmem:[#allocation2 + $0x5a0] ss:$2 sm:$0xff]  ;;  %v4273_v53 = vld [vmem:[#allocation2 + $0x5a1] ss:$2 sm:$0xff]  ;;  %2353 = vst.msk [vmem:[#allocation2 + $0x5d8] sm:$0xff] %vm280_vm3, %v19021_v47  ;;  %v2138_v54 = vpop.f32.mrb[187].mxu0  ;;  %19086 = vmatprep.mubr.msk.bf16.mxu0 %vm280_vm3, %v5251_v40 }
 0x25e   : > { %v4310_v56 = vmax.f32 %v4209_v52, %v4273_v53  ;;  %2351 = vst.msk [vmem:[#allocation2 + $0x5c8] sm:$0xff] %vm280_vm3, %v2138_v54  ;;  %19158 = vmatprep.mubr.msk.bf16.mxu1 %vm280_vm3, %v5145_v49  ;;  %v4936_v36 = vrot.slane %v4928_v14, %v21238_v42 }
 0x25f   : > { %v4910_v58 = vcombine.low %v4902_v50, %v4909_v51  ;;  %v4919_v59 = vrot.slane %v4911_v46, %v21238_v42  ;;  %v4356_v60 = vsel %vm280_vm3, %v4311_v20, -inf }
 0x260   : > { %v4357_v61 = vmax.f32 %v4355_v55, %v4356_v60  ;;  %v4353_v62 = vsel %vm280_vm3, %v4310_v56, -inf }
 0x261   : > { %5042 = vst.msk [vmem:[#allocation5 + $0x1d3] sm:$0xff] %vm280_vm3, %v4910_v58  ;;  %v4354_v63 = vmax.f32 %v4352_v24, %v4353_v62  ;;  %v4927_v0 = vcombine.low %v4919_v59, %v4926_v57  ;;  %v20870_v24 = vld [vmem:[%s24759_s2] ss:$0 sm:$0xff] }
 0x262   : > { %v4384_v1 = vadd.f32 %v21800_v33, %v4357_v61  ;;  %v19024_v2 = vpop.f32.mrb[188].mxu0 }
 0x263   : > { %v4383_v3 = vadd.f32 %v21800_v33, %v4354_v63  ;;  %2356 = vst.msk [vmem:[#allocation2 + $0x5f0] sm:$0xff] %vm280_vm3, %v19024_v2  ;;  %v2151_v4 = vpop.f32.mrb[189].mxu0  ;;  %5043 = vst.msk [vmem:[#allocation5 + $0x1db] sm:$0xff] %vm280_vm3, %v4927_v0 }
 0x264   : > { %v4400_v6 = vmax.f32 %v4384_v1, 0.0  ;;  %2354 = vst.msk [vmem:[#allocation2 + $0x5e0] sm:$0xff] %vm280_vm3, %v2151_v4  ;;  %v19025_v7 = vpop.f32.mrb[190].mxu0  ;;  %v4215_v12 = vld [vmem:[#allocation2 + $0x5d0] ss:$2 sm:$0xff] }
 0x265   : > { %v4399_v8 = vmax.f32 %v4383_v3, 0.0  ;;  %2357 = vst.msk [vmem:[#allocation2 + $0x5f8] sm:$0xff] %vm280_vm3, %v19025_v7  ;;  %v2154_v9 = vpop.f32.mrb[191].mxu0  ;;  %v4279_v38 = vld [vmem:[#allocation2 + $0x5d1] ss:$2 sm:$0xff] }
 0x266   : > { %v4663_v10 = vrot.slane %v4400_v6, %v21238_v42  ;;  %2355 = vst.msk [vmem:[#allocation2 + $0x5e8] sm:$0xff] %vm280_vm3, %v2154_v9  ;;  %v4213_v19 = vld [vmem:[#allocation2 + $0x5c0] ss:$2 sm:$0xff]  ;;  %v4277_v21 = vld [vmem:[#allocation2 + $0x5c1] ss:$2 sm:$0xff]  ;;  %v4656_v23 = vcombine.high %v4400_v6, %v4400_v6  ;;  %v4313_v26 = vmax.f32 %v4215_v12, %v4279_v38 }
 0x267   : > { %v4639_v33 = vcombine.high %v4399_v8, %v4399_v8  ;;  %v4646_v11 = vrot.slane %v4399_v8, %v21238_v42  ;;  %v4312_v37 = vmax.f32 %v4213_v19, %v4277_v21 }
 0x268   : > { %v4671_v15 = vcombine.high %v4663_v10, %v4663_v10  ;;  %v5213_v22 = vld [vmem:[#allocation5 + $0x1d1] sm:$0xff]  ;;  %v4670_v50 = vrot.slane %v4656_v23, %v21238_v42  ;;  %v4361_v51 = vsel %vm280_vm3, %v4313_v26, -inf }
 0x269   : > { %v4653_v16 = vrot.slane %v4639_v33, %v21238_v42  ;;  %v4654_v18 = vcombine.high %v4646_v11, %v4646_v11  ;;  %v5107_v28 = vld [vmem:[#allocation5 + $0x1d0] sm:$0xff]  ;;  %v4358_v55 = vsel %vm280_vm3, %v4312_v37, -inf }
 0x26a   : > { %v4946_v25 = vcombine.low %v4663_v10, %v4671_v15  ;;  %v5214_v27 = vld [vmem:[#allocation5 + $0x1d9] sm:$0xff]  ;;  %v4672_v60 = vcombine.high %v4670_v50, %v4670_v50 }
 0x26b   : > { %v5108_v29 = vld [vmem:[#allocation5 + $0x1d8] sm:$0xff]  ;;  %v4655_v30 = vcombine.high %v4653_v16, %v4653_v16  ;;  %v4929_v31 = vcombine.low %v4646_v11, %v4654_v18  ;;  %v5252_v34 = vpack.c.bf16 %v5214_v27, %v5213_v22 }
 0x26c   : > { %v5146_v35 = vpack.c.bf16 %v5108_v29, %v5107_v28  ;;  %v4219_v40 = vld [vmem:[#allocation2 + $0x5f0] ss:$2 sm:$0xff]  ;;  %v4283_v41 = vld [vmem:[#allocation2 + $0x5f1] ss:$2 sm:$0xff]  ;;  %v4960_v20 = vrot.slane %v4946_v25, %v21238_v42  ;;  %v4962_v1 = vcombine.low %v4670_v50, %v4672_v60 }
 0x26d   : > { %v4943_v43 = vrot.slane %v4929_v31, %v21238_v42  ;;  %v4945_v44 = vcombine.low %v4653_v16, %v4655_v30  ;;  %v4315_v45 = vmax.f32 %v4219_v40, %v4283_v41  ;;  %v4217_v47 = vld [vmem:[#allocation2 + $0x5e0] ss:$2 sm:$0xff]  ;;  %v4281_v49 = vld [vmem:[#allocation2 + $0x5e1] ss:$2 sm:$0xff]  ;;  %19087 = vmatmul.mubr.msk.bf16.gmra.mrb[248].mxu0 %vm280_vm3, %v5252_v34 }
 0x26e   : > { %19159 = vmatmul.mubr.msk.bf16.gmra.mrb[24].mxu1 %vm280_vm3, %v5146_v35  ;;  %v4314_v46 = vmax.f32 %v4217_v47, %v4281_v49  ;;  %v4970_v33 = vrot.slane %v4962_v1, %v21238_v42  ;;  %v6103_v1 = vld [vmem:[#allocation5 + $0x1a] sm:$0xff] }
 0x26f   : > { %v4944_v52 = vcombine.low %v4936_v36, %v4943_v43  ;;  %v4953_v53 = vrot.slane %v4945_v44, %v21238_v42  ;;  %v4362_v54 = vsel %vm280_vm3, %v4315_v45, -inf }
 0x270   : > { %v4363_v56 = vmax.f32 %v4361_v51, %v4362_v54  ;;  %v4359_v57 = vsel %vm280_vm3, %v4314_v46, -inf  ;;  %v5116_v54 = vld [vmem:[#allocation5 + $0x218] sm:$0xf] }
 0x271   : > { %5044 = vst.msk [vmem:[#allocation5 + $0x1e3] sm:$0xff] %vm280_vm3, %v4944_v52  ;;  %v4360_v58 = vmax.f32 %v4358_v55, %v4359_v57  ;;  %v4961_v59 = vcombine.low %v4953_v53, %v4960_v20  ;;  %v5221_v20 = vld [vmem:[#allocation5 + $0x211] sm:$0xff]  ;;  %v5222_v52 = vld [vmem:[#allocation5 + $0x219] sm:$0xf]  ;;  %v5049_v55 = vld [vmem:[#allocation5] sm:$0xff] }
 0x272   : > { %v4386_v61 = vadd.f32 %v20870_v24, %v4363_v56  ;;  %v5115_v53 = vld [vmem:[#allocation5 + $0x210] sm:$0xff]  ;;  %v5050_v56 = vld [vmem:[#allocation5 + $0x8] sm:$0xff] }
 0x273   : > { %v4385_v62 = vadd.f32 %v20870_v24, %v4360_v58  ;;  %5045 = vst.msk [vmem:[#allocation5 + $0x1eb] sm:$0xff] %vm280_vm3, %v4961_v59  ;;  %v6100_v57 = vld [vmem:[#allocation5 + $0x2] sm:$0xff]  ;;  %v6101_v58 = vld [vmem:[#allocation5 + $0xa] sm:$0xff]  ;;  %v5256_v59 = vpack.c.bf16 %v5222_v52, %v5221_v20  ;;  %v5150_v60 = vpack.c.bf16 %v5116_v54, %v5115_v53  ;;  %v5117_v24 = vpack.c.bf16 %v5050_v56, %v5049_v55  ;;  %v5068_v56 = vld [vmem:[#allocation5 + $0x98] sm:$0xff] }
 0x274   : > { %v4402_v63 = vmax.f32 %v4386_v61, 0.0  ;;  %v6168_v61 = vpack.c.bf16 %v6101_v58, %v6100_v57  ;;  %v6116_v20 = vld [vmem:[#allocation5 + $0x82] sm:$0xff]  ;;  %v5067_v54 = vld [vmem:[#allocation5 + $0x90] sm:$0xff]  ;;  %v6119_v58 = vld [vmem:[#allocation5 + $0x9a] sm:$0xff] }
 0x275   : > { %v4401_v0 = vmax.f32 %v4385_v62, 0.0  ;;  %v5051_v62 = vld [vmem:[#allocation5 + $0x10] sm:$0xff]  ;;  %v5070_v55 = vld [vmem:[#allocation5 + $0xa8] sm:$0xff] }
 0x276   : > { %v4690_v2 = vcombine.high %v4402_v63, %v4402_v63  ;;  %v4697_v3 = vrot.slane %v4402_v63, %v21238_v42  ;;  %v5052_v63 = vld [vmem:[#allocation5 + $0x18] sm:$0xff] }
 0x277   : > { %v4673_v4 = vcombine.high %v4401_v0, %v4401_v0  ;;  %v4680_v5 = vrot.slane %v4401_v0, %v21238_v42  ;;  %v6102_v0 = vld [vmem:[#allocation5 + $0x12] sm:$0xff] }
 0x278   : > { %v4704_v6 = vrot.slane %v4690_v2, %v21238_v42  ;;  %v4705_v7 = vcombine.high %v4697_v3, %v4697_v3  ;;  %v5215_v38 = vld [vmem:[#allocation5 + $0x1e1] sm:$0xff]  ;;  %v6118_v57 = vld [vmem:[#allocation5 + $0x92] sm:$0xff] }
 0x279   : > { %v4687_v8 = vrot.slane %v4673_v4, %v21238_v42  ;;  %v4688_v9 = vcombine.high %v4680_v5, %v4680_v5  ;;  %v4963_v10 = vcombine.low %v21288_v48, %v4680_v5  ;;  %v5109_v22 = vld [vmem:[#allocation5 + $0x1e0] sm:$0xff]  ;;  %v5054_v2 = vld [vmem:[#allocation5 + $0x28] sm:$0xff]  ;;  %v5118_v4 = vpack.c.bf16 %v5052_v63, %v5051_v62 }
 0x27a   : > { %v4706_v11 = vcombine.high %v4704_v6, %v4704_v6  ;;  %v4996_v12 = vcombine.low %v4705_v7, %v4704_v6  ;;  %v5216_v14 = vld [vmem:[#allocation5 + $0x1e9] sm:$0xff]  ;;  %v22054_v5 = vpack.c.bf16 %v6103_v1, %v6102_v0  ;;  %v5053_v6 = vld [vmem:[#allocation5 + $0x20] sm:$0xff]  ;;  %v22104_v62 = vpack.c.bf16 %v6119_v58, %v6118_v57 }
 0x27b   : > { %v5110_v15 = vld [vmem:[#allocation5 + $0x1e8] sm:$0xff]  ;;  %v4689_v16 = vcombine.high %v4687_v8, %v4687_v8  ;;  %v4977_v18 = vrot.slane %v4963_v10, %v21238_v42  ;;  %v4979_v19 = vcombine.low %v4688_v9, %v4687_v8  ;;  %v5253_v21 = vpack.c.bf16 %v5216_v14, %v5215_v38  ;;  %v20821_v7 = vld [vmem:[%s24760_s3 + $0x38] sm:$0xff]   ;;  %v5055_v14 = vld [vmem:[#allocation5 + $0x30] sm:$0xff] }
 0x27c   : > { %v4997_v23 = vcombine.low %v4706_v11, %v21288_v48  ;;  %v5147_v25 = vpack.c.bf16 %v5110_v15, %v5109_v22  ;;  %v5004_v28 = vrot.slane %v4996_v12, %v21238_v42  ;;  %v5119_v8 = vpack.c.bf16 %v5054_v2, %v5053_v6  ;;  %v6104_v9 = vld [vmem:[#allocation5 + $0x22] sm:$0xff]  ;;  %v6107_v11 = vld [vmem:[#allocation5 + $0x3a] sm:$0xff]  ;;  %v6109_v38 = vld [vmem:[#allocation5 + $0x4a] sm:$0xff] }
 0x27d   : > { %v4978_v26 = vcombine.low %v4970_v33, %v4977_v18  ;;  %v4980_v27 = vcombine.low %v4689_v16, %v4697_v3  ;;  %19090 = vmatprep.mubr.msk.bf16.mxu0 %vm280_vm3, %v5253_v21  ;;  %v4987_v30 = vrot.slane %v4979_v19, %v21238_v42  ;;  %v6105_v3 = vld [vmem:[#allocation5 + $0x2a] sm:$0xff]  ;;  %v5056_v33 = vld [vmem:[#allocation5 + $0x38] sm:$0xff]  ;;  %v5057_v19 = vld [vmem:[#allocation5 + $0x40] sm:$0xff] }
 0x27e   : > { %v5011_v29 = vrot.slane %v4997_v23, %v21238_v42  ;;  %19162 = vmatprep.mubr.msk.bf16.mxu1 %vm280_vm3, %v5147_v25  ;;  %v22062_v10 = vpack.c.bf16 %v6105_v3, %v6104_v9  ;;  %v5058_v12 = vld [vmem:[#allocation5 + $0x48] sm:$0xff]  ;;  %v6106_v15 = vld [vmem:[#allocation5 + $0x32] sm:$0xff]  ;;  %v5120_v16 = vpack.c.bf16 %v5056_v33, %v5055_v14  ;;  %v6123_v6 = vld [vmem:[#allocation5 + $0xba] sm:$0xff] }
 0x27f   : > { %v4994_v31 = vrot.slane %v4980_v27, %v21238_v42  ;;  %5046 = vst.msk [vmem:[#allocation5 + $0x1f3] sm:$0xff] %vm280_vm3, %v4978_v26  ;;  %v22068_v18 = vpack.c.bf16 %v6107_v11, %v6106_v15  ;;  %v6108_v21 = vld [vmem:[#allocation5 + $0x42] sm:$0xff]  ;;  %v5121_v22 = vpack.c.bf16 %v5058_v12, %v5057_v19  ;;  %v5060_v25 = vld [vmem:[#allocation5 + $0x58] sm:$0xff]  ;;  %v5071_v1 = vld [vmem:[#allocation5 + $0xb0] sm:$0xff] }
 0x280   : > { %v5012_v34 = vcombine.low %v5004_v28, %v5011_v29  ;;  %v22075_v23 = vpack.c.bf16 %v6109_v38, %v6108_v21  ;;  %v6111_v26 = vld [vmem:[#allocation5 + $0x5a] sm:$0xff]  ;;  %v5062_v27 = vld [vmem:[#allocation5 + $0x68] sm:$0xff]  ;;  %v5059_v29 = vld [vmem:[#allocation5 + $0x50] sm:$0xff] }
 0x281   : > { %v4995_v35 = vcombine.low %v4987_v30, %v4994_v31  ;;  %v6113_v28 = vld [vmem:[#allocation5 + $0x6a] sm:$0xff]  ;;  %v6110_v30 = vld [vmem:[#allocation5 + $0x52] sm:$0xff]  ;;  %v5122_v31 = vpack.c.bf16 %v5060_v25, %v5059_v29  ;;  %v5073_v9 = vld [vmem:[#allocation5 + $0xc0] sm:$0xff] }
 0x282   : > { %5048 = vst.msk [vmem:[#allocation5 + $0x203] sm:$0xff] %vm280_vm3, %v5012_v34  ;;  %v22084_v34 = vpack.c.bf16 %v6111_v26, %v6110_v30  ;;  %v5072_v3 = vld [vmem:[#allocation5 + $0xb8] sm:$0xff]  ;;  %v5074_v38 = vld [vmem:[#allocation5 + $0xc8] sm:$0xff] }
 0x283   : > { %5047 = vst.msk [vmem:[#allocation5 + $0x1fb] sm:$0xff] %vm280_vm3, %v4995_v35  ;;  %v5061_v35 = vld [vmem:[#allocation5 + $0x60] sm:$0xff]  ;;  %v5128_v11 = vpack.c.bf16 %v5072_v3, %v5071_v1  ;;  %v6125_v15 = vld [vmem:[#allocation5 + $0xca] sm:$0xff]  ;;  %v5076_v21 = vld [vmem:[#allocation5 + $0xd8] sm:$0xff] }
 0x284   : > { %v6124_v14 = vld [vmem:[#allocation5 + $0xc2] sm:$0xff]  ;;  %v6129_v26 = vld [vmem:[#allocation5 + $0xea] sm:$0xff]  ;;  %v7934_v48 = vld [vmem:[#allocation5 + $0x1b4] sm:$0xff] }
 0x285   : > { %v22124_v19 = vpack.c.bf16 %v6125_v15, %v6124_v14  ;;  %v5078_v25 = vld [vmem:[#allocation5 + $0xe8] sm:$0xff] }
 0x286   : > { %v5217_v36 = vld [vmem:[#allocation5 + $0x1f1] sm:$0xff]  ;;  %v6136_v57 = vld [vmem:[#allocation5 + $0x122] sm:$0xff] }
 0x287   : > { %v5111_v37 = vld [vmem:[#allocation5 + $0x1f0] sm:$0xff]  ;;  %v6140_v1 = vld [vmem:[#allocation5 + $0x142] sm:$0xff] }
 0x288   : > { %v6141_v3 = vld [vmem:[#allocation5 + $0x14a] sm:$0xff] }
 0x289   : > { %v5220_v40 = vld [vmem:[#allocation5 + $0x209] sm:$0xff] }
 0x28a   : > { %v5114_v41 = vld [vmem:[#allocation5 + $0x208] sm:$0xff]  ;;  %v5218_v43 = vld [vmem:[#allocation5 + $0x1f9] sm:$0xff] }
 0x28b   : > { %v5112_v44 = vld [vmem:[#allocation5 + $0x1f8] sm:$0xff]  ;;  %v5219_v45 = vld [vmem:[#allocation5 + $0x201] sm:$0xff]  ;;  %v5254_v47 = vpack.c.bf16 %v5218_v43, %v5217_v36 }
 0x28c   : > { %v5148_v49 = vpack.c.bf16 %v5112_v44, %v5111_v37  ;;  %v5255_v50 = vpack.c.bf16 %v5220_v40, %v5219_v45  ;;  %v5113_v51 = vld [vmem:[#allocation5 + $0x200] sm:$0xff]  ;;  %v5123_v37 = vpack.c.bf16 %v5062_v27, %v5061_v35  ;;  %v5066_v44 = vld [vmem:[#allocation5 + $0x88] sm:$0xff]  ;;  %v5075_v27 = vld [vmem:[#allocation5 + $0xd0] sm:$0xff] }
 0x28d   : > { %v5149_v46 = vpack.c.bf16 %v5114_v41, %v5113_v51  ;;  %19091 = vmatmul.mubr.msk.bf16.gmra.mrb[252].mxu0 %vm280_vm3, %v5254_v47  ;;  %v6112_v36 = vld [vmem:[#allocation5 + $0x62] sm:$0xff]  ;;  %v5064_v41 = vld [vmem:[#allocation5 + $0x78] sm:$0xff]  ;;  %v6117_v45 = vld [vmem:[#allocation5 + $0x8a] sm:$0xff]  ;;  %v5130_v29 = vpack.c.bf16 %v5076_v21, %v5075_v27 }
 0x28e   : > { %19163 = vmatmul.mubr.msk.bf16.gmra.mrb[28].mxu1 %vm280_vm3, %v5148_v49  ;;  %19094 = vmatprep.mubr.msk.bf16.mxu0 %vm280_vm3, %v5255_v50  ;;  %v22086_v40 = vpack.c.bf16 %v6113_v28, %v6112_v36  ;;  %v6115_v43 = vld [vmem:[#allocation5 + $0x7a] sm:$0xff]  ;;  %v5063_v47 = vld [vmem:[#allocation5 + $0x70] sm:$0xff]  ;;  %v22096_v53 = vpack.c.bf16 %v6117_v45, %v6116_v20  ;;  %v6128_v35 = vld [vmem:[#allocation5 + $0xe2] sm:$0xff] }
 0x28f   : > { %19166 = vmatprep.mubr.msk.bf16.mxu1 %vm280_vm3, %v5149_v46  ;;  %v6114_v49 = vld [vmem:[#allocation5 + $0x72] sm:$0xff]  ;;  %v5124_v50 = vpack.c.bf16 %v5064_v41, %v5063_v47  ;;  %v5065_v46 = vld [vmem:[#allocation5 + $0x80] sm:$0xff]  ;;  %v6145_v21 = vld [vmem:[#allocation5 + $0x16a] sm:$0xff] }
 0x290   : > { %v22094_v51 = vpack.c.bf16 %v6115_v43, %v6114_v49  ;;  %v5125_v52 = vpack.c.bf16 %v5066_v44, %v5065_v46  ;;  %v6126_v28 = vld [vmem:[#allocation5 + $0xd2] sm:$0xff]  ;;  %v6131_v43 = vld [vmem:[#allocation5 + $0xfa] sm:$0xff]  ;;  %v6133_v44 = vld [vmem:[#allocation5 + $0x10a] sm:$0xff] }
 0x291   : > { %v5080_v41 = vld [vmem:[#allocation5 + $0xf8] sm:$0xff]  ;;  %v5079_v45 = vld [vmem:[#allocation5 + $0xf0] sm:$0xff]  ;;  %v6132_v46 = vld [vmem:[#allocation5 + $0x102] sm:$0xff] }
 0x292   : > { %v6130_v47 = vld [vmem:[#allocation5 + $0xf2] sm:$0xff]  ;;  %v5132_v49 = vpack.c.bf16 %v5080_v41, %v5079_v45  ;;  %v22144_v20 = vpack.c.bf16 %v6133_v44, %v6132_v46  ;;  %v6148_v45 = vld [vmem:[#allocation5 + $0x182] sm:$0xff]  ;;  %v6153_v46 = vld [vmem:[#allocation5 + $0x1aa] sm:$0xff] }
 0x295   : > { %19095 = vmatmul.mubr.msk.bf16.gmra.mrb[0].mxu0 %vm280_vm3, %v5256_v59  ;;  %v5069_v59 = vld [vmem:[#allocation5 + $0xa0] sm:$0xff] }
 0x296   : > { %19167 = vmatmul.mubr.msk.bf16.gmra.mrb[32].mxu1 %vm280_vm3, %v5150_v60  ;;  %19102 = vmatprep.mubr.msk.bf16.mxu0 %vm280_vm3, %v5117_v24  ;;  %v6120_v60 = vld [vmem:[#allocation5 + $0xa2] sm:$0xff]  ;;  %v6121_v24 = vld [vmem:[#allocation5 + $0xaa] sm:$0xff]  ;;  %v5127_v63 = vpack.c.bf16 %v5070_v55, %v5069_v59  ;;  %v6134_v55 = vld [vmem:[#allocation5 + $0x112] sm:$0xff] }
 0x297   : > { %19174 = vmatprep.mubr.msk.bf16.mxu1 %vm280_vm3, %v6168_v61  ;;  %v5126_v61 = vpack.c.bf16 %v5068_v56, %v5067_v54  ;;  %v22106_v0 = vpack.c.bf16 %v6121_v24, %v6120_v60  ;;  %v6137_v54 = vld [vmem:[#allocation5 + $0x12a] sm:$0xff] }
 0x298   : > { %v22155_v59 = vpack.c.bf16 %v6137_v54, %v6136_v57 }
 0x29d   : > { %19103 = vmatmul.mubr.msk.bf16.vlgmr.msra.gmra.mrb[192].mxu0 %vm280_vm3, %v5118_v4  ;;  %v6122_v4 = vld [vmem:[#allocation5 + $0xb2] sm:$0xff] }
 0x29e   : > { %19175 = vmatmul.mubr.msk.bf16.vlgmr.msra.gmra.mrb[36].mxu1 %vm280_vm3, %v22054_v5  ;;  %19106 = vmatprep.mubr.msk.bf16.mxu0 %vm280_vm3, %v5119_v8  ;;  %v22122_v12 = vpack.c.bf16 %v6123_v6, %v6122_v4  ;;  %v6138_v4 = vld [vmem:[#allocation5 + $0x132] sm:$0xff] }
 0x29f   : > { %19243 = vmatpush3.bf16.msra.mxu1 %v21861_v13  ;;  %19178 = vmatprep.mubr.msk.bf16.mxu1 %vm280_vm3, %v22062_v10  ;;  %v22073_v13 = vld [vmem:[%s24760_s3 + $0x40] sm:$0xff]  }
 0x2a0   : > { %19244 = vmatprep.subr.bf16.mxu1 %v20821_v7 }
 0x2a3   : > { %19245 = vmatpush3.bf16.msra.mxu1 %v20821_v7 }
 0x2a4   : > { %19314 = vmatprep.subr.bf16.mxu1 %v22073_v13 }
 0x2a5   : > { %19107 = vmatmul.mubr.msk.bf16.gmra.mrb[196].mxu0 %vm280_vm3, %v5120_v16  ;;  %v5129_v16 = vpack.c.bf16 %v5074_v38, %v5073_v9 }
 0x2a6   : > { %19179 = vmatmul.mubr.msk.bf16.gmra.mrb[40].mxu1 %vm280_vm3, %v22068_v18  ;;  %19110 = vmatprep.mubr.msk.bf16.mxu0 %vm280_vm3, %v5121_v22  ;;  %v6127_v22 = vld [vmem:[#allocation5 + $0xda] sm:$0xff] }
 0x2a7   : > { %19182 = vmatprep.mubr.msk.bf16.mxu1 %vm280_vm3, %v22075_v23  ;;  %v22132_v30 = vpack.c.bf16 %v6127_v22, %v6126_v28  ;;  %v6142_v22 = vld [vmem:[#allocation5 + $0x152] sm:$0xff] }
 0x2ad   : > { %19111 = vmatmul.mubr.msk.bf16.gmra.mrb[200].mxu0 %vm280_vm3, %v5122_v31  ;;  %v5077_v31 = vld [vmem:[#allocation5 + $0xe0] sm:$0xff] }
 0x2ae   : > { %19183 = vmatmul.mubr.msk.bf16.gmra.mrb[44].mxu1 %vm280_vm3, %v22084_v34  ;;  %19114 = vmatprep.mubr.msk.bf16.mxu0 %vm280_vm3, %v5123_v37  ;;  %v5131_v36 = vpack.c.bf16 %v5078_v25, %v5077_v31  ;;  %v22134_v37 = vpack.c.bf16 %v6129_v26, %v6128_v35  ;;  %v6143_v25 = vld [vmem:[#allocation5 + $0x15a] sm:$0xff] }
 0x2af   : > { %19186 = vmatprep.mubr.msk.bf16.mxu1 %vm280_vm3, %v22086_v40  ;;  %v22179_v27 = vpack.c.bf16 %v6143_v25, %v6142_v22  ;;  %v6147_v31 = vld [vmem:[#allocation5 + $0x17a] sm:$0xff]  ;;  %v6160_v25 = vld [vmem:[#allocation5 + $0x1e2] sm:$0xff] }
 0x2b5   : > { %19115 = vmatmul.mubr.msk.bf16.gmra.mrb[204].mxu0 %vm280_vm3, %v5124_v50  ;;  %v22142_v50 = vpack.c.bf16 %v6131_v43, %v6130_v47 }
 0x2b6   : > { %19187 = vmatmul.mubr.msk.bf16.gmra.mrb[48].mxu1 %vm280_vm3, %v22094_v51  ;;  %19118 = vmatprep.mubr.msk.bf16.mxu0 %vm280_vm3, %v5125_v52  ;;  %v6135_v52 = vld [vmem:[#allocation5 + $0x11a] sm:$0xff] }
 0x2b7   : > { %19190 = vmatprep.mubr.msk.bf16.mxu1 %vm280_vm3, %v22096_v53  ;;  %v22151_v56 = vpack.c.bf16 %v6135_v52, %v6134_v55  ;;  %v6150_v52 = vld [vmem:[#allocation5 + $0x192] sm:$0xff]  ;;  %v6152_v55 = vld [vmem:[#allocation5 + $0x1a2] sm:$0xff] }
 0x2b8   : > { %v22201_v57 = vpack.c.bf16 %v6153_v46, %v6152_v55  ;;  %v6164_v46 = vld [vmem:[#allocation5 + $0x202] sm:$0xff]  ;;  %v6162_v55 = vld [vmem:[#allocation5 + $0x1f2] sm:$0xff] }
 0x2bd   : > { %19119 = vmatmul.mubr.msk.bf16.gmra.mrb[208].mxu0 %vm280_vm3, %v5126_v61 }
 0x2be   : > { %19191 = vmatmul.mubr.msk.bf16.gmra.mrb[52].mxu1 %vm280_vm3, %v22104_v62  ;;  %v22111_v2 = vpop.f32.mrb[224].mxu0  ;;  %19122 = vmatprep.mubr.msk.bf16.mxu0 %vm280_vm3, %v5127_v63  ;;  %v6139_v63 = vld [vmem:[#allocation5 + $0x13a] sm:$0xff] }
 0x2bf   : > { %24775 = vst [vmem:[#allocation9_spill] sm:$0xff] %v22111_v2  ;;  %19194 = vmatprep.mubr.msk.bf16.mxu1 %vm280_vm3, %v22106_v0  ;;  %v22116_v7 = vpop.f32.mrb[225].mxu0  ;;  %v22167_v6 = vpack.c.bf16 %v6139_v63, %v6138_v4  ;;  %v6154_v63 = vld [vmem:[#allocation5 + $0x1b2] sm:$0xff]  ;;  %v6157_v4 = vld [vmem:[#allocation5 + $0x1ca] sm:$0xff] }
 0x2c0   : > { %24776 = vst [vmem:[#allocation10_spill] sm:$0xff] %v22116_v7  ;;  %v22118_v8 = vpop.f32.mrb[226].mxu0  ;;  %v7930_v7 = vld [vmem:[#allocation5 + $0x194] sm:$0xff] }
 0x2c1   : > { %24777 = vst [vmem:[#allocation11_spill] sm:$0xff] %v22118_v8  ;;  %v22120_v33 = vpop.f32.mrb[227].mxu0 }
 0x2c2   : > { %24778 = vst [vmem:[#allocation12_spill] sm:$0xff] %v22120_v33  ;;  %v7927_v33 = vld [vmem:[#allocation5 + $0x17c] sm:$0xff] }
 0x2c5   : > { %19123 = vmatmul.mubr.msk.bf16.gmra.mrb[212].mxu0 %vm280_vm3, %v5128_v11  ;;  %v22169_v11 = vpack.c.bf16 %v6141_v3, %v6140_v1  ;;  %v6155_v1 = vld [vmem:[#allocation5 + $0x1ba] sm:$0xff]  ;;  %v6156_v3 = vld [vmem:[#allocation5 + $0x1c2] sm:$0xff] }
 0x2c6   : > { %19195 = vmatmul.mubr.msk.bf16.gmra.mrb[56].mxu1 %vm280_vm3, %v22122_v12  ;;  %19126 = vmatprep.mubr.msk.bf16.mxu0 %vm280_vm3, %v5129_v16  ;;  %v6144_v16 = vld [vmem:[#allocation5 + $0x162] sm:$0xff] }
 0x2c7   : > { %19198 = vmatprep.mubr.msk.bf16.mxu1 %vm280_vm3, %v22124_v19  ;;  %v22177_v26 = vpack.c.bf16 %v6145_v21, %v6144_v16  ;;  %v6161_v16 = vld [vmem:[#allocation5 + $0x1ea] sm:$0xff]  ;;  %v6158_v21 = vld [vmem:[#allocation5 + $0x1d2] sm:$0xff] }
 0x2cd   : > { %19127 = vmatmul.mubr.msk.bf16.gmra.mrb[216].mxu0 %vm280_vm3, %v5130_v29  ;;  %v6146_v29 = vld [vmem:[#allocation5 + $0x172] sm:$0xff] }
 0x2ce   : > { %19199 = vmatmul.mubr.msk.bf16.gmra.mrb[60].mxu1 %vm280_vm3, %v22132_v30  ;;  %19130 = vmatprep.mubr.msk.bf16.mxu0 %vm280_vm3, %v5131_v36  ;;  %v6149_v36 = vld [vmem:[#allocation5 + $0x18a] sm:$0xff]  ;;  %v22191_v44 = vpack.c.bf16 %v6147_v31, %v6146_v29  ;;  %v22217_v29 = vpack.c.bf16 %v6161_v16, %v6160_v25 }
 0x2cf   : > { %19202 = vmatprep.mubr.msk.bf16.mxu1 %vm280_vm3, %v22134_v37  ;;  %v22193_v47 = vpack.c.bf16 %v6149_v36, %v6148_v45  ;;  %v6163_v45 = vld [vmem:[#allocation5 + $0x1fa] sm:$0xff] }
 0x2d5   : > { %19131 = vmatmul.mubr.msk.bf16.gmra.mrb[220].mxu0 %vm280_vm3, %v5132_v49  ;;  %v6151_v49 = vld [vmem:[#allocation5 + $0x19a] sm:$0xff] }
 0x2d6   : > { %19203 = vmatmul.mubr.msk.bf16.gmra.mrb[64].mxu1 %vm280_vm3, %v22142_v50  ;;  %v22199_v54 = vpack.c.bf16 %v6151_v49, %v6150_v52  ;;  %v6165_v52 = vld [vmem:[#allocation5 + $0x20a] sm:$0xff] }
 0x2d7   : > { %19206 = vmatprep.mubr.msk.bf16.mxu1 %vm280_vm3, %v22144_v20 }
 0x2dc   : > { %v22153_v58 = vpop.f32.mrb[228].mxu0 }
 0x2dd   : > { %24779 = vst [vmem:[#allocation13_spill] sm:$0xff] %v22153_v58  ;;  %v22157_v60 = vpop.f32.mrb[229].mxu0 }
 0x2de   : > { %24780 = vst [vmem:[#allocation14_spill] sm:$0xff] %v22157_v60  ;;  %19207 = vmatmul.mubr.msk.bf16.gmra.mrb[0].mxu1 %vm280_vm3, %v22151_v56  ;;  %v22161_v24 = vpop.f32.mrb[230].mxu0 }
 0x2df   : > { %24781 = vst [vmem:[#allocation15_spill] sm:$0xff] %v22161_v24  ;;  %19210 = vmatprep.mubr.msk.bf16.mxu1 %vm280_vm3, %v22155_v59  ;;  %v22165_v61 = vpop.f32.mrb[231].mxu0 }
 0x2e0   : > { %24782 = vst [vmem:[#allocation16_spill] sm:$0xff] %v22165_v61  ;;  %v7918_v61 = vld [vmem:[#allocation5 + $0x134] sm:$0xff] }
 0x2e4   : > { %v19072_v9 = vpop.f32.mrb[232].mxu0 }
 0x2e5   : > { %v22171_v38 = vpop.f32.mrb[233].mxu0  ;;  %v22207_v9 = vpack.c.bf16 %v6155_v1, %v6154_v63  ;;  %v22231_v63 = vpack.c.bf16 %v6163_v45, %v6162_v55  ;;  %v22233_v1 = vpack.c.bf16 %v6165_v52, %v6164_v46  ;;  %v20823_v46 = vld [vmem:[%s24760_s3 + $0x48] sm:$0xff]  }
 0x2e6   : > { %24783 = vst [vmem:[#allocation17_spill] sm:$0xff] %v22171_v38  ;;  %19211 = vmatmul.mubr.msk.bf16.gmra.mrb[4].mxu1 %vm280_vm3, %v22167_v6  ;;  %v19073_v14 = vpop.f32.mrb[234].mxu0 }
 0x2e7   : > { %19214 = vmatprep.mubr.msk.bf16.mxu1 %vm280_vm3, %v22169_v11  ;;  %v5573_v15 = vpop.f32.mrb[235].mxu0  ;;  %v22209_v14 = vpack.c.bf16 %v6157_v4, %v6156_v3  ;;  %v22239_v3 = vld [vmem:[#allocation5 + $0x212] sm:$0xff]  ;;  %v6167_v4 = vld [vmem:[#allocation5 + $0x21a] sm:$0xf] }
 0x2e8   : > { %v6159_v15 = vld [vmem:[#allocation5 + $0x1da] sm:$0xff] }
 0x2e9   : > { %v22215_v22 = vpack.c.bf16 %v6159_v15, %v6158_v21  ;;  %v6201_v15 = vpack.c.bf16 %v6167_v4, %v22239_v3 }
 0x2ee   : > { %19215 = vmatmul.mubr.msk.bf16.gmra.mrb[8].mxu1 %vm280_vm3, %v22179_v27 }
 0x2ef   : > { %19218 = vmatprep.mubr.msk.bf16.mxu1 %vm280_vm3, %v22177_v26 }
 0x2f0   : > { %v22185_v28 = vpop.f32.mrb[236].mxu0 }
 0x2f1   : > { %24784 = vst [vmem:[#allocation18_spill] sm:$0xff] %v22185_v28  ;;  %v5586_v35 = vpop.f32.mrb[237].mxu0  ;;  %v7914_v28 = vld [vmem:[#allocation5 + $0x114] sm:$0xff] }
 0x2f2   : > { %v22187_v41 = vpop.f32.mrb[238].mxu0 }
 0x2f3   : > { %24785 = vst [vmem:[#allocation19_spill] sm:$0xff] %v22187_v41  ;;  %v22189_v43 = vpop.f32.mrb[239].mxu0 }
 0x2f4   : > { %24786 = vst [vmem:[#allocation20_spill] sm:$0xff] %v22189_v43  ;;  %v7910_v43 = vld [vmem:[#allocation5 + $0xf4] sm:$0xff] }
 0x2f6   : > { %19219 = vmatmul.mubr.msk.bf16.gmra.mrb[12].mxu1 %vm280_vm3, %v22191_v44 }
 0x2f7   : > { %19222 = vmatprep.mubr.msk.bf16.mxu1 %vm280_vm3, %v22193_v47 }
 0x2fe   : > { %19223 = vmatmul.mubr.msk.bf16.gmra.mrb[16].mxu1 %vm280_vm3, %v22199_v54 }
 0x2ff   : > { %19226 = vmatprep.mubr.msk.bf16.mxu1 %vm280_vm3, %v22201_v57 }
 0x306   : > { %19227 = vmatmul.mubr.msk.bf16.gmra.mrb[20].mxu1 %vm280_vm3, %v22207_v9 }
 0x307   : > { %19230 = vmatprep.mubr.msk.bf16.mxu1 %vm280_vm3, %v22209_v14 }
 0x30e   : > { %19231 = vmatmul.mubr.msk.bf16.gmra.mrb[24].mxu1 %vm280_vm3, %v22215_v22  ;;  %v22221_v31 = vpop.f32.mrb[240].mxu0 }
 0x30f   : > { %24787 = vst [vmem:[#allocation21_spill] sm:$0xff] %v22221_v31  ;;  %19234 = vmatprep.mubr.msk.bf16.mxu1 %vm280_vm3, %v22217_v29  ;;  %v22225_v35 = vpop.f32.mrb[241].mxu0 }
 0x310   : > { %24788 = vst [vmem:[#allocation22_spill] sm:$0xff] %v22225_v35  ;;  %v22227_v36 = vpop.f32.mrb[242].mxu0  ;;  %v7906_v35 = vld [vmem:[#allocation5 + $0xd4] sm:$0xff] }
 0x311   : > { %24789 = vst [vmem:[#allocation23_spill] sm:$0xff] %v22227_v36  ;;  %v22229_v49 = vpop.f32.mrb[243].mxu0 }
 0x312   : > { %24790 = vst [vmem:[#allocation24_spill] sm:$0xff] %v22229_v49 }
 0x316   : > { %19235 = vmatmul.mubr.msk.bf16.gmra.mrb[28].mxu1 %vm280_vm3, %v22231_v63 }
 0x317   : > { %19238 = vmatprep.mubr.msk.bf16.mxu1 %vm280_vm3, %v22233_v1 }
 0x31e   : > { %19239 = vmatmul.mubr.msk.bf16.gmra.mrb[32].mxu1 %vm280_vm3, %v6201_v15 }
 0x31f   : > { %19246 = vmatprep.mubr.msk.bf16.mxu1 %vm280_vm3, %v22054_v5  ;;  %v22264_v5 = vld [vmem:[%s24760_s3 + $0x50] sm:$0xff]  }
 0x320   : > { %v22245_v16 = vpop.f32.mrb[244].mxu0 }
 0x321   : > { %24791 = vst [vmem:[#allocation25_spill] sm:$0xff] %v22245_v16  ;;  %v22247_v21 = vpop.f32.mrb[245].mxu0 }
 0x322   : > { %24792 = vst [vmem:[#allocation26_spill] sm:$0xff] %v22247_v21  ;;  %v22249_v25 = vpop.f32.mrb[246].mxu0 }
 0x323   : > { %24793 = vst [vmem:[#allocation27_spill] sm:$0xff] %v22249_v25  ;;  %v22251_v45 = vpop.f32.mrb[247].mxu0  ;;  %v7302_v25 = vld [vmem:[#allocation5 + $0x83] sm:$0xff] }
 0x324   : > { %24794 = vst [vmem:[#allocation28_spill] sm:$0xff] %v22251_v45 }
 0x326   : > { %19247 = vmatmul.mubr.msk.bf16.vlgmr.msra.gmra.mrb[36].mxu1 %vm280_vm3, %v22062_v10 }
 0x327   : > { %19315 = vmatpush3.bf16.msra.mxu1 %v22073_v13  ;;  %19250 = vmatprep.mubr.msk.bf16.mxu1 %vm280_vm3, %v22068_v18 }
 0x328   : > { %19316 = vmatprep.subr.bf16.mxu1 %v20823_v46 }
 0x32b   : > { %19317 = vmatpush3.bf16.msra.mxu1 %v20823_v46 }
 0x32c   : > { %19386 = vmatprep.subr.bf16.mxu1 %v22264_v5 }
 0x32e   : > { %19251 = vmatmul.mubr.msk.bf16.gmra.mrb[40].mxu1 %vm280_vm3, %v22075_v23 }
 0x32f   : > { %19254 = vmatprep.mubr.msk.bf16.mxu1 %vm280_vm3, %v22084_v34 }
 0x336   : > { %19255 = vmatmul.mubr.msk.bf16.gmra.mrb[44].mxu1 %vm280_vm3, %v22086_v40 }
 0x337   : > { %19258 = vmatprep.mubr.msk.bf16.mxu1 %vm280_vm3, %v22094_v51 }
 0x33e   : > { %19259 = vmatmul.mubr.msk.bf16.gmra.mrb[48].mxu1 %vm280_vm3, %v22096_v53 }
 0x33f   : > { %19262 = vmatprep.mubr.msk.bf16.mxu1 %vm280_vm3, %v22104_v62 }
 0x340   : > { %v22279_v10 = vpop.f32.mrb[248].mxu0 }
 0x341   : > { %24795 = vst [vmem:[#allocation29_spill] sm:$0xff] %v22279_v10  ;;  %v22281_v18 = vpop.f32.mrb[249].mxu0  ;;  %v7300_v10 = vld [vmem:[#allocation5 + $0x73] sm:$0xff] }
 0x342   : > { %24796 = vst [vmem:[#allocation30_spill] sm:$0xff] %v22281_v18  ;;  %v22283_v13 = vpop.f32.mrb[250].mxu0  ;;  %v7296_v18 = vld [vmem:[#allocation5 + $0x53] sm:$0xff] }
 0x343   : > { %24797 = vst [vmem:[#allocation31_spill] sm:$0xff] %v22283_v13  ;;  %v22285_v23 = vpop.f32.mrb[251].mxu0 }
 0x344   : > { %24798 = vst [vmem:[#allocation32_spill] sm:$0xff] %v22285_v23  ;;  %v7292_v23 = vld [vmem:[#allocation5 + $0x33] sm:$0xff] }
 0x346   : > { %19263 = vmatmul.mubr.msk.bf16.gmra.mrb[52].mxu1 %vm280_vm3, %v22106_v0 }
 0x347   : > { %19266 = vmatprep.mubr.msk.bf16.mxu1 %vm280_vm3, %v22122_v12 }
 0x34e   : > { %19267 = vmatmul.mubr.msk.bf16.gmra.mrb[56].mxu1 %vm280_vm3, %v22124_v19 }
 0x34f   : > { %19270 = vmatprep.mubr.msk.bf16.mxu1 %vm280_vm3, %v22132_v30 }
 0x356   : > { %19271 = vmatmul.mubr.msk.bf16.gmra.mrb[60].mxu1 %vm280_vm3, %v22134_v37 }
 0x357   : > { %19274 = vmatprep.mubr.msk.bf16.mxu1 %vm280_vm3, %v22142_v50 }
 0x35e   : > { %19275 = vmatmul.mubr.msk.bf16.gmra.mrb[64].mxu1 %vm280_vm3, %v22144_v20 }
 0x35f   : > { %19278 = vmatprep.mubr.msk.bf16.mxu1 %vm280_vm3, %v22151_v56 }
 0x360   : > { %v22303_v34 = vpop.f32.mrb[252].mxu0 }
 0x361   : > { %24799 = vst [vmem:[#allocation33_spill] sm:$0xff] %v22303_v34  ;;  %v22305_v40 = vpop.f32.mrb[253].mxu0 }
 0x362   : > { %24800 = vst [vmem:[#allocation34_spill] sm:$0xff] %v22305_v40  ;;  %v19093_v51 = vpop.f32.mrb[254].mxu0 }
 0x363   : > { %v22307_v53 = vpop.f32.mrb[255].mxu0 }
 0x364   : > { %24801 = vst [vmem:[#allocation35_spill] sm:$0xff] %v22307_v53 }
 0x366   : > { %19279 = vmatmul.mubr.msk.bf16.gmra.mrb[0].mxu1 %vm280_vm3, %v22155_v59 }
 0x367   : > { %19282 = vmatprep.mubr.msk.bf16.mxu1 %vm280_vm3, %v22167_v6 }
 0x368   : > { %v19096_v62 = vpop.f32.mrb[0].mxu0 }
 0x369   : > { %v5666_v0 = vpop.f32.mrb[1].mxu0 }
 0x36a   : > { %v19097_v12 = vpop.f32.mrb[2].mxu0 }
 0x36b   : > { %v5669_v19 = vpop.f32.mrb[3].mxu0 }
 0x36c   : > { %v6760_v19 = vld [vmem:[#allocation5 + $0x222] sm:$0xff] }
 0x36e   : > { %19283 = vmatmul.mubr.msk.bf16.gmra.mrb[4].mxu1 %vm280_vm3, %v22169_v11 }
 0x36f   : > { %19286 = vmatprep.mubr.msk.bf16.mxu1 %vm280_vm3, %v22179_v27 }
 0x370   : > { %v22317_v30 = vpop.f32.mrb[192].mxu0 }
 0x371   : > { %v22319_v37 = vpop.f32.mrb[193].mxu0 }
 0x372   : > { %v22321_v50 = vpop.f32.mrb[194].mxu0 }
 0x373   : > { %v22323_v20 = vpop.f32.mrb[195].mxu0 }
 0x376   : > { %19287 = vmatmul.mubr.msk.bf16.gmra.mrb[8].mxu1 %vm280_vm3, %v22177_v26 }
 0x377   : > { %19290 = vmatprep.mubr.msk.bf16.mxu1 %vm280_vm3, %v22191_v44 }
 0x378   : > { %v22329_v56 = vpop.f32.mrb[196].mxu0 }
 0x379   : > { %v22331_v59 = vpop.f32.mrb[197].mxu0 }
 0x37a   : > { %v22333_v6 = vpop.f32.mrb[198].mxu0 }
 0x37b   : > { %v22335_v11 = vpop.f32.mrb[199].mxu0 }
 0x37e   : > { %19291 = vmatmul.mubr.msk.bf16.gmra.mrb[12].mxu1 %vm280_vm3, %v22193_v47 }
 0x37f   : > { %19294 = vmatprep.mubr.msk.bf16.mxu1 %vm280_vm3, %v22199_v54 }
 0x380   : > { %v22341_v27 = vpop.f32.mrb[200].mxu0 }
 0x381   : > { %v22343_v26 = vpop.f32.mrb[201].mxu0 }
 0x382   : > { %v22345_v52 = vpop.f32.mrb[202].mxu0 }
 0x383   : > { %v22347_v44 = vpop.f32.mrb[203].mxu0 }
 0x386   : > { %19295 = vmatmul.mubr.msk.bf16.gmra.mrb[16].mxu1 %vm280_vm3, %v22201_v57 }
 0x387   : > { %19298 = vmatprep.mubr.msk.bf16.mxu1 %vm280_vm3, %v22207_v9  ;;  %v6759_v9 = vld [vmem:[#allocation5 + $0x21a] sm:$0xff] }
 0x388   : > { %v22353_v55 = vpop.f32.mrb[204].mxu0 }
 0x389   : > { %v22355_v47 = vpop.f32.mrb[205].mxu0 }
 0x38a   : > { %v22357_v4 = vpop.f32.mrb[206].mxu0 }
 0x38b   : > { %v22359_v54 = vpop.f32.mrb[207].mxu0 }
 0x38e   : > { %19299 = vmatmul.mubr.msk.bf16.gmra.mrb[20].mxu1 %vm280_vm3, %v22209_v14 }
 0x38f   : > { %19302 = vmatprep.mubr.msk.bf16.mxu1 %vm280_vm3, %v22215_v22  ;;  %v6794_v22 = vpack.c.bf16 %v6759_v9, %v22239_v3  ;;  %v7356_v3 = vpack.c.bf16 %v7289_v39, %v7288_v17  ;;  %v7291_v9 = vld [vmem:[#allocation5 + $0x2b] sm:$0xff]  ;;  %v20825_v39 = vld [vmem:[%s24760_s3 + $0x58] sm:$0xff]  }
 0x390   : > { %v19120_v15 = vpop.f32.mrb[208].mxu0 }
 0x391   : > { %v22365_v46 = vpop.f32.mrb[209].mxu0  ;;  %v6761_v15 = vld [vmem:[#allocation5 + $0x22a] sm:$0xf] }
 0x392   : > { %v19121_v57 = vpop.f32.mrb[210].mxu0 }
 0x393   : > { %v22367_v51 = vpop.f32.mrb[211].mxu0 }
 0x396   : > { %19303 = vmatmul.mubr.msk.bf16.gmra.mrb[24].mxu1 %vm280_vm3, %v22217_v29 }
 0x397   : > { %19306 = vmatprep.mubr.msk.bf16.mxu1 %vm280_vm3, %v22231_v63  ;;  %v6795_v63 = vpack.c.bf16 %v6761_v15, %v6760_v19  ;;  %v7290_v19 = vld [vmem:[#allocation5 + $0x23] sm:$0xff] }
 0x398   : > { %v22373_v62 = vpop.f32.mrb[212].mxu0  ;;  %v7357_v34 = vpack.c.bf16 %v7291_v9, %v7290_v19  ;;  %v7297_v9 = vld [vmem:[#allocation5 + $0x5b] sm:$0xff]  ;;  %v7294_v19 = vld [vmem:[#allocation5 + $0x43] sm:$0xff] }
 0x399   : > { %v5909_v0 = vpop.f32.mrb[213].mxu0 }
 0x39a   : > { %v22375_v14 = vpop.f32.mrb[214].mxu0 }
 0x39b   : > { %24802 = vst [vmem:[#allocation36_spill] sm:$0xff] %v22375_v14  ;;  %v5912_v12 = vpop.f32.mrb[215].mxu0 }
 0x39c   : > { %v7293_v12 = vld [vmem:[#allocation5 + $0x3b] sm:$0xff] }
 0x39d   : > { %v7358_v17 = vpack.c.bf16 %v7293_v12, %v7292_v23  ;;  %v7360_v23 = vpack.c.bf16 %v7297_v9, %v7296_v18  ;;  %v7298_v12 = vld [vmem:[#allocation5 + $0x63] sm:$0xff]  ;;  %v7307_v9 = vld [vmem:[#allocation5 + $0xab] sm:$0xff] }
 0x39e   : > { %19307 = vmatmul.mubr.msk.bf16.gmra.mrb[28].mxu1 %vm280_vm3, %v22233_v1 }
 0x39f   : > { %19310 = vmatprep.mubr.msk.bf16.mxu1 %vm280_vm3, %v6794_v22 }
 0x3a0   : > { %v22381_v29 = vpop.f32.mrb[216].mxu0 }
 0x3a1   : > { %24803 = vst [vmem:[#allocation37_spill] sm:$0xff] %v22381_v29  ;;  %v22383_v57 = vpop.f32.mrb[217].mxu0  ;;  %v7949_v29 = vld [vmem:[#allocation5 + $0x22c] sm:$0xf] }
 0x3a2   : > { %24804 = vst [vmem:[#allocation38_spill] sm:$0xff] %v22383_v57  ;;  %v22385_v0 = vpop.f32.mrb[218].mxu0  ;;  %v7944_v57 = vld [vmem:[#allocation5 + $0x204] sm:$0xff] }
 0x3a3   : > { %24805 = vst [vmem:[#allocation39_spill] sm:$0xff] %v22385_v0  ;;  %v22387_v53 = vpop.f32.mrb[219].mxu0  ;;  %v7947_v0 = vld [vmem:[#allocation5 + $0x21c] sm:$0xff] }
 0x3a4   : > { %24806 = vst [vmem:[#allocation40_spill] sm:$0xff] %v22387_v53  ;;  %v7946_v53 = vld [vmem:[#allocation5 + $0x214] sm:$0xff] }
 0x3a6   : > { %19311 = vmatmul.mubr.msk.bf16.gmra.mrb[32].mxu1 %vm280_vm3, %v6795_v63  ;;  %v22408_v63 = vld [vmem:[%s24760_s3 + $0x60] sm:$0xff]  }
 0x3a7   : > { %19318 = vmatprep.mubr.msk.bf16.mxu1 %vm280_vm3, %v7356_v3  ;;  %v7295_v3 = vld [vmem:[#allocation5 + $0x4b] sm:$0xff] }
 0x3a8   : > { %v22391_v1 = vpop.f32.mrb[220].mxu0  ;;  %v7359_v13 = vpack.c.bf16 %v7295_v3, %v7294_v19  ;;  %v7304_v3 = vld [vmem:[#allocation5 + $0x93] sm:$0xff]  ;;  %v7305_v19 = vld [vmem:[#allocation5 + $0x9b] sm:$0xff] }
 0x3a9   : > { %24807 = vst [vmem:[#allocation41_spill] sm:$0xff] %v22391_v1  ;;  %v22393_v22 = vpop.f32.mrb[221].mxu0  ;;  %v7364_v18 = vpack.c.bf16 %v7305_v19, %v7304_v3  ;;  %v7317_v3 = vld [vmem:[#allocation5 + $0xfb] sm:$0xff]  ;;  %v7314_v19 = vld [vmem:[#allocation5 + $0xe3] sm:$0xff] }
 0x3aa   : > { %24808 = vst [vmem:[#allocation42_spill] sm:$0xff] %v22393_v22  ;;  %v22395_v40 = vpop.f32.mrb[222].mxu0  ;;  %v7941_v22 = vld [vmem:[#allocation5 + $0x1ec] sm:$0xff]  ;;  %v7940_v1 = vld [vmem:[#allocation5 + $0x1e4] sm:$0xff] }
 0x3ab   : > { %24809 = vst [vmem:[#allocation43_spill] sm:$0xff] %v22395_v40  ;;  %v22397_v15 = vpop.f32.mrb[223].mxu0 }
 0x3ac   : > { %24810 = vst [vmem:[#allocation44_spill] sm:$0xff] %v22397_v15  ;;  %v7938_v15 = vld [vmem:[#allocation5 + $0x1d4] sm:$0xff] }
 0x3ae   : > { %19319 = vmatmul.mubr.msk.bf16.vlgmr.msra.gmra.mrb[36].mxu1 %vm280_vm3, %v7357_v34  ;;  %v7301_v34 = vld [vmem:[#allocation5 + $0x7b] sm:$0xff] }
 0x3af   : > { %19387 = vmatpush3.bf16.msra.mxu1 %v22264_v5  ;;  %19322 = vmatprep.mubr.msk.bf16.mxu1 %vm280_vm3, %v7358_v17  ;;  %v7299_v5 = vld [vmem:[#allocation5 + $0x6b] sm:$0xff]  ;;  %v7362_v45 = vpack.c.bf16 %v7301_v34, %v7300_v10 }
 0x3b0   : > { %19388 = vmatprep.subr.bf16.mxu1 %v20825_v39  ;;  %v7361_v17 = vpack.c.bf16 %v7299_v5, %v7298_v12  ;;  %v7309_v5 = vld [vmem:[#allocation5 + $0xbb] sm:$0xff]  ;;  %v7311_v34 = vld [vmem:[#allocation5 + $0xcb] sm:$0xff] }
 0x3b3   : > { %19389 = vmatpush3.bf16.msra.mxu1 %v20825_v39  ;;  %v7303_v39 = vld [vmem:[#allocation5 + $0x8b] sm:$0xff] }
 0x3b4   : > { %19458 = vmatprep.subr.bf16.mxu1 %v22408_v63  ;;  %v7363_v21 = vpack.c.bf16 %v7303_v39, %v7302_v25  ;;  %v7312_v25 = vld [vmem:[#allocation5 + $0xd3] sm:$0xff] }
 0x3b6   : > { %19323 = vmatmul.mubr.msk.bf16.gmra.mrb[40].mxu1 %vm280_vm3, %v7359_v13  ;;  %v7306_v13 = vld [vmem:[#allocation5 + $0xa3] sm:$0xff] }
 0x3b7   : > { %19326 = vmatprep.mubr.msk.bf16.mxu1 %vm280_vm3, %v7360_v23  ;;  %v7308_v23 = vld [vmem:[#allocation5 + $0xb3] sm:$0xff]  ;;  %v7365_v12 = vpack.c.bf16 %v7307_v9, %v7306_v13 }
 0x3b8   : > { %v7366_v10 = vpack.c.bf16 %v7309_v5, %v7308_v23  ;;  %v7316_v13 = vld [vmem:[#allocation5 + $0xf3] sm:$0xff]  ;;  %v7319_v23 = vld [vmem:[#allocation5 + $0x10b] sm:$0xff]  ;;  %v7321_v5 = vld [vmem:[#allocation5 + $0x11b] sm:$0xff] }
 0x3b9   : > { %v7370_v9 = vpack.c.bf16 %v7317_v3, %v7316_v13  ;;  %v7328_v13 = vld [vmem:[#allocation5 + $0x153] sm:$0xff] }
 0x3be   : > { %19327 = vmatmul.mubr.msk.bf16.gmra.mrb[44].mxu1 %vm280_vm3, %v7361_v17  ;;  %v7313_v17 = vld [vmem:[#allocation5 + $0xdb] sm:$0xff] }
 0x3bf   : > { %19330 = vmatprep.mubr.msk.bf16.mxu1 %vm280_vm3, %v7362_v45  ;;  %v7310_v45 = vld [vmem:[#allocation5 + $0xc3] sm:$0xff]  ;;  %v7368_v39 = vpack.c.bf16 %v7313_v17, %v7312_v25  ;;  %v7325_v17 = vld [vmem:[#allocation5 + $0x13b] sm:$0xff] }
 0x3c0   : > { %v7367_v16 = vpack.c.bf16 %v7311_v34, %v7310_v45  ;;  %v7320_v45 = vld [vmem:[#allocation5 + $0x113] sm:$0xff]  ;;  %v7322_v25 = vld [vmem:[#allocation5 + $0x123] sm:$0xff] }
 0x3c1   : > { %v7372_v34 = vpack.c.bf16 %v7321_v5, %v7320_v45 }
 0x3c6   : > { %19331 = vmatmul.mubr.msk.bf16.gmra.mrb[48].mxu1 %vm280_vm3, %v7363_v21  ;;  %v7315_v21 = vld [vmem:[#allocation5 + $0xeb] sm:$0xff] }
 0x3c7   : > { %19334 = vmatprep.mubr.msk.bf16.mxu1 %vm280_vm3, %v7364_v18  ;;  %v7369_v18 = vpack.c.bf16 %v7315_v21, %v7314_v19  ;;  %v7324_v21 = vld [vmem:[#allocation5 + $0x133] sm:$0xff]  ;;  %v7326_v19 = vld [vmem:[#allocation5 + $0x143] sm:$0xff] }
 0x3c8   : > { %v7374_v3 = vpack.c.bf16 %v7325_v17, %v7324_v21  ;;  %v7334_v21 = vld [vmem:[#allocation5 + $0x183] sm:$0xff] }
 0x3ce   : > { %19335 = vmatmul.mubr.msk.bf16.gmra.mrb[52].mxu1 %vm280_vm3, %v7365_v12  ;;  %v7318_v12 = vld [vmem:[#allocation5 + $0x103] sm:$0xff] }
 0x3cf   : > { %19338 = vmatprep.mubr.msk.bf16.mxu1 %vm280_vm3, %v7366_v10  ;;  %v7371_v10 = vpack.c.bf16 %v7319_v23, %v7318_v12  ;;  %v7330_v12 = vld [vmem:[#allocation5 + $0x163] sm:$0xff] }
 0x3d6   : > { %19339 = vmatmul.mubr.msk.bf16.gmra.mrb[56].mxu1 %vm280_vm3, %v7367_v16  ;;  %v7323_v16 = vld [vmem:[#allocation5 + $0x12b] sm:$0xff] }
 0x3d7   : > { %19342 = vmatprep.mubr.msk.bf16.mxu1 %vm280_vm3, %v7368_v39  ;;  %v7373_v39 = vpack.c.bf16 %v7323_v16, %v7322_v25  ;;  %v7333_v16 = vld [vmem:[#allocation5 + $0x17b] sm:$0xff]  ;;  %v7335_v25 = vld [vmem:[#allocation5 + $0x18b] sm:$0xff] }
 0x3de   : > { %19343 = vmatmul.mubr.msk.bf16.gmra.mrb[60].mxu1 %vm280_vm3, %v7369_v18  ;;  %v7327_v18 = vld [vmem:[#allocation5 + $0x14b] sm:$0xff] }
 0x3df   : > { %19346 = vmatprep.mubr.msk.bf16.mxu1 %vm280_vm3, %v7370_v9  ;;  %v7329_v9 = vld [vmem:[#allocation5 + $0x15b] sm:$0xff]  ;;  %v7375_v23 = vpack.c.bf16 %v7327_v18, %v7326_v19  ;;  %v7336_v19 = vld [vmem:[#allocation5 + $0x193] sm:$0xff] }
 0x3e0   : > { %v7376_v5 = vpack.c.bf16 %v7329_v9, %v7328_v13  ;;  %v7339_v13 = vld [vmem:[#allocation5 + $0x1ab] sm:$0xff]  ;;  %v7340_v9 = vld [vmem:[#allocation5 + $0x1b3] sm:$0xff] }
 0x3e6   : > { %19347 = vmatmul.mubr.msk.bf16.gmra.mrb[64].mxu1 %vm280_vm3, %v7371_v10  ;;  %v7331_v10 = vld [vmem:[#allocation5 + $0x16b] sm:$0xff] }
 0x3e7   : > { %19350 = vmatprep.mubr.msk.bf16.mxu1 %vm280_vm3, %v7372_v34  ;;  %v7377_v45 = vpack.c.bf16 %v7331_v10, %v7330_v12  ;;  %v7332_v34 = vld [vmem:[#allocation5 + $0x173] sm:$0xff] }
 0x3e8   : > { %v7378_v17 = vpack.c.bf16 %v7333_v16, %v7332_v34  ;;  %v7343_v34 = vld [vmem:[#allocation5 + $0x1cb] sm:$0xff]  ;;  %v7345_v16 = vld [vmem:[#allocation5 + $0x1db] sm:$0xff] }
 0x3ee   : > { %19351 = vmatmul.mubr.msk.bf16.gmra.mrb[0].mxu1 %vm280_vm3, %v7373_v39  ;;  %v7337_v39 = vld [vmem:[#allocation5 + $0x19b] sm:$0xff] }
 0x3ef   : > { %19354 = vmatprep.mubr.msk.bf16.mxu1 %vm280_vm3, %v7374_v3  ;;  %v7379_v3 = vpack.c.bf16 %v7335_v25, %v7334_v21  ;;  %v7380_v18 = vpack.c.bf16 %v7337_v39, %v7336_v19  ;;  %v7344_v25 = vld [vmem:[#allocation5 + $0x1d3] sm:$0xff]  ;;  %v7347_v21 = vld [vmem:[#allocation5 + $0x1eb] sm:$0xff]  ;;  %v7346_v19 = vld [vmem:[#allocation5 + $0x1e3] sm:$0xff] }
 0x3f0   : > { %v7384_v39 = vpack.c.bf16 %v7345_v16, %v7344_v25  ;;  %v7354_v16 = vld [vmem:[#allocation5 + $0x223] sm:$0xff] }
 0x3f6   : > { %19355 = vmatmul.mubr.msk.bf16.gmra.mrb[4].mxu1 %vm280_vm3, %v7375_v23  ;;  %v7341_v23 = vld [vmem:[#allocation5 + $0x1bb] sm:$0xff] }
 0x3f7   : > { %19358 = vmatprep.mubr.msk.bf16.mxu1 %vm280_vm3, %v7376_v5  ;;  %v7338_v5 = vld [vmem:[#allocation5 + $0x1a3] sm:$0xff]  ;;  %v7382_v10 = vpack.c.bf16 %v7341_v23, %v7340_v9  ;;  %v7352_v23 = vld [vmem:[#allocation5 + $0x213] sm:$0xff] }
 0x3f8   : > { %v7381_v12 = vpack.c.bf16 %v7339_v13, %v7338_v5  ;;  %v7348_v13 = vld [vmem:[#allocation5 + $0x1f3] sm:$0xff]  ;;  %v7353_v5 = vld [vmem:[#allocation5 + $0x21b] sm:$0xff] }
 0x3fe   : > { %19359 = vmatmul.mubr.msk.bf16.gmra.mrb[8].mxu1 %vm280_vm3, %v7377_v45  ;;  %v7342_v45 = vld [vmem:[#allocation5 + $0x1c3] sm:$0xff] }
 0x3ff   : > { %19362 = vmatprep.mubr.msk.bf16.mxu1 %vm280_vm3, %v7378_v17  ;;  %v7383_v17 = vpack.c.bf16 %v7343_v34, %v7342_v45  ;;  %v7388_v45 = vpack.c.bf16 %v7353_v5, %v7352_v23  ;;  %v7886_v23 = vld [vmem:[#allocation5 + $0x34] sm:$0xff] }
 0x400   : > { %v20827_v5 = vld [vmem:[%s24760_s3 + $0x68] sm:$0xff]  }
 0x406   : > { %19363 = vmatmul.mubr.msk.bf16.gmra.mrb[12].mxu1 %vm280_vm3, %v7379_v3  ;;  %v7349_v3 = vld [vmem:[#allocation5 + $0x1fb] sm:$0xff] }
 0x407   : > { %19366 = vmatprep.mubr.msk.bf16.mxu1 %vm280_vm3, %v7380_v18  ;;  %v7385_v18 = vpack.c.bf16 %v7347_v21, %v7346_v19  ;;  %v7386_v9 = vpack.c.bf16 %v7349_v3, %v7348_v13  ;;  %v7882_v21 = vld [vmem:[#allocation5 + $0x14] sm:$0xff]  ;;  %v7885_v19 = vld [vmem:[#allocation5 + $0x2c] sm:$0xff]  ;;  %v7884_v13 = vld [vmem:[#allocation5 + $0x24] sm:$0xff] }
 0x40e   : > { %19367 = vmatmul.mubr.msk.bf16.gmra.mrb[16].mxu1 %vm280_vm3, %v7381_v12  ;;  %v7350_v12 = vld [vmem:[#allocation5 + $0x203] sm:$0xff] }
 0x40f   : > { %19370 = vmatprep.mubr.msk.bf16.mxu1 %vm280_vm3, %v7382_v10  ;;  %v7351_v10 = vld [vmem:[#allocation5 + $0x20b] sm:$0xff] }
 0x410   : > { %v7387_v34 = vpack.c.bf16 %v7351_v10, %v7350_v12  ;;  %v22458_v10 = vld [vmem:[%s24760_s3 + $0x70] sm:$0xff]  }
 0x416   : > { %19371 = vmatmul.mubr.msk.bf16.gmra.mrb[20].mxu1 %vm280_vm3, %v7383_v17  ;;  %v7355_v17 = vld [vmem:[#allocation5 + $0x22b] sm:$0xf] }
 0x417   : > { %19374 = vmatprep.mubr.msk.bf16.mxu1 %vm280_vm3, %v7384_v39  ;;  %v7389_v25 = vpack.c.bf16 %v7355_v17, %v7354_v16  ;;  %v7883_v39 = vld [vmem:[#allocation5 + $0x1c] sm:$0xff]  ;;  %v7890_v16 = vld [vmem:[#allocation5 + $0x54] sm:$0xff] }
 0x418   : > { %v7950_v3 = vpack.c.bf16 %v7883_v39, %v7882_v21  ;;  %v7891_v17 = vld [vmem:[#allocation5 + $0x5c] sm:$0xff] }
 0x419   : > { %v22463_v39 = vpack.c.bf16 %v7891_v17, %v7890_v16  ;;  %v7895_v21 = vld [vmem:[#allocation5 + $0x7c] sm:$0xff] }
 0x41e   : > { %19375 = vmatmul.mubr.msk.bf16.gmra.mrb[24].mxu1 %vm280_vm3, %v7385_v18  ;;  %v7887_v18 = vld [vmem:[#allocation5 + $0x3c] sm:$0xff] }
 0x41f   : > { %19378 = vmatprep.mubr.msk.bf16.mxu1 %vm280_vm3, %v7386_v9  ;;  %v22443_v9 = vpack.c.bf16 %v7885_v19, %v7884_v13  ;;  %v22448_v12 = vpack.c.bf16 %v7887_v18, %v7886_v23  ;;  %v7894_v18 = vld [vmem:[#allocation5 + $0x74] sm:$0xff]  ;;  %v7897_v23 = vld [vmem:[#allocation5 + $0x8c] sm:$0xff] }
 0x420   : > { %v22471_v13 = vpack.c.bf16 %v7895_v21, %v7894_v18  ;;  %v7901_v21 = vld [vmem:[#allocation5 + $0xac] sm:$0xff]  ;;  %v7903_v18 = vld [vmem:[#allocation5 + $0xbc] sm:$0xff] }
 0x426   : > { %19379 = vmatmul.mubr.msk.bf16.gmra.mrb[28].mxu1 %vm280_vm3, %v7387_v34  ;;  %v7889_v34 = vld [vmem:[#allocation5 + $0x4c] sm:$0xff] }
 0x427   : > { %19382 = vmatprep.mubr.msk.bf16.mxu1 %vm280_vm3, %v7388_v45  ;;  %v7888_v45 = vld [vmem:[#allocation5 + $0x44] sm:$0xff] }
 0x42e   : > { %19383 = vmatmul.mubr.msk.bf16.gmra.mrb[32].mxu1 %vm280_vm3, %v7389_v25  ;;  %v22460_v25 = vpack.c.bf16 %v7889_v34, %v7888_v45  ;;  %v7899_v45 = vld [vmem:[#allocation5 + $0x9c] sm:$0xff]  ;;  %v7896_v34 = vld [vmem:[#allocation5 + $0x84] sm:$0xff] }
 0x42f   : > { %19390 = vmatprep.mubr.msk.bf16.mxu1 %vm280_vm3, %v7950_v3  ;;  %v7892_v3 = vld [vmem:[#allocation5 + $0x64] sm:$0xff]  ;;  %v22477_v16 = vpack.c.bf16 %v7897_v23, %v7896_v34 }
 0x430   : > { %v7904_v23 = vld [vmem:[#allocation5 + $0xc4] sm:$0xff] }
 0x436   : > { %19391 = vmatmul.mubr.msk.bf16.vlgmr.msra.gmra.mrb[36].mxu1 %vm280_vm3, %v22443_v9 }
 0x437   : > { %19459 = vmatpush3.bf16.msra.mxu1 %v22408_v63  ;;  %19394 = vmatprep.mubr.msk.bf16.mxu1 %vm280_vm3, %v22448_v12  ;;  %v7893_v63 = vld [vmem:[#allocation5 + $0x6c] sm:$0xff] }
 0x438   : > { %19460 = vmatprep.subr.bf16.mxu1 %v20827_v5  ;;  %v22469_v19 = vpack.c.bf16 %v7893_v63, %v7892_v3  ;;  %v7900_v63 = vld [vmem:[#allocation5 + $0xa4] sm:$0xff]  ;;  %v7902_v3 = vld [vmem:[#allocation5 + $0xb4] sm:$0xff] }
 0x439   : > { %v22485_v49 = vpack.c.bf16 %v7901_v21, %v7900_v63  ;;  %v22487_v36 = vpack.c.bf16 %v7903_v18, %v7902_v3  ;;  %v7909_v63 = vld [vmem:[#allocation5 + $0xec] sm:$0xff]  ;;  %v7911_v21 = vld [vmem:[#allocation5 + $0xfc] sm:$0xff]  ;;  %v7908_v3 = vld [vmem:[#allocation5 + $0xe4] sm:$0xff] }
 0x43a   : > { %v22501_v18 = vpack.c.bf16 %v7909_v63, %v7908_v3  ;;  %v22503_v41 = vpack.c.bf16 %v7911_v21, %v7910_v43  ;;  %v7917_v43 = vld [vmem:[#allocation5 + $0x12c] sm:$0xff]  ;;  %v7919_v63 = vld [vmem:[#allocation5 + $0x13c] sm:$0xff]  ;;  %v7916_v21 = vld [vmem:[#allocation5 + $0x124] sm:$0xff] }
 0x43b   : > { %19461 = vmatpush3.bf16.msra.mxu1 %v20827_v5  ;;  %v7898_v5 = vld [vmem:[#allocation5 + $0x94] sm:$0xff]  ;;  %v22517_v3 = vpack.c.bf16 %v7917_v43, %v7916_v21  ;;  %v22519_v24 = vpack.c.bf16 %v7919_v63, %v7918_v61  ;;  %v7924_v61 = vld [vmem:[#allocation5 + $0x164] sm:$0xff]  ;;  %v7925_v43 = vld [vmem:[#allocation5 + $0x16c] sm:$0xff] }
 0x43c   : > { %19530 = vmatprep.subr.bf16.mxu1 %v22458_v10  ;;  %v22479_v17 = vpack.c.bf16 %v7899_v45, %v7898_v5  ;;  %v7905_v5 = vld [vmem:[#allocation5 + $0xcc] sm:$0xff]  ;;  %v7907_v45 = vld [vmem:[#allocation5 + $0xdc] sm:$0xff]  ;;  %v22533_v63 = vpack.c.bf16 %v7925_v43, %v7924_v61  ;;  %v7926_v21 = vld [vmem:[#allocation5 + $0x174] sm:$0xff] }
 0x43d   : > { %v22493_v34 = vpack.c.bf16 %v7905_v5, %v7904_v23  ;;  %v22495_v31 = vpack.c.bf16 %v7907_v45, %v7906_v35  ;;  %v7913_v35 = vld [vmem:[#allocation5 + $0x10c] sm:$0xff]  ;;  %v7915_v23 = vld [vmem:[#allocation5 + $0x11c] sm:$0xff]  ;;  %v7912_v5 = vld [vmem:[#allocation5 + $0x104] sm:$0xff]  ;;  %v22535_v8 = vpack.c.bf16 %v7927_v33, %v7926_v21 }
 0x43e   : > { %19395 = vmatmul.mubr.msk.bf16.gmra.mrb[40].mxu1 %vm280_vm3, %v22460_v25  ;;  %v22509_v45 = vpack.c.bf16 %v7913_v35, %v7912_v5  ;;  %v22511_v38 = vpack.c.bf16 %v7915_v23, %v7914_v28  ;;  %v7920_v28 = vld [vmem:[#allocation5 + $0x144] sm:$0xff]  ;;  %v7921_v35 = vld [vmem:[#allocation5 + $0x14c] sm:$0xff]  ;;  %v7922_v23 = vld [vmem:[#allocation5 + $0x154] sm:$0xff] }
 0x43f   : > { %19398 = vmatprep.mubr.msk.bf16.mxu1 %vm280_vm3, %v22463_v39  ;;  %v7923_v5 = vld [vmem:[#allocation5 + $0x15c] sm:$0xff]  ;;  %v22525_v60 = vpack.c.bf16 %v7921_v35, %v7920_v28  ;;  %v7929_v28 = vld [vmem:[#allocation5 + $0x18c] sm:$0xff]  ;;  %v7932_v43 = vld [vmem:[#allocation5 + $0x1a4] sm:$0xff] }
 0x440   : > { %v22527_v58 = vpack.c.bf16 %v7923_v5, %v7922_v23  ;;  %v7931_v35 = vld [vmem:[#allocation5 + $0x19c] sm:$0xff]  ;;  %v7928_v23 = vld [vmem:[#allocation5 + $0x184] sm:$0xff]  ;;  %v7933_v33 = vld [vmem:[#allocation5 + $0x1ac] sm:$0xff] }
 0x441   : > { %v22541_v5 = vpack.c.bf16 %v7929_v28, %v7928_v23  ;;  %v22543_v2 = vpack.c.bf16 %v7931_v35, %v7930_v7  ;;  %v7935_v61 = vld [vmem:[#allocation5 + $0x1bc] sm:$0xff]  ;;  %v22549_v21 = vpack.c.bf16 %v7933_v33, %v7932_v43  ;;  %v7937_v7 = vld [vmem:[#allocation5 + $0x1cc] sm:$0xff]  ;;  %v7936_v35 = vld [vmem:[#allocation5 + $0x1c4] sm:$0xff] }
 0x442   : > { %v7976_v42 = vpack.c.bf16 %v7935_v61, %v7934_v48  ;;  %v7939_v28 = vld [vmem:[#allocation5 + $0x1dc] sm:$0xff]  ;;  %v7977_v23 = vpack.c.bf16 %v7937_v7, %v7936_v35  ;;  %v7942_v33 = vld [vmem:[#allocation5 + $0x1f4] sm:$0xff]  ;;  %v7979_v48 = vpack.c.bf16 %v7941_v22, %v7940_v1  ;;  %v7945_v7 = vld [vmem:[#allocation5 + $0x20c] sm:$0xff]  ;;  %v7982_v35 = vpack.c.bf16 %v7947_v0, %v7946_v53 }
 0x443   : > { %v7978_v40 = vpack.c.bf16 %v7939_v28, %v7938_v15  ;;  %v7943_v43 = vld [vmem:[#allocation5 + $0x1fc] sm:$0xff]  ;;  %v7981_v15 = vpack.c.bf16 %v7945_v7, %v7944_v57  ;;  %v7948_v28 = vld [vmem:[#allocation5 + $0x224] sm:$0xff] }
 0x444   : > { %v7980_v61 = vpack.c.bf16 %v7943_v43, %v7942_v33  ;;  %v7983_v14 = vpack.c.bf16 %v7949_v29, %v7948_v28  ;;  %v20829_v1 = vld [vmem:[%s24760_s3 + $0x78] sm:$0xff]   ;;  %v20830_v53 = vld [vmem:[%s24760_s3 + $0x80] sm:$0xff]   ;;  %v20831_v29 = vld [vmem:[%s24760_s3 + $0x88] sm:$0xff]  }
 0x445   : > { %v9076_v0 = vld [vmem:[#allocation5 + $0x55] sm:$0xff]  ;;  %v9077_v22 = vld [vmem:[#allocation5 + $0x5d] sm:$0xff] }
 0x446   : > { %19399 = vmatmul.mubr.msk.bf16.gmra.mrb[44].mxu1 %vm280_vm3, %v22469_v19  ;;  %v9089_v33 = vld [vmem:[#allocation5 + $0xbd] sm:$0xff] }
 0x447   : > { %19402 = vmatprep.mubr.msk.bf16.mxu1 %vm280_vm3, %v22471_v13 }
 0x44e   : > { %19403 = vmatmul.mubr.msk.bf16.gmra.mrb[48].mxu1 %vm280_vm3, %v22477_v16 }
 0x44f   : > { %19406 = vmatprep.mubr.msk.bf16.mxu1 %vm280_vm3, %v22479_v17 }
 0x456   : > { %19407 = vmatmul.mubr.msk.bf16.gmra.mrb[52].mxu1 %vm280_vm3, %v22485_v49 }
 0x457   : > { %19410 = vmatprep.mubr.msk.bf16.mxu1 %vm280_vm3, %v22487_v36 }
 0x45e   : > { %19411 = vmatmul.mubr.msk.bf16.gmra.mrb[56].mxu1 %vm280_vm3, %v22493_v34 }
 0x45f   : > { %19414 = vmatprep.mubr.msk.bf16.mxu1 %vm280_vm3, %v22495_v31 }
 0x466   : > { %19415 = vmatmul.mubr.msk.bf16.gmra.mrb[60].mxu1 %vm280_vm3, %v22501_v18 }
 0x467   : > { %19418 = vmatprep.mubr.msk.bf16.mxu1 %vm280_vm3, %v22503_v41 }
 0x46e   : > { %19419 = vmatmul.mubr.msk.bf16.gmra.mrb[64].mxu1 %vm280_vm3, %v22509_v45 }
 0x46f   : > { %19422 = vmatprep.mubr.msk.bf16.mxu1 %vm280_vm3, %v22511_v38 }
 0x476   : > { %19423 = vmatmul.mubr.msk.bf16.gmra.mrb[0].mxu1 %vm280_vm3, %v22517_v3 }
 0x477   : > { %19426 = vmatprep.mubr.msk.bf16.mxu1 %vm280_vm3, %v22519_v24 }
 0x47e   : > { %19427 = vmatmul.mubr.msk.bf16.gmra.mrb[4].mxu1 %vm280_vm3, %v22525_v60 }
 0x47f   : > { %19430 = vmatprep.mubr.msk.bf16.mxu1 %vm280_vm3, %v22527_v58 }
 0x486   : > { %19431 = vmatmul.mubr.msk.bf16.gmra.mrb[8].mxu1 %vm280_vm3, %v22533_v63 }
 0x487   : > { %19434 = vmatprep.mubr.msk.bf16.mxu1 %vm280_vm3, %v22535_v8 }
 0x48e   : > { %19435 = vmatmul.mubr.msk.bf16.gmra.mrb[12].mxu1 %vm280_vm3, %v22541_v5 }
 0x48f   : > { %19438 = vmatprep.mubr.msk.bf16.mxu1 %vm280_vm3, %v22543_v2 }
 0x496   : > { %19439 = vmatmul.mubr.msk.bf16.gmra.mrb[16].mxu1 %vm280_vm3, %v22549_v21 }
 0x497   : > { %19442 = vmatprep.mubr.msk.bf16.mxu1 %vm280_vm3, %v7976_v42 }
 0x49e   : > { %19443 = vmatmul.mubr.msk.bf16.gmra.mrb[20].mxu1 %vm280_vm3, %v7977_v23 }
 0x49f   : > { %19446 = vmatprep.mubr.msk.bf16.mxu1 %vm280_vm3, %v7978_v40 }
 0x4a6   : > { %19447 = vmatmul.mubr.msk.bf16.gmra.mrb[24].mxu1 %vm280_vm3, %v7979_v48 }
 0x4a7   : > { %19450 = vmatprep.mubr.msk.bf16.mxu1 %vm280_vm3, %v7980_v61 }
 0x4ae   : > { %19451 = vmatmul.mubr.msk.bf16.gmra.mrb[28].mxu1 %vm280_vm3, %v7981_v15 }
 0x4af   : > { %19454 = vmatprep.mubr.msk.bf16.mxu1 %vm280_vm3, %v7982_v35 }
 0x4b6   : > { %19455 = vmatmul.mubr.msk.bf16.gmra.mrb[32].mxu1 %vm280_vm3, %v7983_v14 }
 0x4b7   : > { %19462 = vmatprep.mubr.msk.bf16.mxu1 %vm280_vm3, %v22443_v9  ;;  %v9079_v9 = vld [vmem:[#allocation5 + $0x6d] sm:$0xff] }
 0x4be   : > { %19463 = vmatmul.mubr.msk.bf16.vlgmr.msra.gmra.mrb[36].mxu1 %vm280_vm3, %v22448_v12  ;;  %v9141_v12 = vpack.c.bf16 %v9077_v22, %v9076_v0  ;;  %v9107_v0 = vld [vmem:[#allocation5 + $0x14d] sm:$0xff]  ;;  %v9104_v22 = vld [vmem:[#allocation5 + $0x135] sm:$0xff] }
 0x4bf   : > { %19531 = vmatpush3.bf16.msra.mxu1 %v22458_v10  ;;  %19466 = vmatprep.mubr.msk.bf16.mxu1 %vm280_vm3, %v22460_v25  ;;  %v9078_v10 = vld [vmem:[#allocation5 + $0x65] sm:$0xff] }
 0x4c0   : > { %19532 = vmatprep.subr.bf16.mxu1 %v20829_v1  ;;  %v9142_v25 = vpack.c.bf16 %v9079_v9, %v9078_v10  ;;  %v9110_v10 = vld [vmem:[#allocation5 + $0x165] sm:$0xff] }
 0x4c3   : > { %19533 = vmatpush3.bf16.msra.mxu1 %v20829_v1 }
 0x4c4   : > { %19602 = vmatprep.subr.bf16.mxu1 %v20830_v53 }
 0x4c6   : > { %19467 = vmatmul.mubr.msk.bf16.gmra.mrb[40].mxu1 %vm280_vm3, %v22463_v39  ;;  %v9081_v39 = vld [vmem:[#allocation5 + $0x7d] sm:$0xff] }
 0x4c7   : > { %19470 = vmatprep.mubr.msk.bf16.mxu1 %vm280_vm3, %v22469_v19  ;;  %v9083_v19 = vld [vmem:[#allocation5 + $0x8d] sm:$0xff] }
 0x4ce   : > { %19471 = vmatmul.mubr.msk.bf16.gmra.mrb[44].mxu1 %vm280_vm3, %v22471_v13  ;;  %v9080_v13 = vld [vmem:[#allocation5 + $0x75] sm:$0xff] }
 0x4cf   : > { %19474 = vmatprep.mubr.msk.bf16.mxu1 %vm280_vm3, %v22477_v16  ;;  %v9143_v16 = vpack.c.bf16 %v9081_v39, %v9080_v13  ;;  %v9108_v39 = vld [vmem:[#allocation5 + $0x155] sm:$0xff] }
 0x4d6   : > { %19475 = vmatmul.mubr.msk.bf16.gmra.mrb[48].mxu1 %vm280_vm3, %v22479_v17  ;;  %v9082_v17 = vld [vmem:[#allocation5 + $0x85] sm:$0xff] }
 0x4d7   : > { %19478 = vmatprep.mubr.msk.bf16.mxu1 %vm280_vm3, %v22485_v49  ;;  %v9075_v49 = vld [vmem:[#allocation5 + $0x4d] sm:$0xff] }
 0x4de   : > { %19479 = vmatmul.mubr.msk.bf16.gmra.mrb[52].mxu1 %vm280_vm3, %v22487_v36  ;;  %v9074_v36 = vld [vmem:[#allocation5 + $0x45] sm:$0xff] }
 0x4df   : > { %19482 = vmatprep.mubr.msk.bf16.mxu1 %vm280_vm3, %v22493_v34  ;;  %v9140_v57 = vpack.c.bf16 %v9075_v49, %v9074_v36  ;;  %v9144_v34 = vpack.c.bf16 %v9083_v19, %v9082_v17  ;;  %v9100_v36 = vld [vmem:[#allocation5 + $0x115] sm:$0xff]  ;;  %v9109_v19 = vld [vmem:[#allocation5 + $0x15d] sm:$0xff] }
 0x4e0   : > { %v9112_v17 = vld [vmem:[#allocation5 + $0x175] sm:$0xff] }
 0x4e6   : > { %19483 = vmatmul.mubr.msk.bf16.gmra.mrb[56].mxu1 %vm280_vm3, %v22495_v31  ;;  %v9073_v31 = vld [vmem:[#allocation5 + $0x3d] sm:$0xff] }
 0x4e7   : > { %19486 = vmatprep.mubr.msk.bf16.mxu1 %vm280_vm3, %v22501_v18  ;;  %v9086_v18 = vld [vmem:[#allocation5 + $0xa5] sm:$0xff] }
 0x4ee   : > { %19487 = vmatmul.mubr.msk.bf16.gmra.mrb[60].mxu1 %vm280_vm3, %v22503_v41 }
 0x4ef   : > { %19490 = vmatprep.mubr.msk.bf16.mxu1 %vm280_vm3, %v22509_v45  ;;  %v9087_v45 = vld [vmem:[#allocation5 + $0xad] sm:$0xff] }
 0x4f6   : > { %19491 = vmatmul.mubr.msk.bf16.gmra.mrb[64].mxu1 %vm280_vm3, %v22511_v38  ;;  %v9070_v38 = vld [vmem:[#allocation5 + $0x25] sm:$0xff] }
 0x4f7   : > { %19494 = vmatprep.mubr.msk.bf16.mxu1 %vm280_vm3, %v22517_v3  ;;  %v9084_v3 = vld [vmem:[#allocation5 + $0x95] sm:$0xff] }
 0x4fe   : > { %19495 = vmatmul.mubr.msk.bf16.gmra.mrb[0].mxu1 %vm280_vm3, %v22519_v24 }
 0x4ff   : > { %19498 = vmatprep.mubr.msk.bf16.mxu1 %vm280_vm3, %v22525_v60  ;;  %v8543_v60 = vld [vmem:[#allocation5 + $0x23c] sm:$0xf] }
 0x506   : > { %19499 = vmatmul.mubr.msk.bf16.gmra.mrb[4].mxu1 %vm280_vm3, %v22527_v58 }
 0x507   : > { %19502 = vmatprep.mubr.msk.bf16.mxu1 %vm280_vm3, %v22533_v63  ;;  %v9085_v63 = vld [vmem:[#allocation5 + $0x9d] sm:$0xff] }
 0x50e   : > { %19503 = vmatmul.mubr.msk.bf16.gmra.mrb[8].mxu1 %vm280_vm3, %v22535_v8  ;;  %v8541_v8 = vld [vmem:[#allocation5 + $0x22c] sm:$0xff] }
 0x50f   : > { %19506 = vmatprep.mubr.msk.bf16.mxu1 %vm280_vm3, %v22541_v5  ;;  %v8576_v58 = vpack.c.bf16 %v8541_v8, %v7948_v28  ;;  %v9146_v5 = vpack.c.bf16 %v9087_v45, %v9086_v18  ;;  %v9092_v28 = vld [vmem:[#allocation5 + $0xd5] sm:$0xff]  ;;  %v9115_v18 = vld [vmem:[#allocation5 + $0x18d] sm:$0xff] }
 0x516   : > { %19507 = vmatmul.mubr.msk.bf16.gmra.mrb[12].mxu1 %vm280_vm3, %v22543_v2  ;;  %v8542_v2 = vld [vmem:[#allocation5 + $0x234] sm:$0xff] }
 0x517   : > { %19510 = vmatprep.mubr.msk.bf16.mxu1 %vm280_vm3, %v22549_v21  ;;  %v8577_v24 = vpack.c.bf16 %v8543_v60, %v8542_v2  ;;  %v9145_v21 = vpack.c.bf16 %v9085_v63, %v9084_v3  ;;  %v9099_v2 = vld [vmem:[#allocation5 + $0x10d] sm:$0xff]  ;;  %v9096_v60 = vld [vmem:[#allocation5 + $0xf5] sm:$0xff]  ;;  %v9114_v3 = vld [vmem:[#allocation5 + $0x185] sm:$0xff] }
 0x518   : > { %v9160_v63 = vpack.c.bf16 %v9115_v18, %v9114_v3  ;;  %v24811_v3 = vmov 0.0  }
 0x519   : > { %356 = vst.msk [vmem:[#allocation6] sm:$0xff] %vm355_vm4, %v24811_v3  ;;  %357 = vst.msk [vmem:[#allocation6 + $0x8] sm:$0xff] %vm355_vm4, %v24811_v3 }
 0x51a   : > { %358 = vst.msk [vmem:[#allocation6 + $0x10] sm:$0xff] %vm355_vm4, %v24811_v3  ;;  %359 = vst.msk [vmem:[#allocation6 + $0x18] sm:$0xff] %vm355_vm4, %v24811_v3 }
 0x51b   : > { %360 = vst.msk [vmem:[#allocation6 + $0x20] sm:$0xff] %vm355_vm4, %v24811_v3  ;;  %361 = vst.msk [vmem:[#allocation6 + $0x28] sm:$0xff] %vm355_vm4, %v24811_v3 }
 0x51c   : > { %362 = vst.msk [vmem:[#allocation6 + $0x30] sm:$0xff] %vm355_vm4, %v24811_v3  ;;  %363 = vst.msk [vmem:[#allocation6 + $0x38] sm:$0xff] %vm355_vm4, %v24811_v3 }
 0x51d   : > { %364 = vst.msk [vmem:[#allocation6 + $0x40] sm:$0xff] %vm355_vm4, %v24811_v3  ;;  %365 = vst.msk [vmem:[#allocation6 + $0x48] sm:$0xff] %vm355_vm4, %v24811_v3 }
 0x51e   : > { %19511 = vmatmul.mubr.msk.bf16.gmra.mrb[16].mxu1 %vm280_vm3, %v7976_v42  ;;  %v9071_v42 = vld [vmem:[#allocation5 + $0x2d] sm:$0xff]  ;;  %366 = vst.msk [vmem:[#allocation6 + $0x50] sm:$0xff] %vm355_vm4, %v24811_v3  ;;  %367 = vst.msk [vmem:[#allocation6 + $0x58] sm:$0xff] %vm355_vm4, %v24811_v3 }
 0x51f   : > { %19514 = vmatprep.mubr.msk.bf16.mxu1 %vm280_vm3, %v7977_v23  ;;  %v9138_v41 = vpack.c.bf16 %v9071_v42, %v9070_v38  ;;  %v9088_v23 = vld [vmem:[#allocation5 + $0xb5] sm:$0xff]  ;;  %v9098_v42 = vld [vmem:[#allocation5 + $0x105] sm:$0xff]  ;;  %368 = vst.msk [vmem:[#allocation6 + $0x60] sm:$0xff] %vm355_vm4, %v24811_v3  ;;  %369 = vst.msk [vmem:[#allocation6 + $0x68] sm:$0xff] %vm355_vm4, %v24811_v3 }
 0x520   : > { %v9147_v43 = vpack.c.bf16 %v9089_v33, %v9088_v23  ;;  %v9152_v38 = vpack.c.bf16 %v9099_v2, %v9098_v42  ;;  %v9116_v23 = vld [vmem:[#allocation5 + $0x195] sm:$0xff]  ;;  %370 = vst.msk [vmem:[#allocation6 + $0x70] sm:$0xff] %vm355_vm4, %v24811_v3  ;;  %371 = vst.msk [vmem:[#allocation6 + $0x78] sm:$0xff] %vm355_vm4, %v24811_v3 }
 0x521   : > { %v9128_v42 = vld [vmem:[#allocation5 + $0x1f5] sm:$0xff]  ;;  %372 = vst.msk [vmem:[#allocation6 + $0x80] sm:$0xff] %vm355_vm4, %v24811_v3  ;;  %373 = vst.msk [vmem:[#allocation6 + $0x88] sm:$0xff] %vm355_vm4, %v24811_v3 }
 0x522   : > { %374 = vst.msk [vmem:[#allocation6 + $0x90] sm:$0xff] %vm355_vm4, %v24811_v3  ;;  %375 = vst.msk [vmem:[#allocation6 + $0x98] sm:$0xff] %vm355_vm4, %v24811_v3 }
 0x523   : > { %376 = vst.msk [vmem:[#allocation6 + $0xa0] sm:$0xff] %vm355_vm4, %v24811_v3  ;;  %377 = vst.msk [vmem:[#allocation6 + $0xa8] sm:$0xff] %vm355_vm4, %v24811_v3 }
 0x524   : > { %378 = vst.msk [vmem:[#allocation6 + $0xb0] sm:$0xff] %vm355_vm4, %v24811_v3  ;;  %379 = vst.msk [vmem:[#allocation6 + $0xb8] sm:$0xff] %vm355_vm4, %v24811_v3 }
 0x525   : > { %380 = vst.msk [vmem:[#allocation6 + $0xc0] sm:$0xff] %vm355_vm4, %v24811_v3  ;;  %381 = vst.msk [vmem:[#allocation6 + $0xc8] sm:$0xff] %vm355_vm4, %v24811_v3  ;;  %v9700_v3 = vld [vmem:[#allocation5 + $0x146] sm:$0xff] }
 0x526   : > { %19515 = vmatmul.mubr.msk.bf16.gmra.mrb[20].mxu1 %vm280_vm3, %v7978_v40  ;;  %v9072_v40 = vld [vmem:[#allocation5 + $0x35] sm:$0xff] }
 0x527   : > { %19518 = vmatprep.mubr.msk.bf16.mxu1 %vm280_vm3, %v7979_v48  ;;  %v9139_v14 = vpack.c.bf16 %v9073_v31, %v9072_v40  ;;  %v9090_v48 = vld [vmem:[#allocation5 + $0xc5] sm:$0xff]  ;;  %v9103_v31 = vld [vmem:[#allocation5 + $0x12d] sm:$0xff] }
 0x528   : > { %v9102_v40 = vld [vmem:[#allocation5 + $0x125] sm:$0xff] }
 0x52e   : > { %19519 = vmatmul.mubr.msk.bf16.gmra.mrb[24].mxu1 %vm280_vm3, %v7980_v61  ;;  %v9091_v61 = vld [vmem:[#allocation5 + $0xcd] sm:$0xff] }
 0x52f   : > { %19522 = vmatprep.mubr.msk.bf16.mxu1 %vm280_vm3, %v7981_v15  ;;  %v9148_v7 = vpack.c.bf16 %v9091_v61, %v9090_v48  ;;  %v9095_v15 = vld [vmem:[#allocation5 + $0xed] sm:$0xff]  ;;  %v9121_v61 = vld [vmem:[#allocation5 + $0x1bd] sm:$0xff] }
 0x536   : > { %19523 = vmatmul.mubr.msk.bf16.gmra.mrb[28].mxu1 %vm280_vm3, %v7982_v35  ;;  %v9093_v35 = vld [vmem:[#allocation5 + $0xdd] sm:$0xff] }
 0x537   : > { %19526 = vmatprep.mubr.msk.bf16.mxu1 %vm280_vm3, %v8576_v58  ;;  %v9149_v1 = vpack.c.bf16 %v9093_v35, %v9092_v28  ;;  %v9097_v58 = vld [vmem:[#allocation5 + $0xfd] sm:$0xff]  ;;  %v9120_v35 = vld [vmem:[#allocation5 + $0x1b5] sm:$0xff]  ;;  %v9122_v28 = vld [vmem:[#allocation5 + $0x1c5] sm:$0xff] }
 0x53e   : > { %19527 = vmatmul.mubr.msk.bf16.gmra.mrb[32].mxu1 %vm280_vm3, %v8577_v24  ;;  %v9151_v24 = vpack.c.bf16 %v9097_v58, %v9096_v60  ;;  %v9124_v58 = vld [vmem:[#allocation5 + $0x1d5] sm:$0xff]  ;;  %v9126_v60 = vld [vmem:[#allocation5 + $0x1e5] sm:$0xff] }
 0x53f   : > { %19534 = vmatprep.mubr.msk.bf16.mxu1 %vm280_vm3, %v9138_v41  ;;  %v9101_v41 = vld [vmem:[#allocation5 + $0x11d] sm:$0xff] }
 0x540   : > { %v9153_v49 = vpack.c.bf16 %v9101_v41, %v9100_v36  ;;  %v9130_v41 = vld [vmem:[#allocation5 + $0x205] sm:$0xff] }
 0x546   : > { %19535 = vmatmul.mubr.msk.bf16.vlgmr.msra.gmra.mrb[36].mxu1 %vm280_vm3, %v9139_v14  ;;  %v9154_v14 = vpack.c.bf16 %v9103_v31, %v9102_v40  ;;  %v9131_v31 = vld [vmem:[#allocation5 + $0x20d] sm:$0xff]  ;;  %v9132_v40 = vld [vmem:[#allocation5 + $0x215] sm:$0xff] }
 0x547   : > { %19603 = vmatpush3.bf16.msra.mxu1 %v20830_v53  ;;  %19538 = vmatprep.mubr.msk.bf16.mxu1 %vm280_vm3, %v9140_v57  ;;  %v9094_v53 = vld [vmem:[#allocation5 + $0xe5] sm:$0xff] }
 0x548   : > { %19604 = vmatprep.subr.bf16.mxu1 %v20831_v29  ;;  %v9150_v8 = vpack.c.bf16 %v9095_v15, %v9094_v53  ;;  %v9106_v57 = vld [vmem:[#allocation5 + $0x145] sm:$0xff]  ;;  %v9163_v15 = vpack.c.bf16 %v9121_v61, %v9120_v35  ;;  %v9125_v53 = vld [vmem:[#allocation5 + $0x1dd] sm:$0xff]  ;;  %v9677_v61 = vld [vmem:[#allocation5 + $0x8e] sm:$0xff] }
 0x549   : > { %v9165_v2 = vpack.c.bf16 %v9125_v53, %v9124_v58  ;;  %v9681_v53 = vld [vmem:[#allocation5 + $0xae] sm:$0xff]  ;;  %v9679_v58 = vld [vmem:[#allocation5 + $0x9e] sm:$0xff] }
 0x54b   : > { %19605 = vmatpush3.bf16.msra.mxu1 %v20831_v29  ;;  %v9105_v29 = vld [vmem:[#allocation5 + $0x13d] sm:$0xff] }
 0x54c   : > { %v9155_v9 = vpack.c.bf16 %v9105_v29, %v9104_v22  ;;  %v9134_v29 = vld [vmem:[#allocation5 + $0x225] sm:$0xff] }
 0x54e   : > { %19539 = vmatmul.mubr.msk.bf16.gmra.mrb[40].mxu1 %vm280_vm3, %v9141_v12  ;;  %v9156_v12 = vpack.c.bf16 %v9107_v0, %v9106_v57  ;;  %v9135_v57 = vld [vmem:[#allocation5 + $0x22d] sm:$0xff] }
 0x54f   : > { %19542 = vmatprep.mubr.msk.bf16.mxu1 %vm280_vm3, %v9142_v25  ;;  %v9111_v25 = vld [vmem:[#allocation5 + $0x16d] sm:$0xff]  ;;  %v9170_v22 = vpack.c.bf16 %v9135_v57, %v9134_v29 }
 0x550   : > { %v9158_v13 = vpack.c.bf16 %v9111_v25, %v9110_v10  ;;  %v9665_v25 = vld [vmem:[#allocation5 + $0x2e] sm:$0xff]  ;;  %v9688_v57 = vld [vmem:[#allocation5 + $0xe6] sm:$0xff] }
 0x556   : > { %19543 = vmatmul.mubr.msk.bf16.gmra.mrb[44].mxu1 %vm280_vm3, %v9143_v16  ;;  %v9157_v16 = vpack.c.bf16 %v9109_v19, %v9108_v39  ;;  %v9664_v39 = vld [vmem:[#allocation5 + $0x26] sm:$0xff] }
 0x557   : > { %19546 = vmatprep.mubr.msk.bf16.mxu1 %vm280_vm3, %v9144_v34  ;;  %v9113_v34 = vld [vmem:[#allocation5 + $0x17d] sm:$0xff]  ;;  %v9732_v19 = vpack.c.bf16 %v9665_v25, %v9664_v39  ;;  %v9692_v25 = vld [vmem:[#allocation5 + $0x106] sm:$0xff] }
 0x558   : > { %v9159_v45 = vpack.c.bf16 %v9113_v34, %v9112_v17  ;;  %v9669_v17 = vld [vmem:[#allocation5 + $0x4e] sm:$0xff]  ;;  %v9666_v34 = vld [vmem:[#allocation5 + $0x36] sm:$0xff] }
 0x55e   : > { %19547 = vmatmul.mubr.msk.bf16.gmra.mrb[48].mxu1 %vm280_vm3, %v9145_v21  ;;  %v9119_v21 = vld [vmem:[#allocation5 + $0x1ad] sm:$0xff] }
 0x55f   : > { %19550 = vmatprep.mubr.msk.bf16.mxu1 %vm280_vm3, %v9146_v5  ;;  %v9117_v5 = vld [vmem:[#allocation5 + $0x19d] sm:$0xff] }
 0x560   : > { %v9161_v33 = vpack.c.bf16 %v9117_v5, %v9116_v23  ;;  %v9671_v5 = vld [vmem:[#allocation5 + $0x5e] sm:$0xff] }
 0x566   : > { %19551 = vmatmul.mubr.msk.bf16.gmra.mrb[52].mxu1 %vm280_vm3, %v9147_v43  ;;  %v9118_v43 = vld [vmem:[#allocation5 + $0x1a5] sm:$0xff] }
 0x567   : > { %19554 = vmatprep.mubr.msk.bf16.mxu1 %vm280_vm3, %v9148_v7  ;;  %v9162_v48 = vpack.c.bf16 %v9119_v21, %v9118_v43  ;;  %v9123_v7 = vld [vmem:[#allocation5 + $0x1cd] sm:$0xff] }
 0x568   : > { %v9673_v21 = vld [vmem:[#allocation5 + $0x6e] sm:$0xff] }
 0x56e   : > { %19555 = vmatmul.mubr.msk.bf16.gmra.mrb[56].mxu1 %vm280_vm3, %v9149_v1  ;;  %v9164_v1 = vpack.c.bf16 %v9123_v7, %v9122_v28  ;;  %v9674_v7 = vld [vmem:[#allocation5 + $0x76] sm:$0xff] }
 0x56f   : > { %19558 = vmatprep.mubr.msk.bf16.mxu1 %vm280_vm3, %v9150_v8  ;;  %v9127_v8 = vld [vmem:[#allocation5 + $0x1ed] sm:$0xff] }
 0x576   : > { %19559 = vmatmul.mubr.msk.bf16.gmra.mrb[60].mxu1 %vm280_vm3, %v9151_v24  ;;  %v9166_v24 = vpack.c.bf16 %v9127_v8, %v9126_v60  ;;  %v9678_v8 = vld [vmem:[#allocation5 + $0x96] sm:$0xff] }
 0x577   : > { %19562 = vmatprep.mubr.msk.bf16.mxu1 %vm280_vm3, %v9152_v38  ;;  %v9129_v38 = vld [vmem:[#allocation5 + $0x1fd] sm:$0xff]  ;;  %v9739_v60 = vpack.c.bf16 %v9679_v58, %v9678_v8  ;;  %v9708_v8 = vld [vmem:[#allocation5 + $0x186] sm:$0xff] }
 0x578   : > { %v9167_v36 = vpack.c.bf16 %v9129_v38, %v9128_v42  ;;  %v9683_v42 = vld [vmem:[#allocation5 + $0xbe] sm:$0xff] }
 0x57e   : > { %19563 = vmatmul.mubr.msk.bf16.gmra.mrb[64].mxu1 %vm280_vm3, %v9153_v49  ;;  %v9168_v49 = vpack.c.bf16 %v9131_v31, %v9130_v41  ;;  %v9684_v41 = vld [vmem:[#allocation5 + $0xc6] sm:$0xff]  ;;  %v9685_v31 = vld [vmem:[#allocation5 + $0xce] sm:$0xff] }
 0x57f   : > { %19566 = vmatprep.mubr.msk.bf16.mxu1 %vm280_vm3, %v9154_v14  ;;  %v9133_v14 = vld [vmem:[#allocation5 + $0x21d] sm:$0xff] }
 0x580   : > { %v9169_v0 = vpack.c.bf16 %v9133_v14, %v9132_v40  ;;  %v9689_v40 = vld [vmem:[#allocation5 + $0xee] sm:$0xff]  ;;  %v9686_v14 = vld [vmem:[#allocation5 + $0xd6] sm:$0xff] }
 0x586   : > { %19567 = vmatmul.mubr.msk.bf16.gmra.mrb[0].mxu1 %vm280_vm3, %v9155_v9  ;;  %v9136_v9 = vld [vmem:[#allocation5 + $0x235] sm:$0xff] }
 0x587   : > { %19570 = vmatprep.mubr.msk.bf16.mxu1 %vm280_vm3, %v9156_v12  ;;  %v9137_v12 = vld [vmem:[#allocation5 + $0x23d] sm:$0xf] }
 0x588   : > { %v9171_v10 = vpack.c.bf16 %v9137_v12, %v9136_v9  ;;  %v9693_v9 = vld [vmem:[#allocation5 + $0x10e] sm:$0xff]  ;;  %v9690_v12 = vld [vmem:[#allocation5 + $0xf6] sm:$0xff] }
 0x589   : > { %v9746_v39 = vpack.c.bf16 %v9693_v9, %v9692_v25  ;;  %v9722_v25 = vld [vmem:[#allocation5 + $0x1f6] sm:$0xff] }
 0x58e   : > { %19571 = vmatmul.mubr.msk.bf16.gmra.mrb[4].mxu1 %vm280_vm3, %v9157_v16  ;;  %v9668_v16 = vld [vmem:[#allocation5 + $0x46] sm:$0xff] }
 0x58f   : > { %19574 = vmatprep.mubr.msk.bf16.mxu1 %vm280_vm3, %v9158_v13  ;;  %v9667_v13 = vld [vmem:[#allocation5 + $0x3e] sm:$0xff] }
 0x590   : > { %v9733_v18 = vpack.c.bf16 %v9667_v13, %v9666_v34  ;;  %v9697_v13 = vld [vmem:[#allocation5 + $0x12e] sm:$0xff]  ;;  %v9696_v34 = vld [vmem:[#allocation5 + $0x126] sm:$0xff] }
 0x596   : > { %19575 = vmatmul.mubr.msk.bf16.gmra.mrb[8].mxu1 %vm280_vm3, %v9159_v45  ;;  %v9734_v45 = vpack.c.bf16 %v9669_v17, %v9668_v16  ;;  %v9694_v16 = vld [vmem:[#allocation5 + $0x116] sm:$0xff] }
 0x597   : > { %19578 = vmatprep.mubr.msk.bf16.mxu1 %vm280_vm3, %v9160_v63  ;;  %v9670_v63 = vld [vmem:[#allocation5 + $0x56] sm:$0xff] }
 0x598   : > { %v9735_v23 = vpack.c.bf16 %v9671_v5, %v9670_v63  ;;  %v9701_v63 = vld [vmem:[#allocation5 + $0x14e] sm:$0xff]  ;;  %v9698_v5 = vld [vmem:[#allocation5 + $0x136] sm:$0xff] }
 0x59e   : > { %19579 = vmatmul.mubr.msk.bf16.gmra.mrb[12].mxu1 %vm280_vm3, %v9161_v33  ;;  %v9672_v33 = vld [vmem:[#allocation5 + $0x66] sm:$0xff] }
 0x59f   : > { %19582 = vmatprep.mubr.msk.bf16.mxu1 %vm280_vm3, %v9162_v48  ;;  %v9736_v43 = vpack.c.bf16 %v9673_v21, %v9672_v33  ;;  %v9675_v48 = vld [vmem:[#allocation5 + $0x7e] sm:$0xff]  ;;  %v9704_v33 = vld [vmem:[#allocation5 + $0x166] sm:$0xff] }
 0x5a0   : > { %v9737_v35 = vpack.c.bf16 %v9675_v48, %v9674_v7  ;;  %v9702_v48 = vld [vmem:[#allocation5 + $0x156] sm:$0xff] }
 0x5a6   : > { %19583 = vmatmul.mubr.msk.bf16.gmra.mrb[16].mxu1 %vm280_vm3, %v9163_v15  ;;  %v9676_v15 = vld [vmem:[#allocation5 + $0x86] sm:$0xff] }
 0x5a7   : > { %19586 = vmatprep.mubr.msk.bf16.mxu1 %vm280_vm3, %v9164_v1  ;;  %v9738_v28 = vpack.c.bf16 %v9677_v61, %v9676_v15  ;;  %v9680_v1 = vld [vmem:[#allocation5 + $0xa6] sm:$0xff]  ;;  %v9703_v61 = vld [vmem:[#allocation5 + $0x15e] sm:$0xff]  ;;  %v9706_v15 = vld [vmem:[#allocation5 + $0x176] sm:$0xff] }
 0x5ae   : > { %19587 = vmatmul.mubr.msk.bf16.gmra.mrb[20].mxu1 %vm280_vm3, %v9165_v2  ;;  %v9740_v2 = vpack.c.bf16 %v9681_v53, %v9680_v1  ;;  %v9709_v1 = vld [vmem:[#allocation5 + $0x18e] sm:$0xff] }
 0x5af   : > { %19590 = vmatprep.mubr.msk.bf16.mxu1 %vm280_vm3, %v9166_v24  ;;  %v9682_v24 = vld [vmem:[#allocation5 + $0xb6] sm:$0xff]  ;;  %v9754_v58 = vpack.c.bf16 %v9709_v1, %v9708_v8 }
 0x5b0   : > { %v9741_v38 = vpack.c.bf16 %v9683_v42, %v9682_v24  ;;  %v9710_v24 = vld [vmem:[#allocation5 + $0x196] sm:$0xff] }
 0x5b6   : > { %19591 = vmatmul.mubr.msk.bf16.gmra.mrb[24].mxu1 %vm280_vm3, %v9167_v36  ;;  %v9742_v36 = vpack.c.bf16 %v9685_v31, %v9684_v41  ;;  %v9715_v31 = vld [vmem:[#allocation5 + $0x1be] sm:$0xff] }
 0x5b7   : > { %19594 = vmatprep.mubr.msk.bf16.mxu1 %vm280_vm3, %v9168_v49  ;;  %v9687_v49 = vld [vmem:[#allocation5 + $0xde] sm:$0xff] }
 0x5b8   : > { %v9743_v29 = vpack.c.bf16 %v9687_v49, %v9686_v14  ;;  %v9714_v49 = vld [vmem:[#allocation5 + $0x1b6] sm:$0xff]  ;;  %v9716_v14 = vld [vmem:[#allocation5 + $0x1c6] sm:$0xff] }
 0x5be   : > { %19595 = vmatmul.mubr.msk.bf16.gmra.mrb[28].mxu1 %vm280_vm3, %v9169_v0  ;;  %v9744_v0 = vpack.c.bf16 %v9689_v40, %v9688_v57  ;;  %v9757_v40 = vpack.c.bf16 %v9715_v31, %v9714_v49  ;;  %v9719_v57 = vld [vmem:[#allocation5 + $0x1de] sm:$0xff] }
 0x5bf   : > { %19598 = vmatprep.mubr.msk.bf16.mxu1 %vm280_vm3, %v9170_v22  ;;  %v9691_v22 = vld [vmem:[#allocation5 + $0xfe] sm:$0xff] }
 0x5c6   : > { %19599 = vmatmul.mubr.msk.bf16.gmra.mrb[32].mxu1 %vm280_vm3, %v9171_v10  ;;  %v9745_v10 = vpack.c.bf16 %v9691_v22, %v9690_v12  ;;  %v9718_v22 = vld [vmem:[#allocation5 + $0x1d6] sm:$0xff]  ;;  %v9720_v12 = vld [vmem:[#allocation5 + $0x1e6] sm:$0xff] }
 0x5c7   : > { %19606 = vmatprep.mubr.msk.bf16.mxu1 %vm280_vm3, %v9732_v19  ;;  %v9695_v19 = vld [vmem:[#allocation5 + $0x11e] sm:$0xff]  ;;  %v9759_v9 = vpack.c.bf16 %v9719_v57, %v9718_v22  ;;  %v24812_v22 = vlaneseq }
 0x5c8   : > { %v9747_v17 = vpack.c.bf16 %v9695_v19, %v9694_v16  ;;  %v9724_v19 = vld [vmem:[#allocation5 + $0x206] sm:$0xff] }
 0x5c9   : > { %vm22782_vm5 = vcmp.lt.s32.totalorder %v24812_v22, 64 }
 0x5ce   : > { %19607 = vmatmul.mubr.msk.bf16.vlgmr.msra.gmra.mrb[36].mxu1 %vm280_vm3, %v9733_v18  ;;  %v9748_v18 = vpack.c.bf16 %v9697_v13, %v9696_v34  ;;  %v9725_v13 = vld [vmem:[#allocation5 + $0x20e] sm:$0xff]  ;;  %v9726_v34 = vld [vmem:[#allocation5 + $0x216] sm:$0xff] }
 0x5cf   : > { %19610 = vmatprep.mubr.msk.bf16.mxu1 %vm280_vm3, %v9734_v45  ;;  %v9699_v45 = vld [vmem:[#allocation5 + $0x13e] sm:$0xff] }
 0x5d0   : > { %v9749_v21 = vpack.c.bf16 %v9699_v45, %v9698_v5  ;;  %v9728_v45 = vld [vmem:[#allocation5 + $0x226] sm:$0xff] }
 0x5d6   : > { %19611 = vmatmul.mubr.msk.bf16.gmra.mrb[40].mxu1 %vm280_vm3, %v9735_v23  ;;  %v9750_v23 = vpack.c.bf16 %v9701_v63, %v9700_v3  ;;  %v9729_v3 = vld [vmem:[#allocation5 + $0x22e] sm:$0xff] }
 0x5d7   : > { %19614 = vmatprep.mubr.msk.bf16.mxu1 %vm280_vm3, %v9736_v43  ;;  %v9705_v43 = vld [vmem:[#allocation5 + $0x16e] sm:$0xff]  ;;  %v9764_v5 = vpack.c.bf16 %v9729_v3, %v9728_v45 }
 0x5d8   : > { %v9752_v7 = vpack.c.bf16 %v9705_v43, %v9704_v33  ;;  %v20882_v43 = vmov 1966171168  }
 0x5de   : > { %19615 = vmatmul.mubr.msk.bf16.gmra.mrb[44].mxu1 %vm280_vm3, %v9737_v35  ;;  %v9751_v35 = vpack.c.bf16 %v9703_v61, %v9702_v48  ;;  %v10382_v48 = vunpack.c.l.s4 %v20882_v43 }
 0x5df   : > { %19618 = vmatprep.mubr.msk.bf16.mxu1 %vm280_vm3, %v9738_v28  ;;  %v9707_v28 = vld [vmem:[#allocation5 + $0x17e] sm:$0xff] }
 0x5e0   : > { %v9753_v53 = vpack.c.bf16 %v9707_v28, %v9706_v15  ;;  %v10383_v61 = vunpack.c.0.s8 %v10382_v48  ;;  %v18034_v28 = vld [vmem:[%s24761_s4] ss:$0 sm:$0xff] }
 0x5e2   : > { %v22755_v1 = vsub.s32 %v10383_v61, %v21224_v32  ;;  %v11011_v32 = vcombine.high %v18034_v28, %v18034_v28 }
 0x5e4   : > { %v22768_v31 = vrot.slane %v11011_v32, %v22755_v1 }
 0x5e6   : > { %19619 = vmatmul.mubr.msk.bf16.gmra.mrb[48].mxu1 %vm280_vm3, %v9739_v60  ;;  %v9713_v60 = vld [vmem:[#allocation5 + $0x1ae] sm:$0xff] }
 0x5e7   : > { %19622 = vmatprep.mubr.msk.bf16.mxu1 %vm280_vm3, %v9740_v2  ;;  %v9711_v2 = vld [vmem:[#allocation5 + $0x19e] sm:$0xff] }
 0x5e8   : > { %v9755_v42 = vpack.c.bf16 %v9711_v2, %v9710_v24 }
 0x5ee   : > { %19623 = vmatmul.mubr.msk.bf16.gmra.mrb[52].mxu1 %vm280_vm3, %v9741_v38  ;;  %v9712_v38 = vld [vmem:[#allocation5 + $0x1a6] sm:$0xff] }
 0x5ef   : > { %19626 = vmatprep.mubr.msk.bf16.mxu1 %vm280_vm3, %v9742_v36  ;;  %v9756_v41 = vpack.c.bf16 %v9713_v60, %v9712_v38  ;;  %v9717_v36 = vld [vmem:[#allocation5 + $0x1ce] sm:$0xff]  ;;  %v11018_v60 = vrot.slane %v18034_v28, %v22755_v1 }
 0x5f1   : > { %v11026_v24 = vcombine.high %v11018_v60, %v11018_v60 }
 0x5f6   : > { %19627 = vmatmul.mubr.msk.bf16.gmra.mrb[56].mxu1 %vm280_vm3, %v9743_v29  ;;  %v9758_v29 = vpack.c.bf16 %v9717_v36, %v9716_v14  ;;  %v22773_v14 = vrot.slane %v11018_v60, %v22755_v1 }
 0x5f7   : > { %19630 = vmatprep.mubr.msk.bf16.mxu1 %vm280_vm3, %v9744_v0  ;;  %v9721_v0 = vld [vmem:[#allocation5 + $0x1ee] sm:$0xff] }
 0x5fe   : > { %19631 = vmatmul.mubr.msk.bf16.gmra.mrb[60].mxu1 %vm280_vm3, %v9745_v10  ;;  %v9760_v10 = vpack.c.bf16 %v9721_v0, %v9720_v12 }
 0x5ff   : > { %19634 = vmatprep.mubr.msk.bf16.mxu1 %vm280_vm3, %v9746_v39  ;;  %v9723_v39 = vld [vmem:[#allocation5 + $0x1fe] sm:$0xff] }
 0x600   : > { %v9761_v16 = vpack.c.bf16 %v9723_v39, %v9722_v25  ;;  %v11027_v25 = vcombine.high %v22768_v31, %v22768_v31 }
 0x606   : > { %19635 = vmatmul.mubr.msk.bf16.gmra.mrb[64].mxu1 %vm280_vm3, %v9747_v17  ;;  %v9762_v17 = vpack.c.bf16 %v9725_v13, %v9724_v19  ;;  %v22797_v13 = vcombine.high %v22773_v14, %v22773_v14 }
 0x607   : > { %19638 = vmatprep.mubr.msk.bf16.mxu1 %vm280_vm3, %v9748_v18  ;;  %v9727_v18 = vld [vmem:[#allocation5 + $0x21e] sm:$0xff] }
 0x608   : > { %v9763_v63 = vpack.c.bf16 %v9727_v18, %v9726_v34 }
 0x60e   : > { %19639 = vmatmul.mubr.msk.bf16.gmra.mrb[0].mxu1 %vm280_vm3, %v9749_v21  ;;  %v9730_v21 = vld [vmem:[#allocation5 + $0x236] sm:$0xff] }
 0x60f   : > { %19642 = vmatprep.mubr.msk.bf16.mxu1 %vm280_vm3, %v9750_v23  ;;  %v9731_v23 = vld [vmem:[#allocation5 + $0x23e] sm:$0xf] }
 0x610   : > { %v9765_v33 = vpack.c.bf16 %v9731_v23, %v9730_v21 }
 0x616   : > { %19643 = vmatmul.mubr.msk.bf16.gmra.mrb[4].mxu1 %vm280_vm3, %v9751_v35 }
 0x617   : > { %19646 = vmatprep.mubr.msk.bf16.mxu1 %vm280_vm3, %v9752_v7 }
 0x61e   : > { %19647 = vmatmul.mubr.msk.bf16.gmra.mrb[8].mxu1 %vm280_vm3, %v9753_v53 }
 0x61f   : > { %19650 = vmatprep.mubr.msk.bf16.mxu1 %vm280_vm3, %v9754_v58 }
 0x626   : > { %19651 = vmatmul.mubr.msk.bf16.gmra.mrb[12].mxu1 %vm280_vm3, %v9755_v42 }
 0x627   : > { %19654 = vmatprep.mubr.msk.bf16.mxu1 %vm280_vm3, %v9756_v41 }
 0x62e   : > { %19655 = vmatmul.mubr.msk.bf16.gmra.mrb[16].mxu1 %vm280_vm3, %v9757_v40 }
 0x62f   : > { %19658 = vmatprep.mubr.msk.bf16.mxu1 %vm280_vm3, %v9758_v29  ;;  %v22776_v29 = vrot.slane %v11026_v24, %v22755_v1 }
 0x636   : > { %19659 = vmatmul.mubr.msk.bf16.gmra.mrb[20].mxu1 %vm280_vm3, %v9759_v9 }
 0x637   : > { %19662 = vmatprep.mubr.msk.bf16.mxu1 %vm280_vm3, %v9760_v10 }
 0x63e   : > { %19663 = vmatmul.mubr.msk.bf16.gmra.mrb[24].mxu1 %vm280_vm3, %v9761_v16  ;;  %v22801_v16 = vcombine.high %v22776_v29, %v22776_v29 }
 0x63f   : > { %19666 = vmatprep.mubr.msk.bf16.mxu1 %vm280_vm3, %v9762_v17 }
 0x646   : > { %19667 = vmatmul.mubr.msk.bf16.gmra.mrb[28].mxu1 %vm280_vm3, %v9763_v63 }
 0x647   : > { %19670 = vmatprep.mubr.msk.bf16.mxu1 %vm280_vm3, %v9764_v5 }
 0x64e   : > { %19671 = vmatmul.mubr.msk.bf16.gmra.mrb[32].mxu1 %vm280_vm3, %v9765_v33 }
 0x6a1   : > { %v19608_v7 = vpop.f32.mrb[36].mxu1 }
 0x6a2   : > { %v19966_v35 = vadd.f32 %v19608_v7, %v22317_v30  ;;  %v9919_v15 = vpop.f32.mrb[37].mxu1 }
 0x6a3   : > { %v19967_v53 = vadd.f32 %v9919_v15, %v22319_v37  ;;  %v19609_v8 = vpop.f32.mrb[38].mxu1 }
 0x6a4   : > { %10260 = vst.msk [vmem:[#allocation3 + $0x10] sm:$0xff] %vm355_vm4, %v19966_v35  ;;  %v19968_v58 = vadd.f32 %v19609_v8, %v22321_v50  ;;  %v9922_v2 = vpop.f32.mrb[39].mxu1 }
 0x6a5   : > { %10258 = vst.msk [vmem:[#allocation3] sm:$0xff] %vm355_vm4, %v19967_v53  ;;  %v19969_v30 = vadd.f32 %v9922_v2, %v22323_v20 }
 0x6a6   : > { %10261 = vst.msk [vmem:[#allocation3 + $0x18] sm:$0xff] %vm355_vm4, %v19968_v58 }
 0x6a7   : > { %10259 = vst.msk [vmem:[#allocation3 + $0x8] sm:$0xff] %vm355_vm4, %v19969_v30 }
 0x6a9   : > { %v19612_v42 = vpop.f32.mrb[40].mxu1 }
 0x6aa   : > { %v19970_v37 = vadd.f32 %v19612_v42, %v22329_v56  ;;  %v9935_v38 = vpop.f32.mrb[41].mxu1 }
 0x6ab   : > { %v19971_v41 = vadd.f32 %v9935_v38, %v22331_v59  ;;  %v19613_v50 = vpop.f32.mrb[42].mxu1 }
 0x6ac   : > { %10264 = vst.msk [vmem:[#allocation3 + $0x30] sm:$0xff] %vm355_vm4, %v19970_v37  ;;  %v19972_v20 = vadd.f32 %v19613_v50, %v22333_v6  ;;  %v9938_v36 = vpop.f32.mrb[43].mxu1 }
 0x6ad   : > { %v10329_v49 = vld [vmem:[#allocation3 + $0x10] ss:$2 sm:$0xff]  ;;  %v10347_v40 = vld [vmem:[#allocation3 + $0x11] ss:$2 sm:$0xff]  ;;  %10262 = vst.msk [vmem:[#allocation3 + $0x20] sm:$0xff] %vm355_vm4, %v19971_v41  ;;  %v19973_v56 = vadd.f32 %v9938_v36, %v22335_v11  ;;  %v22792_v11 = vrot.slane %v22768_v31, %v22755_v1 }
 0x6ae   : > { %v10363_v59 = vmax.f32 %v10329_v49, %v10347_v40  ;;  %v10327_v57 = vld [vmem:[#allocation3] ss:$2 sm:$0xff]  ;;  %v10345_v0 = vld [vmem:[#allocation3 + $0x1] ss:$2 sm:$0xff]  ;;  %10265 = vst.msk [vmem:[#allocation3 + $0x38] sm:$0xff] %vm355_vm4, %v19972_v20 }
 0x6af   : > { %v10362_v9 = vmax.f32 %v10327_v57, %v10345_v0  ;;  %10263 = vst.msk [vmem:[#allocation3 + $0x28] sm:$0xff] %vm355_vm4, %v19973_v56 }
 0x6b0   : > { %v10429_v12 = vcombine.high %v10363_v59, %v10363_v59  ;;  %v10436_v10 = vrot.slane %v10363_v59, %v22755_v1 }
 0x6b1   : > { %v10380_v39 = vcombine.high %v10362_v9, %v10362_v9  ;;  %v10387_v19 = vrot.slane %v10362_v9, %v22755_v1  ;;  %v19616_v17 = vpop.f32.mrb[44].mxu1 }
 0x6b2   : > { %v10443_v34 = vrot.slane %v10429_v12, %v22755_v1  ;;  %v10444_v18 = vcombine.high %v10436_v10, %v10436_v10  ;;  %v10452_v45 = vrot.slane %v10436_v10, %v22755_v1  ;;  %v19974_v3 = vadd.f32 %v19616_v17, %v22341_v27  ;;  %v9951_v63 = vpop.f32.mrb[45].mxu1 }
 0x6b3   : > { %v10394_v5 = vrot.slane %v10380_v39, %v22755_v1  ;;  %v10395_v21 = vcombine.high %v10387_v19, %v10387_v19  ;;  %v10403_v23 = vrot.slane %v10387_v19, %v22755_v1  ;;  %v19975_v33 = vadd.f32 %v9951_v63, %v22343_v26  ;;  %v22809_v43 = vpop.f32.mrb[46].mxu1 }
 0x6b4   : > { %v10445_v48 = vcombine.high %v10443_v34, %v10443_v34  ;;  %v10459_v61 = vrot.slane %v10443_v34, %v22755_v1  ;;  %v10466_v7 = vrot.slane %v10444_v18, %v22755_v1  ;;  %v10474_v35 = vcombine.high %v10452_v45, %v10452_v45  ;;  %10268 = vst.msk [vmem:[#allocation3 + $0x50] sm:$0xff] %vm355_vm4, %v19974_v3  ;;  %v22814_v15 = vpop.f32.mrb[47].mxu1 }
 0x6b5   : > { %v10396_v27 = vcombine.high %v10394_v5, %v10394_v5  ;;  %v10410_v28 = vrot.slane %v10394_v5, %v22755_v1  ;;  %v10417_v53 = vrot.slane %v10395_v21, %v22755_v1  ;;  %v10425_v8 = vcombine.high %v10403_v23, %v10403_v23  ;;  %10266 = vst.msk [vmem:[#allocation3 + $0x40] sm:$0xff] %vm355_vm4, %v19975_v33  ;;  %v10333_v9 = vld [vmem:[#allocation3 + $0x30] ss:$2 sm:$0xff]  ;;  %v10351_v34 = vld [vmem:[#allocation3 + $0x31] ss:$2 sm:$0xff] }
 0x6b6   : > { %v10473_v26 = vrot.slane %v10445_v48, %v22755_v1  ;;  %v10475_v58 = vcombine.high %v10459_v61, %v10459_v61  ;;  %v10476_v2 = vcombine.high %v10466_v7, %v10466_v7  ;;  %v10901_v30 = vsel %vm22782_vm5, %v10474_v35, -inf  ;;  %v10331_v35 = vld [vmem:[#allocation3 + $0x20] ss:$2 sm:$0xff] }
 0x6b7   : > { %v10907_v60 = vsel %vm22782_vm5, %v10459_v61, -inf  ;;  %v22825_v32 = vrot.slane %v10396_v27, %v22755_v1  ;;  %v10426_v24 = vcombine.high %v10410_v28, %v10410_v28  ;;  %v10427_v42 = vcombine.high %v10417_v53, %v10417_v53  ;;  %v10349_v27 = vld [vmem:[#allocation3 + $0x21] ss:$2 sm:$0xff] }
 0x6b8   : > { %v10477_v37 = vcombine.high %v10473_v26, %v10473_v26  ;;  %v10913_v38 = vsel %vm22782_vm5, %v10475_v58, -inf  ;;  %v10897_v41 = vsel %vm22782_vm5, %v10403_v23, -inf  ;;  %v10898_v50 = vsel %vm22782_vm5, %v10466_v7, -inf }
 0x6b9   : > { %v10899_v31 = vmax.f32 %v10897_v41, %v10898_v50  ;;  %v10900_v20 = vsel %vm22782_vm5, %v10417_v53, -inf  ;;  %v10903_v36 = vsel %vm22782_vm5, %v10425_v8, -inf  ;;  %v10904_v49 = vsel %vm22782_vm5, %v10476_v2, -inf  ;;  %v22839_v40 = vpop.f32.mrb[48].mxu1 }
 0x6ba   : > { %v10902_v56 = vmax.f32 %v10900_v20, %v10901_v30  ;;  %v10905_v59 = vmax.f32 %v10903_v36, %v10904_v49  ;;  %v10906_v57 = vsel %vm22782_vm5, %v10427_v42, -inf  ;;  %v10909_v0 = vsel %vm22782_vm5, %v10410_v28, -inf  ;;  %v22845_v12 = vpop.f32.mrb[49].mxu1 }
 0x6bb   : > { %v10908_v10 = vmax.f32 %v10906_v57, %v10907_v60  ;;  %v10910_v39 = vsel %vm22782_vm5, %v10473_v26, -inf  ;;  %v10912_v19 = vsel %vm22782_vm5, %v22825_v32, -inf  ;;  %v10915_v17 = vsel %vm22782_vm5, %v10426_v24, -inf  ;;  %v22854_v18 = vpop.f32.mrb[50].mxu1 }
 0x6bc   : > { %v10911_v45 = vmax.f32 %v10909_v0, %v10910_v39  ;;  %v10916_v3 = vsel %vm22782_vm5, %v10477_v37, -inf  ;;  %v22858_v63 = vpop.f32.mrb[51].mxu1  ;;  %v10914_v5 = vmax.f32 %v10912_v19, %v10913_v38  ;;  %v22861_v21 = vrot.slane %v11027_v25, %v22755_v1  ;;  %v20832_v39 = vld [vmem:[%s24762_s5 + $0x20] sm:$0xff]  }
 0x6bd   : > { %v11068_v23 = vadd.f32 %v22773_v14, %v10899_v31  ;;  %v10917_v33 = vmax.f32 %v10915_v17, %v10916_v3  ;;  %v22866_v48 = vcombine.high %v22792_v11, %v22792_v11  ;;  %v11069_v61 = vadd.f32 %v22776_v29, %v10902_v56  ;;  %19674 = vmatprep.subr.bf16.mxu0 %v20832_v39 }
 0x6be   : > { %v10365_v7 = vmax.f32 %v10333_v9, %v10351_v34  ;;  %v11070_v28 = vadd.f32 %v22797_v13, %v10905_v59  ;;  %v11071_v53 = vadd.f32 %v22801_v16, %v10908_v10  ;;  %v22872_v8 = vadd.f32 %v22792_v11, %v10911_v45  ;;  %19675 = vmatpush3.bf16.msra.mxu0 %v20832_v39 }
 0x6bf   : > { %v22878_v58 = vadd.f32 %v22861_v21, %v10914_v5  ;;  %v11104_v2 = vmax.f32 %v11068_v23, 0.0  ;;  %v10364_v30 = vmax.f32 %v10331_v35, %v10349_v27  ;;  %v22882_v60 = vcombine.high %v22861_v21, %v22861_v21 }
 0x6c0   : > { %v10527_v25 = vcombine.high %v10365_v7, %v10365_v7  ;;  %v22875_v26 = vrot.slane %v10365_v7, %v22755_v1  ;;  %v22885_v42 = vadd.f32 %v22866_v48, %v10917_v33  ;;  %v11105_v37 = vmax.f32 %v11069_v61, 0.0 }
 0x6c1   : > { %v19624_v24 = vpop.f32.mrb[52].mxu1  ;;  %v11106_v31 = vmax.f32 %v11070_v28, 0.0  ;;  %v11107_v20 = vmax.f32 %v11071_v53, 0.0  ;;  %v10478_v36 = vcombine.high %v10364_v30, %v10364_v30  ;;  %v10485_v49 = vrot.slane %v10364_v30, %v22755_v1 }
 0x6c2   : > { %v10541_v38 = vrot.slane %v10527_v25, %v22755_v1  ;;  %v10542_v41 = vcombine.high %v22875_v26, %v22875_v26  ;;  %v22890_v50 = vpop.f32.mrb[53].mxu1  ;;  %v11108_v59 = vmax.f32 %v22872_v8, 0.0  ;;  %v11109_v19 = vmax.f32 %v22878_v58, 0.0  ;;  %v20833_v25 = vld [vmem:[%s24762_s5 + $0x28] sm:$0xff]  }
 0x6c3   : > { %v19625_v56 = vpop.f32.mrb[54].mxu1  ;;  %v10428_v17 = vcombine.high %v22825_v32, %v22825_v32  ;;  %v10492_v34 = vrot.slane %v10478_v36, %v22755_v1  ;;  %v10493_v45 = vcombine.high %v10485_v49, %v10485_v49  ;;  %v22907_v3 = vcombine.low %v11104_v2, %v11105_v37  ;;  %19676 = vmatprep.subr.bf16.mxu0 %v20833_v25 }
 0x6c4   : > { %v10543_v57 = vcombine.high %v10541_v38, %v10541_v38  ;;  %v10557_v0 = vrot.slane %v10541_v38, %v22755_v1  ;;  %v22896_v9 = vrot.slane %v10542_v41, %v22755_v1  ;;  %v22898_v10 = vpop.f32.mrb[55].mxu1  ;;  %v22912_v61 = vcombine.low %v11106_v31, %v11107_v20  ;;  %19677 = vmatpush3.bf16.msra.mxu0 %v20833_v25 }
 0x6c5   : > { %v10494_v35 = vcombine.high %v10492_v34, %v10492_v34  ;;  %v10501_v32 = vrot.slane %v10485_v49, %v22755_v1  ;;  %v10508_v53 = vrot.slane %v10492_v34, %v22755_v1  ;;  %v10515_v8 = vrot.slane %v10493_v45, %v22755_v1 }
 0x6c6   : > { %v10571_v5 = vrot.slane %v10543_v57, %v22755_v1  ;;  %v10573_v23 = vcombine.high %v10557_v0, %v10557_v0  ;;  %v10574_v33 = vcombine.high %v22896_v9, %v22896_v9  ;;  %v10928_v7 = vsel %vm22782_vm5, %v10557_v0, -inf }
 0x6c7   : > { %v22925_v58 = vrot.slane %v10494_v35, %v22755_v1  ;;  %v10523_v2 = vcombine.high %v10501_v32, %v10501_v32  ;;  %v10918_v30 = vsel %vm22782_vm5, %v10428_v17, -inf  ;;  %v10919_v24 = vsel %vm22782_vm5, %v10501_v32, -inf  ;;  %v20834_v35 = vld [vmem:[%s24762_s5 + $0x30] sm:$0xff]  }
 0x6c8   : > { %v10575_v27 = vcombine.high %v10571_v5, %v10571_v5  ;;  %v10934_v28 = vsel %vm22782_vm5, %v10573_v23, -inf  ;;  %v10524_v38 = vcombine.high %v10508_v53, %v10508_v53  ;;  %v10525_v41 = vcombine.high %v10515_v8, %v10515_v8  ;;  %19678 = vmatprep.subr.bf16.mxu0 %v20834_v35 }
 0x6c9   : > { %v22931_v37 = vpop.f32.mrb[56].mxu1  ;;  %v10920_v31 = vmax.f32 %v10918_v30, %v10919_v24  ;;  %v10925_v20 = vsel %vm22782_vm5, %v10574_v33, -inf  ;;  %v10924_v49 = vsel %vm22782_vm5, %v10523_v2, -inf  ;;  %v10930_v56 = vsel %vm22782_vm5, %v10508_v53, -inf  ;;  %19679 = vmatpush3.bf16.msra.mxu0 %v20834_v35  ;;  %v24817_v35 = vld [vmem:[#allocation38_spill] sm:$0xff] }
 0x6ca   : > { %v9999_v36 = vpop.f32.mrb[57].mxu1  ;;  %v10931_v57 = vsel %vm22782_vm5, %v10571_v5, -inf  ;;  %v10933_v0 = vsel %vm22782_vm5, %v22925_v58, -inf  ;;  %v10926_v17 = vmax.f32 %v10924_v49, %v10925_v20  ;;  %v10927_v34 = vsel %vm22782_vm5, %v10525_v41, -inf }
 0x6cb   : > { %v19629_v39 = vpop.f32.mrb[58].mxu1  ;;  %v10932_v45 = vmax.f32 %v10930_v56, %v10931_v57  ;;  %v10935_v23 = vmax.f32 %v10933_v0, %v10934_v28  ;;  %v11180_v32 = vcombine.low %v11108_v59, %v11109_v19  ;;  %v11188_v5 = vrot.slane %v22907_v3, %v22755_v1 }
 0x6cc   : > { %v10002_v33 = vpop.f32.mrb[59].mxu1  ;;  %v10929_v53 = vmax.f32 %v10927_v34, %v10928_v7  ;;  %v11075_v8 = vadd.f32 %v22882_v60, %v10920_v31  ;;  %v10936_v25 = vsel %vm22782_vm5, %v10524_v38, -inf  ;;  %v11077_v2 = vadd.f32 %v22773_v14, %v10926_v17 }
 0x6cd   : > { %v11079_v30 = vadd.f32 %v22797_v13, %v10932_v45  ;;  %v11080_v28 = vadd.f32 %v22801_v16, %v10935_v23  ;;  %v11110_v59 = vmax.f32 %v22885_v42, 0.0  ;;  %v19976_v3 = vadd.f32 %v22809_v43, %v22345_v52 }
 0x6ce   : > { %v11078_v24 = vadd.f32 %v22776_v29, %v10929_v53  ;;  %v11111_v19 = vmax.f32 %v11075_v8, 0.0  ;;  %v10937_v7 = vsel %vm22782_vm5, %v10575_v27, -inf  ;;  %v11113_v38 = vmax.f32 %v11077_v2, 0.0 }
 0x6cf   : > { %v11115_v41 = vmax.f32 %v11079_v30, 0.0  ;;  %v11116_v31 = vmax.f32 %v11080_v28, 0.0  ;;  %v11195_v20 = vrot.slane %v22912_v61, %v22755_v1  ;;  %10269 = vst.msk [vmem:[#allocation3 + $0x58] sm:$0xff] %vm355_vm4, %v19976_v3  ;;  %v19977_v42 = vadd.f32 %v22814_v15, %v22347_v44  ;;  %v24820_v3 = vld [vmem:[#allocation41_spill] sm:$0xff] }
 0x6d0   : > { %v11114_v36 = vmax.f32 %v11078_v24, 0.0  ;;  %v11181_v49 = vcombine.low %v11110_v59, %v11111_v19  ;;  %v11202_v52 = vrot.slane %v11180_v32, %v22755_v1  ;;  %v19978_v27 = vadd.f32 %v22839_v40, %v22353_v55 }
 0x6d1   : > { %v19632_v56 = vpop.f32.mrb[60].mxu1  ;;  %v11242_v43 = vcombine.low %v11115_v41, %v11116_v31  ;;  %v19979_v57 = vadd.f32 %v22845_v12, %v22355_v47  ;;  %v10938_v17 = vmax.f32 %v10936_v25, %v10937_v7  ;;  %10267 = vst.msk [vmem:[#allocation3 + $0x48] sm:$0xff] %vm355_vm4, %v19977_v42  ;;  %v19980_v44 = vadd.f32 %v22854_v18, %v22357_v4  ;;  %v20835_v12 = vld [vmem:[%s24762_s5 + $0x38] sm:$0xff]  }
 0x6d2   : > { %v10015_v0 = vpop.f32.mrb[61].mxu1  ;;  %v11209_v61 = vrot.slane %v11181_v49, %v22755_v1  ;;  %v11241_v34 = vcombine.low %v11113_v38, %v11114_v36  ;;  %10272 = vst.msk [vmem:[#allocation3 + $0x70] sm:$0xff] %vm355_vm4, %v19978_v27  ;;  %v19981_v55 = vadd.f32 %v22858_v63, %v22359_v54  ;;  %v19983_v47 = vadd.f32 %v22890_v50, %v22365_v46  ;;  %v24815_v46 = vld [vmem:[#allocation36_spill] sm:$0xff]  ;;  %v24816_v50 = vld [vmem:[#allocation37_spill] sm:$0xff] }
 0x6d3   : > { %v19633_v15 = vpop.f32.mrb[62].mxu1  ;;  %v11258_v45 = vrot.slane %v11242_v43, %v22755_v1  ;;  %10270 = vst.msk [vmem:[#allocation3 + $0x60] sm:$0xff] %vm355_vm4, %v19979_v57  ;;  %10273 = vst.msk [vmem:[#allocation3 + $0x78] sm:$0xff] %vm355_vm4, %v19980_v44  ;;  %v19985_v18 = vadd.f32 %v22898_v10, %v22367_v51  ;;  %v19986_v54 = vadd.f32 %v22931_v37, %v22373_v62  ;;  %19680 = vmatprep.subr.bf16.mxu0 %v20835_v12  ;;  %v24818_v62 = vld [vmem:[#allocation39_spill] sm:$0xff] }
 0x6d4   : > { %v10018_v40 = vpop.f32.mrb[63].mxu1  ;;  %v11211_v23 = vcombine.low %v11202_v52, %v11209_v61  ;;  %v11251_v4 = vrot.slane %v11241_v34, %v22755_v1  ;;  %10271 = vst.msk [vmem:[#allocation3 + $0x68] sm:$0xff] %vm355_vm4, %v19981_v55  ;;  %10274 = vst.msk [vmem:[#allocation3 + $0x80] sm:$0xff] %vm355_vm4, %v19983_v47  ;;  %v19988_v63 = vadd.f32 %v19629_v39, %v24815_v46  ;;  %19681 = vmatpush3.bf16.msra.mxu0 %v20835_v12  ;;  %v24819_v39 = vld [vmem:[#allocation40_spill] sm:$0xff]  ;;  %v24822_v43 = vld [vmem:[#allocation43_spill] sm:$0xff] }
 0x6d5   : > { %10275 = vst.msk [vmem:[#allocation3 + $0x88] sm:$0xff] %vm355_vm4, %v19985_v18  ;;  %v19990_v33 = vadd.f32 %v19632_v56, %v24816_v50  ;;  %v19991_v32 = vadd.f32 %v10015_v0, %v24817_v35  ;;  %v11210_v53 = vcombine.low %v11188_v5, %v11195_v20  ;;  %v10550_v51 = vrot.slane %v22875_v26, %v22755_v1  ;;  %v24821_v20 = vld [vmem:[#allocation42_spill] sm:$0xff] }
 0x6d6   : > { %v10337_v10 = vld [vmem:[#allocation3 + $0x50] ss:$2 sm:$0xff]  ;;  %v10355_v8 = vld [vmem:[#allocation3 + $0x51] ss:$2 sm:$0xff]  ;;  %10280 = vst.msk [vmem:[#allocation3 + $0xb0] sm:$0xff] %vm355_vm4, %v19986_v54  ;;  %10281 = vst.msk [vmem:[#allocation3 + $0xb8] sm:$0xff] %vm355_vm4, %v19988_v63  ;;  %v19992_v37 = vadd.f32 %v19633_v15, %v24818_v62  ;;  %v19993_v25 = vadd.f32 %v10018_v40, %v24819_v39  ;;  %v23006_v2 = vadd.f32 %v22792_v11, %v10938_v17 }
 0x6d7   : > { %v10367_v30 = vmax.f32 %v10337_v10, %v10355_v8  ;;  %v10526_v5 = vcombine.high %v22925_v58, %v22925_v58  ;;  %10284 = vst.msk [vmem:[#allocation3 + $0xd0] sm:$0xff] %vm355_vm4, %v19990_v33  ;;  %10282 = vst.msk [vmem:[#allocation3 + $0xc0] sm:$0xff] %vm355_vm4, %v19991_v32  ;;  %v23013_v28 = vrot.slane %v11211_v23, %v22755_v1  ;;  %v10942_v56 = vsel %vm22782_vm5, %v10550_v51, -inf  ;;  %v24823_v40 = vld [vmem:[#allocation44_spill] sm:$0xff] }
 0x6d8   : > { %v23015_v24 = vcombine.low %v11251_v4, %v11258_v45  ;;  %v10335_v59 = vld [vmem:[#allocation3 + $0x40] ss:$2 sm:$0xff]  ;;  %v10353_v19 = vld [vmem:[#allocation3 + $0x41] ss:$2 sm:$0xff]  ;;  %10285 = vst.msk [vmem:[#allocation3 + $0xd8] sm:$0xff] %vm355_vm4, %v19992_v37  ;;  %10283 = vst.msk [vmem:[#allocation3 + $0xc8] sm:$0xff] %vm355_vm4, %v19993_v25  ;;  %v11218_v42 = vrot.slane %v11210_v53, %v22755_v1 }
 0x6d9   : > { %v19636_v26 = vpop.f32.mrb[64].mxu1  ;;  %v10625_v58 = vcombine.high %v10367_v30, %v10367_v30  ;;  %v10632_v41 = vrot.slane %v10367_v30, %v22755_v1  ;;  %v10366_v31 = vmax.f32 %v10335_v59, %v10353_v19  ;;  %v10945_v52 = vsel %vm22782_vm5, %v22896_v9, -inf }
 0x6da   : > { %v19994_v7 = vadd.f32 %v19636_v26, %v24820_v3  ;;  %v10031_v38 = vpop.f32.mrb[65].mxu1  ;;  %v10939_v61 = vsel %vm22782_vm5, %v10526_v5, -inf  ;;  %v11117_v34 = vmax.f32 %v23006_v2, 0.0  ;;  %v10341_v44 = vld [vmem:[#allocation3 + $0x70] ss:$2 sm:$0xff]  ;;  %v23039_v23 = vcombine.low %v11218_v42, %v23013_v28 }
 0x6db   : > { %v19995_v36 = vadd.f32 %v10031_v38, %v24821_v20  ;;  %v19637_v49 = vpop.f32.mrb[66].mxu1  ;;  %v10639_v0 = vrot.slane %v10625_v58, %v22755_v1  ;;  %v10576_v17 = vcombine.high %v10366_v31, %v10366_v31  ;;  %v10640_v15 = vcombine.high %v10632_v41, %v10632_v41  ;;  %v10359_v9 = vld [vmem:[#allocation3 + $0x71] ss:$2 sm:$0xff]  ;;  %v10339_v55 = vld [vmem:[#allocation3 + $0x60] ss:$2 sm:$0xff] }
 0x6dc   : > { %10288 = vst.msk [vmem:[#allocation3 + $0xf0] sm:$0xff] %vm355_vm4, %v19994_v7  ;;  %v19996_v27 = vadd.f32 %v19637_v49, %v24822_v43  ;;  %v10034_v57 = vpop.f32.mrb[67].mxu1  ;;  %v10583_v45 = vrot.slane %v10366_v31, %v22755_v1  ;;  %v10357_v47 = vld [vmem:[#allocation3 + $0x61] ss:$2 sm:$0xff]  ;;  %v11281_v4 = vrot.slane %v23015_v24, %v22755_v1  ;;  %v23045_v46 = vrot.slane %v10632_v41, %v22755_v1 }
 0x6dd   : > { %10286 = vst.msk [vmem:[#allocation3 + $0xe0] sm:$0xff] %vm355_vm4, %v19995_v36  ;;  %v19997_v12 = vadd.f32 %v10034_v57, %v24823_v40  ;;  %v10641_v18 = vcombine.high %v10639_v0, %v10639_v0  ;;  %v10655_v54 = vrot.slane %v10639_v0, %v22755_v1  ;;  %v10590_v63 = vrot.slane %v10576_v17, %v22755_v1 }
 0x6de   : > { %10289 = vst.msk [vmem:[#allocation3 + $0xf8] sm:$0xff] %vm355_vm4, %v19996_v27  ;;  %v10591_v50 = vcombine.high %v10583_v45, %v10583_v45  ;;  %v10599_v33 = vrot.slane %v10583_v45, %v22755_v1  ;;  %v10369_v53 = vmax.f32 %v10341_v44, %v10359_v9  ;;  %v23051_v51 = vmax.f32 %v10339_v55, %v10357_v47 }
 0x6df   : > { %10287 = vst.msk [vmem:[#allocation3 + $0xe8] sm:$0xff] %vm355_vm4, %v19997_v12  ;;  %v10669_v35 = vrot.slane %v10641_v18, %v22755_v1  ;;  %v10671_v32 = vcombine.high %v10655_v54, %v10655_v54  ;;  %v23056_v8 = vrot.slane %v10640_v15, %v22755_v1  ;;  %v10592_v62 = vcombine.high %v10590_v63, %v10590_v63 }
 0x6e0   : > { %v10606_v37 = vrot.slane %v10590_v63, %v22755_v1  ;;  %v10613_v39 = vrot.slane %v10591_v50, %v22755_v1  ;;  %v10621_v26 = vcombine.high %v10599_v33, %v10599_v33  ;;  %v10940_v59 = vsel %vm22782_vm5, %v10599_v33, -inf }
 0x6e1   : > { %v23053_v10 = vpop.f32.mrb[0].mxu1  ;;  %v10673_v30 = vcombine.high %v10669_v35, %v10669_v35  ;;  %v10955_v5 = vsel %vm22782_vm5, %v10671_v32, -inf  ;;  %v23069_v3 = vrot.slane %v10592_v62, %v22755_v1  ;;  %v10941_v38 = vmax.f32 %v10939_v61, %v10940_v59 }
 0x6e2   : > { %v23060_v25 = vpop.f32.mrb[1].mxu1  ;;  %v10622_v7 = vcombine.high %v10606_v37, %v10606_v37  ;;  %v10943_v58 = vsel %vm22782_vm5, %v10613_v39, -inf  ;;  %v10946_v20 = vsel %vm22782_vm5, %v10621_v26, -inf  ;;  %v10951_v36 = vsel %vm22782_vm5, %v10606_v37, -inf }
 0x6e3   : > { %v23066_v19 = vpop.f32.mrb[2].mxu1  ;;  %v10944_v31 = vmax.f32 %v10942_v56, %v10943_v58  ;;  %v10952_v49 = vsel %vm22782_vm5, %v10669_v35, -inf  ;;  %v10947_v42 = vmax.f32 %v10945_v52, %v10946_v20  ;;  %v10954_v27 = vsel %vm22782_vm5, %v23069_v3, -inf }
 0x6e4   : > { %v23073_v41 = vpop.f32.mrb[3].mxu1  ;;  %v10953_v43 = vmax.f32 %v10951_v36, %v10952_v49  ;;  %v10957_v57 = vsel %vm22782_vm5, %v10622_v7, -inf  ;;  %v10956_v0 = vmax.f32 %v10954_v27, %v10955_v5  ;;  %v10958_v56 = vsel %vm22782_vm5, %v10673_v30, -inf }
 0x6e5   : > { %v11082_v17 = vadd.f32 %v22861_v21, %v10941_v38  ;;  %v11083_v61 = vadd.f32 %v22866_v48, %v10944_v31  ;;  %v10670_v44 = vcombine.high %v23045_v46, %v23045_v46  ;;  %v11084_v52 = vadd.f32 %v22882_v60, %v10947_v42 }
 0x6e6   : > { %v11086_v15 = vadd.f32 %v22773_v14, %v10953_v43  ;;  %v10723_v45 = vcombine.high %v10369_v53, %v10369_v53  ;;  %v11087_v9 = vadd.f32 %v22776_v29, %v10956_v0  ;;  %v10730_v40 = vrot.slane %v10369_v53, %v22755_v1 }
 0x6e7   : > { %v11118_v55 = vmax.f32 %v11082_v17, 0.0  ;;  %v11119_v47 = vmax.f32 %v11083_v61, 0.0  ;;  %v10959_v18 = vmax.f32 %v10957_v57, %v10958_v56  ;;  %v11120_v54 = vmax.f32 %v11084_v52, 0.0 }
 0x6e8   : > { %v11122_v63 = vmax.f32 %v11086_v15, 0.0  ;;  %v10737_v50 = vrot.slane %v10723_v45, %v22755_v1  ;;  %v11123_v35 = vmax.f32 %v11087_v9, 0.0  ;;  %v10738_v62 = vcombine.high %v10730_v40, %v10730_v40 }
 0x6e9   : > { %v23096_v12 = vpop.f32.mrb[4].mxu1  ;;  %v11243_v32 = vcombine.low %v11117_v34, %v11118_v55  ;;  %v23104_v37 = vrot.slane %v10730_v40, %v22755_v1  ;;  %v10963_v53 = vsel %vm22782_vm5, %v23045_v46, -inf  ;;  %v11244_v30 = vcombine.low %v11119_v47, %v11120_v54  ;;  %v10343_v55 = vld [vmem:[#allocation3 + $0x80] ss:$2 sm:$0xff] }
 0x6ea   : > { %v23099_v33 = vpop.f32.mrb[5].mxu1  ;;  %v10739_v5 = vcombine.high %v10737_v50, %v10737_v50  ;;  %v10753_v26 = vrot.slane %v10737_v50, %v22755_v1  ;;  %v10672_v2 = vcombine.high %v23056_v8, %v23056_v8  ;;  %v10966_v34 = vsel %vm22782_vm5, %v23056_v8, -inf }
 0x6eb   : > { %v23106_v39 = vpop.f32.mrb[6].mxu1  ;;  %v23119_v7 = vcombine.low %v11122_v63, %v11123_v35  ;;  %v23122_v38 = vrot.slane %v10738_v62, %v22755_v1  ;;  %v11265_v46 = vrot.slane %v11243_v32, %v22755_v1  ;;  %v11272_v58 = vrot.slane %v11244_v30, %v22755_v1  ;;  %v10361_v63 = vld [vmem:[#allocation3 + $0x81] ss:$2 sm:$0xff] }
 0x6ec   : > { %v23112_v59 = vpop.f32.mrb[7].mxu1  ;;  %v23127_v31 = vrot.slane %v10739_v5, %v22755_v1  ;;  %v10768_v20 = vcombine.high %v23104_v37, %v23104_v37  ;;  %v23133_v36 = vsel %vm22782_vm5, %v10670_v44, -inf  ;;  %v23136_v8 = vadd.f32 %v22797_v13, %v10959_v18 }
 0x6ed   : > { %v10624_v42 = vcombine.high %v23069_v3, %v23069_v3  ;;  %v11274_v43 = vcombine.low %v11265_v46, %v11272_v58  ;;  %v11314_v27 = vrot.slane %v23119_v7, %v22755_v1  ;;  %v23147_v57 = vsel %vm22782_vm5, %v10753_v26, -inf }
 0x6ee   : > { %v10674_v0 = vcombine.high %v23051_v51, %v23051_v51  ;;  %v10770_v56 = vcombine.high %v23122_v38, %v23122_v38  ;;  %v10771_v17 = vcombine.high %v23127_v31, %v23127_v31  ;;  %v10681_v61 = vrot.slane %v23051_v51, %v22755_v1 }
 0x6ef   : > { %v11288_v52 = vrot.slane %v11274_v43, %v22755_v1  ;;  %v23163_v15 = vsel %vm22782_vm5, %v10768_v20, -inf  ;;  %v10960_v51 = vsel %vm22782_vm5, %v10624_v42, -inf  ;;  %v10972_v54 = vsel %vm22782_vm5, %v10672_v2, -inf  ;;  %v11651_v42 = vld [vmem:[#allocation3 + $0xb4] ss:$2 sm:$0xff] }
 0x6f0   : > { %v10688_v9 = vrot.slane %v10674_v0, %v22755_v1  ;;  %v10689_v40 = vcombine.high %v10681_v61, %v10681_v61  ;;  %v10697_v18 = vrot.slane %v10681_v61, %v22755_v1  ;;  %v11124_v30 = vmax.f32 %v23136_v8, 0.0  ;;  %v11669_v2 = vld [vmem:[#allocation3 + $0xb5] ss:$2 sm:$0xff] }
 0x6f1   : > { %v19648_v44 = vpop.f32.mrb[8].mxu1  ;;  %v18036_v35 = vcombine.low %v11288_v52, %v11288_v52  ;;  %v10979_v20 = vsel %vm22782_vm5, %v10771_v17, -inf  ;;  %v24824_v43 = vld [vmem:[#allocation7_spill] sm:$0xff]  ;;  %v23194_v17 = vcombine.low %v11281_v4, %v11288_v52 }
 0x6f2   : > { %v23169_v47 = vpop.f32.mrb[9].mxu1  ;;  %v10690_v32 = vcombine.high %v10688_v9, %v10688_v9  ;;  %v10704_v62 = vrot.slane %v10688_v9, %v22755_v1  ;;  %v10711_v26 = vrot.slane %v10689_v40, %v22755_v1  ;;  %v10719_v46 = vcombine.high %v10697_v18, %v10697_v18 }
 0x6f3   : > { %v19649_v50 = vpop.f32.mrb[10].mxu1  ;;  %v10961_v58 = vsel %vm22782_vm5, %v10697_v18, -inf  ;;  %v23184_v0 = vrot.slane %v18036_v35, %v24824_v43  ;;  %v10370_v9 = vmax.f32 %v10343_v55, %v10361_v63  ;;  %v23200_v55 = vmax.f32 %v11651_v42, %v11669_v2 }
 0x6f4   : > { %v10082_v5 = vpop.f32.mrb[11].mxu1  ;;  %v10718_v61 = vrot.slane %v10690_v32, %v22755_v1  ;;  %v10720_v44 = vcombine.high %v10704_v62, %v10704_v62  ;;  %v10721_v8 = vcombine.high %v10711_v26, %v10711_v26  ;;  %v10962_v50 = vmax.f32 %v10960_v51, %v10961_v58 }
 0x6f5   : > { %v10964_v40 = vsel %vm22782_vm5, %v10711_v26, -inf  ;;  %v10967_v18 = vsel %vm22782_vm5, %v10719_v46, -inf  ;;  %v11499_v35 = vcombine.high %v23184_v0, %v23184_v0  ;;  %v10993_v32 = vsel %vm22782_vm5, %v10770_v56, -inf }
 0x6f6   : > { %v10965_v51 = vmax.f32 %v10963_v53, %v10964_v40  ;;  %v10968_v63 = vmax.f32 %v10966_v34, %v10967_v18  ;;  %v10970_v5 = vsel %vm22782_vm5, %v10721_v8, -inf  ;;  %v10973_v26 = vsel %vm22782_vm5, %v10704_v62, -inf  ;;  %v24825_v62 = vld [vmem:[#allocation8_spill] sm:$0xff] }
 0x6f7   : > { %v10722_v24 = vcombine.high %v10718_v61, %v10718_v61  ;;  %v10971_v4 = vmax.f32 %v23133_v36, %v10970_v5  ;;  %v10974_v52 = vmax.f32 %v10972_v54, %v10973_v26  ;;  %v10772_v58 = vcombine.high %v10370_v9, %v10370_v9 }
 0x6f8   : > { %v10978_v56 = vsel %vm22782_vm5, %v10720_v44, -inf  ;;  %v11089_v53 = vadd.f32 %v22801_v16, %v10962_v50  ;;  %v11090_v34 = vadd.f32 %v22792_v11, %v10965_v51  ;;  %v11091_v42 = vadd.f32 %v22861_v21, %v10968_v63 }
 0x6f9   : > { %v23206_v46 = vpop.f32.mrb[12].mxu1  ;;  %v23217_v8 = vcombine.low %v11499_v35, %v24825_v62  ;;  %v10980_v61 = vmax.f32 %v10978_v56, %v10979_v20  ;;  %v11092_v36 = vadd.f32 %v22866_v48, %v10971_v4  ;;  %v11093_v54 = vadd.f32 %v22882_v60, %v10974_v52 }
 0x6fa   : > { %v10095_v45 = vpop.f32.mrb[13].mxu1  ;;  %v11125_v40 = vmax.f32 %v11089_v53, 0.0  ;;  %v11126_v44 = vmax.f32 %v11090_v34, 0.0  ;;  %v11127_v18 = vmax.f32 %v11091_v42, 0.0  ;;  %v10779_v50 = vrot.slane %v10370_v9, %v22755_v1 }
 0x6fb   : > { %v23214_v2 = vpop.f32.mrb[14].mxu1  ;;  %v11095_v51 = vadd.f32 %v22773_v14, %v10980_v61  ;;  %v11128_v63 = vmax.f32 %v11092_v36, 0.0  ;;  %v11129_v5 = vmax.f32 %v11093_v54, 0.0  ;;  %v10786_v26 = vrot.slane %v10772_v58, %v22755_v1 }
 0x6fc   : > { %v23221_v45 = vpop.f32.mrb[15].mxu1  ;;  %v11305_v35 = vcombine.low %v11124_v30, %v11125_v40  ;;  %v11306_v3 = vcombine.low %v11126_v44, %v11127_v18  ;;  %v10787_v20 = vcombine.high %v10779_v50, %v10779_v50  ;;  %v10795_v4 = vrot.slane %v10779_v50, %v22755_v1 }
 0x6fd   : > { %v11307_v56 = vcombine.low %v11128_v63, %v11129_v5  ;;  %v10788_v52 = vcombine.high %v10786_v26, %v10786_v26  ;;  %v10802_v49 = vrot.slane %v10786_v26, %v22755_v1  ;;  %v10981_v53 = vsel %vm22782_vm5, %v10722_v24, -inf }
 0x6fe   : > { %v11321_v9 = vrot.slane %v11305_v35, %v22755_v1  ;;  %v11328_v34 = vrot.slane %v11306_v3, %v22755_v1  ;;  %v10809_v42 = vrot.slane %v10787_v20, %v22755_v1  ;;  %v10817_v61 = vcombine.high %v10795_v4, %v10795_v4 }
 0x6ff   : > { %v11335_v30 = vrot.slane %v11307_v56, %v22755_v1  ;;  %v10816_v58 = vrot.slane %v10788_v52, %v22755_v1  ;;  %v10818_v36 = vcombine.high %v10802_v49, %v10802_v49  ;;  %v10982_v54 = vsel %vm22782_vm5, %v10795_v4, -inf }
 0x700   : > { %v11336_v40 = vcombine.low %v11314_v27, %v11321_v9  ;;  %v10819_v24 = vcombine.high %v10809_v42, %v10809_v42  ;;  %v10983_v44 = vmax.f32 %v10981_v53, %v10982_v54  ;;  %v10985_v3 = vsel %vm22782_vm5, %v10809_v42, -inf }
 0x701   : > { %v11337_v18 = vcombine.low %v11328_v34, %v11335_v30  ;;  %v24826_v50 = vsel %vm22782_vm5, %v23104_v37, -inf  ;;  %v10988_v5 = vsel %vm22782_vm5, %v10817_v61, -inf  ;;  %v10994_v26 = vsel %vm22782_vm5, %v10802_v49, -inf  ;;  %v23265_v53 = vpop.f32.mrb[16].mxu1 }
 0x702   : > { %v10986_v63 = vmax.f32 %v24826_v50, %v10985_v3  ;;  %v11344_v7 = vrot.slane %v11336_v40, %v22755_v1  ;;  %v24827_v27 = vsel %vm22782_vm5, %v23122_v38, -inf  ;;  %v10991_v20 = vsel %vm22782_vm5, %v10819_v24, -inf  ;;  %v11653_v24 = vld [vmem:[#allocation3 + $0xc4] ss:$2 sm:$0xff] }
 0x703   : > { %v10989_v35 = vmax.f32 %v24827_v27, %v10988_v5  ;;  %v10995_v4 = vmax.f32 %v10993_v32, %v10994_v26  ;;  %v23258_v37 = vrot.slane %v11337_v18, %v22755_v1  ;;  %v10992_v56 = vmax.f32 %v23163_v15, %v10991_v20  ;;  %v23274_v15 = vpop.f32.mrb[17].mxu1 }
 0x704   : > { %v10997_v52 = vsel %vm22782_vm5, %v10816_v58, -inf  ;;  %v11000_v49 = vsel %vm22782_vm5, %v10818_v36, -inf  ;;  %v24828_v9 = vsel %vm22782_vm5, %v23127_v31, -inf  ;;  %v11096_v34 = vadd.f32 %v22776_v29, %v10983_v44 }
 0x705   : > { %v10998_v38 = vmax.f32 %v23147_v57, %v10997_v52  ;;  %v11001_v32 = vmax.f32 %v24828_v9, %v11000_v49  ;;  %v11097_v42 = vadd.f32 %v22797_v13, %v10986_v63  ;;  %v11352_v61 = vcombine.low %v11344_v7, %v23258_v37  ;;  %v11671_v63 = vld [vmem:[#allocation3 + $0xc5] ss:$2 sm:$0xff] }
 0x706   : > { %v11098_v30 = vadd.f32 %v22801_v16, %v10989_v35  ;;  %v11099_v58 = vadd.f32 %v22792_v11, %v10992_v56  ;;  %v11100_v36 = vadd.f32 %v22861_v21, %v10995_v4  ;;  %v11131_v31 = vmax.f32 %v11095_v51, 0.0 }
 0x707   : > { %v11101_v57 = vadd.f32 %v22866_v48, %v10998_v38  ;;  %v11102_v54 = vadd.f32 %v22882_v60, %v11001_v32  ;;  %v11132_v40 = vmax.f32 %v11096_v34, 0.0  ;;  %v11514_v44 = vrot.slane %v11352_v61, %v24824_v43  ;;  %v23294_v61 = vpop.f32.mrb[18].mxu1 }
 0x708   : > { %v11133_v3 = vmax.f32 %v11097_v42, 0.0  ;;  %v11134_v18 = vmax.f32 %v11098_v30, 0.0  ;;  %v11135_v50 = vmax.f32 %v11099_v58, 0.0  ;;  %v11136_v5 = vmax.f32 %v11100_v36, 0.0  ;;  %24829 = vst [vmem:[#allocation36_spill] sm:$0xff] %v23294_v61  ;;  %v23301_v36 = vpop.f32.mrb[19].mxu1 }
 0x709   : > { %v11137_v26 = vmax.f32 %v11101_v57, 0.0  ;;  %v11138_v7 = vmax.f32 %v11102_v54, 0.0  ;;  %v11367_v27 = vcombine.low %v11131_v31, %v11132_v40  ;;  %v11522_v35 = vcombine.high %v11514_v44, %v11514_v44  ;;  %24830 = vst [vmem:[#allocation37_spill] sm:$0xff] %v23301_v36 }
 0x70a   : > { %v11368_v20 = vcombine.low %v11133_v3, %v11134_v18  ;;  %v11704_v4 = vcombine.high %v23200_v55, %v23200_v55  ;;  %v11711_v51 = vrot.slane %v23200_v55, %v22755_v1  ;;  %v18035_v56 = vcombine.low %v23013_v28, %v23013_v28 }
 0x70b   : > { %v11369_v52 = vcombine.low %v11135_v50, %v11136_v5  ;;  %v11370_v49 = vcombine.low %v11137_v26, %v11138_v7  ;;  %v11687_v38 = vmax.f32 %v11653_v24, %v11671_v63  ;;  %v23291_v9 = vrot.slane %v23194_v17, %v24824_v43  ;;  %v11655_v63 = vld [vmem:[#allocation3 + $0xd4] ss:$2 sm:$0xff]  ;;  %v11673_v5 = vld [vmem:[#allocation3 + $0xd5] ss:$2 sm:$0xff] }
 0x70c   : > { %v11590_v32 = vcombine.low %v11514_v44, %v11522_v35  ;;  %v11718_v34 = vrot.slane %v11704_v4, %v22755_v1  ;;  %v11719_v42 = vcombine.high %v11711_v51, %v11711_v51  ;;  %v11597_v30 = vrot.slane %v23217_v8, %v24824_v43 }
 0x70d   : > { %v11391_v55 = vrot.slane %v11369_v52, %v22755_v1  ;;  %v11398_v28 = vrot.slane %v11370_v49, %v22755_v1  ;;  %v11727_v58 = vrot.slane %v11711_v51, %v22755_v1  ;;  %v11384_v57 = vrot.slane %v11368_v20, %v22755_v1 }
 0x70e   : > { %v11604_v17 = vrot.slane %v11590_v32, %v24824_v43  ;;  %v11720_v54 = vcombine.high %v11718_v34, %v11718_v34  ;;  %v23306_v31 = vrot.slane %v11718_v34, %v22755_v1  ;;  %v11741_v24 = vrot.slane %v11719_v42, %v22755_v1 }
 0x70f   : > { %v11400_v40 = vcombine.low %v11391_v55, %v11398_v28  ;;  %v11753_v8 = vcombine.high %v11687_v38, %v11687_v38  ;;  %v23311_v44 = vrot.slane %v23039_v23, %v24824_v43  ;;  %v11377_v18 = vrot.slane %v11367_v27, %v22755_v1 }
 0x710   : > { %v11605_v3 = vcombine.low %v11597_v30, %v11604_v17  ;;  %v11749_v50 = vcombine.high %v11727_v58, %v11727_v58  ;;  %v23315_v26 = vrot.slane %v18035_v56, %v24824_v43  ;;  %v23322_v20 = vrot.slane %v11720_v54, %v22755_v1 }
 0x711   : > { %v11751_v23 = vcombine.high %v11741_v24, %v11741_v24  ;;  %v23325_v4 = vcombine.low %v11377_v18, %v11384_v57  ;;  %v11750_v27 = vcombine.high %v23306_v31, %v23306_v31  ;;  %v12217_v51 = vsel %vm22782_vm5, %v11727_v58, -inf }
 0x712   : > { %11647 = vst.msk [vmem:[#allocation6 + $0x1b] sm:$0xff] %vm355_vm4, %v11605_v3  ;;  %v11760_v56 = vrot.slane %v11687_v38, %v22755_v1  ;;  %v23333_v52 = vrot.slane %v11400_v40, %v22755_v1  ;;  %v12220_v49 = vsel %vm22782_vm5, %v11741_v24, -inf  ;;  %v11767_v32 = vrot.slane %v11753_v8, %v22755_v1  ;;  %v23344_v38 = vpop.f32.mrb[20].mxu1 }
 0x713   : > { %v11688_v34 = vmax.f32 %v11655_v63, %v11673_v5  ;;  %v12223_v42 = vsel %vm22782_vm5, %v11749_v50, -inf  ;;  %v12229_v30 = vsel %vm22782_vm5, %v23306_v31, -inf  ;;  %24831 = vst [vmem:[#allocation38_spill] sm:$0xff] %v23344_v38  ;;  %v12232_v58 = vsel %vm22782_vm5, %v23322_v20, -inf  ;;  %v23352_v40 = vpop.f32.mrb[21].mxu1 }
 0x714   : > { %v11768_v55 = vcombine.high %v11760_v56, %v11760_v56  ;;  %v11776_v28 = vrot.slane %v11760_v56, %v22755_v1  ;;  %v11769_v17 = vcombine.high %v11767_v32, %v11767_v32  ;;  %v11783_v57 = vrot.slane %v11767_v32, %v22755_v1  ;;  %24832 = vst [vmem:[#allocation39_spill] sm:$0xff] %v23352_v40  ;;  %v23357_v18 = vpop.f32.mrb[22].mxu1  ;;  %v11675_v32 = vld [vmem:[#allocation3 + $0xe5] ss:$2 sm:$0xff] }
 0x715   : > { %v12226_v54 = vsel %vm22782_vm5, %v11751_v23, -inf  ;;  %v11752_v8 = vcombine.high %v23322_v20, %v23322_v20  ;;  %v11802_v3 = vcombine.high %v11688_v34, %v11688_v34  ;;  %24833 = vst [vmem:[#allocation40_spill] sm:$0xff] %v23357_v18  ;;  %v11809_v56 = vrot.slane %v11688_v34, %v22755_v1  ;;  %v11657_v23 = vld [vmem:[#allocation3 + $0xe4] ss:$2 sm:$0xff]  ;;  %v23363_v35 = vpop.f32.mrb[23].mxu1 }
 0x716   : > { %v11790_v24 = vrot.slane %v11768_v55, %v22755_v1  ;;  %v11798_v31 = vcombine.high %v11776_v28, %v11776_v28  ;;  %v11797_v50 = vrot.slane %v11769_v17, %v22755_v1  ;;  %v11799_v63 = vcombine.high %v11783_v57, %v11783_v57  ;;  %24834 = vst [vmem:[#allocation41_spill] sm:$0xff] %v23363_v35 }
 0x717   : > { %v12227_v5 = vsel %vm22782_vm5, %v11783_v57, -inf  ;;  %v11689_v38 = vmax.f32 %v11657_v23, %v11675_v32 }
 0x718   : > { %v11800_v55 = vcombine.high %v11790_v24, %v11790_v24  ;;  %v12218_v28 = vsel %vm22782_vm5, %v11790_v24, -inf  ;;  %v12221_v20 = vsel %vm22782_vm5, %v11798_v31, -inf  ;;  %v12228_v7 = vmax.f32 %v12226_v54, %v12227_v5 }
 0x719   : > { %v11801_v22 = vcombine.high %v11797_v50, %v11797_v50  ;;  %v12219_v17 = vmax.f32 %v12217_v51, %v12218_v28  ;;  %v12222_v18 = vmax.f32 %v12220_v49, %v12221_v20  ;;  %v12230_v57 = vsel %vm22782_vm5, %v11797_v50, -inf }
 0x71a   : > { %v12224_v34 = vsel %vm22782_vm5, %v11800_v55, -inf  ;;  %v12231_v40 = vmax.f32 %v12229_v30, %v12230_v57  ;;  %v12233_v35 = vsel %vm22782_vm5, %v11799_v63, -inf  ;;  %v11816_v54 = vrot.slane %v11802_v3, %v22755_v1  ;;  %v23382_v30 = vpop.f32.mrb[24].mxu1 }
 0x71b   : > { %v12225_v36 = vmax.f32 %v12223_v42, %v12224_v34  ;;  %v12234_v24 = vmax.f32 %v12232_v58, %v12233_v35  ;;  %v12388_v61 = vadd.f32 %v12219_v17, %v22773_v14  ;;  %v12236_v51 = vsel %vm22782_vm5, %v11801_v22, -inf  ;;  %v23386_v5 = vpop.f32.mrb[25].mxu1 }
 0x71c   : > { %v12389_v49 = vadd.f32 %v12222_v18, %v22776_v29  ;;  %v12391_v31 = vadd.f32 %v12228_v7, %v22801_v16  ;;  %v12392_v50 = vadd.f32 %v12231_v40, %v22792_v11  ;;  %v11817_v58 = vcombine.high %v11809_v56, %v11809_v56  ;;  %v23391_v7 = vpop.f32.mrb[26].mxu1 }
 0x71d   : > { %v12390_v63 = vadd.f32 %v12225_v36, %v22797_v13  ;;  %v12393_v42 = vadd.f32 %v12234_v24, %v22861_v21  ;;  %v12424_v35 = vmax.f32 %v12388_v61, 0.0  ;;  %v12235_v3 = vsel %vm22782_vm5, %v11750_v27, -inf  ;;  %v23394_v28 = vpop.f32.mrb[27].mxu1 }
 0x71e   : > { %v12425_v22 = vmax.f32 %v12389_v49, 0.0  ;;  %v12428_v23 = vmax.f32 %v12392_v50, 0.0  ;;  %v11825_v18 = vrot.slane %v11809_v56, %v22755_v1  ;;  %v11818_v55 = vcombine.high %v11816_v54, %v11816_v54  ;;  %24835 = vst [vmem:[#allocation42_spill] sm:$0xff] %v23394_v28 }
 0x71f   : > { %v12426_v40 = vmax.f32 %v12390_v63, 0.0  ;;  %v12429_v32 = vmax.f32 %v12393_v42, 0.0  ;;  %v11839_v36 = vrot.slane %v11817_v58, %v22755_v1  ;;  %v12237_v61 = vmax.f32 %v12235_v3, %v12236_v51 }
 0x720   : > { %v12427_v20 = vmax.f32 %v12391_v31, 0.0  ;;  %v11832_v17 = vrot.slane %v11816_v54, %v22755_v1  ;;  %v12239_v27 = vsel %vm22782_vm5, %v11825_v18, -inf  ;;  %v11407_v57 = vrot.slane %v23325_v4, %v22755_v1 }
 0x721   : > { %v12496_v56 = vcombine.low %v12424_v35, %v12425_v22  ;;  %v12238_v34 = vsel %vm22782_vm5, %v11752_v8, -inf  ;;  %v11851_v24 = vcombine.high %v11689_v38, %v11689_v38  ;;  %v24836_v49 = vcombine.high %v23291_v9, %v23291_v9 }
 0x722   : > { %v12497_v51 = vcombine.low %v12426_v40, %v12427_v20  ;;  %v11847_v31 = vcombine.high %v11825_v18, %v11825_v18  ;;  %v12240_v54 = vmax.f32 %v12238_v34, %v12239_v27  ;;  %v23410_v63 = vcombine.low %v11407_v57, %v23333_v52  ;;  %v24837_v40 = vld [vmem:[#allocation9_spill] sm:$0xff] }
 0x723   : > { %v23407_v50 = vcombine.low %v24836_v49, %v23184_v0  ;;  %v23412_v42 = vcombine.low %v12428_v23, %v12429_v32  ;;  %v23415_v4 = vrot.slane %v11818_v55, %v22755_v1  ;;  %v11849_v35 = vcombine.high %v11839_v36, %v11839_v36  ;;  %v24838_v32 = vld [vmem:[#allocation10_spill] sm:$0xff] }
 0x724   : > { %v11848_v8 = vcombine.high %v11832_v17, %v11832_v17  ;;  %v12394_v58 = vadd.f32 %v12237_v61, %v22866_v48  ;;  %v12395_v3 = vadd.f32 %v12240_v54, %v22882_v60  ;;  %v23420_v0 = vrot.slane %v11689_v38, %v22755_v1 }
 0x725   : > { %v12506_v22 = vrot.slane %v12496_v56, %v22755_v1  ;;  %v11865_v18 = vrot.slane %v11851_v24, %v22755_v1  ;;  %v19998_v23 = vadd.f32 %v23053_v10, %v24837_v40  ;;  %v19999_v55 = vadd.f32 %v23060_v25, %v24838_v32  ;;  %v23443_v56 = vpop.f32.mrb[28].mxu1 }
 0x726   : > { %v12513_v36 = vrot.slane %v12497_v51, %v22755_v1  ;;  %v12244_v61 = vsel %vm22782_vm5, %v11847_v31, -inf  ;;  %v12250_v20 = vsel %vm22782_vm5, %v11832_v17, -inf  ;;  %v11866_v38 = vcombine.high %v23420_v0, %v23420_v0  ;;  %24839 = vst [vmem:[#allocation43_spill] sm:$0xff] %v23443_v56  ;;  %v23450_v51 = vpop.f32.mrb[29].mxu1 }
 0x727   : > { %v12247_v27 = vsel %vm22782_vm5, %v11849_v35, -inf  ;;  %v12253_v10 = vsel %vm22782_vm5, %v23415_v4, -inf  ;;  %v11867_v57 = vcombine.high %v11865_v18, %v11865_v18  ;;  %v11881_v25 = vrot.slane %v11865_v18, %v22755_v1  ;;  %10292 = vst.msk [vmem:[#allocation3 + $0x110] sm:$0xff] %vm355_vm4, %v19998_v23  ;;  %10290 = vst.msk [vmem:[#allocation3 + $0x100] sm:$0xff] %vm355_vm4, %v19999_v55 }
 0x728   : > { %v12256_v17 = vsel %vm22782_vm5, %v11848_v8, -inf  ;;  %v12430_v34 = vmax.f32 %v12394_v58, 0.0  ;;  %v12431_v24 = vmax.f32 %v12395_v3, 0.0  ;;  %v23448_v49 = vrot.slane %v11866_v38, %v22755_v1  ;;  %24840 = vst [vmem:[#allocation44_spill] sm:$0xff] %v23450_v51 }
 0x729   : > { %v12520_v31 = vrot.slane %v23412_v42, %v22755_v1  ;;  %v11895_v54 = vrot.slane %v11867_v57, %v22755_v1  ;;  %v11897_v35 = vcombine.high %v11881_v25, %v11881_v25  ;;  %v12248_v18 = vsel %vm22782_vm5, %v11881_v25, -inf }
 0x72a   : > { %v23457_v40 = vcombine.low %v12506_v22, %v12513_v36  ;;  %v11898_v8 = vcombine.high %v23448_v49, %v23448_v49  ;;  %v12249_v58 = vmax.f32 %v12247_v27, %v12248_v18  ;;  %v11474_v3 = vcombine.high %v23311_v44, %v23311_v44 }
 0x72b   : > { %v11899_v23 = vcombine.high %v11895_v54, %v11895_v54  ;;  %v12251_v32 = vsel %vm22782_vm5, %v11895_v54, -inf  ;;  %v12254_v42 = vsel %vm22782_vm5, %v11897_v35, -inf  ;;  %v11475_v55 = vcombine.high %v23315_v26, %v23315_v26 }
 0x72c   : > { %v12499_v38 = vcombine.low %v12430_v34, %v12431_v24  ;;  %v12245_v22 = vsel %vm22782_vm5, %v11898_v8, -inf  ;;  %v12252_v36 = vmax.f32 %v12250_v20, %v12251_v32  ;;  %v12255_v57 = vmax.f32 %v12253_v10, %v12254_v42 }
 0x72d   : > { %v11874_v27 = vrot.slane %v23420_v0, %v22755_v1  ;;  %v12246_v25 = vmax.f32 %v12244_v61, %v12245_v22  ;;  %v12257_v18 = vsel %vm22782_vm5, %v11899_v23, -inf  ;;  %v12398_v54 = vadd.f32 %v12249_v58, %v22776_v29 }
 0x72e   : > { %v12399_v35 = vadd.f32 %v12252_v36, %v22797_v13  ;;  %v12400_v51 = vadd.f32 %v12255_v57, %v22801_v16  ;;  %v11659_v56 = vld [vmem:[#allocation3 + $0xf4] ss:$2 sm:$0xff]  ;;  %v11677_v34 = vld [vmem:[#allocation3 + $0xf5] ss:$2 sm:$0xff]  ;;  %v11850_v24 = vcombine.high %v23415_v4, %v23415_v4  ;;  %v11555_v20 = vcombine.low %v23311_v44, %v11474_v3 }
 0x72f   : > { %v12536_v0 = vrot.slane %v23457_v40, %v22755_v1  ;;  %v12397_v61 = vadd.f32 %v12246_v25, %v22773_v14  ;;  %v11690_v10 = vmax.f32 %v11659_v56, %v11677_v34  ;;  %v11556_v8 = vcombine.low %v23315_v26, %v11475_v55 }
 0x730   : > { %v12527_v58 = vrot.slane %v12499_v38, %v22755_v1  ;;  %v12258_v23 = vmax.f32 %v12256_v17, %v12257_v18  ;;  %v12435_v32 = vmax.f32 %v12399_v35, 0.0  ;;  %v12436_v42 = vmax.f32 %v12400_v51, 0.0 }
 0x731   : > { %v12433_v22 = vmax.f32 %v12397_v61, 0.0  ;;  %v12434_v36 = vmax.f32 %v12398_v54, 0.0  ;;  %v11900_v57 = vcombine.high %v11690_v10, %v11690_v10  ;;  %v11907_v4 = vrot.slane %v11690_v10, %v22755_v1 }
 0x732   : > { %v12560_v28 = vcombine.low %v12435_v32, %v12436_v42  ;;  %v12259_v44 = vsel %vm22782_vm5, %v11850_v24, -inf  ;;  %v11563_v3 = vrot.slane %v11555_v20, %v24824_v43  ;;  %v11570_v56 = vrot.slane %v11556_v8, %v24824_v43 }
 0x733   : > { %v12559_v25 = vcombine.low %v12433_v22, %v12434_v36  ;;  %v11914_v26 = vrot.slane %v11900_v57, %v22755_v1  ;;  %v11915_v55 = vcombine.high %v11907_v4, %v11907_v4  ;;  %v11923_v17 = vrot.slane %v11907_v4, %v22755_v1 }
 0x734   : > { %v12529_v51 = vcombine.low %v12520_v31, %v12527_v58  ;;  %v11571_v38 = vcombine.low %v11563_v3, %v11570_v56  ;;  %v24841_v18 = vcombine.low %v24825_v62, %v23291_v9  ;;  %v11587_v35 = vrot.slane %v23407_v50, %v24824_v43  ;;  %v24842_v9 = vld [vmem:[#allocation11_spill] sm:$0xff] }
 0x735   : > { %v12569_v34 = vrot.slane %v12559_v25, %v22755_v1  ;;  %v12576_v24 = vrot.slane %v12560_v28, %v22755_v1  ;;  %v11937_v20 = vrot.slane %v11915_v55, %v22755_v1  ;;  %v12401_v61 = vadd.f32 %v12258_v23, %v22792_v11  ;;  %v24844_v25 = vld [vmem:[#allocation13_spill] sm:$0xff] }
 0x736   : > { %v11580_v54 = vrot.slane %v24841_v18, %v24824_v43  ;;  %v11945_v10 = vcombine.high %v11923_v17, %v11923_v17  ;;  %v12260_v31 = vsel %vm22782_vm5, %v11923_v17, -inf  ;;  %11645 = vst.msk [vmem:[#allocation6 + $0xb] sm:$0xff] %vm355_vm4, %v11571_v38  ;;  %v20000_v58 = vadd.f32 %v23066_v19, %v24842_v9  ;;  %v24843_v19 = vld [vmem:[#allocation12_spill] sm:$0xff]  ;;  %v24845_v17 = vld [vmem:[#allocation14_spill] sm:$0xff] }
 0x737   : > { %v12262_v50 = vsel %vm22782_vm5, %v11874_v27, -inf  ;;  %v12265_v28 = vsel %vm22782_vm5, %v23448_v49, -inf  ;;  %v11916_v32 = vcombine.high %v11914_v26, %v11914_v26  ;;  %v12261_v42 = vmax.f32 %v12259_v44, %v12260_v31  ;;  %v14327_v18 = vld [vmem:[#allocation6 + $0x1] sm:$0xff] }
 0x738   : > { %v11588_v8 = vcombine.low %v11580_v54, %v11587_v35  ;;  %v23514_v23 = vrot.slane %v12529_v51, %v22755_v1  ;;  %v12263_v22 = vsel %vm22782_vm5, %v11937_v20, -inf  ;;  %v12266_v36 = vsel %vm22782_vm5, %v11945_v10, -inf  ;;  %10293 = vst.msk [vmem:[#allocation3 + $0x118] sm:$0xff] %vm355_vm4, %v20000_v58  ;;  %v24846_v54 = vld [vmem:[#allocation15_spill] sm:$0xff]  ;;  %v24849_v58 = vld [vmem:[#allocation18_spill] sm:$0xff] }
 0x739   : > { %v20001_v27 = vadd.f32 %v23073_v41, %v24843_v19  ;;  %v23525_v49 = vrot.slane %v11914_v26, %v22755_v1  ;;  %v12264_v57 = vmax.f32 %v12262_v50, %v12263_v22  ;;  %v12267_v4 = vmax.f32 %v12265_v28, %v12266_v36  ;;  %v24851_v22 = vld [vmem:[#allocation20_spill] sm:$0xff] }
 0x73a   : > { %11646 = vst.msk [vmem:[#allocation6 + $0x13] sm:$0xff] %vm355_vm4, %v11588_v8  ;;  %v12437_v44 = vmax.f32 %v12401_v61, 0.0  ;;  %v23527_v3 = vcombine.low %v12569_v34, %v12576_v24  ;;  %v12402_v56 = vadd.f32 %v12261_v42, %v22861_v21  ;;  %v20002_v55 = vadd.f32 %v23096_v12, %v24844_v25  ;;  %v24847_v12 = vld [vmem:[#allocation16_spill] sm:$0xff] }
 0x73b   : > { %10291 = vst.msk [vmem:[#allocation3 + $0x108] sm:$0xff] %vm355_vm4, %v20001_v27  ;;  %v20003_v51 = vadd.f32 %v23099_v33, %v24845_v17  ;;  %v23536_v41 = vrot.slane %v11916_v32, %v22755_v1  ;;  %v12403_v26 = vadd.f32 %v12264_v57, %v22866_v48  ;;  %v12404_v38 = vadd.f32 %v12267_v4, %v22882_v60  ;;  %v24848_v33 = vld [vmem:[#allocation17_spill] sm:$0xff]  ;;  %v24850_v32 = vld [vmem:[#allocation19_spill] sm:$0xff] }
 0x73c   : > { %v20004_v35 = vadd.f32 %v23106_v39, %v24846_v54  ;;  %v12438_v34 = vmax.f32 %v12402_v56, 0.0  ;;  %10296 = vst.msk [vmem:[#allocation3 + $0x130] sm:$0xff] %vm355_vm4, %v20002_v55  ;;  %v20005_v24 = vadd.f32 %v23112_v59, %v24847_v12  ;;  %v20007_v20 = vadd.f32 %v23169_v47, %v24848_v33  ;;  %v24853_v56 = vld [vmem:[#allocation22_spill] sm:$0xff] }
 0x73d   : > { %10294 = vst.msk [vmem:[#allocation3 + $0x120] sm:$0xff] %vm355_vm4, %v20003_v51  ;;  %v11946_v61 = vcombine.high %v23525_v49, %v23525_v49  ;;  %v12439_v10 = vmax.f32 %v12403_v26, 0.0  ;;  %v12440_v31 = vmax.f32 %v12404_v38, 0.0  ;;  %v14328_v8 = vld [vmem:[#allocation6 + $0x9] sm:$0xff]  ;;  %v20010_v59 = vadd.f32 %v23206_v46, %v24849_v58 }
 0x73e   : > { %10297 = vst.msk [vmem:[#allocation3 + $0x138] sm:$0xff] %vm355_vm4, %v20004_v35  ;;  %v12561_v39 = vcombine.low %v12437_v44, %v12438_v34  ;;  %v14350_v9 = vpack.c.bf16 %v14328_v8, %v14327_v18  ;;  %10295 = vst.msk [vmem:[#allocation3 + $0x128] sm:$0xff] %vm355_vm4, %v20005_v24  ;;  %v20012_v42 = vadd.f32 %v23214_v2, %v24850_v32  ;;  %v12271_v17 = vsel %vm22782_vm5, %v23525_v49, -inf }
 0x73f   : > { %10298 = vst.msk [vmem:[#allocation3 + $0x140] sm:$0xff] %vm355_vm4, %v20007_v20  ;;  %v12562_v50 = vcombine.low %v12439_v10, %v12440_v31  ;;  %v20013_v36 = vadd.f32 %v23221_v45, %v24851_v22  ;;  %v23563_v19 = vcombine.low %v12536_v0, %v23514_v23  ;;  %v11948_v46 = vcombine.high %v23536_v41, %v23536_v41  ;;  %v24852_v0 = vld [vmem:[#allocation21_spill] sm:$0xff] }
 0x740   : > { %19682 = vmatprep.mubr.msk.bf16.mxu0 %vm355_vm4, %v14350_v9  ;;  %10304 = vst.msk [vmem:[#allocation3 + $0x170] sm:$0xff] %vm355_vm4, %v20010_v59  ;;  %v18037_v2 = vcombine.low %v23258_v37, %v23258_v37  ;;  %10305 = vst.msk [vmem:[#allocation3 + $0x178] sm:$0xff] %vm355_vm4, %v20012_v42  ;;  %v18038_v40 = vcombine.low %v23333_v52, %v23333_v52  ;;  %v20014_v44 = vadd.f32 %v23265_v53, %v24852_v0  ;;  %v23591_v53 = vld [vmem:[%s24761_s4] ss:$0 sm:$0xff] }
 0x741   : > { %v14329_v28 = vld [vmem:[#allocation6 + $0x11] sm:$0xff]  ;;  %v14330_v47 = vld [vmem:[#allocation6 + $0x19] sm:$0xff]  ;;  %v12590_v57 = vrot.slane %v12562_v50, %v22755_v1  ;;  %10303 = vst.msk [vmem:[#allocation3 + $0x168] sm:$0xff] %vm355_vm4, %v20013_v36  ;;  %v20015_v25 = vadd.f32 %v23274_v15, %v24853_v56  ;;  %v18040_v37 = vcombine.low %v23514_v23, %v23514_v23  ;;  %v12599_v55 = vrot.slane %v23527_v3, %v22755_v1 }
 0x742   : > { %v14351_v27 = vpack.c.bf16 %v14330_v47, %v14329_v28  ;;  %v11661_v45 = vld [vmem:[#allocation3 + $0x104] ss:$2 sm:$0xff]  ;;  %v11679_v4 = vld [vmem:[#allocation3 + $0x105] ss:$2 sm:$0xff]  ;;  %v12274_v15 = vsel %vm22782_vm5, %v23536_v41, -inf  ;;  %v23598_v52 = vsel %vm22782_vm5, %v11946_v61, -inf  ;;  %v12583_v26 = vrot.slane %v12561_v39, %v22755_v1 }
 0x743   : > { %v11691_v51 = vmax.f32 %v11661_v45, %v11679_v4  ;;  %v23603_v18 = vrot.slane %v23410_v63, %v24824_v43  ;;  %10308 = vst.msk [vmem:[#allocation3 + $0x190] sm:$0xff] %vm355_vm4, %v20014_v44  ;;  %10306 = vst.msk [vmem:[#allocation3 + $0x180] sm:$0xff] %vm355_vm4, %v20015_v25  ;;  %v23609_v34 = vrot.slane %v18037_v2, %v24824_v43  ;;  %v12280_v24 = vsel %vm22782_vm5, %v11948_v46, -inf }
 0x744   : > { %19683 = vmatmul.mubr.msk.bf16.vlgmr.msra.gmra.mrb[4].mxu0 %vm355_vm4, %v14351_v27  ;;  %v11663_v38 = vld [vmem:[#allocation3 + $0x114] ss:$2 sm:$0xff]  ;;  %v11681_v49 = vld [vmem:[#allocation3 + $0x115] ss:$2 sm:$0xff]  ;;  %v12592_v12 = vcombine.low %v12583_v26, %v12590_v57  ;;  %v23614_v33 = vrot.slane %v18038_v40, %v24824_v43  ;;  %v13648_v63 = vcombine.high %v23591_v53, %v23591_v53  ;;  %v23627_v50 = vrot.slane %v23591_v53, %v22755_v1  ;;  %v19669_v40 = vpop.f32.mrb[30].mxu1 }
 0x745   : > { %v11949_v54 = vcombine.high %v11691_v51, %v11691_v51  ;;  %v11956_v35 = vrot.slane %v11691_v51, %v22755_v1  ;;  %v11692_v41 = vmax.f32 %v11663_v38, %v11681_v49  ;;  %v11665_v39 = vld [vmem:[#allocation3 + $0x124] ss:$2 sm:$0xff]  ;;  %v11683_v9 = vld [vmem:[#allocation3 + $0x125] ss:$2 sm:$0xff]  ;;  %v11546_v58 = vcombine.high %v23603_v18, %v23603_v18  ;;  %v23644_v51 = vpop.f32.mrb[31].mxu1 }
 0x746   : > { %v11607_v59 = vcombine.low %v24825_v62, %v23603_v18  ;;  %v11523_v42 = vcombine.high %v23609_v34, %v23609_v34  ;;  %v23634_v22 = vrot.slane %v12592_v12, %v22755_v1  ;;  %v11693_v4 = vmax.f32 %v11665_v39, %v11683_v9 }
 0x747   : > { %v11963_v20 = vrot.slane %v11949_v54, %v22755_v1  ;;  %v11964_v61 = vcombine.high %v11956_v35, %v11956_v35  ;;  %v11972_v10 = vrot.slane %v11956_v35, %v22755_v1  ;;  %v11998_v31 = vcombine.high %v11692_v41, %v11692_v41 }
 0x748   : > { %v12005_v8 = vrot.slane %v11692_v41, %v22755_v1  ;;  %v23843_v53 = vrot.slane %v23627_v50, %v22755_v1 }
 0x749   : > { %v11965_v28 = vcombine.high %v11963_v20, %v11963_v20  ;;  %v11979_v47 = vrot.slane %v11963_v20, %v22755_v1  ;;  %v11986_v32 = vrot.slane %v11964_v61, %v22755_v1  ;;  %v12012_v36 = vrot.slane %v11998_v31, %v22755_v1 }
 0x74a   : > { %v12013_v46 = vcombine.high %v12005_v8, %v12005_v8  ;;  %v12021_v27 = vrot.slane %v12005_v8, %v22755_v1  ;;  %v11994_v57 = vcombine.high %v11972_v10, %v11972_v10  ;;  %v12283_v44 = vsel %vm22782_vm5, %v11972_v10, -inf }
 0x74b   : > { %v11993_v2 = vrot.slane %v11965_v28, %v22755_v1  ;;  %v11995_v45 = vcombine.high %v11979_v47, %v11979_v47  ;;  %v11996_v0 = vcombine.high %v11986_v32, %v11986_v32  ;;  %v12286_v56 = vsel %vm22782_vm5, %v11986_v32, -inf }
 0x74c   : > { %v12035_v25 = vrot.slane %v12013_v46, %v22755_v1  ;;  %v12043_v54 = vcombine.high %v12021_v27, %v12021_v27  ;;  %v12014_v12 = vcombine.high %v12012_v36, %v12012_v36  ;;  %v23651_v20 = vrot.slane %v12012_v36, %v22755_v1 }
 0x74d   : > { %v11997_v26 = vcombine.high %v11993_v2, %v11993_v2  ;;  %v12272_v38 = vsel %vm22782_vm5, %v11993_v2, -inf  ;;  %v12275_v49 = vsel %vm22782_vm5, %v11995_v45, -inf  ;;  %v12281_v31 = vsel %vm22782_vm5, %v12021_v27, -inf }
 0x74e   : > { %v12273_v35 = vmax.f32 %v12271_v17, %v12272_v38  ;;  %v12276_v41 = vmax.f32 %v12274_v15, %v12275_v49  ;;  %v12045_v10 = vcombine.high %v12035_v25, %v12035_v25  ;;  %v12284_v8 = vsel %vm22782_vm5, %v12035_v25, -inf }
 0x74f   : > { %v12278_v61 = vsel %vm22782_vm5, %v11997_v26, -inf  ;;  %v12289_v17 = vsel %vm22782_vm5, %v11994_v57, -inf  ;;  %v12282_v28 = vmax.f32 %v12280_v24, %v12281_v31  ;;  %v12285_v47 = vmax.f32 %v12283_v44, %v12284_v8 }
 0x750   : > { %v12279_v39 = vmax.f32 %v23598_v52, %v12278_v61  ;;  %v12406_v15 = vadd.f32 %v12273_v35, %v22773_v14  ;;  %v12407_v9 = vadd.f32 %v12276_v41, %v22776_v29  ;;  %v12287_v32 = vsel %vm22782_vm5, %v12043_v54, -inf  ;;  %v11667_v35 = vld [vmem:[#allocation3 + $0x134] ss:$2 sm:$0xff]  ;;  %v11685_v41 = vld [vmem:[#allocation3 + $0x135] ss:$2 sm:$0xff] }
 0x751   : > { %v12290_v36 = vsel %vm22782_vm5, %v12045_v10, -inf  ;;  %v12288_v2 = vmax.f32 %v12286_v56, %v12287_v32  ;;  %v12042_v52 = vrot.slane %v12014_v12, %v22755_v1  ;;  %v12292_v57 = vsel %vm22782_vm5, %v11996_v0, -inf  ;;  %v19672_v32 = vpop.f32.mrb[32].mxu1 }
 0x752   : > { %v12442_v46 = vmax.f32 %v12406_v15, 0.0  ;;  %v12443_v27 = vmax.f32 %v12407_v9, 0.0  ;;  %v12291_v45 = vmax.f32 %v12289_v17, %v12290_v36  ;;  %v12293_v24 = vsel %vm22782_vm5, %v23651_v20, -inf }
 0x753   : > { %v12408_v40 = vadd.f32 %v12279_v39, %v22797_v13  ;;  %v12044_v44 = vcombine.high %v23651_v20, %v23651_v20  ;;  %v12294_v25 = vmax.f32 %v12292_v57, %v12293_v24  ;;  %v12409_v26 = vadd.f32 %v12282_v28, %v22801_v16 }
 0x754   : > { %v12410_v56 = vadd.f32 %v12285_v47, %v22792_v11  ;;  %v12411_v38 = vadd.f32 %v12288_v2, %v22861_v21  ;;  %v12412_v49 = vadd.f32 %v12291_v45, %v22866_v48  ;;  %v12047_v0 = vcombine.high %v11693_v4, %v11693_v4 }
 0x755   : > { %v12444_v54 = vmax.f32 %v12408_v40, 0.0  ;;  %v12622_v12 = vcombine.low %v12442_v46, %v12443_v27  ;;  %v12413_v61 = vadd.f32 %v12294_v25, %v22882_v60  ;;  %v12445_v10 = vmax.f32 %v12409_v26, 0.0  ;;  %v10175_v27 = vpop.f32.mrb[33].mxu1 }
 0x756   : > { %v12446_v31 = vmax.f32 %v12410_v56, 0.0  ;;  %v12447_v8 = vmax.f32 %v12411_v38, 0.0  ;;  %v12448_v20 = vmax.f32 %v12412_v49, 0.0  ;;  %v12054_v39 = vrot.slane %v11693_v4, %v22755_v1  ;;  %v19673_v25 = vpop.f32.mrb[34].mxu1 }
 0x757   : > { %v12061_v17 = vrot.slane %v12047_v0, %v22755_v1  ;;  %v12046_v15 = vcombine.high %v12042_v52, %v12042_v52  ;;  %v12449_v9 = vmax.f32 %v12413_v61, 0.0  ;;  %v12623_v28 = vcombine.low %v12444_v54, %v12445_v10  ;;  %v10178_v49 = vpop.f32.mrb[35].mxu1 }
 0x758   : > { %v11694_v47 = vmax.f32 %v11667_v35, %v11685_v41  ;;  %v12624_v36 = vcombine.low %v12446_v31, %v12447_v8  ;;  %v12062_v2 = vcombine.high %v12054_v39, %v12054_v39  ;;  %v12070_v46 = vrot.slane %v12054_v39, %v22755_v1 }
 0x759   : > { %v12063_v45 = vcombine.high %v12061_v17, %v12061_v17  ;;  %v12632_v57 = vrot.slane %v12622_v12, %v22755_v1  ;;  %v12625_v24 = vcombine.low %v12448_v20, %v12449_v9  ;;  %v12639_v40 = vrot.slane %v12623_v28, %v22755_v1 }
 0x75a   : > { %v12077_v4 = vrot.slane %v12061_v17, %v22755_v1  ;;  %v12084_v52 = vrot.slane %v12062_v2, %v22755_v1  ;;  %v12096_v56 = vcombine.high %v11694_v47, %v11694_v47  ;;  %v11547_v38 = vcombine.high %v23614_v33, %v23614_v33 }
 0x75b   : > { %v12091_v26 = vrot.slane %v12063_v45, %v22755_v1  ;;  %v12646_v54 = vrot.slane %v12624_v36, %v22755_v1  ;;  %v12653_v0 = vrot.slane %v12625_v24, %v22755_v1  ;;  %v12654_v35 = vcombine.low %v12632_v57, %v12639_v40  ;;  %v12968_v57 = vld [vmem:[#allocation3 + $0x168] ss:$2 sm:$0xff]  ;;  %v12986_v24 = vld [vmem:[#allocation3 + $0x169] ss:$2 sm:$0xff] }
 0x75c   : > { %v23698_v41 = vcombine.low %v11546_v58, %v23614_v33  ;;  %v12298_v12 = vsel %vm22782_vm5, %v12044_v44, -inf  ;;  %v12092_v61 = vcombine.high %v12070_v46, %v12070_v46  ;;  %v12301_v31 = vsel %vm22782_vm5, %v12046_v15, -inf }
 0x75d   : > { %v12095_v10 = vcombine.high %v12091_v26, %v12091_v26  ;;  %v12655_v8 = vcombine.low %v12646_v54, %v12653_v0  ;;  %v12304_v20 = vsel %vm22782_vm5, %v12070_v46, -inf  ;;  %v12316_v39 = vsel %vm22782_vm5, %v12077_v4, -inf }
 0x75e   : > { %v12103_v17 = vrot.slane %v11694_v47, %v22755_v1  ;;  %v12094_v9 = vcombine.high %v12084_v52, %v12084_v52  ;;  %v12307_v44 = vsel %vm22782_vm5, %v12084_v52, -inf  ;;  %v12110_v28 = vrot.slane %v12096_v56, %v22755_v1 }
 0x75f   : > { %v12299_v58 = vsel %vm22782_vm5, %v12095_v10, -inf  ;;  %v12662_v15 = vrot.slane %v12654_v35, %v22755_v1  ;;  %v12669_v32 = vrot.slane %v12655_v8, %v22755_v1  ;;  %v12310_v47 = vsel %vm22782_vm5, %v12092_v61, -inf }
 0x760   : > { %v12111_v36 = vcombine.high %v12103_v17, %v12103_v17  ;;  %v12119_v2 = vrot.slane %v12103_v17, %v22755_v1  ;;  %v12300_v45 = vmax.f32 %v12298_v12, %v12299_v58  ;;  %v12112_v46 = vcombine.high %v12110_v28, %v12110_v28 }
 0x761   : > { %v12126_v27 = vrot.slane %v12110_v28, %v22755_v1  ;;  %v12670_v40 = vcombine.low %v12662_v15, %v12669_v32  ;;  %v18042_v4 = vcombine.low %v12669_v32, %v12669_v32  ;;  %v12313_v61 = vsel %vm22782_vm5, %v12094_v9, -inf }
 0x762   : > { %v12133_v25 = vrot.slane %v12111_v36, %v22755_v1  ;;  %v12141_v52 = vcombine.high %v12119_v2, %v12119_v2  ;;  %v12140_v56 = vrot.slane %v12112_v46, %v22755_v1  ;;  %v12302_v54 = vsel %vm22782_vm5, %v12119_v2, -inf }
 0x763   : > { %v12142_v49 = vcombine.high %v12126_v27, %v12126_v27  ;;  %v12314_v0 = vsel %vm22782_vm5, %v12126_v27, -inf  ;;  %v12303_v12 = vmax.f32 %v12301_v31, %v12302_v54  ;;  %v13003_v10 = vmax.f32 %v12968_v57, %v12986_v24 }
 0x764   : > { %v12143_v35 = vcombine.high %v12133_v25, %v12133_v25  ;;  %v12305_v8 = vsel %vm22782_vm5, %v12133_v25, -inf  ;;  %v12308_v17 = vsel %vm22782_vm5, %v12141_v52, -inf  ;;  %v12315_v58 = vmax.f32 %v12313_v61, %v12314_v0 }
 0x765   : > { %v12317_v28 = vsel %vm22782_vm5, %v12140_v56, -inf  ;;  %v12838_v15 = vrot.slane %v18042_v4, %v24824_v43  ;;  %v12319_v32 = vsel %vm22782_vm5, %v12091_v26, -inf  ;;  %v12306_v31 = vmax.f32 %v12304_v20, %v12305_v8 }
 0x766   : > { %v12309_v36 = vmax.f32 %v12307_v44, %v12308_v17  ;;  %v12311_v9 = vsel %vm22782_vm5, %v12143_v35, -inf  ;;  %v12318_v2 = vmax.f32 %v12316_v39, %v12317_v28  ;;  %v12320_v46 = vsel %vm22782_vm5, %v12142_v49, -inf }
 0x767   : > { %v12415_v27 = vadd.f32 %v12300_v45, %v22773_v14  ;;  %v12312_v57 = vmax.f32 %v12310_v47, %v12311_v9  ;;  %v12321_v24 = vmax.f32 %v12319_v32, %v12320_v46  ;;  %v13021_v25 = vcombine.high %v13003_v10, %v13003_v10  ;;  %v20837_v46 = vld [vmem:[%s24762_s5 + $0x8] sm:$0xff]  }
 0x768   : > { %v13028_v52 = vrot.slane %v13003_v10, %v22755_v1  ;;  %v12416_v4 = vadd.f32 %v12303_v12, %v22776_v29  ;;  %v12417_v26 = vadd.f32 %v12306_v31, %v22797_v13  ;;  %v12418_v20 = vadd.f32 %v12309_v36, %v22801_v16 }
 0x769   : > { %v12420_v44 = vadd.f32 %v12315_v58, %v22861_v21  ;;  %v12840_v56 = vcombine.high %v12838_v15, %v12838_v15  ;;  %v12419_v39 = vadd.f32 %v12312_v57, %v22792_v11  ;;  %v12421_v49 = vadd.f32 %v12318_v2, %v22866_v48  ;;  %v20836_v2 = vld [vmem:[%s24762_s5] sm:$0xff]  }
 0x76a   : > { %v12422_v14 = vadd.f32 %v12321_v24, %v22882_v60  ;;  %v12451_v45 = vmax.f32 %v12415_v27, 0.0  ;;  %v12452_v47 = vmax.f32 %v12416_v4, 0.0  ;;  %v12453_v54 = vmax.f32 %v12417_v26, 0.0  ;;  %v12970_v4 = vld [vmem:[#allocation3 + $0x178] ss:$2 sm:$0xff]  ;;  %19706 = vmatprep.subr.bf16.mxu0 %v20836_v2 }
 0x76b   : > { %v12454_v0 = vmax.f32 %v12418_v20, 0.0  ;;  %v12455_v35 = vmax.f32 %v12419_v39, 0.0  ;;  %v12456_v61 = vmax.f32 %v12420_v44, 0.0  ;;  %v12457_v29 = vmax.f32 %v12421_v49, 0.0  ;;  %v12988_v26 = vld [vmem:[#allocation3 + $0x179] ss:$2 sm:$0xff]  ;;  %19707 = vmatpush3.bf16.msra.mxu0 %v20836_v2 }
 0x76c   : > { %v12458_v12 = vmax.f32 %v12422_v14, 0.0  ;;  %v12685_v13 = vcombine.low %v12451_v45, %v12452_v47  ;;  %v13035_v16 = vrot.slane %v13021_v25, %v22755_v1  ;;  %v13036_v21 = vcombine.high %v13028_v52, %v13028_v52  ;;  %19708 = vmatprep.subr.bf16.mxu0 %v20837_v46  ;;  %v20838_v45 = vld [vmem:[%s24762_s5 + $0x10] sm:$0xff]  }
 0x76d   : > { %v12686_v10 = vcombine.low %v12453_v54, %v12454_v0  ;;  %v23751_v8 = vcombine.low %v12838_v15, %v12840_v56  ;;  %v12687_v11 = vcombine.low %v12455_v35, %v12456_v61  ;;  %v23754_v48 = vrot.slane %v13028_v52, %v22755_v1 }
 0x76e   : > { %v12688_v17 = vcombine.low %v12457_v29, %v12458_v12  ;;  %v12695_v60 = vrot.slane %v12685_v13, %v22755_v1  ;;  %v13037_v28 = vcombine.high %v13035_v16, %v13035_v16  ;;  %v23759_v32 = vrot.slane %v13035_v16, %v22755_v1 }
 0x76f   : > { %v12702_v58 = vrot.slane %v12686_v10, %v22755_v1  ;;  %v12709_v31 = vrot.slane %v12687_v11, %v22755_v1  ;;  %v23764_v15 = vrot.slane %v13036_v21, %v22755_v1  ;;  %v11606_v9 = vcombine.low %v23609_v34, %v11523_v42  ;;  %19709 = vmatpush3.bf16.msra.mxu0 %v20837_v46 }
 0x770   : > { %v12716_v36 = vrot.slane %v12688_v17, %v22755_v1  ;;  %v23777_v27 = vrot.slane %v12670_v40, %v24824_v43  ;;  %v13066_v24 = vcombine.high %v23754_v48, %v23754_v48  ;;  %v11621_v34 = vrot.slane %v11607_v59, %v24824_v43  ;;  %19710 = vmatprep.subr.bf16.mxu0 %v20838_v45 }
 0x771   : > { %v12717_v57 = vcombine.low %v12695_v60, %v12702_v58  ;;  %v12931_v42 = vrot.slane %v23751_v8, %v24824_v43  ;;  %v23788_v52 = vrot.slane %v13037_v28, %v22755_v1  ;;  %v13067_v40 = vcombine.high %v23759_v32, %v23759_v32  ;;  %v24855_v28 = vld [vmem:[#allocation36_spill] sm:$0xff] }
 0x772   : > { %v12718_v25 = vcombine.low %v12709_v31, %v12716_v36  ;;  %v13068_v44 = vcombine.high %v23764_v15, %v23764_v15  ;;  %v13534_v18 = vsel %vm22782_vm5, %v23754_v48, -inf  ;;  %v13537_v59 = vsel %vm22782_vm5, %v23764_v15, -inf  ;;  %v24856_v31 = vld [vmem:[#allocation24_spill] sm:$0xff]  ;;  %v24857_v36 = vld [vmem:[#allocation37_spill] sm:$0xff] }
 0x773   : > { %v12725_v20 = vrot.slane %v12717_v57, %v22755_v1  ;;  %v11614_v39 = vrot.slane %v11606_v9, %v24824_v43  ;;  %v11624_v49 = vcombine.low %v11547_v38, %v24825_v62  ;;  %v11631_v14 = vrot.slane %v23698_v41, %v24824_v43  ;;  %19711 = vmatpush3.bf16.msra.mxu0 %v20838_v45 }
 0x774   : > { %v23802_v56 = vrot.slane %v12718_v25, %v22755_v1  ;;  %v23816_v47 = vsel %vm22782_vm5, %v13066_v24, -inf  ;;  %v13546_v54 = vsel %vm22782_vm5, %v23759_v32, -inf  ;;  %v13004_v0 = vmax.f32 %v12970_v4, %v12988_v26  ;;  %v20839_v4 = vld [vmem:[%s24762_s5 + $0x18] sm:$0xff]  }
 0x775   : > { %v13663_v33 = vcombine.high %v23627_v50, %v23627_v50  ;;  %v11622_v41 = vcombine.low %v11614_v39, %v11621_v34  ;;  %v11638_v35 = vrot.slane %v11624_v49, %v24824_v43  ;;  %v13662_v61 = vrot.slane %v13648_v63, %v22755_v1  ;;  %v24854_v50 = vld [vmem:[#allocation23_spill] sm:$0xff]  ;;  %19712 = vmatprep.subr.bf16.mxu0 %v20839_v4 }
 0x776   : > { %v12733_v38 = vcombine.low %v12725_v20, %v23802_v56  ;;  %v13549_v29 = vsel %vm22782_vm5, %v23788_v52, -inf  ;;  %v23834_v12 = vsel %vm22782_vm5, %v13067_v40, -inf  ;;  %v13070_v13 = vcombine.high %v13004_v0, %v13004_v0 }
 0x777   : > { %v13077_v10 = vrot.slane %v13004_v0, %v22755_v1  ;;  %v11639_v21 = vcombine.low %v11631_v14, %v11638_v35  ;;  %11648 = vst.msk [vmem:[#allocation6 + $0x23] sm:$0xff] %vm355_vm4, %v11622_v41  ;;  %v23846_v63 = vrot.slane %v13663_v33, %v22755_v1  ;;  %v13543_v48 = vsel %vm22782_vm5, %v13068_v44, -inf  ;;  %v14334_v33 = vld [vmem:[#allocation6 + $0x39] sm:$0xff]  ;;  %19713 = vmatpush3.bf16.msra.mxu0 %v20839_v4 }
 0x778   : > { %v23838_v16 = vrot.slane %v12733_v38, %v24824_v43  ;;  %v13084_v8 = vrot.slane %v13070_v13, %v22755_v1  ;;  %v13664_v58 = vcombine.high %v13662_v61, %v13662_v61  ;;  %v20016_v32 = vadd.f32 %v24855_v28, %v24854_v50 }
 0x779   : > { %v13085_v11 = vcombine.high %v13077_v10, %v13077_v10  ;;  %v13093_v17 = vrot.slane %v13077_v10, %v22755_v1  ;;  %11649 = vst.msk [vmem:[#allocation6 + $0x2b] sm:$0xff] %vm355_vm4, %v11639_v21  ;;  %v20017_v15 = vadd.f32 %v24857_v36, %v24856_v31  ;;  %v23863_v34 = vrot.slane %v13662_v61, %v22755_v1 }
 0x77a   : > { %v12924_v60 = vcombine.low %v24825_v62, %v23838_v16  ;;  %v13086_v9 = vcombine.high %v13084_v8, %v13084_v8  ;;  %v13100_v2 = vrot.slane %v13084_v8, %v22755_v1  ;;  %v23867_v25 = vcombine.high %v23843_v53, %v23843_v53  ;;  %10309 = vst.msk [vmem:[#allocation3 + $0x198] sm:$0xff] %vm355_vm4, %v20016_v32 }
 0x77b   : > { %v13107_v46 = vrot.slane %v13085_v11, %v22755_v1  ;;  %v13115_v57 = vcombine.high %v13093_v17, %v13093_v17  ;;  %v23871_v40 = vcombine.high %v23846_v63, %v23846_v63  ;;  %10307 = vst.msk [vmem:[#allocation3 + $0x188] sm:$0xff] %vm355_vm4, %v20017_v15 }
 0x77c   : > { %v12938_v24 = vrot.slane %v12924_v60, %v24824_v43  ;;  %v13114_v26 = vrot.slane %v13086_v9, %v22755_v1  ;;  %v13116_v20 = vcombine.high %v13100_v2, %v13100_v2  ;;  %v13544_v0 = vsel %vm22782_vm5, %v13100_v2, -inf }
 0x77d   : > { %v13117_v44 = vcombine.high %v13107_v46, %v13107_v46  ;;  %v13535_v39 = vsel %vm22782_vm5, %v13107_v46, -inf  ;;  %v13538_v45 = vsel %vm22782_vm5, %v13115_v57, -inf  ;;  %v13545_v61 = vmax.f32 %v13543_v48, %v13544_v0  ;;  %v24859_v0 = vld [vmem:[#allocation38_spill] sm:$0xff] }
 0x77e   : > { %v12939_v49 = vcombine.low %v12931_v42, %v12938_v24  ;;  %v13536_v14 = vmax.f32 %v13534_v18, %v13535_v39  ;;  %v13118_v38 = vcombine.high %v13114_v26, %v13114_v26  ;;  %v13539_v41 = vmax.f32 %v13537_v59, %v13538_v45  ;;  %v14331_v21 = vld [vmem:[#allocation6 + $0x21] sm:$0xff] }
 0x77f   : > { %v13541_v35 = vsel %vm22782_vm5, %v13117_v44, -inf  ;;  %v13547_v18 = vsel %vm22782_vm5, %v13114_v26, -inf  ;;  %v13550_v13 = vsel %vm22782_vm5, %v13116_v20, -inf  ;;  %v23895_v48 = vrot.slane %v13664_v58, %v22755_v1  ;;  %v23907_v58 = vld [vmem:[%s24762_s5 + $0x40] sm:$0xff]   ;;  %v24858_v45 = vld [vmem:[#allocation25_spill] sm:$0xff] }
 0x780   : > { %12965 = vst.msk [vmem:[#allocation6 + $0x5f] sm:$0xff] %vm355_vm4, %v12939_v49  ;;  %v13542_v42 = vmax.f32 %v23816_v47, %v13541_v35  ;;  %v13705_v10 = vadd.f32 %v23843_v53, %v13536_v14  ;;  %v14332_v8 = vld [vmem:[#allocation6 + $0x29] sm:$0xff]  ;;  %v14333_v59 = vld [vmem:[#allocation6 + $0x31] sm:$0xff]  ;;  %v13548_v11 = vmax.f32 %v13546_v54, %v13547_v18  ;;  %v13551_v17 = vmax.f32 %v13549_v29, %v13550_v13 }
 0x781   : > { %v13706_v60 = vadd.f32 %v23846_v63, %v13539_v41  ;;  %v14352_v50 = vpack.c.bf16 %v14332_v8, %v14331_v21  ;;  %v14353_v47 = vpack.c.bf16 %v14334_v33, %v14333_v59  ;;  %v13553_v28 = vsel %vm22782_vm5, %v13118_v38, -inf  ;;  %19738 = vmatprep.subr.bf16.mxu0 %v23907_v58  ;;  %v24860_v41 = vld [vmem:[#allocation26_spill] sm:$0xff]  ;;  %v24861_v35 = vld [vmem:[#allocation39_spill] sm:$0xff] }
 0x782   : > { %v13707_v32 = vadd.f32 %v23867_v25, %v13542_v42  ;;  %v13708_v31 = vadd.f32 %v23871_v40, %v13545_v61  ;;  %v13709_v36 = vadd.f32 %v23863_v34, %v13548_v11  ;;  %v13710_v15 = vadd.f32 %v23895_v48, %v13551_v17  ;;  %v12972_v29 = vld [vmem:[#allocation3 + $0x188] ss:$2 sm:$0xff]  ;;  %v12990_v9 = vld [vmem:[#allocation3 + $0x189] ss:$2 sm:$0xff]  ;;  %v24862_v59 = vld [vmem:[#allocation27_spill] sm:$0xff] }
 0x783   : > { %v13741_v54 = vmax.f32 %v13705_v10, 0.0  ;;  %19686 = vmatprep.mubr.msk.bf16.mxu0 %vm355_vm4, %v14352_v50  ;;  %v13742_v2 = vmax.f32 %v13706_v60, 0.0  ;;  %v13005_v57 = vmax.f32 %v12972_v29, %v12990_v9  ;;  %v13069_v24 = vcombine.high %v23788_v52, %v23788_v52  ;;  %v24863_v11 = vld [vmem:[#allocation40_spill] sm:$0xff]  ;;  %v24865_v50 = vld [vmem:[#allocation41_spill] sm:$0xff] }
 0x784   : > { %v13743_v46 = vmax.f32 %v13707_v32, 0.0  ;;  %19687 = vmatmul.mubr.msk.bf16.gmra.mrb[8].mxu0 %vm355_vm4, %v14353_v47  ;;  %v13554_v4 = vmax.f32 %v23834_v12, %v13553_v28  ;;  %v13744_v26 = vmax.f32 %v13708_v31, 0.0  ;;  %v13745_v20 = vmax.f32 %v13709_v36, 0.0  ;;  %v24864_v60 = vld [vmem:[#allocation28_spill] sm:$0xff]  ;;  %v24866_v29 = vld [vmem:[#allocation29_spill] sm:$0xff] }
 0x785   : > { %v23916_v44 = vcombine.high %v23863_v34, %v23863_v34  ;;  %v13746_v39 = vmax.f32 %v13710_v15, 0.0  ;;  %v13119_v49 = vcombine.high %v13005_v57, %v13005_v57  ;;  %v13126_v14 = vrot.slane %v13005_v57, %v22755_v1 }
 0x786   : > { %v20018_v33 = vadd.f32 %v24859_v0, %v24858_v45  ;;  %v12839_v52 = vcombine.high %v23777_v27, %v23777_v27  ;;  %v13813_v38 = vcombine.low %v13741_v54, %v13742_v2  ;;  %v13814_v12 = vcombine.low %v13743_v46, %v13744_v26  ;;  %v24867_v2 = vld [vmem:[#allocation30_spill] sm:$0xff]  ;;  %v24869_v0 = vld [vmem:[#allocation32_spill] sm:$0xff] }
 0x787   : > { %v20019_v61 = vadd.f32 %v24861_v35, %v24860_v41  ;;  %v13133_v42 = vrot.slane %v13119_v49, %v22755_v1  ;;  %v13134_v18 = vcombine.high %v13126_v14, %v13126_v14  ;;  %v13142_v13 = vrot.slane %v13126_v14, %v22755_v1  ;;  %v24872_v41 = vld [vmem:[#allocation43_spill] sm:$0xff] }
 0x788   : > { %v23930_v10 = vcombine.high %v23895_v48, %v23895_v48  ;;  %10312 = vst.msk [vmem:[#allocation3 + $0x1b0] sm:$0xff] %vm355_vm4, %v20018_v33  ;;  %v13830_v21 = vrot.slane %v13814_v12, %v22755_v1  ;;  %v13555_v8 = vsel %vm22782_vm5, %v13069_v24, -inf  ;;  %v20020_v17 = vadd.f32 %v24863_v11, %v24862_v59  ;;  %v24870_v33 = vld [vmem:[#allocation42_spill] sm:$0xff]  ;;  %v24871_v12 = vld [vmem:[#allocation33_spill] sm:$0xff] }
 0x789   : > { %10310 = vst.msk [vmem:[#allocation3 + $0x1a0] sm:$0xff] %vm355_vm4, %v20019_v61  ;;  %v20021_v47 = vadd.f32 %v24865_v50, %v24864_v60  ;;  %v23941_v28 = vcombine.low %v13745_v20, %v13746_v39  ;;  %v13135_v32 = vcombine.high %v13133_v42, %v13133_v42  ;;  %v13156_v31 = vrot.slane %v13134_v18, %v22755_v1  ;;  %v24873_v61 = vld [vmem:[#allocation34_spill] sm:$0xff] }
 0x78a   : > { %v13711_v36 = vadd.f32 %v23916_v44, %v13554_v4  ;;  %v13823_v15 = vrot.slane %v13813_v38, %v22755_v1  ;;  %v13556_v54 = vsel %vm22782_vm5, %v13142_v13, -inf  ;;  %10313 = vst.msk [vmem:[#allocation3 + $0x1b8] sm:$0xff] %vm355_vm4, %v20020_v17  ;;  %v20022_v9 = vadd.f32 %v23382_v30, %v24866_v29 }
 0x78b   : > { %10311 = vst.msk [vmem:[#allocation3 + $0x1a8] sm:$0xff] %vm355_vm4, %v20021_v47  ;;  %v20023_v46 = vadd.f32 %v23386_v5, %v24867_v2  ;;  %v12607_v57 = vcombine.low %v12599_v55, %v23634_v22  ;;  %v18041_v24 = vcombine.low %v23634_v22, %v23634_v22  ;;  %v23961_v4 = vrot.slane %v13133_v42, %v22755_v1  ;;  %v24868_v5 = vld [vmem:[#allocation31_spill] sm:$0xff] }
 0x78c   : > { %v13557_v26 = vmax.f32 %v13555_v8, %v13556_v54  ;;  %v23963_v20 = vcombine.low %v13823_v15, %v13830_v21  ;;  %v23966_v39 = vrot.slane %v13135_v32, %v22755_v1  ;;  %v13164_v30 = vcombine.high %v13142_v13, %v13142_v13  ;;  %10316 = vst.msk [vmem:[#allocation3 + $0x1d0] sm:$0xff] %vm355_vm4, %v20022_v9 }
 0x78d   : > { %10314 = vst.msk [vmem:[#allocation3 + $0x1c0] sm:$0xff] %vm355_vm4, %v20023_v46  ;;  %v20024_v3 = vadd.f32 %v23391_v7, %v24868_v5  ;;  %v23973_v55 = vcombine.low %v23777_v27, %v12839_v52  ;;  %v13166_v22 = vcombine.high %v13156_v31, %v13156_v31  ;;  %v13747_v14 = vmax.f32 %v13711_v36, 0.0  ;;  %v24874_v7 = vld [vmem:[#allocation44_spill] sm:$0xff] }
 0x78e   : > { %v13712_v49 = vadd.f32 %v23930_v10, %v13557_v26  ;;  %v13837_v45 = vrot.slane %v23941_v28, %v22755_v1  ;;  %v20025_v38 = vadd.f32 %v24870_v33, %v24869_v0  ;;  %v20026_v35 = vadd.f32 %v24872_v41, %v24871_v12 }
 0x78f   : > { %10317 = vst.msk [vmem:[#allocation3 + $0x1d8] sm:$0xff] %vm355_vm4, %v20024_v3  ;;  %v20027_v42 = vadd.f32 %v24874_v7, %v24873_v61  ;;  %v13165_v27 = vcombine.high %v23961_v4, %v23961_v4  ;;  %v12783_v21 = vrot.slane %v23563_v19, %v24824_v43  ;;  %v12790_v8 = vrot.slane %v18040_v37, %v24824_v43 }
 0x790   : > { %v13748_v52 = vmax.f32 %v13712_v49, 0.0  ;;  %v12974_v18 = vld [vmem:[#allocation3 + $0x198] ss:$2 sm:$0xff]  ;;  %v12992_v13 = vld [vmem:[#allocation3 + $0x199] ss:$2 sm:$0xff]  ;;  %v13853_v59 = vrot.slane %v23963_v20, %v22755_v1  ;;  %v13561_v11 = vsel %vm22782_vm5, %v13164_v30, -inf  ;;  %v13167_v60 = vcombine.high %v23966_v39, %v23966_v39 }
 0x791   : > { %v13006_v17 = vmax.f32 %v12974_v18, %v12992_v13  ;;  %10315 = vst.msk [vmem:[#allocation3 + $0x1c8] sm:$0xff] %vm355_vm4, %v20025_v38  ;;  %10320 = vst.msk [vmem:[#allocation3 + $0x1f0] sm:$0xff] %vm355_vm4, %v20026_v35  ;;  %v13564_v23 = vsel %vm22782_vm5, %v13166_v22, -inf  ;;  %v13567_v19 = vsel %vm22782_vm5, %v23961_v4, -inf  ;;  %v24008_v28 = vrot.slane %v12607_v57, %v24824_v43 }
 0x792   : > { %10318 = vst.msk [vmem:[#allocation3 + $0x1e0] sm:$0xff] %vm355_vm4, %v20027_v42  ;;  %v13816_v37 = vcombine.low %v13747_v14, %v13748_v52  ;;  %v12976_v50 = vld [vmem:[#allocation3 + $0x1a8] ss:$2 sm:$0xff]  ;;  %v12994_v47 = vld [vmem:[#allocation3 + $0x1a9] ss:$2 sm:$0xff]  ;;  %v24012_v15 = vrot.slane %v18041_v24, %v24824_v43  ;;  %v13570_v54 = vsel %vm22782_vm5, %v23966_v39, -inf  ;;  %v12791_v9 = vcombine.high %v12783_v21, %v12783_v21 }
 0x793   : > { %v13168_v32 = vcombine.high %v13006_v17, %v13006_v17  ;;  %v13175_v31 = vrot.slane %v13006_v17, %v22755_v1  ;;  %v13007_v36 = vmax.f32 %v12976_v50, %v12994_v47  ;;  %v24019_v29 = vsel %vm22782_vm5, %v13165_v27, -inf }
 0x794   : > { %v12792_v2 = vcombine.high %v12790_v8, %v12790_v8  ;;  %v13576_v4 = vsel %vm22782_vm5, %v13167_v60, -inf  ;;  %v12921_v24 = vrot.slane %v23973_v55, %v24824_v43  ;;  %v13844_v26 = vrot.slane %v13816_v37, %v22755_v1  ;;  %v12978_v13 = vld [vmem:[#allocation3 + $0x1b8] ss:$2 sm:$0xff]  ;;  %v12996_v17 = vld [vmem:[#allocation3 + $0x1b9] ss:$2 sm:$0xff] }
 0x795   : > { %v13182_v46 = vrot.slane %v13168_v32, %v22755_v1  ;;  %v13183_v57 = vcombine.high %v13175_v31, %v13175_v31  ;;  %v13217_v30 = vcombine.high %v13007_v36, %v13007_v36  ;;  %v13224_v39 = vrot.slane %v13007_v36, %v22755_v1 }
 0x796   : > { %v12815_v5 = vcombine.high %v24008_v28, %v24008_v28  ;;  %v12816_v14 = vcombine.high %v24012_v15, %v24012_v15  ;;  %v13191_v0 = vrot.slane %v13175_v31, %v22755_v1  ;;  %v24035_v38 = vcombine.low %v12783_v21, %v12791_v9 }
 0x797   : > { %v13184_v3 = vcombine.high %v13182_v46, %v13182_v46  ;;  %v13198_v22 = vrot.slane %v13182_v46, %v22755_v1  ;;  %v13205_v49 = vrot.slane %v13183_v57, %v22755_v1  ;;  %v13232_v33 = vcombine.high %v13224_v39, %v13224_v39 }
 0x798   : > { %v24037_v12 = vcombine.low %v12790_v8, %v12792_v2  ;;  %v13846_v42 = vcombine.low %v13837_v45, %v13844_v26  ;;  %v13231_v52 = vrot.slane %v13217_v30, %v22755_v1  ;;  %v13240_v18 = vrot.slane %v13224_v39, %v22755_v1 }
 0x799   : > { %v13212_v41 = vrot.slane %v13184_v3, %v22755_v1  ;;  %v13214_v35 = vcombine.high %v13198_v22, %v13198_v22  ;;  %v13215_v61 = vcombine.high %v13205_v49, %v13205_v49  ;;  %v13565_v7 = vsel %vm22782_vm5, %v13198_v22, -inf }
 0x79a   : > { %v13566_v27 = vmax.f32 %v13564_v23, %v13565_v7  ;;  %v13579_v31 = vsel %vm22782_vm5, %v13191_v0, -inf  ;;  %v13254_v36 = vrot.slane %v13232_v33, %v22755_v1  ;;  %v13008_v9 = vmax.f32 %v12978_v13, %v12996_v17 }
 0x79b   : > { %v13216_v60 = vcombine.high %v13212_v41, %v13212_v41  ;;  %v13562_v21 = vsel %vm22782_vm5, %v13215_v61, -inf  ;;  %v13568_v8 = vsel %vm22782_vm5, %v13212_v41, -inf  ;;  %v13571_v37 = vsel %vm22782_vm5, %v13214_v35, -inf }
 0x79c   : > { %v13563_v50 = vmax.f32 %v13561_v11, %v13562_v21  ;;  %v13569_v47 = vmax.f32 %v13567_v19, %v13568_v8  ;;  %v13572_v45 = vmax.f32 %v13570_v54, %v13571_v37  ;;  %v13715_v23 = vadd.f32 %v23846_v63, %v13566_v27 }
 0x79d   : > { %v13574_v32 = vsel %vm22782_vm5, %v13216_v60, -inf  ;;  %v13233_v11 = vcombine.high %v13231_v52, %v13231_v52  ;;  %v13247_v26 = vrot.slane %v13231_v52, %v22755_v1  ;;  %v13262_v30 = vcombine.high %v13240_v18, %v13240_v18  ;;  %v12998_v60 = vld [vmem:[#allocation3 + $0x1c9] ss:$2 sm:$0xff] }
 0x79e   : > { %v13714_v2 = vadd.f32 %v23843_v53, %v13563_v50  ;;  %v13716_v46 = vadd.f32 %v23867_v25, %v13569_v47  ;;  %v13717_v57 = vadd.f32 %v23871_v40, %v13572_v45  ;;  %v13575_v19 = vmax.f32 %v24019_v29, %v13574_v32 }
 0x79f   : > { %v13751_v54 = vmax.f32 %v13715_v23, 0.0  ;;  %v13577_v0 = vsel %vm22782_vm5, %v13240_v18, -inf  ;;  %v13582_v33 = vsel %vm22782_vm5, %v13205_v49, -inf  ;;  %v13580_v35 = vsel %vm22782_vm5, %v13254_v36, -inf  ;;  %v12980_v49 = vld [vmem:[#allocation3 + $0x1c8] ss:$2 sm:$0xff] }
 0x7a0   : > { %v13750_v39 = vmax.f32 %v13714_v2, 0.0  ;;  %v13752_v3 = vmax.f32 %v13716_v46, 0.0  ;;  %v13753_v22 = vmax.f32 %v13717_v57, 0.0  ;;  %v13578_v41 = vmax.f32 %v13576_v4, %v13577_v0 }
 0x7a1   : > { %v13583_v29 = vsel %vm22782_vm5, %v13262_v30, -inf  ;;  %v13581_v27 = vmax.f32 %v13579_v31, %v13580_v35  ;;  %v24070_v13 = vrot.slane %v13846_v42, %v22755_v1  ;;  %v24073_v17 = vrot.slane %v13233_v11, %v22755_v1 }
 0x7a2   : > { %v13876_v61 = vcombine.low %v13750_v39, %v13751_v54  ;;  %v13877_v7 = vcombine.low %v13752_v3, %v13753_v22  ;;  %v13584_v52 = vmax.f32 %v13582_v33, %v13583_v29  ;;  %v13718_v18 = vadd.f32 %v23863_v34, %v13575_v19 }
 0x7a3   : > { %v13719_v4 = vadd.f32 %v23895_v48, %v13578_v41  ;;  %v13263_v8 = vcombine.high %v13247_v26, %v13247_v26  ;;  %v13720_v37 = vadd.f32 %v23916_v44, %v13581_v27  ;;  %v13266_v45 = vcombine.high %v13008_v9, %v13008_v9 }
 0x7a4   : > { %v13886_v21 = vrot.slane %v13876_v61, %v22755_v1  ;;  %v13721_v50 = vadd.f32 %v23930_v10, %v13584_v52  ;;  %v13893_v47 = vrot.slane %v13877_v7, %v22755_v1  ;;  %v13754_v42 = vmax.f32 %v13718_v18, 0.0 }
 0x7a5   : > { %v13273_v23 = vrot.slane %v13008_v9, %v22755_v1  ;;  %v13755_v32 = vmax.f32 %v13719_v4, 0.0  ;;  %v13756_v31 = vmax.f32 %v13720_v37, 0.0  ;;  %v13009_v2 = vmax.f32 %v12980_v49, %v12998_v60 }
 0x7a6   : > { %v13757_v36 = vmax.f32 %v13721_v50, 0.0  ;;  %v13280_v46 = vrot.slane %v13266_v45, %v22755_v1  ;;  %v12880_v11 = vrot.slane %v24035_v38, %v24824_v43  ;;  %v12889_v19 = vcombine.low %v24825_v62, %v24008_v28 }
 0x7a7   : > { %v13281_v57 = vcombine.high %v13273_v23, %v13273_v23  ;;  %v24091_v54 = vcombine.low %v13853_v59, %v24070_v13  ;;  %v13878_v9 = vcombine.low %v13754_v42, %v13755_v32  ;;  %v13289_v30 = vrot.slane %v13273_v23, %v22755_v1 }
 0x7a8   : > { %v13315_v39 = vcombine.high %v13009_v2, %v13009_v2  ;;  %v13588_v3 = vsel %vm22782_vm5, %v13247_v26, -inf  ;;  %v13591_v22 = vsel %vm22782_vm5, %v24073_v17, -inf  ;;  %v13282_v0 = vcombine.high %v13280_v46, %v13280_v46 }
 0x7a9   : > { %v13296_v33 = vrot.slane %v13280_v46, %v22755_v1  ;;  %v24100_v41 = vcombine.low %v13886_v21, %v13893_v47  ;;  %v13594_v20 = vsel %vm22782_vm5, %v13263_v8, -inf  ;;  %v13879_v59 = vcombine.low %v13756_v31, %v13757_v36 }
 0x7aa   : > { %v13322_v35 = vrot.slane %v13009_v2, %v22755_v1  ;;  %v13303_v29 = vrot.slane %v13281_v57, %v22755_v1  ;;  %v13310_v61 = vrot.slane %v13282_v0, %v22755_v1  ;;  %v13265_v7 = vcombine.high %v24073_v17, %v24073_v17 }
 0x7ab   : > { %v13312_v26 = vcombine.high %v13296_v33, %v13296_v33  ;;  %v13900_v27 = vrot.slane %v13878_v9, %v22755_v1  ;;  %v13311_v52 = vcombine.high %v13289_v30, %v13289_v30  ;;  %v13329_v18 = vrot.slane %v13315_v39, %v22755_v1 }
 0x7ac   : > { %v13330_v4 = vcombine.high %v13322_v35, %v13322_v35  ;;  %v13314_v49 = vcombine.high %v13310_v61, %v13310_v61  ;;  %v13589_v60 = vsel %vm22782_vm5, %v13310_v61, -inf  ;;  %v13338_v8 = vrot.slane %v13322_v35, %v22755_v1 }
 0x7ad   : > { %v13592_v21 = vsel %vm22782_vm5, %v13312_v26, -inf  ;;  %v13907_v37 = vrot.slane %v13879_v59, %v22755_v1  ;;  %v13590_v50 = vmax.f32 %v13588_v3, %v13589_v60  ;;  %v13600_v17 = vsel %vm22782_vm5, %v13289_v30, -inf  ;;  %v12982_v60 = vld [vmem:[#allocation3 + $0x1d8] ss:$2 sm:$0xff] }
 0x7ae   : > { %v13593_v47 = vmax.f32 %v13591_v22, %v13592_v21  ;;  %v13313_v42 = vcombine.high %v13303_v29, %v13303_v29  ;;  %v13595_v45 = vsel %vm22782_vm5, %v13314_v49, -inf  ;;  %v13603_v23 = vsel %vm22782_vm5, %v13303_v29, -inf  ;;  %v13000_v21 = vld [vmem:[#allocation3 + $0x1d9] ss:$2 sm:$0xff] }
 0x7af   : > { %v13352_v32 = vrot.slane %v13330_v4, %v22755_v1  ;;  %v13909_v31 = vcombine.low %v13900_v27, %v13907_v37  ;;  %v13723_v36 = vadd.f32 %v23843_v53, %v13590_v50  ;;  %v24126_v2 = vrot.slane %v13329_v18, %v22755_v1 }
 0x7b0   : > { %v13360_v46 = vcombine.high %v13338_v8, %v13338_v8  ;;  %v13606_v57 = vsel %vm22782_vm5, %v13311_v52, -inf  ;;  %v13724_v9 = vadd.f32 %v23846_v63, %v13593_v47  ;;  %v13331_v30 = vcombine.high %v13329_v18, %v13329_v18 }
 0x7b1   : > { %v13362_v39 = vcombine.high %v13352_v32, %v13352_v32  ;;  %v13596_v3 = vmax.f32 %v13594_v20, %v13595_v45  ;;  %v13597_v22 = vsel %vm22782_vm5, %v13265_v7, -inf  ;;  %v13598_v0 = vsel %vm22782_vm5, %v13338_v8, -inf }
 0x7b2   : > { %v13601_v33 = vsel %vm22782_vm5, %v13352_v32, -inf  ;;  %v13759_v59 = vmax.f32 %v13723_v36, 0.0  ;;  %v13760_v35 = vmax.f32 %v13724_v9, 0.0  ;;  %v13599_v29 = vmax.f32 %v13597_v22, %v13598_v0 }
 0x7b3   : > { %v13602_v61 = vmax.f32 %v13600_v17, %v13601_v33  ;;  %v13604_v26 = vsel %vm22782_vm5, %v13360_v46, -inf  ;;  %v13607_v27 = vsel %vm22782_vm5, %v13362_v39, -inf  ;;  %v13609_v20 = vsel %vm22782_vm5, %v13313_v42, -inf }
 0x7b4   : > { %v13610_v7 = vsel %vm22782_vm5, %v24126_v2, -inf  ;;  %v24147_v52 = vrot.slane %v13909_v31, %v22755_v1  ;;  %v13605_v18 = vmax.f32 %v13603_v23, %v13604_v26  ;;  %v13608_v4 = vmax.f32 %v13606_v57, %v13607_v27 }
 0x7b5   : > { %v13611_v49 = vmax.f32 %v13609_v20, %v13610_v7  ;;  %v24150_v8 = vrot.slane %v13331_v30, %v22755_v1  ;;  %v13725_v37 = vadd.f32 %v23867_v25, %v13596_v3  ;;  %v13726_v50 = vadd.f32 %v23871_v40, %v13599_v29 }
 0x7b6   : > { %v13727_v47 = vadd.f32 %v23863_v34, %v13602_v61  ;;  %v13939_v17 = vcombine.low %v13759_v59, %v13760_v35  ;;  %v13728_v42 = vadd.f32 %v23895_v48, %v13605_v18  ;;  %v13729_v45 = vadd.f32 %v23916_v44, %v13608_v4 }
 0x7b7   : > { %v13730_v23 = vadd.f32 %v23930_v10, %v13611_v49  ;;  %v13761_v32 = vmax.f32 %v13725_v37, 0.0  ;;  %v13762_v31 = vmax.f32 %v13726_v50, 0.0  ;;  %v13010_v46 = vmax.f32 %v12982_v60, %v13000_v21 }
 0x7b8   : > { %v13763_v36 = vmax.f32 %v13727_v47, 0.0  ;;  %v13764_v57 = vmax.f32 %v13728_v42, 0.0  ;;  %v13765_v9 = vmax.f32 %v13729_v45, 0.0  ;;  %v12887_v39 = vrot.slane %v24037_v12, %v24824_v43  ;;  %v24875_v45 = vld [vmem:[#allocation35_spill] sm:$0xff] }
 0x7b9   : > { %v13766_v30 = vmax.f32 %v13730_v23, 0.0  ;;  %v13940_v3 = vcombine.low %v13761_v32, %v13762_v31  ;;  %v13364_v22 = vcombine.high %v13010_v46, %v13010_v46  ;;  %v13371_v0 = vrot.slane %v13010_v46, %v22755_v1 }
 0x7ba   : > { %v12890_v33 = vcombine.low %v12815_v5, %v24012_v15  ;;  %v13949_v59 = vrot.slane %v13939_v17, %v22755_v1  ;;  %v13941_v35 = vcombine.low %v13763_v36, %v13764_v57  ;;  %v12888_v61 = vcombine.low %v12880_v11, %v12887_v39 }
 0x7bb   : > { %v13942_v29 = vcombine.low %v13765_v9, %v13766_v30  ;;  %v13956_v26 = vrot.slane %v13940_v3, %v22755_v1  ;;  %v13378_v12 = vrot.slane %v13364_v22, %v22755_v1  ;;  %v13379_v27 = vcombine.high %v13371_v0, %v13371_v0 }
 0x7bc   : > { %v12897_v20 = vrot.slane %v12889_v19, %v24824_v43  ;;  %v13963_v5 = vrot.slane %v13941_v35, %v22755_v1  ;;  %v12904_v18 = vrot.slane %v12890_v33, %v24824_v43  ;;  %v12906_v38 = vcombine.low %v12816_v14, %v24825_v62  ;;  %12962 = vst.msk [vmem:[#allocation6 + $0x47] sm:$0xff] %vm355_vm4, %v12888_v61 }
 0x7bd   : > { %v13970_v7 = vrot.slane %v13942_v29, %v22755_v1  ;;  %v13916_v11 = vrot.slane %v24100_v41, %v22755_v1  ;;  %v13361_v28 = vcombine.high %v24126_v2, %v24126_v2  ;;  %v13971_v19 = vcombine.low %v13949_v59, %v13956_v26 }
 0x7be   : > { %v13380_v4 = vcombine.high %v13378_v12, %v13378_v12  ;;  %v18045_v49 = vcombine.low %v24070_v13, %v24070_v13  ;;  %v24190_v21 = vrot.slane %v13371_v0, %v22755_v1  ;;  %v12905_v37 = vcombine.low %v12897_v20, %v12904_v18 }
 0x7bf   : > { %v13972_v60 = vcombine.low %v13963_v5, %v13970_v7  ;;  %v13924_v15 = vcombine.low %v13916_v11, %v24147_v52  ;;  %v18046_v14 = vcombine.low %v24147_v52, %v24147_v52  ;;  %v13979_v41 = vrot.slane %v13971_v19, %v22755_v1 }
 0x7c0   : > { %v24197_v50 = vrot.slane %v13380_v4, %v22755_v1  ;;  %v13363_v2 = vcombine.high %v24150_v8, %v24150_v8  ;;  %v24205_v47 = vrot.slane %v13379_v27, %v22755_v1  ;;  %v12914_v17 = vrot.slane %v12906_v38, %v24824_v43  ;;  %12963 = vst.msk [vmem:[#allocation6 + $0x4f] sm:$0xff] %vm355_vm4, %v12905_v37 }
 0x7c1   : > { %v24202_v13 = vrot.slane %v13972_v60, %v22755_v1  ;;  %v13615_v52 = vsel %vm22782_vm5, %v13361_v28, -inf  ;;  %v20029_v23 = vadd.f32 %v23644_v51, %v24875_v45  ;;  %v13394_v31 = vrot.slane %v13378_v12, %v22755_v1 }
 0x7c2   : > { %v13412_v42 = vcombine.high %v24197_v50, %v24197_v50  ;;  %v13409_v36 = vcombine.high %v24190_v21, %v24190_v21  ;;  %v12922_v46 = vcombine.low %v12914_v17, %v12921_v24  ;;  %v13621_v9 = vsel %vm22782_vm5, %v24190_v21, -inf }
 0x7c3   : > { %v13987_v32 = vcombine.low %v13979_v41, %v24202_v13  ;;  %10319 = vst.msk [vmem:[#allocation3 + $0x1e8] sm:$0xff] %vm355_vm4, %v20029_v23  ;;  %v13411_v30 = vcombine.high %v24205_v47, %v24205_v47  ;;  %v18043_v55 = vcombine.low %v23802_v56, %v23802_v56  ;;  %v12863_v24 = vcombine.high %v23838_v16, %v23838_v16  ;;  %v14335_v59 = vld [vmem:[#allocation6 + $0x41] sm:$0xff] }
 0x7c4   : > { %v13616_v57 = vsel %vm22782_vm5, %v13412_v42, -inf  ;;  %12964 = vst.msk [vmem:[#allocation6 + $0x57] sm:$0xff] %vm355_vm4, %v12922_v46  ;;  %v13624_v22 = vsel %vm22782_vm5, %v24205_v47, -inf  ;;  %v24241_v0 = vsel %vm22782_vm5, %v13409_v36, -inf  ;;  %v24245_v33 = vsel %vm22782_vm5, %v13394_v31, -inf }
 0x7c5   : > { %v14148_v51 = vrot.slane %v13987_v32, %v24824_v43  ;;  %v13617_v39 = vmax.f32 %v13615_v52, %v13616_v57  ;;  %v12862_v56 = vrot.slane %v18043_v55, %v24824_v43  ;;  %v14100_v16 = vrot.slane %v24091_v54, %v24824_v43 }
 0x7c6   : > { %v14107_v29 = vrot.slane %v18045_v49, %v24824_v43  ;;  %v14124_v61 = vrot.slane %v13924_v15, %v24824_v43  ;;  %v18047_v26 = vcombine.low %v24202_v13, %v24202_v13  ;;  %v13636_v12 = vsel %vm22782_vm5, %v24197_v50, -inf }
 0x7c7   : > { %v14156_v3 = vcombine.high %v14148_v51, %v14148_v51  ;;  %v14336_v35 = vld [vmem:[#allocation6 + $0x49] sm:$0xff]  ;;  %v24258_v20 = vadd.f32 %v23843_v53, %v13617_v39  ;;  %v12864_v5 = vcombine.high %v12862_v56, %v12862_v56  ;;  %v12940_v7 = vcombine.low %v12863_v24, %v12862_v56 }
 0x7c8   : > { %v14354_v27 = vpack.c.bf16 %v14336_v35, %v14335_v59  ;;  %v14108_v18 = vcombine.high %v14100_v16, %v14100_v16  ;;  %v14109_v38 = vcombine.high %v14107_v29, %v14107_v29  ;;  %v14131_v19 = vrot.slane %v18046_v14, %v24824_v43 }
 0x7c9   : > { %v14224_v54 = vcombine.low %v14148_v51, %v14156_v3  ;;  %v14132_v4 = vcombine.high %v14124_v61, %v14124_v61  ;;  %v14206_v49 = vcombine.low %v24825_v62, %v14124_v61  ;;  %v12941_v53 = vcombine.low %v12864_v5, %v24825_v62 }
 0x7ca   : > { %19690 = vmatprep.mubr.msk.bf16.mxu0 %vm355_vm4, %v14354_v27  ;;  %v12984_v11 = vld [vmem:[#allocation3 + $0x1e8] ss:$2 sm:$0xff]  ;;  %v13002_v28 = vld [vmem:[#allocation3 + $0x1e9] ss:$2 sm:$0xff]  ;;  %v12948_v41 = vrot.slane %v12940_v7, %v24824_v43  ;;  %v14189_v17 = vcombine.low %v14100_v16, %v14108_v18  ;;  %v14133_v42 = vcombine.high %v14131_v19, %v14131_v19  ;;  %v14190_v45 = vcombine.low %v14107_v29, %v14109_v38 }
 0x7cb   : > { %v13011_v60 = vmax.f32 %v12984_v11, %v13002_v28  ;;  %v14337_v37 = vld [vmem:[#allocation6 + $0x51] sm:$0xff]  ;;  %v14338_v15 = vld [vmem:[#allocation6 + $0x59] sm:$0xff]  ;;  %v14207_v23 = vcombine.low %v14132_v4, %v14131_v19  ;;  %v12955_v14 = vrot.slane %v12941_v53, %v24824_v43  ;;  %v14214_v57 = vrot.slane %v14206_v49, %v24824_v43 }
 0x7cc   : > { %v14355_v52 = vpack.c.bf16 %v14338_v15, %v14337_v37  ;;  %v14197_v36 = vrot.slane %v14189_v17, %v24824_v43  ;;  %v14204_v46 = vrot.slane %v14190_v45, %v24824_v43  ;;  %v14223_v39 = vcombine.low %v14133_v42, %v24825_v62  ;;  %v14341_v17 = vld [vmem:[#allocation6 + $0x71] sm:$0xff] }
 0x7cd   : > { %v13413_v32 = vcombine.high %v13011_v60, %v13011_v60  ;;  %v13420_v31 = vrot.slane %v13011_v60, %v22755_v1  ;;  %v14221_v51 = vrot.slane %v14207_v23, %v24824_v43  ;;  %v12956_v59 = vcombine.low %v12948_v41, %v12955_v14 }
 0x7ce   : > { %19691 = vmatmul.mubr.msk.bf16.gmra.mrb[12].mxu0 %vm355_vm4, %v14355_v52  ;;  %v14205_v35 = vcombine.low %v14197_v36, %v14204_v46  ;;  %v14231_v16 = vrot.slane %v14223_v39, %v24824_v43  ;;  %v14238_v29 = vrot.slane %v14224_v54, %v24824_v43  ;;  %v13618_v18 = vsel %vm22782_vm5, %v13363_v2, -inf  ;;  %v14342_v52 = vld [vmem:[#allocation6 + $0x79] sm:$0xff] }
 0x7cf   : > { %v13427_v55 = vrot.slane %v13413_v32, %v22755_v1  ;;  %v13428_v24 = vcombine.high %v13420_v31, %v13420_v31  ;;  %v13436_v3 = vrot.slane %v13420_v31, %v22755_v1  ;;  %v14222_v56 = vcombine.low %v14214_v57, %v14221_v51  ;;  %12966 = vst.msk [vmem:[#allocation6 + $0x67] sm:$0xff] %vm355_vm4, %v12956_v59 }
 0x7d0   : > { %v13630_v54 = vsel %vm22782_vm5, %v13411_v30, -inf  ;;  %v14239_v11 = vcombine.low %v14231_v16, %v14238_v29  ;;  %14279 = vst.msk [vmem:[#allocation6 + $0x83] sm:$0xff] %vm355_vm4, %v14205_v35  ;;  %v13768_v30 = vmax.f32 %v24258_v20, 0.0  ;;  %v14357_v46 = vpack.c.bf16 %v14342_v52, %v14341_v17 }
 0x7d1   : > { %v13429_v61 = vcombine.high %v13427_v55, %v13427_v55  ;;  %v13443_v27 = vrot.slane %v13427_v55, %v22755_v1  ;;  %v13450_v5 = vrot.slane %v13428_v24, %v22755_v1  ;;  %v13458_v7 = vcombine.high %v13436_v3, %v13436_v3  ;;  %14280 = vst.msk [vmem:[#allocation6 + $0x8b] sm:$0xff] %vm355_vm4, %v14222_v56 }
 0x7d2   : > { %v13619_v38 = vsel %vm22782_vm5, %v13436_v3, -inf  ;;  %14281 = vst.msk [vmem:[#allocation6 + $0x93] sm:$0xff] %vm355_vm4, %v14239_v11  ;;  %v14155_v56 = vrot.slane %v18047_v26, %v24824_v43 }
 0x7d3   : > { %v13457_v28 = vrot.slane %v13429_v61, %v22755_v1  ;;  %v13459_v8 = vcombine.high %v13443_v27, %v13443_v27  ;;  %v13460_v19 = vcombine.high %v13450_v5, %v13450_v5  ;;  %v13620_v4 = vmax.f32 %v13618_v18, %v13619_v38 }
 0x7d4   : > { %v13622_v2 = vsel %vm22782_vm5, %v13450_v5, -inf  ;;  %v13625_v49 = vsel %vm22782_vm5, %v13458_v7, -inf  ;;  %v13631_v60 = vsel %vm22782_vm5, %v13443_v27, -inf  ;;  %v14157_v5 = vcombine.high %v14155_v56, %v14155_v56 }
 0x7d5   : > { %v13623_v37 = vmax.f32 %v13621_v9, %v13622_v2  ;;  %v13626_v15 = vmax.f32 %v13624_v22, %v13625_v49  ;;  %v13628_v53 = vsel %vm22782_vm5, %v13460_v19, -inf  ;;  %v13632_v41 = vmax.f32 %v13630_v54, %v13631_v60 }
 0x7d6   : > { %v13629_v20 = vmax.f32 %v24241_v0, %v13628_v53  ;;  %v13634_v42 = vsel %vm22782_vm5, %v13457_v28, -inf  ;;  %v13637_v21 = vsel %vm22782_vm5, %v13459_v8, -inf  ;;  %v13733_v9 = vadd.f32 %v23846_v63, %v13620_v4  ;;  %v14339_v14 = vld [vmem:[#allocation6 + $0x61] sm:$0xff]  ;;  %v14340_v36 = vld [vmem:[#allocation6 + $0x69] sm:$0xff] }
 0x7d7   : > { %v13635_v45 = vmax.f32 %v24245_v33, %v13634_v42  ;;  %v13638_v47 = vmax.f32 %v13636_v12, %v13637_v21  ;;  %v13734_v22 = vadd.f32 %v23867_v25, %v13623_v37  ;;  %v13735_v23 = vadd.f32 %v23871_v40, %v13626_v15  ;;  %v14343_v40 = vld [vmem:[#allocation6 + $0x81] sm:$0xff]  ;;  %v14349_v21 = vld [vmem:[#allocation6 + $0xb1] sm:$0xf] }
 0x7d8   : > { %v13736_v0 = vadd.f32 %v23863_v34, %v13629_v20  ;;  %v13737_v32 = vadd.f32 %v23895_v48, %v13632_v41  ;;  %v13769_v31 = vmax.f32 %v13733_v9, 0.0  ;;  %v14344_v50 = vld [vmem:[#allocation6 + $0x89] sm:$0xff]  ;;  %v14356_v39 = vpack.c.bf16 %v14340_v36, %v14339_v14  ;;  %v14284_v9 = vld [vmem:[#allocation6] sm:$0xff] }
 0x7d9   : > { %v13738_v63 = vadd.f32 %v23916_v44, %v13635_v45  ;;  %v13739_v33 = vadd.f32 %v23930_v10, %v13638_v47  ;;  %v13770_v6 = vmax.f32 %v13734_v22, 0.0  ;;  %v13771_v57 = vmax.f32 %v13735_v23, 0.0  ;;  %v14345_v53 = vld [vmem:[#allocation6 + $0x91] sm:$0xff]  ;;  %v14285_v45 = vld [vmem:[#allocation6 + $0x8] sm:$0xff] }
 0x7da   : > { %v13772_v12 = vmax.f32 %v13736_v0, 0.0  ;;  %v13773_v51 = vmax.f32 %v13737_v32, 0.0  ;;  %v14002_v25 = vcombine.low %v13768_v30, %v13769_v31  ;;  %v14358_v48 = vpack.c.bf16 %v14344_v50, %v14343_v40  ;;  %19694 = vmatprep.mubr.msk.bf16.mxu0 %vm355_vm4, %v14356_v39  ;;  %v14287_v47 = vld [vmem:[#allocation6 + $0x18] sm:$0xff]  ;;  %v14289_v22 = vld [vmem:[#allocation6 + $0x28] sm:$0xff]  ;;  %v14286_v23 = vld [vmem:[#allocation6 + $0x10] sm:$0xff] }
 0x7db   : > { %v13774_v55 = vmax.f32 %v13738_v63, 0.0  ;;  %v13775_v34 = vmax.f32 %v13739_v33, 0.0  ;;  %v14003_v24 = vcombine.low %v13770_v6, %v13771_v57  ;;  %19695 = vmatmul.mubr.msk.bf16.gmra.mrb[16].mxu0 %vm355_vm4, %v14357_v46  ;;  %v14240_v54 = vcombine.low %v14155_v56, %v14157_v5  ;;  %v14288_v32 = vld [vmem:[#allocation6 + $0x20] sm:$0xff]  ;;  %v20842_v36 = vld [vmem:[%s24762_s5 + $0x50] sm:$0xff]   ;;  %v14290_v46 = vld [vmem:[#allocation6 + $0x30] sm:$0xff] }
 0x7dc   : > { %v14004_v3 = vcombine.low %v13772_v12, %v13773_v51  ;;  %v14012_v59 = vrot.slane %v14002_v25, %v22755_v1  ;;  %19698 = vmatprep.mubr.msk.bf16.mxu0 %vm355_vm4, %v14358_v48  ;;  %v14308_v0 = vpack.c.bf16 %v14287_v47, %v14286_v23  ;;  %v20841_v31 = vld [vmem:[%s24762_s5 + $0x48] sm:$0xff]   ;;  %v14309_v14 = vpack.c.bf16 %v14289_v22, %v14288_v32  ;;  %v14291_v63 = vld [vmem:[#allocation6 + $0x38] sm:$0xff]  ;;  %v14293_v33 = vld [vmem:[#allocation6 + $0x48] sm:$0xff] }
 0x7dd   : > { %v14005_v44 = vcombine.low %v13774_v55, %v13775_v34  ;;  %v14019_v10 = vrot.slane %v14003_v24, %v22755_v1  ;;  %v14248_v19 = vrot.slane %v14240_v54, %v24824_v43  ;;  %v14310_v6 = vpack.c.bf16 %v14291_v63, %v14290_v46  ;;  %v14292_v57 = vld [vmem:[#allocation6 + $0x40] sm:$0xff]  ;;  %v20843_v50 = vld [vmem:[%s24762_s5 + $0x58] sm:$0xff]   ;;  %v14295_v51 = vld [vmem:[#allocation6 + $0x58] sm:$0xff] }
 0x7de   : > { %v14026_v35 = vrot.slane %v14004_v3, %v22755_v1  ;;  %v14311_v12 = vpack.c.bf16 %v14293_v33, %v14292_v57  ;;  %v14296_v25 = vld [vmem:[#allocation6 + $0x60] sm:$0xff]  ;;  %v14297_v39 = vld [vmem:[#allocation6 + $0x68] sm:$0xff]  ;;  %v14294_v40 = vld [vmem:[#allocation6 + $0x50] sm:$0xff] }
 0x7df   : > { %v14033_v16 = vrot.slane %v14005_v44, %v22755_v1  ;;  %v14034_v29 = vcombine.low %v14012_v59, %v14019_v10  ;;  %v14312_v55 = vpack.c.bf16 %v14295_v51, %v14294_v40  ;;  %v14313_v34 = vpack.c.bf16 %v14297_v39, %v14296_v25  ;;  %v14298_v24 = vld [vmem:[#allocation6 + $0x70] sm:$0xff]  ;;  %v14299_v48 = vld [vmem:[#allocation6 + $0x78] sm:$0xff]  ;;  %v14301_v59 = vld [vmem:[#allocation6 + $0x88] sm:$0xff] }
 0x7e0   : > { %v14314_v3 = vpack.c.bf16 %v14299_v48, %v14298_v24  ;;  %v14300_v44 = vld [vmem:[#allocation6 + $0x80] sm:$0xff]  ;;  %v14306_v5 = vld [vmem:[#allocation6 + $0xb0] sm:$0xf]  ;;  %v20850_v51 = vld [vmem:[%s24762_s5 + $0x90] sm:$0xff]  }
 0x7e1   : > { %v14035_v61 = vcombine.low %v14026_v35, %v14033_v16  ;;  %v14042_v27 = vrot.slane %v14034_v29, %v22755_v1  ;;  %v14315_v10 = vpack.c.bf16 %v14301_v59, %v14300_v44  ;;  %v14302_v29 = vld [vmem:[#allocation6 + $0x90] sm:$0xff]  ;;  %v14763_v23 = vld [vmem:[#allocation6 + $0x82] sm:$0xff] }
 0x7e2   : > { %v14764_v22 = vld [vmem:[#allocation6 + $0x8a] sm:$0xff]  ;;  %v14769_v33 = vld [vmem:[#allocation6 + $0xb2] sm:$0xf] }
 0x7e3   : > { %v14049_v7 = vrot.slane %v14035_v61, %v22755_v1  ;;  %v20851_v39 = vld [vmem:[%s24762_s5 + $0x98] sm:$0xff]  }
 0x7e4   : > { %v15023_v59 = vld [vmem:[#allocation6 + $0xb2] sm:$0xff] }
 0x7e5   : > { %v14050_v18 = vcombine.low %v14042_v27, %v14049_v7  ;;  %v18048_v38 = vcombine.low %v14049_v7, %v14049_v7  ;;  %v14318_v7 = vpack.c.bf16 %v14306_v5, %v14306_v5  ;;  %v15261_v5 = vld [vmem:[#allocation6 + $0x2b] sm:$0xff] }
 0x7e7   : > { %v14172_v11 = vrot.slane %v14050_v18, %v24824_v43  ;;  %v14179_v28 = vrot.slane %v18048_v38, %v24824_v43  ;;  %v14747_v18 = vld [vmem:[#allocation6 + $0x2] sm:$0xff]  ;;  %v14748_v38 = vld [vmem:[#allocation6 + $0xa] sm:$0xff] }
 0x7e8   : > { %v14770_v54 = vpack.c.bf16 %v14748_v38, %v14747_v18  ;;  %v15259_v18 = vld [vmem:[#allocation6 + $0x1b] sm:$0xff] }
 0x7e9   : > { %v14241_v8 = vcombine.low %v24825_v62, %v14172_v11  ;;  %v14180_v13 = vcombine.high %v14172_v11, %v14172_v11  ;;  %v14181_v26 = vcombine.high %v14179_v28, %v14179_v28  ;;  %v14750_v11 = vld [vmem:[#allocation6 + $0x1a] sm:$0xff] }
 0x7eb   : > { %v14255_v4 = vrot.slane %v14241_v8, %v24824_v43  ;;  %v14257_v2 = vcombine.low %v14180_v13, %v14179_v28  ;;  %v14258_v49 = vcombine.low %v14181_v26, %v24825_v62  ;;  %v14361_v62 = vpack.c.bf16 %v14349_v21, %v14349_v21  ;;  %v14752_v28 = vld [vmem:[#allocation6 + $0x2a] sm:$0xff]  ;;  %v14749_v8 = vld [vmem:[#allocation6 + $0x12] sm:$0xff]  ;;  %v14751_v26 = vld [vmem:[#allocation6 + $0x22] sm:$0xff] }
 0x7ec   : > { %v14771_v13 = vpack.c.bf16 %v14750_v11, %v14749_v8  ;;  %v14757_v21 = vld [vmem:[#allocation6 + $0x52] sm:$0xff]  ;;  %v15025_v57 = vpack.c.bf16 %v14749_v8, %v14748_v38  ;;  %v15263_v8 = vld [vmem:[#allocation6 + $0x3b] sm:$0xff] }
 0x7ed   : > { %v14256_v60 = vcombine.low %v14248_v19, %v14255_v4  ;;  %v14265_v30 = vrot.slane %v14257_v2, %v24824_v43  ;;  %v14272_v37 = vrot.slane %v14258_v49, %v24824_v43  ;;  %v14307_v43 = vpack.c.bf16 %v14285_v45, %v14284_v9  ;;  %v20845_v19 = vld [vmem:[%s24762_s5 + $0x68] sm:$0xff]   ;;  %v20846_v2 = vld [vmem:[%s24762_s5 + $0x70] sm:$0xff]   ;;  %v14753_v49 = vld [vmem:[#allocation6 + $0x32] sm:$0xff] }
 0x7ee   : > { %v14772_v4 = vpack.c.bf16 %v14752_v28, %v14751_v26  ;;  %v14761_v45 = vld [vmem:[#allocation6 + $0x72] sm:$0xff] }
 0x7ef   : > { %14282 = vst.msk [vmem:[#allocation6 + $0x9b] sm:$0xff] %vm355_vm4, %v14256_v60  ;;  %v14273_v15 = vcombine.low %v14265_v30, %v14272_v37  ;;  %v14754_v60 = vld [vmem:[#allocation6 + $0x3a] sm:$0xff]  ;;  %v14756_v30 = vld [vmem:[#allocation6 + $0x4a] sm:$0xff] }
 0x7f0   : > { %v14773_v37 = vpack.c.bf16 %v14754_v60, %v14753_v49  ;;  %v15029_v40 = vpack.c.bf16 %v14757_v21, %v14756_v30 }
 0x7f1   : > { %14283 = vst.msk [vmem:[#allocation6 + $0xa3] sm:$0xff] %vm355_vm4, %v14273_v15  ;;  %v14755_v15 = vld [vmem:[#allocation6 + $0x42] sm:$0xff] }
 0x7f2   : > { %v15028_v25 = vpack.c.bf16 %v14755_v15, %v14754_v60  ;;  %v20856_v60 = vld [vmem:[%s24762_s5 + $0xc0] sm:$0xff]  }
 0x7f6   : > { %v14346_v41 = vld [vmem:[#allocation6 + $0x99] sm:$0xff] }
 0x7f7   : > { %v14359_v17 = vpack.c.bf16 %v14346_v41, %v14345_v53  ;;  %v14303_v35 = vld [vmem:[#allocation6 + $0x98] sm:$0xff]  ;;  %v20847_v53 = vld [vmem:[%s24762_s5 + $0x78] sm:$0xff]   ;;  %v14774_v41 = vpack.c.bf16 %v14756_v30, %v14755_v15  ;;  %v15268_v30 = vld [vmem:[#allocation6 + $0x63] sm:$0xff] }
 0x7f8   : > { %v14347_v52 = vld [vmem:[#allocation6 + $0xa1] sm:$0xff]  ;;  %v14348_v20 = vld [vmem:[#allocation6 + $0xa9] sm:$0xff]  ;;  %v14316_v61 = vpack.c.bf16 %v14303_v35, %v14302_v29  ;;  %v15024_v35 = vld [vmem:[#allocation6 + $0xba] sm:$0xf] }
 0x7f9   : > { %19699 = vmatmul.mubr.msk.bf16.gmra.mrb[20].mxu0 %vm355_vm4, %v14359_v17  ;;  %v14360_v42 = vpack.c.bf16 %v14348_v20, %v14347_v52  ;;  %v14304_v56 = vld [vmem:[#allocation6 + $0xa0] sm:$0xff]  ;;  %v14305_v16 = vld [vmem:[#allocation6 + $0xa8] sm:$0xff]  ;;  %v20848_v17 = vld [vmem:[%s24762_s5 + $0x80] sm:$0xff]  }
 0x7fa   : > { %v14317_v27 = vpack.c.bf16 %v14305_v16, %v14304_v56  ;;  %v14758_v52 = vld [vmem:[#allocation6 + $0x5a] sm:$0xff]  ;;  %v14759_v20 = vld [vmem:[#allocation6 + $0x62] sm:$0xff]  ;;  %v15036_v56 = vpack.c.bf16 %v15024_v35, %v15024_v35  ;;  %v15257_v29 = vld [vmem:[#allocation6 + $0xb] sm:$0xff] }
 0x7fb   : > { %19702 = vmatprep.mubr.msk.bf16.mxu0 %vm355_vm4, %v14360_v42  ;;  %v14760_v42 = vld [vmem:[#allocation6 + $0x6a] sm:$0xff]  ;;  %v14766_v32 = vld [vmem:[#allocation6 + $0x9a] sm:$0xff] }
 0x7fc   : > { %v14776_v9 = vpack.c.bf16 %v14760_v42, %v14759_v20  ;;  %v15031_v24 = vpack.c.bf16 %v14761_v45, %v14760_v42  ;;  %v15258_v16 = vld [vmem:[#allocation6 + $0x13] sm:$0xff]  ;;  %v15522_v35 = vld [vmem:[#allocation6 + $0x5c] sm:$0xff] }
 0x7fd   : > { %v15270_v15 = vld [vmem:[#allocation6 + $0x73] sm:$0xff] }
 0x7fe   : > { %v15274_v42 = vld [vmem:[#allocation6 + $0x93] sm:$0xff] }
 0x801   : > { %19703 = vmatmul.mubr.msk.bf16.gmra.mrb[24].mxu0 %vm355_vm4, %v14361_v62  ;;  %v14775_v62 = vpack.c.bf16 %v14758_v52, %v14757_v21 }
 0x802   : > { %19714 = vmatprep.mubr.msk.bf16.mxu0 %vm355_vm4, %v14307_v43  ;;  %v14762_v43 = vld [vmem:[#allocation6 + $0x7a] sm:$0xff] }
 0x803   : > { %v14777_v47 = vpack.c.bf16 %v14762_v43, %v14761_v45  ;;  %v15032_v48 = vpack.c.bf16 %v14763_v23, %v14762_v43  ;;  %v15277_v45 = vld [vmem:[#allocation6 + $0xab] sm:$0xff]  ;;  %v15278_v43 = vld [vmem:[#allocation6 + $0xb3] sm:$0xff] }
 0x809   : > { %19715 = vmatmul.mubr.msk.bf16.vlgmr.msra.gmra.mrb[4].mxu0 %vm355_vm4, %v14308_v0  ;;  %v14778_v0 = vpack.c.bf16 %v14764_v22, %v14763_v23  ;;  %v15290_v23 = vpack.c.bf16 %v15278_v43, %v15277_v45  ;;  %v15789_v45 = vld [vmem:[#allocation6 + $0xc4] sm:$0xf] }
 0x80a   : > { %19739 = vmatpush3.bf16.msra.mxu0 %v23907_v58  ;;  %19718 = vmatprep.mubr.msk.bf16.mxu0 %vm355_vm4, %v14309_v14  ;;  %v20844_v58 = vld [vmem:[%s24762_s5 + $0x60] sm:$0xff]   ;;  %v14768_v14 = vld [vmem:[#allocation6 + $0xaa] sm:$0xff]  ;;  %v15801_v43 = vpack.c.bf16 %v15789_v45, %v15789_v45 }
 0x80b   : > { %19740 = vmatprep.subr.bf16.mxu0 %v20841_v31  ;;  %v16291_v45 = vld [vmem:[#allocation6 + $0x86] sm:$0xff] }
 0x80e   : > { %19741 = vmatpush3.bf16.msra.mxu0 %v20841_v31  ;;  %v14767_v31 = vld [vmem:[#allocation6 + $0xa2] sm:$0xff] }
 0x80f   : > { %19742 = vmatprep.subr.bf16.mxu0 %v20842_v36  ;;  %v14780_v63 = vpack.c.bf16 %v14768_v14, %v14767_v31  ;;  %v15034_v44 = vpack.c.bf16 %v14767_v31, %v14766_v32 }
 0x811   : > { %19719 = vmatmul.mubr.msk.bf16.gmra.mrb[8].mxu0 %vm355_vm4, %v14310_v6  ;;  %v14781_v6 = vpack.c.bf16 %v14769_v33, %v14769_v33  ;;  %v15516_v33 = vld [vmem:[#allocation6 + $0x2c] sm:$0xff] }
 0x812   : > { %19722 = vmatprep.mubr.msk.bf16.mxu0 %vm355_vm4, %v14311_v12  ;;  %19743 = vmatpush3.bf16.msra.mxu0 %v20842_v36  ;;  %v14765_v36 = vld [vmem:[#allocation6 + $0x92] sm:$0xff]  ;;  %v20849_v12 = vld [vmem:[%s24762_s5 + $0x88] sm:$0xff]  }
 0x813   : > { %19744 = vmatprep.subr.bf16.mxu0 %v20843_v50  ;;  %v14779_v46 = vpack.c.bf16 %v14766_v32, %v14765_v36  ;;  %v15279_v32 = vld [vmem:[#allocation6 + $0xbb] sm:$0xf] }
 0x814   : > { %v15291_v31 = vpack.c.bf16 %v15279_v32, %v15279_v32  ;;  %v16027_v32 = vld [vmem:[#allocation6 + $0x3d] sm:$0xff] }
 0x816   : > { %19745 = vmatpush3.bf16.msra.mxu0 %v20843_v50  ;;  %v15026_v50 = vpack.c.bf16 %v14751_v26, %v14750_v11  ;;  %v15266_v26 = vld [vmem:[#allocation6 + $0x53] sm:$0xff] }
 0x817   : > { %19770 = vmatprep.subr.bf16.mxu0 %v20844_v58 }
 0x819   : > { %19723 = vmatmul.mubr.msk.bf16.gmra.mrb[12].mxu0 %vm355_vm4, %v14312_v55  ;;  %v20852_v55 = vld [vmem:[%s24762_s5 + $0xa0] sm:$0xff]  }
 0x81a   : > { %19726 = vmatprep.mubr.msk.bf16.mxu0 %vm355_vm4, %v14313_v34  ;;  %v15030_v34 = vpack.c.bf16 %v14759_v20, %v14758_v52  ;;  %v15271_v52 = vld [vmem:[#allocation6 + $0x7b] sm:$0xff]  ;;  %v15272_v20 = vld [vmem:[#allocation6 + $0x83] sm:$0xff] }
 0x81b   : > { %v15287_v21 = vpack.c.bf16 %v15272_v20, %v15271_v52 }
 0x821   : > { %19727 = vmatmul.mubr.msk.bf16.gmra.mrb[16].mxu0 %vm355_vm4, %v14314_v3  ;;  %v15033_v3 = vpack.c.bf16 %v14765_v36, %v14764_v22  ;;  %v15275_v22 = vld [vmem:[#allocation6 + $0x9b] sm:$0xff]  ;;  %v15512_v36 = vld [vmem:[#allocation6 + $0xc] sm:$0xff] }
 0x822   : > { %19730 = vmatprep.mubr.msk.bf16.mxu0 %vm355_vm4, %v14315_v10  ;;  %v15035_v10 = vpack.c.bf16 %v15023_v59, %v14768_v14  ;;  %v15513_v14 = vld [vmem:[#allocation6 + $0x14] sm:$0xff]  ;;  %v15523_v59 = vld [vmem:[#allocation6 + $0x64] sm:$0xff] }
 0x829   : > { %19731 = vmatmul.mubr.msk.bf16.gmra.mrb[20].mxu0 %vm355_vm4, %v14316_v61  ;;  %v15280_v61 = vpack.c.bf16 %v15258_v16, %v15257_v29  ;;  %v15527_v29 = vld [vmem:[#allocation6 + $0x84] sm:$0xff] }
 0x82a   : > { %19734 = vmatprep.mubr.msk.bf16.mxu0 %vm355_vm4, %v14317_v27  ;;  %v15260_v27 = vld [vmem:[#allocation6 + $0x23] sm:$0xff] }
 0x82b   : > { %v15281_v38 = vpack.c.bf16 %v15260_v27, %v15259_v18  ;;  %v15526_v27 = vld [vmem:[#allocation6 + $0x7c] sm:$0xff] }
 0x831   : > { %19735 = vmatmul.mubr.msk.bf16.gmra.mrb[24].mxu0 %vm355_vm4, %v14318_v7  ;;  %v15262_v7 = vld [vmem:[#allocation6 + $0x33] sm:$0xff] }
 0x832   : > { %19746 = vmatprep.mubr.msk.bf16.mxu0 %vm355_vm4, %v14770_v54  ;;  %v20853_v54 = vld [vmem:[%s24762_s5 + $0xa8] sm:$0xff]   ;;  %v15282_v11 = vpack.c.bf16 %v15262_v7, %v15261_v5  ;;  %v15542_v5 = vpack.c.bf16 %v15527_v29, %v15526_v27  ;;  %v15528_v7 = vld [vmem:[#allocation6 + $0x8c] sm:$0xff] }
 0x833   : > { %v15797_v20 = vpack.c.bf16 %v15528_v7, %v15527_v29  ;;  %v16043_v29 = vld [vmem:[#allocation6 + $0xbd] sm:$0xff] }
 0x839   : > { %19747 = vmatmul.mubr.msk.bf16.vlgmr.msra.gmra.mrb[4].mxu0 %vm355_vm4, %v14771_v13  ;;  %v15264_v13 = vld [vmem:[#allocation6 + $0x43] sm:$0xff] }
 0x83a   : > { %19771 = vmatpush3.bf16.msra.mxu0 %v20844_v58  ;;  %19750 = vmatprep.mubr.msk.bf16.mxu0 %vm355_vm4, %v14772_v4  ;;  %v15027_v58 = vpack.c.bf16 %v14753_v49, %v14752_v28  ;;  %v20854_v28 = vld [vmem:[%s24762_s5 + $0xb0] sm:$0xff]  }
 0x83b   : > { %19772 = vmatprep.subr.bf16.mxu0 %v20845_v19  ;;  %v15265_v4 = vld [vmem:[#allocation6 + $0x4b] sm:$0xff] }
 0x83c   : > { %v15284_v49 = vpack.c.bf16 %v15266_v26, %v15265_v4  ;;  %v15534_v26 = vld [vmem:[#allocation6 + $0xbc] sm:$0xf] }
 0x83e   : > { %19773 = vmatpush3.bf16.msra.mxu0 %v20845_v19  ;;  %v15283_v19 = vpack.c.bf16 %v15264_v13, %v15263_v8 }
 0x83f   : > { %19774 = vmatprep.subr.bf16.mxu0 %v20846_v2 }
 0x841   : > { %19751 = vmatmul.mubr.msk.bf16.gmra.mrb[8].mxu0 %vm355_vm4, %v14773_v37  ;;  %v15269_v37 = vld [vmem:[#allocation6 + $0x6b] sm:$0xff] }
 0x842   : > { %19754 = vmatprep.mubr.msk.bf16.mxu0 %vm355_vm4, %v14774_v41  ;;  %19775 = vmatpush3.bf16.msra.mxu0 %v20846_v2  ;;  %v20855_v2 = vld [vmem:[%s24762_s5 + $0xb8] sm:$0xff]  }
 0x843   : > { %19776 = vmatprep.subr.bf16.mxu0 %v20847_v53 }
 0x846   : > { %19777 = vmatpush3.bf16.msra.mxu0 %v20847_v53  ;;  %v15267_v53 = vld [vmem:[#allocation6 + $0x5b] sm:$0xff] }
 0x847   : > { %19802 = vmatprep.subr.bf16.mxu0 %v20848_v17  ;;  %v15285_v41 = vpack.c.bf16 %v15268_v30, %v15267_v53  ;;  %v20862_v30 = vld [vmem:[%s24762_s5 + $0xf0] sm:$0xff]  }
 0x849   : > { %19755 = vmatmul.mubr.msk.bf16.gmra.mrb[12].mxu0 %vm355_vm4, %v14775_v62  ;;  %v15273_v62 = vld [vmem:[#allocation6 + $0x8b] sm:$0xff] }
 0x84a   : > { %19758 = vmatprep.mubr.msk.bf16.mxu0 %vm355_vm4, %v14776_v9  ;;  %v15288_v9 = vpack.c.bf16 %v15274_v42, %v15273_v62 }
 0x851   : > { %19759 = vmatmul.mubr.msk.bf16.gmra.mrb[16].mxu0 %vm355_vm4, %v14777_v47  ;;  %v15276_v47 = vld [vmem:[#allocation6 + $0xa3] sm:$0xff] }
 0x852   : > { %19762 = vmatprep.mubr.msk.bf16.mxu0 %vm355_vm4, %v14778_v0  ;;  %v15289_v0 = vpack.c.bf16 %v15276_v47, %v15275_v22  ;;  %v16023_v47 = vld [vmem:[#allocation6 + $0x1d] sm:$0xff]  ;;  %v16022_v22 = vld [vmem:[#allocation6 + $0x15] sm:$0xff] }
 0x859   : > { %19763 = vmatmul.mubr.msk.bf16.gmra.mrb[20].mxu0 %vm355_vm4, %v14779_v46  ;;  %v15535_v46 = vpack.c.bf16 %v15513_v14, %v15512_v36 }
 0x85a   : > { %19766 = vmatprep.mubr.msk.bf16.mxu0 %vm355_vm4, %v14780_v63  ;;  %v15515_v63 = vld [vmem:[#allocation6 + $0x24] sm:$0xff] }
 0x861   : > { %19767 = vmatmul.mubr.msk.bf16.gmra.mrb[24].mxu0 %vm355_vm4, %v14781_v6  ;;  %v15517_v6 = vld [vmem:[#allocation6 + $0x34] sm:$0xff] }
 0x862   : > { %19778 = vmatprep.mubr.msk.bf16.mxu0 %vm355_vm4, %v15025_v57  ;;  %v15514_v57 = vld [vmem:[#allocation6 + $0x1c] sm:$0xff] }
 0x863   : > { %v15790_v4 = vpack.c.bf16 %v15514_v57, %v15513_v14  ;;  %v16025_v14 = vld [vmem:[#allocation6 + $0x2d] sm:$0xff] }
 0x869   : > { %19779 = vmatmul.mubr.msk.bf16.vlgmr.msra.gmra.mrb[4].mxu0 %vm355_vm4, %v15026_v50  ;;  %v15536_v50 = vpack.c.bf16 %v15515_v63, %v15514_v57  ;;  %v16031_v57 = vld [vmem:[#allocation6 + $0x5d] sm:$0xff] }
 0x86a   : > { %19803 = vmatpush3.bf16.msra.mxu0 %v20848_v17  ;;  %19782 = vmatprep.mubr.msk.bf16.mxu0 %vm355_vm4, %v15027_v58  ;;  %v15286_v17 = vpack.c.bf16 %v15270_v15, %v15269_v37  ;;  %v15537_v58 = vpack.c.bf16 %v15517_v6, %v15516_v33  ;;  %v20863_v15 = vld [vmem:[%s24762_s5 + $0xf8] sm:$0xff]  }
 0x86b   : > { %19804 = vmatprep.subr.bf16.mxu0 %v20849_v12 }
 0x86e   : > { %19805 = vmatpush3.bf16.msra.mxu0 %v20849_v12  ;;  %v20857_v12 = vld [vmem:[%s24762_s5 + $0xc8] sm:$0xff]  }
 0x86f   : > { %19806 = vmatprep.subr.bf16.mxu0 %v20850_v51 }
 0x871   : > { %19783 = vmatmul.mubr.msk.bf16.gmra.mrb[8].mxu0 %vm355_vm4, %v15028_v25  ;;  %v15518_v25 = vld [vmem:[#allocation6 + $0x3c] sm:$0xff] }
 0x872   : > { %19786 = vmatprep.mubr.msk.bf16.mxu0 %vm355_vm4, %v15029_v40  ;;  %19807 = vmatpush3.bf16.msra.mxu0 %v20850_v51  ;;  %v20858_v51 = vld [vmem:[%s24762_s5 + $0xd0] sm:$0xff]   ;;  %v15521_v40 = vld [vmem:[#allocation6 + $0x54] sm:$0xff] }
 0x873   : > { %19808 = vmatprep.subr.bf16.mxu0 %v20851_v39  ;;  %v15794_v53 = vpack.c.bf16 %v15522_v35, %v15521_v40 }
 0x876   : > { %19809 = vmatpush3.bf16.msra.mxu0 %v20851_v39  ;;  %v15519_v39 = vld [vmem:[#allocation6 + $0x44] sm:$0xff] }
 0x877   : > { %19834 = vmatprep.subr.bf16.mxu0 %v20852_v55 }
 0x879   : > { %19787 = vmatmul.mubr.msk.bf16.gmra.mrb[12].mxu0 %vm355_vm4, %v15030_v34  ;;  %v15520_v34 = vld [vmem:[#allocation6 + $0x4c] sm:$0xff] }
 0x87a   : > { %19790 = vmatprep.mubr.msk.bf16.mxu0 %vm355_vm4, %v15031_v24  ;;  %v20859_v24 = vld [vmem:[%s24762_s5 + $0xd8] sm:$0xff]   ;;  %v15793_v37 = vpack.c.bf16 %v15520_v34, %v15519_v39 }
 0x881   : > { %19791 = vmatmul.mubr.msk.bf16.gmra.mrb[16].mxu0 %vm355_vm4, %v15032_v48  ;;  %v15539_v48 = vpack.c.bf16 %v15521_v40, %v15520_v34  ;;  %v16033_v40 = vld [vmem:[#allocation6 + $0x6d] sm:$0xff]  ;;  %v16035_v34 = vld [vmem:[#allocation6 + $0x7d] sm:$0xff] }
 0x882   : > { %19794 = vmatprep.mubr.msk.bf16.mxu0 %vm355_vm4, %v15033_v3  ;;  %v20860_v3 = vld [vmem:[%s24762_s5 + $0xe0] sm:$0xff]  }
 0x889   : > { %19795 = vmatmul.mubr.msk.bf16.gmra.mrb[20].mxu0 %vm355_vm4, %v15034_v44  ;;  %v15524_v44 = vld [vmem:[#allocation6 + $0x6c] sm:$0xff] }
 0x88a   : > { %19798 = vmatprep.mubr.msk.bf16.mxu0 %vm355_vm4, %v15035_v10  ;;  %v15525_v10 = vld [vmem:[#allocation6 + $0x74] sm:$0xff] }
 0x88b   : > { %v15541_v16 = vpack.c.bf16 %v15525_v10, %v15524_v44  ;;  %v15796_v52 = vpack.c.bf16 %v15526_v27, %v15525_v10  ;;  %v16041_v27 = vld [vmem:[#allocation6 + $0xad] sm:$0xff] }
 0x891   : > { %19799 = vmatmul.mubr.msk.bf16.gmra.mrb[24].mxu0 %vm355_vm4, %v15036_v56  ;;  %v15540_v56 = vpack.c.bf16 %v15523_v59, %v15522_v35  ;;  %v16038_v35 = vld [vmem:[#allocation6 + $0x95] sm:$0xff] }
 0x892   : > { %19810 = vmatprep.mubr.msk.bf16.mxu0 %vm355_vm4, %v15280_v61  ;;  %v15529_v61 = vld [vmem:[#allocation6 + $0x94] sm:$0xff] }
 0x893   : > { %v15543_v18 = vpack.c.bf16 %v15529_v61, %v15528_v7 }
 0x899   : > { %19811 = vmatmul.mubr.msk.bf16.vlgmr.msra.gmra.mrb[4].mxu0 %vm355_vm4, %v15281_v38  ;;  %v15533_v38 = vld [vmem:[#allocation6 + $0xb4] sm:$0xff] }
 0x89a   : > { %19835 = vmatpush3.bf16.msra.mxu0 %v20852_v55  ;;  %19814 = vmatprep.mubr.msk.bf16.mxu0 %vm355_vm4, %v15282_v11  ;;  %v15538_v55 = vpack.c.bf16 %v15519_v39, %v15518_v25  ;;  %v15531_v11 = vld [vmem:[#allocation6 + $0xa4] sm:$0xff] }
 0x89b   : > { %19836 = vmatprep.subr.bf16.mxu0 %v20853_v54  ;;  %v16032_v39 = vld [vmem:[#allocation6 + $0x65] sm:$0xff] }
 0x89e   : > { %19837 = vmatpush3.bf16.msra.mxu0 %v20853_v54  ;;  %v15530_v54 = vld [vmem:[#allocation6 + $0x9c] sm:$0xff] }
 0x89f   : > { %19838 = vmatprep.subr.bf16.mxu0 %v20854_v28  ;;  %v15544_v13 = vpack.c.bf16 %v15531_v11, %v15530_v54  ;;  %v15798_v42 = vpack.c.bf16 %v15530_v54, %v15529_v61  ;;  %v16040_v61 = vld [vmem:[#allocation6 + $0xa5] sm:$0xff] }
 0x8a0   : > { %v16054_v7 = vpack.c.bf16 %v16041_v27, %v16040_v61  ;;  %v16278_v54 = vld [vmem:[#allocation6 + $0x1e] sm:$0xff] }
 0x8a1   : > { %19815 = vmatmul.mubr.msk.bf16.gmra.mrb[8].mxu0 %vm355_vm4, %v15283_v19  ;;  %v15546_v19 = vpack.c.bf16 %v15534_v26, %v15534_v26  ;;  %v16279_v26 = vld [vmem:[#allocation6 + $0x26] sm:$0xff] }
 0x8a2   : > { %19818 = vmatprep.mubr.msk.bf16.mxu0 %vm355_vm4, %v15284_v49  ;;  %19839 = vmatpush3.bf16.msra.mxu0 %v20854_v28  ;;  %v15532_v28 = vld [vmem:[#allocation6 + $0xac] sm:$0xff]  ;;  %v15791_v49 = vpack.c.bf16 %v15516_v33, %v15515_v63  ;;  %v20865_v63 = vld [vmem:[%s24762_s5 + $0x108] sm:$0xff]  }
 0x8a3   : > { %19840 = vmatprep.subr.bf16.mxu0 %v20855_v2  ;;  %v15545_v8 = vpack.c.bf16 %v15533_v38, %v15532_v28  ;;  %v20866_v33 = vld [vmem:[%s24762_s5 + $0x110] sm:$0xff]  }
 0x8a6   : > { %19841 = vmatpush3.bf16.msra.mxu0 %v20855_v2  ;;  %v15792_v2 = vpack.c.bf16 %v15518_v25, %v15517_v6  ;;  %v16029_v6 = vld [vmem:[#allocation6 + $0x4d] sm:$0xff] }
 0x8a7   : > { %19866 = vmatprep.subr.bf16.mxu0 %v20856_v60 }
 0x8a9   : > { %19819 = vmatmul.mubr.msk.bf16.gmra.mrb[12].mxu0 %vm355_vm4, %v15285_v41  ;;  %v20864_v41 = vld [vmem:[%s24762_s5 + $0x100] sm:$0xff]  }
 0x8aa   : > { %19822 = vmatprep.mubr.msk.bf16.mxu0 %vm355_vm4, %v15286_v17  ;;  %v15795_v17 = vpack.c.bf16 %v15524_v44, %v15523_v59  ;;  %v16039_v59 = vld [vmem:[#allocation6 + $0x9d] sm:$0xff]  ;;  %v16036_v44 = vld [vmem:[#allocation6 + $0x85] sm:$0xff] }
 0x8b1   : > { %19823 = vmatmul.mubr.msk.bf16.gmra.mrb[16].mxu0 %vm355_vm4, %v15287_v21  ;;  %v15788_v21 = vld [vmem:[#allocation6 + $0xbc] sm:$0xff] }
 0x8b2   : > { %19826 = vmatprep.mubr.msk.bf16.mxu0 %vm355_vm4, %v15288_v9  ;;  %v15800_v62 = vpack.c.bf16 %v15788_v21, %v15533_v38  ;;  %v15799_v9 = vpack.c.bf16 %v15532_v28, %v15531_v11  ;;  %v16277_v11 = vld [vmem:[#allocation6 + $0x16] sm:$0xff] }
 0x8b3   : > { %v16300_v28 = vpack.c.bf16 %v16278_v54, %v16277_v11 }
 0x8b9   : > { %19827 = vmatmul.mubr.msk.bf16.gmra.mrb[20].mxu0 %vm355_vm4, %v15289_v0  ;;  %v16026_v0 = vld [vmem:[#allocation6 + $0x35] sm:$0xff] }
 0x8ba   : > { %19830 = vmatprep.mubr.msk.bf16.mxu0 %vm355_vm4, %v15290_v23  ;;  %v16045_v23 = vpack.c.bf16 %v16023_v47, %v16022_v22  ;;  %v16047_v36 = vpack.c.bf16 %v16027_v32, %v16026_v0  ;;  %v16293_v47 = vld [vmem:[#allocation6 + $0x96] sm:$0xff]  ;;  %v16298_v0 = vld [vmem:[#allocation6 + $0xbe] sm:$0xff]  ;;  %v16295_v32 = vld [vmem:[#allocation6 + $0xa6] sm:$0xff] }
 0x8c1   : > { %19831 = vmatmul.mubr.msk.bf16.gmra.mrb[24].mxu0 %vm355_vm4, %v15291_v31  ;;  %v16024_v31 = vld [vmem:[#allocation6 + $0x25] sm:$0xff] }
 0x8c2   : > { %19842 = vmatprep.mubr.msk.bf16.mxu0 %vm355_vm4, %v15535_v46  ;;  %v16046_v46 = vpack.c.bf16 %v16025_v14, %v16024_v31  ;;  %v16296_v31 = vld [vmem:[#allocation6 + $0xae] sm:$0xff] }
 0x8c9   : > { %19843 = vmatmul.mubr.msk.bf16.vlgmr.msra.gmra.mrb[4].mxu0 %vm355_vm4, %v15536_v50  ;;  %v16028_v50 = vld [vmem:[#allocation6 + $0x45] sm:$0xff] }
 0x8ca   : > { %19867 = vmatpush3.bf16.msra.mxu0 %v20856_v60  ;;  %19846 = vmatprep.mubr.msk.bf16.mxu0 %vm355_vm4, %v15537_v58  ;;  %v20861_v60 = vld [vmem:[%s24762_s5 + $0xe8] sm:$0xff]   ;;  %v16030_v58 = vld [vmem:[#allocation6 + $0x55] sm:$0xff] }
 0x8cb   : > { %19868 = vmatprep.subr.bf16.mxu0 %v20857_v12  ;;  %v16049_v25 = vpack.c.bf16 %v16031_v57, %v16030_v58 }
 0x8ce   : > { %19869 = vmatpush3.bf16.msra.mxu0 %v20857_v12  ;;  %v16048_v12 = vpack.c.bf16 %v16029_v6, %v16028_v50  ;;  %v18257_v50 = vld [vmem:[%s24763_s6] ss:$0 sm:$0xff] }
 0x8cf   : > { %19870 = vmatprep.subr.bf16.mxu0 %v20858_v51  ;;  %v16746_v58 = vrot.slane %v18257_v50, %v22755_v1 }
 0x8d1   : > { %19847 = vmatmul.mubr.msk.bf16.gmra.mrb[8].mxu0 %vm355_vm4, %v15538_v55  ;;  %v16034_v55 = vld [vmem:[#allocation6 + $0x75] sm:$0xff] }
 0x8d2   : > { %19850 = vmatprep.mubr.msk.bf16.mxu0 %vm355_vm4, %v15539_v48  ;;  %19871 = vmatpush3.bf16.msra.mxu0 %v20858_v51  ;;  %v20867_v51 = vld [vmem:[%s24762_s5 + $0x118] sm:$0xff]   ;;  %v16051_v48 = vpack.c.bf16 %v16035_v34, %v16034_v55 }
 0x8d3   : > { %19872 = vmatprep.subr.bf16.mxu0 %v20859_v24 }
 0x8d6   : > { %19873 = vmatpush3.bf16.msra.mxu0 %v20859_v24  ;;  %v16050_v24 = vpack.c.bf16 %v16033_v40, %v16032_v39 }
 0x8d7   : > { %19898 = vmatprep.subr.bf16.mxu0 %v20860_v3 }
 0x8d9   : > { %19851 = vmatmul.mubr.msk.bf16.gmra.mrb[12].mxu0 %vm355_vm4, %v15540_v56  ;;  %v16053_v56 = vpack.c.bf16 %v16039_v59, %v16038_v35 }
 0x8da   : > { %19854 = vmatprep.mubr.msk.bf16.mxu0 %vm355_vm4, %v15541_v16  ;;  %v16042_v16 = vld [vmem:[#allocation6 + $0xb5] sm:$0xff] }
 0x8e1   : > { %19855 = vmatmul.mubr.msk.bf16.gmra.mrb[16].mxu0 %vm355_vm4, %v15542_v5  ;;  %v16055_v5 = vpack.c.bf16 %v16043_v29, %v16042_v16 }
 0x8e2   : > { %19858 = vmatprep.mubr.msk.bf16.mxu0 %vm355_vm4, %v15543_v18  ;;  %v16044_v18 = vld [vmem:[#allocation6 + $0xc5] sm:$0xf] }
 0x8e3   : > { %v16056_v38 = vpack.c.bf16 %v16044_v18, %v16044_v18  ;;  %v24876_v18 = vlaneseq }
 0x8e5   : > { %vm24549_vm6 = vcmp.lt.s32.totalorder %v24876_v18, 128 }
 0x8e9   : > { %19859 = vmatmul.mubr.msk.bf16.gmra.mrb[20].mxu0 %vm355_vm4, %v15544_v13  ;;  %v16282_v13 = vld [vmem:[#allocation6 + $0x3e] sm:$0xff] }
 0x8ea   : > { %19862 = vmatprep.mubr.msk.bf16.mxu0 %vm355_vm4, %v15545_v8  ;;  %v16281_v8 = vld [vmem:[#allocation6 + $0x36] sm:$0xff] }
 0x8f1   : > { %19863 = vmatmul.mubr.msk.bf16.gmra.mrb[24].mxu0 %vm355_vm4, %v15546_v19  ;;  %v16280_v19 = vld [vmem:[#allocation6 + $0x2e] sm:$0xff] }
 0x8f2   : > { %19874 = vmatprep.mubr.msk.bf16.mxu0 %vm355_vm4, %v15790_v4  ;;  %v16302_v4 = vpack.c.bf16 %v16282_v13, %v16281_v8 }
 0x8f9   : > { %19875 = vmatmul.mubr.msk.bf16.vlgmr.msra.gmra.mrb[4].mxu0 %vm355_vm4, %v15791_v49  ;;  %v16284_v49 = vld [vmem:[#allocation6 + $0x4e] sm:$0xff] }
 0x8fa   : > { %19899 = vmatpush3.bf16.msra.mxu0 %v20860_v3  ;;  %19878 = vmatprep.mubr.msk.bf16.mxu0 %vm355_vm4, %v15792_v2  ;;  %v16037_v3 = vld [vmem:[#allocation6 + $0x8d] sm:$0xff]  ;;  %v16301_v2 = vpack.c.bf16 %v16280_v19, %v16279_v26 }
 0x8fb   : > { %19900 = vmatprep.subr.bf16.mxu0 %v20861_v60  ;;  %v16052_v10 = vpack.c.bf16 %v16037_v3, %v16036_v44  ;;  %v24539_v44 = vrot.slane %v16746_v58, %v22755_v1 }
 0x8fd   : > { %v24557_v8 = vcombine.high %v24539_v44, %v24539_v44 }
 0x8fe   : > { %19901 = vmatpush3.bf16.msra.mxu0 %v20861_v60  ;;  %v16286_v60 = vld [vmem:[#allocation6 + $0x5e] sm:$0xff] }
 0x8ff   : > { %19902 = vmatprep.subr.bf16.mxu0 %v20862_v30 }
 0x901   : > { %19879 = vmatmul.mubr.msk.bf16.gmra.mrb[8].mxu0 %vm355_vm4, %v15793_v37 }
 0x902   : > { %19882 = vmatprep.mubr.msk.bf16.mxu0 %vm355_vm4, %v15794_v53  ;;  %19903 = vmatpush3.bf16.msra.mxu0 %v20862_v30  ;;  %v16283_v30 = vld [vmem:[#allocation6 + $0x46] sm:$0xff] }
 0x903   : > { %19904 = vmatprep.subr.bf16.mxu0 %v20863_v15  ;;  %v16303_v37 = vpack.c.bf16 %v16284_v49, %v16283_v30 }
 0x906   : > { %19905 = vmatpush3.bf16.msra.mxu0 %v20863_v15  ;;  %v16285_v15 = vld [vmem:[#allocation6 + $0x56] sm:$0xff] }
 0x907   : > { %19930 = vmatprep.subr.bf16.mxu0 %v20864_v41  ;;  %v16304_v53 = vpack.c.bf16 %v16286_v60, %v16285_v15 }
 0x909   : > { %19883 = vmatmul.mubr.msk.bf16.gmra.mrb[12].mxu0 %vm355_vm4, %v15795_v17  ;;  %v16288_v17 = vld [vmem:[#allocation6 + $0x6e] sm:$0xff] }
 0x90a   : > { %19886 = vmatprep.mubr.msk.bf16.mxu0 %vm355_vm4, %v15796_v52  ;;  %v16289_v52 = vld [vmem:[#allocation6 + $0x76] sm:$0xff] }
 0x911   : > { %19887 = vmatmul.mubr.msk.bf16.gmra.mrb[16].mxu0 %vm355_vm4, %v15797_v20  ;;  %v16290_v20 = vld [vmem:[#allocation6 + $0x7e] sm:$0xff] }
 0x912   : > { %19890 = vmatprep.mubr.msk.bf16.mxu0 %vm355_vm4, %v15798_v42  ;;  %v16306_v21 = vpack.c.bf16 %v16290_v20, %v16289_v52 }
 0x919   : > { %19891 = vmatmul.mubr.msk.bf16.gmra.mrb[20].mxu0 %vm355_vm4, %v15799_v9  ;;  %v16294_v9 = vld [vmem:[#allocation6 + $0x9e] sm:$0xff] }
 0x91a   : > { %19894 = vmatprep.mubr.msk.bf16.mxu0 %vm355_vm4, %v15800_v62  ;;  %v16292_v62 = vld [vmem:[#allocation6 + $0x8e] sm:$0xff]  ;;  %v16308_v22 = vpack.c.bf16 %v16294_v9, %v16293_v47 }
 0x921   : > { %19895 = vmatmul.mubr.msk.bf16.gmra.mrb[24].mxu0 %vm355_vm4, %v15801_v43  ;;  %v16307_v43 = vpack.c.bf16 %v16292_v62, %v16291_v45 }
 0x922   : > { %19906 = vmatprep.mubr.msk.bf16.mxu0 %vm355_vm4, %v16045_v23  ;;  %v16297_v23 = vld [vmem:[#allocation6 + $0xb6] sm:$0xff] }
 0x923   : > { %v16310_v14 = vpack.c.bf16 %v16298_v0, %v16297_v23 }
 0x929   : > { %19907 = vmatmul.mubr.msk.bf16.vlgmr.msra.gmra.mrb[4].mxu0 %vm355_vm4, %v16046_v46  ;;  %v16299_v46 = vld [vmem:[#allocation6 + $0xc6] sm:$0xf] }
 0x92a   : > { %19931 = vmatpush3.bf16.msra.mxu0 %v20864_v41  ;;  %19910 = vmatprep.mubr.msk.bf16.mxu0 %vm355_vm4, %v16047_v36  ;;  %v16287_v41 = vld [vmem:[#allocation6 + $0x66] sm:$0xff]  ;;  %v16309_v36 = vpack.c.bf16 %v16296_v31, %v16295_v32 }
 0x92b   : > { %19932 = vmatprep.subr.bf16.mxu0 %v20865_v63  ;;  %v16305_v42 = vpack.c.bf16 %v16288_v17, %v16287_v41 }
 0x92e   : > { %19933 = vmatpush3.bf16.msra.mxu0 %v20865_v63  ;;  %v16311_v63 = vpack.c.bf16 %v16299_v46, %v16299_v46 }
 0x92f   : > { %19934 = vmatprep.subr.bf16.mxu0 %v20866_v33 }
 0x931   : > { %19911 = vmatmul.mubr.msk.bf16.gmra.mrb[8].mxu0 %vm355_vm4, %v16048_v12 }
 0x932   : > { %19914 = vmatprep.mubr.msk.bf16.mxu0 %vm355_vm4, %v16049_v25  ;;  %19935 = vmatpush3.bf16.msra.mxu0 %v20866_v33  ;;  %v16747_v25 = vcombine.high %v16746_v58, %v16746_v58 }
 0x933   : > { %19936 = vmatprep.subr.bf16.mxu0 %v20867_v51 }
 0x934   : > { %v24543_v16 = vrot.slane %v16747_v25, %v22755_v1 }
 0x936   : > { %19937 = vmatpush3.bf16.msra.mxu0 %v20867_v51 }
 0x939   : > { %19915 = vmatmul.mubr.msk.bf16.gmra.mrb[12].mxu0 %vm355_vm4, %v16050_v24 }
 0x93a   : > { %19918 = vmatprep.mubr.msk.bf16.mxu0 %vm355_vm4, %v16051_v48 }
 0x941   : > { %19919 = vmatmul.mubr.msk.bf16.gmra.mrb[16].mxu0 %vm355_vm4, %v16052_v10 }
 0x942   : > { %19922 = vmatprep.mubr.msk.bf16.mxu0 %vm355_vm4, %v16053_v56 }
 0x949   : > { %19923 = vmatmul.mubr.msk.bf16.gmra.mrb[20].mxu0 %vm355_vm4, %v16054_v7 }
 0x94a   : > { %19926 = vmatprep.mubr.msk.bf16.mxu0 %vm355_vm4, %v16055_v5 }
 0x951   : > { %19927 = vmatmul.mubr.msk.bf16.gmra.mrb[24].mxu0 %vm355_vm4, %v16056_v38 }
 0x952   : > { %19938 = vmatprep.mubr.msk.bf16.mxu0 %vm355_vm4, %v16300_v28 }
 0x959   : > { %19939 = vmatmul.mubr.msk.bf16.vlgmr.msra.gmra.mrb[4].mxu0 %vm355_vm4, %v16301_v2  ;;  %v24562_v2 = vcombine.high %v24543_v16, %v24543_v16 }
 0x95a   : > { %19942 = vmatprep.mubr.msk.bf16.mxu0 %vm355_vm4, %v16302_v4 }
 0x961   : > { %19943 = vmatmul.mubr.msk.bf16.gmra.mrb[8].mxu0 %vm355_vm4, %v16303_v37 }
 0x962   : > { %19946 = vmatprep.mubr.msk.bf16.mxu0 %vm355_vm4, %v16304_v53 }
 0x969   : > { %19947 = vmatmul.mubr.msk.bf16.gmra.mrb[12].mxu0 %vm355_vm4, %v16305_v42 }
 0x96a   : > { %19950 = vmatprep.mubr.msk.bf16.mxu0 %vm355_vm4, %v16306_v21 }
 0x971   : > { %19951 = vmatmul.mubr.msk.bf16.gmra.mrb[16].mxu0 %vm355_vm4, %v16307_v43 }
 0x972   : > { %19954 = vmatprep.mubr.msk.bf16.mxu0 %vm355_vm4, %v16308_v22 }
 0x979   : > { %19955 = vmatmul.mubr.msk.bf16.gmra.mrb[20].mxu0 %vm355_vm4, %v16309_v36 }
 0x97a   : > { %19958 = vmatprep.mubr.msk.bf16.mxu0 %vm355_vm4, %v16310_v14 }
 0x981   : > { %19959 = vmatmul.mubr.msk.bf16.gmra.mrb[24].mxu0 %vm355_vm4, %v16311_v63 }
 0xa2c   : > { %v19940_v33 = vpop.f32.mrb[4].mxu0 }
 0xa2d   : > { %16534 = vst [vmem:[#allocation4 + $0x10] sm:$0xff] %v19940_v33  ;;  %v16415_v6 = vpop.f32.mrb[5].mxu0 }
 0xa2e   : > { %16532 = vst [vmem:[#allocation4] sm:$0xff] %v16415_v6  ;;  %v19941_v57 = vpop.f32.mrb[6].mxu0 }
 0xa2f   : > { %16535 = vst [vmem:[#allocation4 + $0x18] sm:$0xff] %v19941_v57  ;;  %v16418_v12 = vpop.f32.mrb[7].mxu0 }
 0xa30   : > { %16533 = vst [vmem:[#allocation4 + $0x8] sm:$0xff] %v16418_v12 }
 0xa34   : > { %v19944_v51 = vpop.f32.mrb[8].mxu0 }
 0xa35   : > { %v16431_v39 = vpop.f32.mrb[9].mxu0 }
 0xa36   : > { %v16557_v40 = vld [vmem:[#allocation4 + $0x10] ss:$2 sm:$0xff]  ;;  %v16563_v55 = vld [vmem:[#allocation4 + $0x11] ss:$2 sm:$0xff]  ;;  %16536 = vst [vmem:[#allocation4 + $0x20] sm:$0xff] %v16431_v39  ;;  %v19945_v34 = vpop.f32.mrb[10].mxu0 }
 0xa37   : > { %v16567_v24 = vmax.f32 %v16557_v40, %v16563_v55  ;;  %v16555_v48 = vld [vmem:[#allocation4] ss:$2 sm:$0xff]  ;;  %v16561_v3 = vld [vmem:[#allocation4 + $0x1] ss:$2 sm:$0xff]  ;;  %16539 = vst [vmem:[#allocation4 + $0x38] sm:$0xff] %v19945_v34  ;;  %v16434_v59 = vpop.f32.mrb[11].mxu0 }
 0xa38   : > { %v16566_v10 = vmax.f32 %v16555_v48, %v16561_v3 }
 0xa39   : > { %v16621_v35 = vcombine.high %v16567_v24, %v16567_v24  ;;  %v16628_v56 = vrot.slane %v16567_v24, %v22755_v1 }
 0xa3a   : > { %v16572_v29 = vcombine.high %v16566_v10, %v16566_v10  ;;  %v16579_v61 = vrot.slane %v16566_v10, %v22755_v1 }
 0xa3b   : > { %v16635_v27 = vrot.slane %v16621_v35, %v22755_v1  ;;  %v16636_v5 = vcombine.high %v16628_v56, %v16628_v56  ;;  %v16644_v7 = vrot.slane %v16628_v56, %v22755_v1 }
 0xa3c   : > { %v16586_v54 = vrot.slane %v16572_v29, %v22755_v1  ;;  %v16587_v11 = vcombine.high %v16579_v61, %v16579_v61  ;;  %v16595_v28 = vrot.slane %v16579_v61, %v22755_v1  ;;  %v19948_v13 = vpop.f32.mrb[12].mxu0 }
 0xa3d   : > { %v16637_v26 = vcombine.high %v16635_v27, %v16635_v27  ;;  %v16658_v19 = vrot.slane %v16636_v5, %v22755_v1  ;;  %v16666_v4 = vcombine.high %v16644_v7, %v16644_v7  ;;  %v16559_v49 = vld [vmem:[#allocation4 + $0x20] ss:$2 sm:$0xf]  ;;  %16542 = vst [vmem:[#allocation4 + $0x50] sm:$0xff] %v19948_v13  ;;  %v16651_v60 = vrot.slane %v16635_v27, %v22755_v1  ;;  %v16447_v41 = vpop.f32.mrb[13].mxu0 }
 0xa3e   : > { %v16588_v30 = vcombine.high %v16586_v54, %v16586_v54  ;;  %v16602_v37 = vrot.slane %v16586_v54, %v22755_v1  ;;  %v16609_v15 = vrot.slane %v16587_v11, %v22755_v1  ;;  %v16565_v53 = vld [vmem:[#allocation4 + $0x21] ss:$2 sm:$0xf]  ;;  %v16720_v20 = vsel %vm24549_vm6, %v16644_v7, -inf  ;;  %16540 = vst [vmem:[#allocation4 + $0x40] sm:$0xff] %v16447_v41  ;;  %v19949_v21 = vpop.f32.mrb[14].mxu0 }
 0xa3f   : > { %v24568_v17 = vrot.slane %v16637_v26, %v22755_v1  ;;  %v16667_v52 = vcombine.high %v16658_v19, %v16658_v19  ;;  %v16722_v42 = vsel %vm24549_vm6, %v16666_v4, -inf  ;;  %v16617_v9 = vcombine.high %v16595_v28, %v16595_v28  ;;  %16543 = vst [vmem:[#allocation4 + $0x58] sm:$0xff] %v19949_v21  ;;  %v16450_v47 = vpop.f32.mrb[15].mxu0 }
 0xa40   : > { %v16616_v62 = vrot.slane %v16588_v30, %v22755_v1  ;;  %v16618_v45 = vcombine.high %v16602_v37, %v16602_v37  ;;  %v16619_v43 = vcombine.high %v16609_v15, %v16609_v15  ;;  %v16710_v23 = vsel %vm24549_vm6, %v16595_v28, -inf  ;;  %16541 = vst [vmem:[#allocation4 + $0x48] sm:$0xff] %v16450_v47 }
 0xa41   : > { %v16668_v22 = vcombine.high %v24568_v17, %v24568_v17  ;;  %v16713_v0 = vsel %vm24549_vm6, %v16609_v15, -inf  ;;  %v16568_v32 = vmax.f32 %v16559_v49, %v16565_v53  ;;  %v16716_v46 = vsel %vm24549_vm6, %v16617_v9, -inf }
 0xa42   : > { %v16620_v31 = vcombine.high %v16616_v62, %v16616_v62  ;;  %v16711_v14 = vsel %vm24549_vm6, %v16616_v62, -inf  ;;  %v16714_v36 = vsel %vm24549_vm6, %v16618_v45, -inf  ;;  %v16719_v57 = vsel %vm24549_vm6, %v16619_v43, -inf }
 0xa43   : > { %v16723_v63 = vsel %vm24549_vm6, %v16668_v22, -inf  ;;  %v16712_v33 = vmax.f32 %v16710_v23, %v16711_v14  ;;  %v16715_v6 = vmax.f32 %v16713_v0, %v16714_v36  ;;  %v16721_v58 = vmax.f32 %v16719_v57, %v16720_v20 }
 0xa44   : > { %v16724_v50 = vmax.f32 %v16722_v42, %v16723_v63  ;;  %v16717_v12 = vsel %vm24549_vm6, %v16620_v31, -inf  ;;  %v16675_v51 = vrot.slane %v16568_v32, %v22755_v1  ;;  %v19952_v25 = vpop.f32.mrb[16].mxu0  ;;  %v16728_v39 = vsel %vm24549_vm6, %v16651_v60, -inf }
 0xa45   : > { %v16718_v40 = vmax.f32 %v16716_v46, %v16717_v12  ;;  %v16768_v55 = vadd.f32 %v24539_v44, %v16712_v33  ;;  %v16769_v34 = vadd.f32 %v24543_v16, %v16715_v6  ;;  %v16463_v24 = vpop.f32.mrb[17].mxu0  ;;  %v16771_v48 = vadd.f32 %v24562_v2, %v16721_v58 }
 0xa46   : > { %v16676_v3 = vcombine.high %v16675_v51, %v16675_v51  ;;  %v16683_v59 = vrot.slane %v16675_v51, %v22755_v1  ;;  %v16725_v10 = vsel %vm24549_vm6, %v16667_v52, -inf  ;;  %16544 = vst [vmem:[#allocation4 + $0x60] sm:$0xff] %v16463_v24  ;;  %v19953_v35 = vpop.f32.mrb[18].mxu0  ;;  %v16772_v56 = vadd.f32 %v24539_v44, %v16724_v50 }
 0xa47   : > { %v16770_v29 = vadd.f32 %v24557_v8, %v16718_v40  ;;  %v16776_v61 = vmax.f32 %v16768_v55, 0.0  ;;  %v16777_v27 = vmax.f32 %v16769_v34, 0.0  ;;  %16547 = vst [vmem:[#allocation4 + $0x78] sm:$0xff] %v19953_v35  ;;  %v16466_v5 = vpop.f32.mrb[19].mxu0  ;;  %v16779_v7 = vmax.f32 %v16771_v48, 0.0 }
 0xa48   : > { %v16690_v18 = vrot.slane %v16676_v3, %v22755_v1  ;;  %v16691_v54 = vcombine.high %v16683_v59, %v16683_v59  ;;  %v16731_v11 = vsel %vm24549_vm6, %v24568_v17, -inf  ;;  %v16844_v28 = vld [vmem:[#allocation4 + $0x3c] ss:$2 sm:$0xff]  ;;  %v16846_v13 = vld [vmem:[#allocation4 + $0x4c] ss:$2 sm:$0xff]  ;;  %v16726_v4 = vsel %vm24549_vm6, %v16683_v59, -inf }
 0xa49   : > { %v16778_v26 = vmax.f32 %v16770_v29, 0.0  ;;  %v16792_v19 = vcombine.low %v16776_v61, %v16777_v27  ;;  %v16850_v49 = vld [vmem:[#allocation4 + $0x3d] ss:$2 sm:$0xff]  ;;  %v16852_v60 = vld [vmem:[#allocation4 + $0x4d] ss:$2 sm:$0xff]  ;;  %v16727_v30 = vmax.f32 %v16725_v10, %v16726_v4  ;;  %v16780_v41 = vmax.f32 %v16772_v56, 0.0 }
 0xa4a   : > { %v16729_v37 = vsel %vm24549_vm6, %v16690_v18, -inf  ;;  %v16732_v15 = vsel %vm24549_vm6, %v16691_v54, -inf  ;;  %v16855_v53 = vmax.f32 %v16844_v28, %v16850_v49  ;;  %v16856_v21 = vmax.f32 %v16846_v13, %v16852_v60 }
 0xa4b   : > { %v16793_v52 = vcombine.low %v16778_v26, %v16779_v7  ;;  %v16730_v17 = vmax.f32 %v16728_v39, %v16729_v37  ;;  %v16733_v20 = vmax.f32 %v16731_v11, %v16732_v15  ;;  %v16773_v42 = vadd.f32 %v24543_v16, %v16727_v30 }
 0xa4c   : > { %v16861_v62 = vcombine.high %v16855_v53, %v16855_v53  ;;  %v16868_v9 = vrot.slane %v16855_v53, %v22755_v1  ;;  %v19956_v45 = vpop.f32.mrb[20].mxu0  ;;  %v16802_v43 = vrot.slane %v16792_v19, %v22755_v1  ;;  %v16910_v6 = vcombine.high %v16856_v21, %v16856_v21 }
 0xa4d   : > { %v16809_v47 = vrot.slane %v16793_v52, %v22755_v1  ;;  %v16774_v22 = vadd.f32 %v24557_v8, %v16730_v17  ;;  %v16775_v23 = vadd.f32 %v24562_v2, %v16733_v20  ;;  %16550 = vst [vmem:[#allocation4 + $0x90] sm:$0xff] %v19956_v45  ;;  %v16781_v0 = vmax.f32 %v16773_v42, 0.0  ;;  %v16479_v36 = vpop.f32.mrb[21].mxu0  ;;  %v16848_v15 = vld [vmem:[#allocation4 + $0x5c] ss:$2 sm:$0xf] }
 0xa4e   : > { %v16875_v32 = vrot.slane %v16861_v62, %v22755_v1  ;;  %v16876_v31 = vcombine.high %v16868_v9, %v16868_v9  ;;  %v16884_v14 = vrot.slane %v16868_v9, %v22755_v1  ;;  %16548 = vst [vmem:[#allocation4 + $0x80] sm:$0xff] %v16479_v36  ;;  %v19957_v57 = vpop.f32.mrb[22].mxu0  ;;  %v16917_v40 = vrot.slane %v16856_v21, %v22755_v1  ;;  %v16854_v53 = vld [vmem:[#allocation4 + $0x5d] ss:$2 sm:$0xf] }
 0xa4f   : > { %v16824_v46 = vcombine.low %v16802_v43, %v16809_v47  ;;  %v16782_v63 = vmax.f32 %v16774_v22, 0.0  ;;  %v16783_v33 = vmax.f32 %v16775_v23, 0.0  ;;  %v16794_v50 = vcombine.low %v16780_v41, %v16781_v0  ;;  %16551 = vst [vmem:[#allocation4 + $0x98] sm:$0xff] %v19957_v57  ;;  %v16482_v25 = vpop.f32.mrb[23].mxu0 }
 0xa50   : > { %v16877_v12 = vcombine.high %v16875_v32, %v16875_v32  ;;  %v16891_v58 = vrot.slane %v16875_v32, %v22755_v1  ;;  %v16898_v51 = vrot.slane %v16876_v31, %v22755_v1  ;;  %16549 = vst [vmem:[#allocation4 + $0x88] sm:$0xff] %v16482_v25  ;;  %v16924_v59 = vrot.slane %v16910_v6, %v22755_v1 }
 0xa51   : > { %v16795_v39 = vcombine.low %v16782_v63, %v16783_v33  ;;  %v16832_v55 = vrot.slane %v16824_v46, %v22755_v1  ;;  %v16816_v34 = vrot.slane %v16794_v50, %v22755_v1  ;;  %v16925_v10 = vcombine.high %v16917_v40, %v16917_v40 }
 0xa52   : > { %v16905_v24 = vrot.slane %v16877_v12, %v22755_v1  ;;  %v16907_v48 = vcombine.high %v16891_v58, %v16891_v58  ;;  %v16933_v35 = vrot.slane %v16917_v40, %v22755_v1  ;;  %v16906_v56 = vcombine.high %v16884_v14, %v16884_v14 }
 0xa53   : > { %v16823_v3 = vrot.slane %v16795_v39, %v22755_v1  ;;  %v16908_v29 = vcombine.high %v16898_v51, %v16898_v51  ;;  %v16926_v18 = vcombine.high %v16924_v59, %v16924_v59  ;;  %v16997_v54 = vsel %vm24549_vm6, %v16884_v14, -inf }
 0xa54   : > { %v16909_v61 = vcombine.high %v16905_v24, %v16905_v24  ;;  %v16998_v27 = vsel %vm24549_vm6, %v16905_v24, -inf  ;;  %v19960_v5 = vpop.f32.mrb[24].mxu0  ;;  %v17000_v11 = vsel %vm24549_vm6, %v16898_v51, -inf  ;;  %v16947_v13 = vrot.slane %v16925_v10, %v22755_v1 }
 0xa55   : > { %v16825_v7 = vcombine.low %v16816_v34, %v16823_v3  ;;  %v16495_v28 = vpop.f32.mrb[25].mxu0  ;;  %v16955_v26 = vcombine.high %v16933_v35, %v16933_v35  ;;  %v16999_v19 = vmax.f32 %v16997_v54, %v16998_v27  ;;  %v17001_v4 = vsel %vm24549_vm6, %v16907_v48, -inf  ;;  %v17132_v0 = vld [vmem:[#allocation4 + $0x78] ss:$2 sm:$0xff]  ;;  %v17138_v32 = vld [vmem:[#allocation4 + $0x79] ss:$2 sm:$0xff] }
 0xa56   : > { %v16940_v60 = vrot.slane %v16924_v59, %v22755_v1  ;;  %v16954_v30 = vrot.slane %v16926_v18, %v22755_v1  ;;  %v17002_v37 = vmax.f32 %v17000_v11, %v17001_v4  ;;  %v17003_v41 = vsel %vm24549_vm6, %v16906_v56, -inf  ;;  %v19961_v45 = vpop.f32.mrb[26].mxu0  ;;  %v17142_v5 = vld [vmem:[#allocation4 + $0x99] ss:$2 sm:$0xf] }
 0xa57   : > { %v16839_v49 = vrot.slane %v16825_v7, %v22755_v1  ;;  %v17004_v52 = vsel %vm24549_vm6, %v16909_v61, -inf  ;;  %v17006_v17 = vsel %vm24549_vm6, %v16908_v29, -inf  ;;  %v17007_v20 = vsel %vm24549_vm6, %v16933_v35, -inf  ;;  %v16498_v31 = vpop.f32.mrb[27].mxu0 }
 0xa58   : > { %v16957_v21 = vcombine.high %v16954_v30, %v16954_v30  ;;  %v17005_v62 = vmax.f32 %v17003_v41, %v17004_v52  ;;  %v17008_v9 = vmax.f32 %v17006_v17, %v17007_v20  ;;  %v16956_v43 = vcombine.high %v16947_v13, %v16947_v13  ;;  %v17136_v35 = vld [vmem:[#allocation4 + $0x98] ss:$2 sm:$0xf] }
 0xa59   : > { %v16840_v42 = vcombine.low %v16832_v55, %v16839_v49  ;;  %v17009_v47 = vsel %vm24549_vm6, %v16955_v26, -inf  ;;  %v17055_v22 = vadd.f32 %v16999_v19, %v24539_v44  ;;  %v16857_v23 = vmax.f32 %v16848_v15, %v16854_v53 }
 0xa5a   : > { %v17010_v14 = vsel %vm24549_vm6, %v16957_v21, -inf  ;;  %v17056_v36 = vadd.f32 %v17002_v37, %v24543_v16  ;;  %v17057_v46 = vadd.f32 %v17005_v62, %v24557_v8  ;;  %v17058_v63 = vadd.f32 %v17008_v9, %v24562_v2 }
 0xa5b   : > { %16842 = vst [vmem:[%s24647_s11] sm:$0xff] %v16840_v42  ;;  %v17011_v33 = vmax.f32 %v17009_v47, %v17010_v14  ;;  %v16964_v6 = vrot.slane %v16857_v23, %v22755_v1  ;;  %v17015_v57 = vsel %vm24549_vm6, %v16940_v60, -inf  ;;  %v17143_v12 = vmax.f32 %v17132_v0, %v17138_v32  ;;  %v17134_v23 = vld [vmem:[#allocation4 + $0x88] ss:$2 sm:$0xff]  ;;  %v17140_v0 = vld [vmem:[#allocation4 + $0x89] ss:$2 sm:$0xff] }
 0xa5c   : > { %v17065_v50 = vmax.f32 %v17057_v46, 0.0  ;;  %v17063_v58 = vmax.f32 %v17055_v22, 0.0  ;;  %v17012_v39 = vsel %vm24549_vm6, %v16956_v43, -inf  ;;  %v17064_v40 = vmax.f32 %v17056_v36, 0.0 }
 0xa5d   : > { %v16965_v51 = vcombine.high %v16964_v6, %v16964_v6  ;;  %v16972_v25 = vrot.slane %v16964_v6, %v22755_v1  ;;  %v17066_v55 = vmax.f32 %v17058_v63, 0.0  ;;  %v17149_v34 = vcombine.high %v17143_v12, %v17143_v12 }
 0xa5e   : > { %v17156_v24 = vrot.slane %v17143_v12, %v22755_v1  ;;  %v17059_v48 = vadd.f32 %v17011_v33, %v24539_v44  ;;  %v17018_v10 = vsel %vm24549_vm6, %v16954_v30, -inf  ;;  %v17079_v28 = vcombine.low %v17063_v58, %v17064_v40 }
 0xa5f   : > { %v16979_v3 = vrot.slane %v16965_v51, %v22755_v1  ;;  %v16980_v59 = vcombine.high %v16972_v25, %v16972_v25  ;;  %v17080_v56 = vcombine.low %v17065_v50, %v17066_v55  ;;  %v17013_v29 = vsel %vm24549_vm6, %v16972_v25, -inf }
 0xa60   : > { %v17163_v61 = vrot.slane %v17149_v34, %v22755_v1  ;;  %v17164_v27 = vcombine.high %v17156_v24, %v17156_v24  ;;  %v17014_v7 = vmax.f32 %v17012_v39, %v17013_v29  ;;  %v17172_v11 = vrot.slane %v17156_v24, %v22755_v1 }
 0xa61   : > { %v17016_v18 = vsel %vm24549_vm6, %v16979_v3, -inf  ;;  %v17019_v54 = vsel %vm24549_vm6, %v16980_v59, -inf  ;;  %v17067_v4 = vmax.f32 %v17059_v48, 0.0  ;;  %v17145_v30 = vmax.f32 %v17136_v35, %v17142_v5 }
 0xa62   : > { %v17017_v13 = vmax.f32 %v17015_v57, %v17016_v18  ;;  %v17020_v26 = vmax.f32 %v17018_v10, %v17019_v54  ;;  %v17165_v19 = vcombine.high %v17163_v61, %v17163_v61  ;;  %v17060_v49 = vadd.f32 %v17014_v7, %v24543_v16 }
 0xa63   : > { %v17179_v60 = vrot.slane %v17163_v61, %v22755_v1  ;;  %v17186_v53 = vrot.slane %v17164_v27, %v22755_v1  ;;  %v17096_v52 = vrot.slane %v17080_v56, %v22755_v1  ;;  %v17194_v20 = vcombine.high %v17172_v11, %v17172_v11 }
 0xa64   : > { %v17061_v37 = vadd.f32 %v17017_v13, %v24557_v8  ;;  %v17062_v15 = vadd.f32 %v17020_v26, %v24562_v2  ;;  %v17193_v41 = vrot.slane %v17165_v19, %v22755_v1  ;;  %v17068_v17 = vmax.f32 %v17060_v49, 0.0 }
 0xa65   : > { %v17195_v42 = vcombine.high %v17179_v60, %v17179_v60  ;;  %v17089_v43 = vrot.slane %v17079_v28, %v22755_v1  ;;  %v17285_v31 = vsel %vm24549_vm6, %v17172_v11, -inf  ;;  %v17288_v14 = vsel %vm24549_vm6, %v17186_v53, -inf }
 0xa66   : > { %v17069_v21 = vmax.f32 %v17061_v37, 0.0  ;;  %v17070_v62 = vmax.f32 %v17062_v15, 0.0  ;;  %v17197_v9 = vcombine.high %v17193_v41, %v17193_v41  ;;  %v17286_v45 = vsel %vm24549_vm6, %v17193_v41, -inf }
 0xa67   : > { %v17081_v47 = vcombine.low %v17067_v4, %v17068_v17  ;;  %v17289_v22 = vsel %vm24549_vm6, %v17195_v42, -inf  ;;  %v17111_v46 = vcombine.low %v17089_v43, %v17096_v52  ;;  %v17287_v63 = vmax.f32 %v17285_v31, %v17286_v45 }
 0xa68   : > { %v17082_v32 = vcombine.low %v17069_v21, %v17070_v62  ;;  %v17292_v36 = vsel %vm24549_vm6, %v17197_v9, -inf  ;;  %v17290_v33 = vmax.f32 %v17288_v14, %v17289_v22  ;;  %v17252_v6 = vrot.slane %v17145_v30, %v22755_v1 }
 0xa69   : > { %v17103_v57 = vrot.slane %v17081_v47, %v22755_v1  ;;  %v17291_v12 = vsel %vm24549_vm6, %v17194_v20, -inf  ;;  %v17144_v58 = vmax.f32 %v17134_v23, %v17140_v0  ;;  %v17196_v51 = vcombine.high %v17186_v53, %v17186_v53 }
 0xa6a   : > { %v17110_v50 = vrot.slane %v17082_v32, %v22755_v1  ;;  %v17293_v25 = vmax.f32 %v17291_v12, %v17292_v36  ;;  %v17253_v39 = vcombine.high %v17252_v6, %v17252_v6  ;;  %v17260_v40 = vrot.slane %v17252_v6, %v22755_v1 }
 0xa6b   : > { %v17198_v34 = vcombine.high %v17144_v58, %v17144_v58  ;;  %v17205_v24 = vrot.slane %v17144_v58, %v22755_v1  ;;  %v17119_v48 = vrot.slane %v17111_v46, %v22755_v1  ;;  %v17343_v3 = vadd.f32 %v17287_v63, %v24539_v44 }
 0xa6c   : > { %v17112_v55 = vcombine.low %v17103_v57, %v17110_v50  ;;  %v17267_v59 = vrot.slane %v17253_v39, %v22755_v1  ;;  %v17344_v35 = vadd.f32 %v17290_v33, %v24543_v16  ;;  %v17345_v61 = vadd.f32 %v17293_v25, %v24557_v8 }
 0xa6d   : > { %v17212_v56 = vrot.slane %v17198_v34, %v22755_v1  ;;  %v17213_v29 = vcombine.high %v17205_v24, %v17205_v24  ;;  %v17268_v27 = vcombine.high %v17260_v40, %v17260_v40  ;;  %v17221_v5 = vrot.slane %v17205_v24, %v22755_v1 }
 0xa6e   : > { %v17126_v10 = vrot.slane %v17112_v55, %v22755_v1  ;;  %v17294_v7 = vsel %vm24549_vm6, %v17196_v51, -inf  ;;  %v17304_v54 = vsel %vm24549_vm6, %v17267_v59, -inf  ;;  %v17351_v13 = vmax.f32 %v17343_v3, 0.0 }
 0xa6f   : > { %v17214_v11 = vcombine.high %v17212_v56, %v17212_v56  ;;  %v17228_v28 = vrot.slane %v17212_v56, %v22755_v1  ;;  %v17235_v26 = vrot.slane %v17213_v29, %v22755_v1  ;;  %v17295_v19 = vsel %vm24549_vm6, %v17221_v5, -inf }
 0xa70   : > { %v17127_v18 = vcombine.low %v17119_v48, %v17126_v10  ;;  %v17243_v49 = vcombine.high %v17221_v5, %v17221_v5  ;;  %v17296_v60 = vmax.f32 %v17294_v7, %v17295_v19  ;;  %v17352_v37 = vmax.f32 %v17344_v35, 0.0 }
 0xa71   : > { %v17242_v4 = vrot.slane %v17214_v11, %v22755_v1  ;;  %v17303_v30 = vsel %vm24549_vm6, %v17228_v28, -inf  ;;  %v17353_v15 = vmax.f32 %v17345_v61, 0.0  ;;  %v17244_v53 = vcombine.high %v17235_v26, %v17235_v26 }
 0xa72   : > { %18259 = vst [vmem:[%s24647_s11 + $0x8] sm:$0xff] %v17127_v18  ;;  %v17305_v41 = vmax.f32 %v17303_v30, %v17304_v54  ;;  %v17307_v52 = vsel %vm24549_vm6, %v17268_v27, -inf  ;;  %v17346_v42 = vadd.f32 %v17296_v60, %v24562_v2  ;;  %v17301_v21 = vsel %vm24549_vm6, %v17260_v40, -inf }
 0xa73   : > { %v17245_v17 = vcombine.high %v17242_v4, %v17242_v4  ;;  %v17306_v20 = vsel %vm24549_vm6, %v17242_v4, -inf  ;;  %v17300_v62 = vsel %vm24549_vm6, %v17244_v53, -inf  ;;  %v17297_v43 = vsel %vm24549_vm6, %v17243_v49, -inf }
 0xa74   : > { %v17308_v9 = vmax.f32 %v17306_v20, %v17307_v52  ;;  %v17349_v45 = vadd.f32 %v17305_v41, %v24557_v8  ;;  %v17302_v22 = vmax.f32 %v17300_v62, %v17301_v21  ;;  %v17354_v23 = vmax.f32 %v17346_v42, 0.0 }
 0xa75   : > { %v17298_v47 = vsel %vm24549_vm6, %v17245_v17, -inf  ;;  %v17367_v36 = vcombine.low %v17351_v13, %v17352_v37 }
 0xa76   : > { %v17299_v0 = vmax.f32 %v17297_v43, %v17298_v47  ;;  %v17350_v32 = vadd.f32 %v17308_v9, %v24562_v2  ;;  %v17348_v31 = vadd.f32 %v17302_v22, %v24543_v16  ;;  %v17368_v14 = vcombine.low %v17353_v15, %v17354_v23 }
 0xa77   : > { %v17357_v63 = vmax.f32 %v17349_v45, 0.0  ;;  %v17377_v50 = vrot.slane %v17367_v36, %v22755_v1 }
 0xa78   : > { %v17347_v46 = vadd.f32 %v17299_v0, %v24539_v44  ;;  %v17358_v8 = vmax.f32 %v17350_v32, 0.0  ;;  %v17356_v6 = vmax.f32 %v17348_v31, 0.0  ;;  %v17384_v38 = vrot.slane %v17368_v14, %v22755_v1 }
 0xa7a   : > { %v17355_v33 = vmax.f32 %v17347_v46, 0.0  ;;  %v17370_v57 = vcombine.low %v17357_v63, %v17358_v8  ;;  %v17399_v16 = vcombine.low %v17377_v50, %v17384_v38 }
 0xa7c   : > { %v17369_v12 = vcombine.low %v17355_v33, %v17356_v6  ;;  %v17398_v2 = vrot.slane %v17370_v57, %v22755_v1  ;;  %v17407_v25 = vrot.slane %v17399_v16, %v22755_v1 }
 0xa7e   : > { %v17391_v58 = vrot.slane %v17369_v12, %v22755_v1 }
 0xa80   : > { %v17400_v51 = vcombine.low %v17391_v58, %v17398_v2 }
 0xa82   : > { %v17414_v44 = vrot.slane %v17400_v51, %v22755_v1 }
 0xa84   : > { %v17415_v39 = vcombine.low %v17407_v25, %v17414_v44 }
 0xa86   : > { %18261 = vst [vmem:[%s24647_s11 + $0x10] sm:$0xff] %v17415_v39 }
 0xa87 PF: > { %s17_s24 = sadd.s32 1, %s20877_s24  }
 0xa88   : > { %p14_p4 = scmp.ge.s32.totalorder %s17_s24, 4  }
 0xa8a   :  { %16 = sbr.rel (!%p14_p4) target bundleno = 1 (0x1), region = 357 }

</bundles_post_ra>
